<compile_context>
chip_gen: v6e
topology: v6e:2x2x1
jax: 0.10.0
libtpu: 0.0.40
codegen_flags: <defaults>
</compile_context>

<pallas_src>
import math

import numpy as np
import jax
import jax.numpy as jnp
from jax.experimental import pallas as pl
from jax.experimental.pallas import tpu as pltpu


# ----------------------------- fixed configuration -----------------------------
N = 2            # batch
IN_CH = 4        # in_channels
IN_CH_PAD = 8    # input channels zero-padded to a full sublane tile
H = W = 16       # spatial
DEPTH = 3
WF = 3
CH = [2 ** (WF + i) for i in range(DEPTH)]      # [8, 16, 32]
N_CLASSES = 1
EPS = 1e-5
NVALID = float(N * H * W)                       # BatchNorm statistics count

MG = 128                                        # lane-aligned margin (>= Hp+1 at every level)
HL = [H >> l for l in range(DEPTH)]             # [16, 8, 4]   valid spatial extent
HP = [h + 2 for h in HL]                        # [18, 10, 6]  zero-padded spatial extent
MIMG = [hp * hp for hp in HP]                   # [324, 100, 36] real flattened pixels / image
MIMG_PAD = [384, 128, 128]                      # per-image slab, multiple of 128
MPF = [N * m for m in MIMG_PAD]                 # [768, 256, 256] whole-batch lane width
BUFW = [MG + m + MG for m in MPF]               # [1024, 512, 512] margined buffer width


# ------------------------------ in-kernel helpers -------------------------------


def _conv3x3(marg, cols, cin, level, w_ref, b_ref, mask_ref):
    """3x3 conv + bias + ReLU in the padded-flattened (C, M) layout.

    Builds the (9*cin, M) im2col block in VMEM with 9 shifted window copies (taps folded
    into the contraction dim), then one MXU matmul.  The mask re-zeroes padding/dead lanes
    so the result is directly reusable as a zero-padded input.
    """
    hp, mpf = HP[level], MPF[level]
    for t in range(9):
        dy, dx = t // 3, t % 3
        off = (dy - 1) * hp + (dx - 1)
        cols[t * cin:(t + 1) * cin, :] = marg[0:cin, MG + off: MG + off + mpf]
    y = jnp.dot(w_ref[...], cols[0:9 * cin, :], preferred_element_type=jnp.float32)
    return jnp.maximum(y + b_ref[...], 0.0) * mask_ref[...]


def _store_interior(marg, row0, val, level):
    """Write a (c, M) activation into rows [row0:row0+c] of a margined scratch buffer."""
    marg[row0:row0 + val.shape[0], MG:MG + MPF[level]] = val


def _maxpool2x2(m_src, row0, c, lsrc, pool_ref, m_dst, ldst):
    """2x2 / stride-2 max pool: 4 shifted window loads + VPU max, then one per-image
    compaction 0/1 matmul into the coarse level's padded layout."""
    hp, mpf_s = HP[lsrc], MPF[lsrc]
    mp_s, mp_d = MIMG_PAD[lsrc], MIMG_PAD[ldst]
    a = m_src[row0:row0 + c, MG: MG + mpf_s]
    b = m_src[row0:row0 + c, MG + 1: MG + 1 + mpf_s]
    e = m_src[row0:row0 + c, MG + hp: MG + hp + mpf_s]
    f = m_src[row0:row0 + c, MG + hp + 1: MG + hp + 1 + mpf_s]
    v = jnp.maximum(jnp.maximum(a, b), jnp.maximum(e, f))   # 2x2 block max at top-left lanes
    for n in range(N):
        out = jnp.dot(v[:, n * mp_s:(n + 1) * mp_s], pool_ref[...],
                      preferred_element_type=jnp.float32)    # (c, mp_d), zero outside valid
        m_dst[0:c, MG + n * mp_d: MG + (n + 1) * mp_d] = out


def _conv_transpose2x2(m_src, src_row0, cin, cout, lsrc, tw_ref, tb_ref, s00_ref,
                       m_dst, dst_row0, ldst, mask_ref, tmp):
    """ConvTranspose2d(k=2, s=2): one stacked (4*cout, cin) tap matmul over the whole batch,
    one shared (0,0)-tap scatter matmul per image, then the other 3 tap placements via
    shifted reads from a margined temp buffer + VPU adds (tap combs are disjoint)."""
    hp_f = HP[ldst]
    mp_c, mp_f = MIMG_PAD[lsrc], MIMG_PAD[ldst]
    mpf_c = MPF[lsrc]
    src = m_src[src_row0:src_row0 + cin, MG:MG + mpf_c]                      # (cin, mpf_c)
    taps = jnp.dot(tw_ref[...], src, preferred_element_type=jnp.float32)     # (4*cout, mpf_c)
    shifts = (0, 1, hp_f, hp_f + 1)                                          # t = ky*2 + kx
    for n in range(N):
        scattered = jnp.dot(taps[:, n * mp_c:(n + 1) * mp_c], s00_ref[...],
                            preferred_element_type=jnp.float32)              # (4*cout, mp_f)
        tmp[0:4 * cout, MG:MG + mp_f] = scattered
        out = tmp[0:cout, MG:MG + mp_f]
        for t in range(1, 4):
            d = shifts[t]
            out = out + tmp[t * cout:(t + 1) * cout, MG - d: MG - d + mp_f]
        msk = mask_ref[0:1, n * mp_f:(n + 1) * mp_f]
        y = (out + tb_ref[...]) * msk
        m_dst[dst_row0:dst_row0 + cout, MG + n * mp_f: MG + (n + 1) * mp_f] = y


# --------------------------------- the kernel -----------------------------------


def _unet_kernel(
    # inputs
    x_ref, gamma_ref, beta_ref,
    mask0_ref, mask1_ref, mask2_ref,
    d0w1_ref, d0b1_ref, d0w2_ref, d0b2_ref,
    d1w1_ref, d1b1_ref, d1w2_ref, d1b2_ref,
    d2w1_ref, d2b1_ref, d2w2_ref, d2b2_ref,
    u16tw_ref, u16tb_ref, u16w1_ref, u16b1_ref, u16w2_ref, u16b2_ref,
    u8tw_ref, u8tb_ref, u8w1_ref, u8b1_ref, u8w2_ref, u8b2_ref,
    lw_ref, lb_ref,
    pool01_ref, pool12_ref, s21_ref, s10_ref,
    # output
    o_ref,
    # scratch (VMEM)
    m0, m1, m2, cols0, cols1, cols2, tmpT,
):
    c0, c1, c2 = CH

    # Zero only the margin strips; interiors are always fully overwritten (masked, finite)
    # before being read, and stay zero outside the valid pixels thereafter.
    for buf, lvl in ((m0, 0), (m1, 1), (m2, 2)):
        z = jnp.zeros((buf.shape[0], MG), jnp.float32)
        buf[:, 0:MG] = z
        buf[:, MG + MPF[lvl]: MG + MPF[lvl] + MG] = z
    tmpT[:, 0:MG] = jnp.zeros((tmpT.shape[0], MG), jnp.float32)

    # ---- input BatchNorm2d (training-mode batch statistics over the valid pixels) ----
    x = x_ref[...]                                   # (IN_CH_PAD, N*mimg_pad0), zeros off-grid
    mask0 = mask0_ref[...]
    mean = jnp.sum(x, axis=1, keepdims=True) * (1.0 / NVALID)
    xc = (x - mean) * mask0
    var = jnp.sum(xc * xc, axis=1, keepdims=True) * (1.0 / NVALID)
    xbn = (xc * jax.lax.rsqrt(var + EPS) * gamma_ref[...] + beta_ref[...]) * mask0
    _store_interior(m0, 0, xbn, 0)

    # ---- UNet down path ----
    y = _conv3x3(m0, cols0, IN_CH_PAD, 0, d0w1_ref, d0b1_ref, mask0_ref)
    _store_interior(m0, 0, y, 0)
    y = _conv3x3(m0, cols0, c0, 0, d0w2_ref, d0b2_ref, mask0_ref)
    _store_interior(m0, c0, y, 0)                    # bridge0 lives at m0[c0:2*c0]
    _maxpool2x2(m0, c0, c0, 0, pool01_ref, m1, 1)

    y = _conv3x3(m1, cols1, c0, 1, d1w1_ref, d1b1_ref, mask1_ref)
    _store_interior(m1, 0, y, 1)
    y = _conv3x3(m1, cols1, c1, 1, d1w2_ref, d1b2_ref, mask1_ref)
    _store_interior(m1, c1, y, 1)                    # bridge1 lives at m1[c1:2*c1]
    _maxpool2x2(m1, c1, c1, 1, pool12_ref, m2, 2)

    y = _conv3x3(m2, cols2, c1, 2, d2w1_ref, d2b1_ref, mask2_ref)
    _store_interior(m2, 0, y, 2)
    y = _conv3x3(m2, cols2, c2, 2, d2w2_ref, d2b2_ref, mask2_ref)
    _store_interior(m2, 0, y, 2)                     # bottleneck output

    # ---- UNet up path (upconv -> implicit concat([up, bridge]) -> conv block) ----
    _conv_transpose2x2(m2, 0, c2, c1, 2, u16tw_ref, u16tb_ref, s21_ref,
                       m1, 0, 1, mask1_ref, tmpT)    # up at m1[0:c1], bridge at m1[c1:2*c1]
    y = _conv3x3(m1, cols1, 2 * c1, 1, u16w1_ref, u16b1_ref, mask1_ref)
    _store_interior(m1, 0, y, 1)
    y = _conv3x3(m1, cols1, c1, 1, u16w2_ref, u16b2_ref, mask1_ref)
    _store_interior(m1, 0, y, 1)                     # source for the next upconv

    _conv_transpose2x2(m1, 0, c1, c0, 1, u8tw_ref, u8tb_ref, s10_ref,
                       m0, 0, 0, mask0_ref, tmpT)    # up at m0[0:c0], bridge at m0[c0:2*c0]
    y = _conv3x3(m0, cols0, 2 * c0, 0, u8w1_ref, u8b1_ref, mask0_ref)
    _store_interior(m0, 0, y, 0)
    y = _conv3x3(m0, cols0, c0, 0, u8w2_ref, u8b2_ref, mask0_ref)

    # ---- final 1x1 conv + Sigmoid (VPU channel-weighted sum, lane-dense (1, M) output) ----
    logits = jnp.sum(lw_ref[...] * y, axis=0, keepdims=True) + lb_ref[...]
    o_ref[...] = 1.0 / (1.0 + jnp.exp(-logits))


# ----------------------- constants (masks, pool/scatter matrices) -----------------------


def build_constants():
    masks = []
    for l in range(DEPTH):
        hl, hp, mimg, mp = HL[l], HP[l], MIMG[l], MIMG_PAD[l]
        m2d = np.zeros((hp, hp), np.float32)
        m2d[1:hl + 1, 1:hl + 1] = 1.0
        slab = np.zeros((mp,), np.float32)
        slab[:mimg] = m2d.reshape(-1)
        masks.append(jnp.asarray(np.tile(slab, N).reshape(1, N * mp)))

    pools, scats = [], []
    for l in range(DEPTH - 1):               # l = fine level, l+1 = coarse level
        hp_f, hp_c, hd = HP[l], HP[l + 1], HL[l + 1]
        mp_f, mp_c = MIMG_PAD[l], MIMG_PAD[l + 1]
        P = np.zeros((mp_f, mp_c), np.float32)   # pool compaction  (fine -> coarse)
        S = np.zeros((mp_c, mp_f), np.float32)   # (0,0)-tap scatter (coarse -> fine)
        for i in range(1, hd + 1):
            for j in range(1, hd + 1):
                r = (2 * i - 1) * hp_f + (2 * j - 1)
                q = i * hp_c + j
                P[r, q] = 1.0
                S[q, r] = 1.0
        pools.append(jnp.asarray(P))
        scats.append(jnp.asarray(S))
    return masks, pools, scats


# ------------------------------ parameter init (torch layouts) -----------------------------


def init_params(key):
    keys = iter(jax.random.split(key, 64))

    def conv_init(cin, cout, k=3):
        fan_out = cout * k * k                        # kaiming fan_out, relu gain
        std = math.sqrt(2.0 / fan_out)
        w = std * jax.random.normal(next(keys), (cout, cin, k, k), jnp.float32)   # OIHW
        bound = 1.0 / math.sqrt(fan_out)
        b = -bound + bound * jax.random.normal(next(keys), (cout,), jnp.float32)  # normal(-b, b)
        return w, b

    def convt_init(cin, cout):
        fan_out = cin * 4                             # torch fan_out for (Cin, Cout, 2, 2)
        std = math.sqrt(2.0 / fan_out)
        w = std * jax.random.normal(next(keys), (cin, cout, 2, 2), jnp.float32)
        bound = 1.0 / math.sqrt(fan_out)
        b = -bound + bound * jax.random.normal(next(keys), (cout,), jnp.float32)
        return w, b

    params = {'bn_gamma': jnp.ones((IN_CH,), jnp.float32),
              'bn_beta': jnp.zeros((IN_CH,), jnp.float32),
              'down': [], 'up': []}
    prev = IN_CH
    for i in range(DEPTH):
        ch = CH[i]
        w1, b1 = conv_init(prev, ch)
        w2, b2 = conv_init(ch, ch)
        params['down'].append({'w1': w1, 'b1': b1, 'w2': w2, 'b2': b2})
        prev = ch
    for i in reversed(range(DEPTH - 1)):
        ch = CH[i]
        tw, tb = convt_init(prev, ch)
        w1, b1 = conv_init(2 * ch, ch)                # concat([up, bridge]) channels
        w2, b2 = conv_init(ch, ch)
        params['up'].append({'tw': tw, 'tb': tb, 'w1': w1, 'b1': b1, 'w2': w2, 'b2': b2})
        prev = ch
    lw, lb = conv_init(prev, N_CLASSES, k=1)
    params['last_w'], params['last_b'] = lw, lb
    return params


def build_kernel_args(params, masks, pools, scats):
    def pconv(w):                                     # (Co, Ci, 3, 3) -> (Co, 9*Ci), tap-major
        co, ci = w.shape[0], w.shape[1]
        return jnp.transpose(w, (0, 2, 3, 1)).reshape(co, 9 * ci)

    def pconvt(w):                                    # (Ci, Co, 2, 2) -> (4*Co, Ci), t = ky*2+kx
        ci, co = w.shape[0], w.shape[1]
        return jnp.transpose(w, (2, 3, 1, 0)).reshape(4 * co, ci)

    def col(b):
        return b.reshape(-1, 1)

    d = params['down']
    u16, u8 = params['up'][0], params['up'][1]        # applied in this order (32->16, 16->8)

    # first conv: zero-pad the input-channel axis 4 -> 8 (sublane-tile-aligned im2col rows)
    w1_0 = jnp.pad(d[0]['w1'], ((0, 0), (0, IN_CH_PAD - IN_CH), (0, 0), (0, 0)))
    gamma = jnp.pad(params['bn_gamma'], (0, IN_CH_PAD - IN_CH),
                    constant_values=1.0).reshape(-1, 1)
    beta = jnp.pad(params['bn_beta'], (0, IN_CH_PAD - IN_CH)).reshape(-1, 1)

    lw = params['last_w'].reshape(N_CLASSES, CH[0]).transpose(1, 0)   # (c0, 1)
    lb = params['last_b'].reshape(1, 1)

    return (
        gamma, beta,
        masks[0], masks[1], masks[2],
        pconv(w1_0), col(d[0]['b1']), pconv(d[0]['w2']), col(d[0]['b2']),
        pconv(d[1]['w1']), col(d[1]['b1']), pconv(d[1]['w2']), col(d[1]['b2']),
        pconv(d[2]['w1']), col(d[2]['b1']), pconv(d[2]['w2']), col(d[2]['b2']),
        pconvt(u16['tw']), col(u16['tb']), pconv(u16['w1']), col(u16['b1']),
        pconv(u16['w2']), col(u16['b2']),
        pconvt(u8['tw']), col(u8['tb']), pconv(u8['w1']), col(u8['b1']),
        pconv(u8['w2']), col(u8['b2']),
        lw, lb,
        pools[0], pools[1], scats[1], scats[0],
    )


# ---------------------------------- model forward -----------------------------------


@jax.jit
def unet_wrapper_forward(x_nchw, kernel_args):
    # NCHW -> channel-first padded-flattened (IN_CH_PAD, N*mimg_pad0); off-grid lanes are zero.
    xp = jnp.pad(x_nchw, ((0, 0), (0, 0), (1, 1), (1, 1)))                   # (N, 4, 18, 18)
    xp = jnp.pad(xp, ((0, 0), (0, IN_CH_PAD - IN_CH), (0, 0), (0, 0)))       # (N, 8, 18, 18)
    xflat = jnp.transpose(xp, (1, 0, 2, 3)).reshape(IN_CH_PAD, N, MIMG[0])
    xflat = jnp.pad(xflat, ((0, 0), (0, 0), (0, MIMG_PAD[0] - MIMG[0])))
    xflat = xflat.reshape(IN_CH_PAD, MPF[0])

    out = pl.pallas_call(
        _unet_kernel,
        out_shape=jax.ShapeDtypeStruct((N_CLASSES, MPF[0]), jnp.float32),
        scratch_shapes=[
            pltpu.VMEM((2 * CH[0], BUFW[0]), jnp.float32),       # m0 (margined, level 0)
            pltpu.VMEM((2 * CH[1], BUFW[1]), jnp.float32),       # m1 (margined, level 1)
            pltpu.VMEM((CH[2], BUFW[2]), jnp.float32),           # m2 (margined, level 2)
            pltpu.VMEM((9 * 2 * CH[0], MPF[0]), jnp.float32),    # cols0 (im2col, level 0)
            pltpu.VMEM((9 * 2 * CH[1], MPF[1]), jnp.float32),    # cols1 (im2col, level 1)
            pltpu.VMEM((9 * CH[2], MPF[2]), jnp.float32),        # cols2 (im2col, level 2)
            pltpu.VMEM((4 * CH[1], MG + MIMG_PAD[0]), jnp.float32),  # tmpT (convT tap combine)
        ],
    )(xflat, *kernel_args)

    # crop the padding / dead lanes and return PyTorch NCHW
    out = out.reshape(N_CLASSES, N, MIMG_PAD[0])[:, :, :MIMG[0]]
    out = out.reshape(N_CLASSES, N, HP[0], HP[0])[:, :, 1:1 + H, 1:1 + W]
    return jnp.transpose(out, (1, 0, 2, 3))


# -------------------------------------- main ----------------------------------------


if __name__ == "__main__":
    key = jax.random.PRNGKey(0)
    k_x, k_p = jax.random.split(key)

    x = jax.random.normal(k_x, (N, IN_CH, H, W), jnp.float32)       # PyTorch NCHW input
    params = init_params(k_p)
    masks, pools, scats = build_constants()
    kargs = build_kernel_args(params, masks, pools, scats)

    out = unet_wrapper_forward(x, kargs)
    out = jax.block_until_ready(out)

    assert out.shape == (N, 1, H, W), out.shape
    assert out.dtype == jnp.float32
    assert bool(jnp.all(jnp.isfinite(out)))
    assert bool(jnp.all((out >= 0.0) & (out <= 1.0)))               # sigmoid range
    assert float(jnp.std(out)) > 0.0                                # non-degenerate output
    print("KERNEL_OK")
</pallas_src>

<mosaic_0001>
module attributes {stable_mosaic.version = 11 : i64} {
  func.func @_unet_kernel(%arg0: memref<8x768xf32, #tpu.memory_space<vmem>>, %arg1: memref<8x1xf32, #tpu.memory_space<vmem>>, %arg2: memref<8x1xf32, #tpu.memory_space<vmem>>, %arg3: memref<1x768xf32, #tpu.memory_space<vmem>>, %arg4: memref<1x256xf32, #tpu.memory_space<vmem>>, %arg5: memref<1x256xf32, #tpu.memory_space<vmem>>, %arg6: memref<8x72xf32, #tpu.memory_space<vmem>>, %arg7: memref<8x1xf32, #tpu.memory_space<vmem>>, %arg8: memref<8x72xf32, #tpu.memory_space<vmem>>, %arg9: memref<8x1xf32, #tpu.memory_space<vmem>>, %arg10: memref<16x72xf32, #tpu.memory_space<vmem>>, %arg11: memref<16x1xf32, #tpu.memory_space<vmem>>, %arg12: memref<16x144xf32, #tpu.memory_space<vmem>>, %arg13: memref<16x1xf32, #tpu.memory_space<vmem>>, %arg14: memref<32x144xf32, #tpu.memory_space<vmem>>, %arg15: memref<32x1xf32, #tpu.memory_space<vmem>>, %arg16: memref<32x288xf32, #tpu.memory_space<vmem>>, %arg17: memref<32x1xf32, #tpu.memory_space<vmem>>, %arg18: memref<64x32xf32, #tpu.memory_space<vmem>>, %arg19: memref<16x1xf32, #tpu.memory_space<vmem>>, %arg20: memref<16x288xf32, #tpu.memory_space<vmem>>, %arg21: memref<16x1xf32, #tpu.memory_space<vmem>>, %arg22: memref<16x144xf32, #tpu.memory_space<vmem>>, %arg23: memref<16x1xf32, #tpu.memory_space<vmem>>, %arg24: memref<32x16xf32, #tpu.memory_space<vmem>>, %arg25: memref<8x1xf32, #tpu.memory_space<vmem>>, %arg26: memref<8x144xf32, #tpu.memory_space<vmem>>, %arg27: memref<8x1xf32, #tpu.memory_space<vmem>>, %arg28: memref<8x72xf32, #tpu.memory_space<vmem>>, %arg29: memref<8x1xf32, #tpu.memory_space<vmem>>, %arg30: memref<8x1xf32, #tpu.memory_space<vmem>>, %arg31: memref<1x1xf32, #tpu.memory_space<vmem>>, %arg32: memref<384x128xf32, #tpu.memory_space<vmem>>, %arg33: memref<128x128xf32, #tpu.memory_space<vmem>>, %arg34: memref<128x128xf32, #tpu.memory_space<vmem>>, %arg35: memref<128x384xf32, #tpu.memory_space<vmem>>, %arg36: memref<1x768xf32, #tpu.memory_space<vmem>>, %arg37: memref<16x1024xf32, #tpu.memory_space<vmem>>, %arg38: memref<32x512xf32, #tpu.memory_space<vmem>>, %arg39: memref<32x512xf32, #tpu.memory_space<vmem>>, %arg40: memref<144x768xf32, #tpu.memory_space<vmem>>, %arg41: memref<288x256xf32, #tpu.memory_space<vmem>>, %arg42: memref<288x256xf32, #tpu.memory_space<vmem>>, %arg43: memref<64x512xf32, #tpu.memory_space<vmem>>) attributes {dimension_semantics = [], scalar_prefetch = 0 : i64, scratch_operands = 7 : i64, tpu.core_type = #tpu.core_type<tc>} {
    %cst = arith.constant 0.000000e+00 : f32
    %0 = vector.broadcast %cst : f32 to vector<16x128xf32>
    %c0 = arith.constant 0 : index
    %c0_0 = arith.constant 0 : index
    %1 = vector.load %arg37[%c0, %c0_0] : memref<16x1024xf32, #tpu.memory_space<vmem>>, vector<16x128xf32>
    tpu.vector_store %arg37[%c0, %c0_0], %0 {strides = array<i32>} : memref<16x1024xf32, #tpu.memory_space<vmem>>, vector<16x128xf32>,
    %c0_1 = arith.constant 0 : index
    %c896 = arith.constant 896 : index
    %2 = vector.load %arg37[%c0_1, %c896] : memref<16x1024xf32, #tpu.memory_space<vmem>>, vector<16x128xf32>
    tpu.vector_store %arg37[%c0_1, %c896], %0 {strides = array<i32>} : memref<16x1024xf32, #tpu.memory_space<vmem>>, vector<16x128xf32>,
    %cst_2 = arith.constant 0.000000e+00 : f32
    %3 = vector.broadcast %cst_2 : f32 to vector<32x128xf32>
    %c0_3 = arith.constant 0 : index
    %c0_4 = arith.constant 0 : index
    %4 = vector.load %arg38[%c0_3, %c0_4] : memref<32x512xf32, #tpu.memory_space<vmem>>, vector<32x128xf32>
    tpu.vector_store %arg38[%c0_3, %c0_4], %3 {strides = array<i32>} : memref<32x512xf32, #tpu.memory_space<vmem>>, vector<32x128xf32>,
    %c0_5 = arith.constant 0 : index
    %c384 = arith.constant 384 : index
    %5 = vector.load %arg38[%c0_5, %c384] : memref<32x512xf32, #tpu.memory_space<vmem>>, vector<32x128xf32>
    tpu.vector_store %arg38[%c0_5, %c384], %3 {strides = array<i32>} : memref<32x512xf32, #tpu.memory_space<vmem>>, vector<32x128xf32>,
    %cst_6 = arith.constant 0.000000e+00 : f32
    %6 = vector.broadcast %cst_6 : f32 to vector<32x128xf32>
    %c0_7 = arith.constant 0 : index
    %c0_8 = arith.constant 0 : index
    %7 = vector.load %arg39[%c0_7, %c0_8] : memref<32x512xf32, #tpu.memory_space<vmem>>, vector<32x128xf32>
    tpu.vector_store %arg39[%c0_7, %c0_8], %6 {strides = array<i32>} : memref<32x512xf32, #tpu.memory_space<vmem>>, vector<32x128xf32>,
    %c0_9 = arith.constant 0 : index
    %c384_10 = arith.constant 384 : index
    %8 = vector.load %arg39[%c0_9, %c384_10] : memref<32x512xf32, #tpu.memory_space<vmem>>, vector<32x128xf32>
    tpu.vector_store %arg39[%c0_9, %c384_10], %6 {strides = array<i32>} : memref<32x512xf32, #tpu.memory_space<vmem>>, vector<32x128xf32>,
    %cst_11 = arith.constant 0.000000e+00 : f32
    %9 = vector.broadcast %cst_11 : f32 to vector<64x128xf32>
    %c0_12 = arith.constant 0 : index
    %c0_13 = arith.constant 0 : index
    %10 = vector.load %arg43[%c0_12, %c0_13] : memref<64x512xf32, #tpu.memory_space<vmem>>, vector<64x128xf32>
    tpu.vector_store %arg43[%c0_12, %c0_13], %9 {strides = array<i32>} : memref<64x512xf32, #tpu.memory_space<vmem>>, vector<64x128xf32>,
    %c0_14 = arith.constant 0 : index
    %c0_15 = arith.constant 0 : index
    %11 = vector.load %arg0[%c0_14, %c0_15] : memref<8x768xf32, #tpu.memory_space<vmem>>, vector<8x768xf32>
    %c0_16 = arith.constant 0 : index
    %c0_17 = arith.constant 0 : index
    %12 = vector.load %arg3[%c0_16, %c0_17] : memref<1x768xf32, #tpu.memory_space<vmem>>, vector<1x768xf32>
    %cst_18 = arith.constant dense<0.000000e+00> : vector<8xf32>
    %13 = vector.multi_reduction <add>, %11, %cst_18 [1] : vector<8x768xf32> to vector<8xf32>
    %14 = vector.shape_cast %13 : vector<8xf32> to vector<8x1xf32>
    %cst_19 = arith.constant 0.001953125 : f32
    %15 = vector.broadcast %cst_19 : f32 to vector<8x1xf32>
    %16 = arith.mulf %14, %15 : vector<8x1xf32>
    %17 = vector.broadcast %16 : vector<8x1xf32> to vector<8x768xf32>
    %18 = arith.subf %11, %17 : vector<8x768xf32>
    %19 = vector.broadcast %12 : vector<1x768xf32> to vector<8x768xf32>
    %20 = arith.mulf %18, %19 : vector<8x768xf32>
    %21 = arith.mulf %20, %20 : vector<8x768xf32>
    %cst_20 = arith.constant dense<0.000000e+00> : vector<8xf32>
    %22 = vector.multi_reduction <add>, %21, %cst_20 [1] : vector<8x768xf32> to vector<8xf32>
    %23 = vector.shape_cast %22 : vector<8xf32> to vector<8x1xf32>
    %cst_21 = arith.constant 0.001953125 : f32
    %24 = vector.broadcast %cst_21 : f32 to vector<8x1xf32>
    %25 = arith.mulf %23, %24 : vector<8x1xf32>
    %cst_22 = arith.constant 9.99999974E-6 : f32
    %26 = vector.broadcast %cst_22 : f32 to vector<8x1xf32>
    %27 = arith.addf %25, %26 : vector<8x1xf32>
    %28 = math.rsqrt %27 : vector<8x1xf32>
    %29 = vector.broadcast %28 : vector<8x1xf32> to vector<8x768xf32>
    %30 = arith.mulf %20, %29 : vector<8x768xf32>
    %c0_23 = arith.constant 0 : index
    %c0_24 = arith.constant 0 : index
    %31 = vector.load %arg1[%c0_23, %c0_24] : memref<8x1xf32, #tpu.memory_space<vmem>>, vector<8x1xf32>
    %32 = vector.broadcast %31 : vector<8x1xf32> to vector<8x768xf32>
    %33 = arith.mulf %30, %32 : vector<8x768xf32>
    %c0_25 = arith.constant 0 : index
    %c0_26 = arith.constant 0 : index
    %34 = vector.load %arg2[%c0_25, %c0_26] : memref<8x1xf32, #tpu.memory_space<vmem>>, vector<8x1xf32>
    %35 = vector.broadcast %34 : vector<8x1xf32> to vector<8x768xf32>
    %36 = arith.addf %33, %35 : vector<8x768xf32>
    %37 = vector.broadcast %12 : vector<1x768xf32> to vector<8x768xf32>
    %38 = arith.mulf %36, %37 : vector<8x768xf32>
    %c0_27 = arith.constant 0 : index
    %c128 = arith.constant 128 : index
    %39 = vector.load %arg37[%c0_27, %c128] : memref<16x1024xf32, #tpu.memory_space<vmem>>, vector<8x768xf32>
    tpu.vector_store %arg37[%c0_27, %c128], %38 {strides = array<i32>} : memref<16x1024xf32, #tpu.memory_space<vmem>>, vector<8x768xf32>,
    %c0_28 = arith.constant 0 : index
    %c109 = arith.constant 109 : index
    %40 = vector.load %arg37[%c0_28, %c109] : memref<16x1024xf32, #tpu.memory_space<vmem>>, vector<8x768xf32>
    %c0_29 = arith.constant 0 : index
    %c0_30 = arith.constant 0 : index
    %41 = vector.load %arg40[%c0_29, %c0_30] : memref<144x768xf32, #tpu.memory_space<vmem>>, vector<8x768xf32>
    tpu.vector_store %arg40[%c0_29, %c0_30], %40 {strides = array<i32>} : memref<144x768xf32, #tpu.memory_space<vmem>>, vector<8x768xf32>,
    %c0_31 = arith.constant 0 : index
    %c110 = arith.constant 110 : index
    %42 = vector.load %arg37[%c0_31, %c110] : memref<16x1024xf32, #tpu.memory_space<vmem>>, vector<8x768xf32>
    %c8 = arith.constant 8 : index
    %c0_32 = arith.constant 0 : index
    %43 = vector.load %arg40[%c8, %c0_32] : memref<144x768xf32, #tpu.memory_space<vmem>>, vector<8x768xf32>
    tpu.vector_store %arg40[%c8, %c0_32], %42 {strides = array<i32>} : memref<144x768xf32, #tpu.memory_space<vmem>>, vector<8x768xf32>,
    %c0_33 = arith.constant 0 : index
    %c111 = arith.constant 111 : index
    %44 = vector.load %arg37[%c0_33, %c111] : memref<16x1024xf32, #tpu.memory_space<vmem>>, vector<8x768xf32>
    %c16 = arith.constant 16 : index
    %c0_34 = arith.constant 0 : index
    %45 = vector.load %arg40[%c16, %c0_34] : memref<144x768xf32, #tpu.memory_space<vmem>>, vector<8x768xf32>
    tpu.vector_store %arg40[%c16, %c0_34], %44 {strides = array<i32>} : memref<144x768xf32, #tpu.memory_space<vmem>>, vector<8x768xf32>,
    %c0_35 = arith.constant 0 : index
    %c127 = arith.constant 127 : index
    %46 = vector.load %arg37[%c0_35, %c127] : memref<16x1024xf32, #tpu.memory_space<vmem>>, vector<8x768xf32>
    %c24 = arith.constant 24 : index
    %c0_36 = arith.constant 0 : index
    %47 = vector.load %arg40[%c24, %c0_36] : memref<144x768xf32, #tpu.memory_space<vmem>>, vector<8x768xf32>
    tpu.vector_store %arg40[%c24, %c0_36], %46 {strides = array<i32>} : memref<144x768xf32, #tpu.memory_space<vmem>>, vector<8x768xf32>,
    %c0_37 = arith.constant 0 : index
    %c128_38 = arith.constant 128 : index
    %48 = vector.load %arg37[%c0_37, %c128_38] : memref<16x1024xf32, #tpu.memory_space<vmem>>, vector<8x768xf32>
    %c32 = arith.constant 32 : index
    %c0_39 = arith.constant 0 : index
    %49 = vector.load %arg40[%c32, %c0_39] : memref<144x768xf32, #tpu.memory_space<vmem>>, vector<8x768xf32>
    tpu.vector_store %arg40[%c32, %c0_39], %48 {strides = array<i32>} : memref<144x768xf32, #tpu.memory_space<vmem>>, vector<8x768xf32>,
    %c0_40 = arith.constant 0 : index
    %c129 = arith.constant 129 : index
    %50 = vector.load %arg37[%c0_40, %c129] : memref<16x1024xf32, #tpu.memory_space<vmem>>, vector<8x768xf32>
    %c40 = arith.constant 40 : index
    %c0_41 = arith.constant 0 : index
    %51 = vector.load %arg40[%c40, %c0_41] : memref<144x768xf32, #tpu.memory_space<vmem>>, vector<8x768xf32>
    tpu.vector_store %arg40[%c40, %c0_41], %50 {strides = array<i32>} : memref<144x768xf32, #tpu.memory_space<vmem>>, vector<8x768xf32>,
    %c0_42 = arith.constant 0 : index
    %c145 = arith.constant 145 : index
    %52 = vector.load %arg37[%c0_42, %c145] : memref<16x1024xf32, #tpu.memory_space<vmem>>, vector<8x768xf32>
    %c48 = arith.constant 48 : index
    %c0_43 = arith.constant 0 : index
    %53 = vector.load %arg40[%c48, %c0_43] : memref<144x768xf32, #tpu.memory_space<vmem>>, vector<8x768xf32>
    tpu.vector_store %arg40[%c48, %c0_43], %52 {strides = array<i32>} : memref<144x768xf32, #tpu.memory_space<vmem>>, vector<8x768xf32>,
    %c0_44 = arith.constant 0 : index
    %c146 = arith.constant 146 : index
    %54 = vector.load %arg37[%c0_44, %c146] : memref<16x1024xf32, #tpu.memory_space<vmem>>, vector<8x768xf32>
    %c56 = arith.constant 56 : index
    %c0_45 = arith.constant 0 : index
    %55 = vector.load %arg40[%c56, %c0_45] : memref<144x768xf32, #tpu.memory_space<vmem>>, vector<8x768xf32>
    tpu.vector_store %arg40[%c56, %c0_45], %54 {strides = array<i32>} : memref<144x768xf32, #tpu.memory_space<vmem>>, vector<8x768xf32>,
    %c0_46 = arith.constant 0 : index
    %c147 = arith.constant 147 : index
    %56 = vector.load %arg37[%c0_46, %c147] : memref<16x1024xf32, #tpu.memory_space<vmem>>, vector<8x768xf32>
    %c64 = arith.constant 64 : index
    %c0_47 = arith.constant 0 : index
    %57 = vector.load %arg40[%c64, %c0_47] : memref<144x768xf32, #tpu.memory_space<vmem>>, vector<8x768xf32>
    tpu.vector_store %arg40[%c64, %c0_47], %56 {strides = array<i32>} : memref<144x768xf32, #tpu.memory_space<vmem>>, vector<8x768xf32>,
    %c0_48 = arith.constant 0 : index
    %c0_49 = arith.constant 0 : index
    %58 = vector.load %arg6[%c0_48, %c0_49] : memref<8x72xf32, #tpu.memory_space<vmem>>, vector<8x72xf32>
    %c0_50 = arith.constant 0 : index
    %c0_51 = arith.constant 0 : index
    %59 = vector.load %arg40[%c0_50, %c0_51] : memref<144x768xf32, #tpu.memory_space<vmem>>, vector<72x768xf32>
    %cst_52 = arith.constant dense<0.000000e+00> : vector<8x768xf32>
    %60 = tpu.matmul %58, %59, %cst_52 {dimension_numbers = #tpu.dot_dimension_numbers<[1], [0], [0], [1], [0, 0, 1, 1], [], []>} : vector<8x72xf32>, vector<72x768xf32>, vector<8x768xf32> -> vector<8x768xf32>
    %c0_53 = arith.constant 0 : index
    %c0_54 = arith.constant 0 : index
    %61 = vector.load %arg7[%c0_53, %c0_54] : memref<8x1xf32, #tpu.memory_space<vmem>>, vector<8x1xf32>
    %62 = vector.broadcast %61 : vector<8x1xf32> to vector<8x768xf32>
    %63 = arith.addf %60, %62 : vector<8x768xf32>
    %cst_55 = arith.constant 0.000000e+00 : f32
    %64 = vector.broadcast %cst_55 : f32 to vector<8x768xf32>
    %65 = arith.maximumf %63, %64 : vector<8x768xf32>
    %c0_56 = arith.constant 0 : index
    %c0_57 = arith.constant 0 : index
    %66 = vector.load %arg3[%c0_56, %c0_57] : memref<1x768xf32, #tpu.memory_space<vmem>>, vector<1x768xf32>
    %67 = vector.broadcast %66 : vector<1x768xf32> to vector<8x768xf32>
    %68 = arith.mulf %65, %67 : vector<8x768xf32>
    %c0_58 = arith.constant 0 : index
    %c128_59 = arith.constant 128 : index
    %69 = vector.load %arg37[%c0_58, %c128_59] : memref<16x1024xf32, #tpu.memory_space<vmem>>, vector<8x768xf32>
    tpu.vector_store %arg37[%c0_58, %c128_59], %68 {strides = array<i32>} : memref<16x1024xf32, #tpu.memory_space<vmem>>, vector<8x768xf32>,
    %c0_60 = arith.constant 0 : index
    %c109_61 = arith.constant 109 : index
    %70 = vector.load %arg37[%c0_60, %c109_61] : memref<16x1024xf32, #tpu.memory_space<vmem>>, vector<8x768xf32>
    %c0_62 = arith.constant 0 : index
    %c0_63 = arith.constant 0 : index
    %71 = vector.load %arg40[%c0_62, %c0_63] : memref<144x768xf32, #tpu.memory_space<vmem>>, vector<8x768xf32>
    tpu.vector_store %arg40[%c0_62, %c0_63], %70 {strides = array<i32>} : memref<144x768xf32, #tpu.memory_space<vmem>>, vector<8x768xf32>,
    %c0_64 = arith.constant 0 : index
    %c110_65 = arith.constant 110 : index
    %72 = vector.load %arg37[%c0_64, %c110_65] : memref<16x1024xf32, #tpu.memory_space<vmem>>, vector<8x768xf32>
    %c8_66 = arith.constant 8 : index
    %c0_67 = arith.constant 0 : index
    %73 = vector.load %arg40[%c8_66, %c0_67] : memref<144x768xf32, #tpu.memory_space<vmem>>, vector<8x768xf32>
    tpu.vector_store %arg40[%c8_66, %c0_67], %72 {strides = array<i32>} : memref<144x768xf32, #tpu.memory_space<vmem>>, vector<8x768xf32>,
    %c0_68 = arith.constant 0 : index
    %c111_69 = arith.constant 111 : index
    %74 = vector.load %arg37[%c0_68, %c111_69] : memref<16x1024xf32, #tpu.memory_space<vmem>>, vector<8x768xf32>
    %c16_70 = arith.constant 16 : index
    %c0_71 = arith.constant 0 : index
    %75 = vector.load %arg40[%c16_70, %c0_71] : memref<144x768xf32, #tpu.memory_space<vmem>>, vector<8x768xf32>
    tpu.vector_store %arg40[%c16_70, %c0_71], %74 {strides = array<i32>} : memref<144x768xf32, #tpu.memory_space<vmem>>, vector<8x768xf32>,
    %c0_72 = arith.constant 0 : index
    %c127_73 = arith.constant 127 : index
    %76 = vector.load %arg37[%c0_72, %c127_73] : memref<16x1024xf32, #tpu.memory_space<vmem>>, vector<8x768xf32>
    %c24_74 = arith.constant 24 : index
    %c0_75 = arith.constant 0 : index
    %77 = vector.load %arg40[%c24_74, %c0_75] : memref<144x768xf32, #tpu.memory_space<vmem>>, vector<8x768xf32>
    tpu.vector_store %arg40[%c24_74, %c0_75], %76 {strides = array<i32>} : memref<144x768xf32, #tpu.memory_space<vmem>>, vector<8x768xf32>,
    %c0_76 = arith.constant 0 : index
    %c128_77 = arith.constant 128 : index
    %78 = vector.load %arg37[%c0_76, %c128_77] : memref<16x1024xf32, #tpu.memory_space<vmem>>, vector<8x768xf32>
    %c32_78 = arith.constant 32 : index
    %c0_79 = arith.constant 0 : index
    %79 = vector.load %arg40[%c32_78, %c0_79] : memref<144x768xf32, #tpu.memory_space<vmem>>, vector<8x768xf32>
    tpu.vector_store %arg40[%c32_78, %c0_79], %78 {strides = array<i32>} : memref<144x768xf32, #tpu.memory_space<vmem>>, vector<8x768xf32>,
    %c0_80 = arith.constant 0 : index
    %c129_81 = arith.constant 129 : index
    %80 = vector.load %arg37[%c0_80, %c129_81] : memref<16x1024xf32, #tpu.memory_space<vmem>>, vector<8x768xf32>
    %c40_82 = arith.constant 40 : index
    %c0_83 = arith.constant 0 : index
    %81 = vector.load %arg40[%c40_82, %c0_83] : memref<144x768xf32, #tpu.memory_space<vmem>>, vector<8x768xf32>
    tpu.vector_store %arg40[%c40_82, %c0_83], %80 {strides = array<i32>} : memref<144x768xf32, #tpu.memory_space<vmem>>, vector<8x768xf32>,
    %c0_84 = arith.constant 0 : index
    %c145_85 = arith.constant 145 : index
    %82 = vector.load %arg37[%c0_84, %c145_85] : memref<16x1024xf32, #tpu.memory_space<vmem>>, vector<8x768xf32>
    %c48_86 = arith.constant 48 : index
    %c0_87 = arith.constant 0 : index
    %83 = vector.load %arg40[%c48_86, %c0_87] : memref<144x768xf32, #tpu.memory_space<vmem>>, vector<8x768xf32>
    tpu.vector_store %arg40[%c48_86, %c0_87], %82 {strides = array<i32>} : memref<144x768xf32, #tpu.memory_space<vmem>>, vector<8x768xf32>,
    %c0_88 = arith.constant 0 : index
    %c146_89 = arith.constant 146 : index
    %84 = vector.load %arg37[%c0_88, %c146_89] : memref<16x1024xf32, #tpu.memory_space<vmem>>, vector<8x768xf32>
    %c56_90 = arith.constant 56 : index
    %c0_91 = arith.constant 0 : index
    %85 = vector.load %arg40[%c56_90, %c0_91] : memref<144x768xf32, #tpu.memory_space<vmem>>, vector<8x768xf32>
    tpu.vector_store %arg40[%c56_90, %c0_91], %84 {strides = array<i32>} : memref<144x768xf32, #tpu.memory_space<vmem>>, vector<8x768xf32>,
    %c0_92 = arith.constant 0 : index
    %c147_93 = arith.constant 147 : index
    %86 = vector.load %arg37[%c0_92, %c147_93] : memref<16x1024xf32, #tpu.memory_space<vmem>>, vector<8x768xf32>
    %c64_94 = arith.constant 64 : index
    %c0_95 = arith.constant 0 : index
    %87 = vector.load %arg40[%c64_94, %c0_95] : memref<144x768xf32, #tpu.memory_space<vmem>>, vector<8x768xf32>
    tpu.vector_store %arg40[%c64_94, %c0_95], %86 {strides = array<i32>} : memref<144x768xf32, #tpu.memory_space<vmem>>, vector<8x768xf32>,
    %c0_96 = arith.constant 0 : index
    %c0_97 = arith.constant 0 : index
    %88 = vector.load %arg8[%c0_96, %c0_97] : memref<8x72xf32, #tpu.memory_space<vmem>>, vector<8x72xf32>
    %c0_98 = arith.constant 0 : index
    %c0_99 = arith.constant 0 : index
    %89 = vector.load %arg40[%c0_98, %c0_99] : memref<144x768xf32, #tpu.memory_space<vmem>>, vector<72x768xf32>
    %cst_100 = arith.constant dense<0.000000e+00> : vector<8x768xf32>
    %90 = tpu.matmul %88, %89, %cst_100 {dimension_numbers = #tpu.dot_dimension_numbers<[1], [0], [0], [1], [0, 0, 1, 1], [], []>} : vector<8x72xf32>, vector<72x768xf32>, vector<8x768xf32> -> vector<8x768xf32>
    %c0_101 = arith.constant 0 : index
    %c0_102 = arith.constant 0 : index
    %91 = vector.load %arg9[%c0_101, %c0_102] : memref<8x1xf32, #tpu.memory_space<vmem>>, vector<8x1xf32>
    %92 = vector.broadcast %91 : vector<8x1xf32> to vector<8x768xf32>
    %93 = arith.addf %90, %92 : vector<8x768xf32>
    %cst_103 = arith.constant 0.000000e+00 : f32
    %94 = vector.broadcast %cst_103 : f32 to vector<8x768xf32>
    %95 = arith.maximumf %93, %94 : vector<8x768xf32>
    %c0_104 = arith.constant 0 : index
    %c0_105 = arith.constant 0 : index
    %96 = vector.load %arg3[%c0_104, %c0_105] : memref<1x768xf32, #tpu.memory_space<vmem>>, vector<1x768xf32>
    %97 = vector.broadcast %96 : vector<1x768xf32> to vector<8x768xf32>
    %98 = arith.mulf %95, %97 : vector<8x768xf32>
    %c8_106 = arith.constant 8 : index
    %c128_107 = arith.constant 128 : index
    %99 = vector.load %arg37[%c8_106, %c128_107] : memref<16x1024xf32, #tpu.memory_space<vmem>>, vector<8x768xf32>
    tpu.vector_store %arg37[%c8_106, %c128_107], %98 {strides = array<i32>} : memref<16x1024xf32, #tpu.memory_space<vmem>>, vector<8x768xf32>,
    %c8_108 = arith.constant 8 : index
    %c128_109 = arith.constant 128 : index
    %100 = vector.load %arg37[%c8_108, %c128_109] : memref<16x1024xf32, #tpu.memory_space<vmem>>, vector<8x768xf32>
    %c8_110 = arith.constant 8 : index
    %c129_111 = arith.constant 129 : index
    %101 = vector.load %arg37[%c8_110, %c129_111] : memref<16x1024xf32, #tpu.memory_space<vmem>>, vector<8x768xf32>
    %c8_112 = arith.constant 8 : index
    %c146_113 = arith.constant 146 : index
    %102 = vector.load %arg37[%c8_112, %c146_113] : memref<16x1024xf32, #tpu.memory_space<vmem>>, vector<8x768xf32>
    %c8_114 = arith.constant 8 : index
    %c147_115 = arith.constant 147 : index
    %103 = vector.load %arg37[%c8_114, %c147_115] : memref<16x1024xf32, #tpu.memory_space<vmem>>, vector<8x768xf32>
    %104 = arith.maximumf %100, %101 : vector<8x768xf32>
    %105 = arith.maximumf %102, %103 : vector<8x768xf32>
    %106 = arith.maximumf %104, %105 : vector<8x768xf32>
    %107 = vector.extract_strided_slice %106 {offsets = [0, 0], sizes = [8, 384], strides = [1, 1]} : vector<8x768xf32> to vector<8x384xf32>
    %c0_116 = arith.constant 0 : index
    %c0_117 = arith.constant 0 : index
    %108 = vector.load %arg32[%c0_116, %c0_117] : memref<384x128xf32, #tpu.memory_space<vmem>>, vector<384x128xf32>
    %cst_118 = arith.constant dense<0.000000e+00> : vector<8x128xf32>
    %109 = tpu.matmul %107, %108, %cst_118 {dimension_numbers = #tpu.dot_dimension_numbers<[1], [0], [0], [1], [0, 0, 1, 1], [], []>} : vector<8x384xf32>, vector<384x128xf32>, vector<8x128xf32> -> vector<8x128xf32>
    %c0_119 = arith.constant 0 : index
    %c128_120 = arith.constant 128 : index
    %110 = vector.load %arg38[%c0_119, %c128_120] : memref<32x512xf32, #tpu.memory_space<vmem>>, vector<8x128xf32>
    tpu.vector_store %arg38[%c0_119, %c128_120], %109 {strides = array<i32>} : memref<32x512xf32, #tpu.memory_space<vmem>>, vector<8x128xf32>,
    %111 = vector.extract_strided_slice %106 {offsets = [0, 384], sizes = [8, 384], strides = [1, 1]} : vector<8x768xf32> to vector<8x384xf32>
    %c0_121 = arith.constant 0 : index
    %c0_122 = arith.constant 0 : index
    %112 = vector.load %arg32[%c0_121, %c0_122] : memref<384x128xf32, #tpu.memory_space<vmem>>, vector<384x128xf32>
    %cst_123 = arith.constant dense<0.000000e+00> : vector<8x128xf32>
    %113 = tpu.matmul %111, %112, %cst_123 {dimension_numbers = #tpu.dot_dimension_numbers<[1], [0], [0], [1], [0, 0, 1, 1], [], []>} : vector<8x384xf32>, vector<384x128xf32>, vector<8x128xf32> -> vector<8x128xf32>
    %c0_124 = arith.constant 0 : index
    %c256 = arith.constant 256 : index
    %114 = vector.load %arg38[%c0_124, %c256] : memref<32x512xf32, #tpu.memory_space<vmem>>, vector<8x128xf32>
    tpu.vector_store %arg38[%c0_124, %c256], %113 {strides = array<i32>} : memref<32x512xf32, #tpu.memory_space<vmem>>, vector<8x128xf32>,
    %c0_125 = arith.constant 0 : index
    %c117 = arith.constant 117 : index
    %115 = vector.load %arg38[%c0_125, %c117] : memref<32x512xf32, #tpu.memory_space<vmem>>, vector<8x256xf32>
    %c0_126 = arith.constant 0 : index
    %c0_127 = arith.constant 0 : index
    %116 = vector.load %arg41[%c0_126, %c0_127] : memref<288x256xf32, #tpu.memory_space<vmem>>, vector<8x256xf32>
    tpu.vector_store %arg41[%c0_126, %c0_127], %115 {strides = array<i32>} : memref<288x256xf32, #tpu.memory_space<vmem>>, vector<8x256xf32>,
    %c0_128 = arith.constant 0 : index
    %c118 = arith.constant 118 : index
    %117 = vector.load %arg38[%c0_128, %c118] : memref<32x512xf32, #tpu.memory_space<vmem>>, vector<8x256xf32>
    %c8_129 = arith.constant 8 : index
    %c0_130 = arith.constant 0 : index
    %118 = vector.load %arg41[%c8_129, %c0_130] : memref<288x256xf32, #tpu.memory_space<vmem>>, vector<8x256xf32>
    tpu.vector_store %arg41[%c8_129, %c0_130], %117 {strides = array<i32>} : memref<288x256xf32, #tpu.memory_space<vmem>>, vector<8x256xf32>,
    %c0_131 = arith.constant 0 : index
    %c119 = arith.constant 119 : index
    %119 = vector.load %arg38[%c0_131, %c119] : memref<32x512xf32, #tpu.memory_space<vmem>>, vector<8x256xf32>
    %c16_132 = arith.constant 16 : index
    %c0_133 = arith.constant 0 : index
    %120 = vector.load %arg41[%c16_132, %c0_133] : memref<288x256xf32, #tpu.memory_space<vmem>>, vector<8x256xf32>
    tpu.vector_store %arg41[%c16_132, %c0_133], %119 {strides = array<i32>} : memref<288x256xf32, #tpu.memory_space<vmem>>, vector<8x256xf32>,
    %c0_134 = arith.constant 0 : index
    %c127_135 = arith.constant 127 : index
    %121 = vector.load %arg38[%c0_134, %c127_135] : memref<32x512xf32, #tpu.memory_space<vmem>>, vector<8x256xf32>
    %c24_136 = arith.constant 24 : index
    %c0_137 = arith.constant 0 : index
    %122 = vector.load %arg41[%c24_136, %c0_137] : memref<288x256xf32, #tpu.memory_space<vmem>>, vector<8x256xf32>
    tpu.vector_store %arg41[%c24_136, %c0_137], %121 {strides = array<i32>} : memref<288x256xf32, #tpu.memory_space<vmem>>, vector<8x256xf32>,
    %c0_138 = arith.constant 0 : index
    %c128_139 = arith.constant 128 : index
    %123 = vector.load %arg38[%c0_138, %c128_139] : memref<32x512xf32, #tpu.memory_space<vmem>>, vector<8x256xf32>
    %c32_140 = arith.constant 32 : index
    %c0_141 = arith.constant 0 : index
    %124 = vector.load %arg41[%c32_140, %c0_141] : memref<288x256xf32, #tpu.memory_space<vmem>>, vector<8x256xf32>
    tpu.vector_store %arg41[%c32_140, %c0_141], %123 {strides = array<i32>} : memref<288x256xf32, #tpu.memory_space<vmem>>, vector<8x256xf32>,
    %c0_142 = arith.constant 0 : index
    %c129_143 = arith.constant 129 : index
    %125 = vector.load %arg38[%c0_142, %c129_143] : memref<32x512xf32, #tpu.memory_space<vmem>>, vector<8x256xf32>
    %c40_144 = arith.constant 40 : index
    %c0_145 = arith.constant 0 : index
    %126 = vector.load %arg41[%c40_144, %c0_145] : memref<288x256xf32, #tpu.memory_space<vmem>>, vector<8x256xf32>
    tpu.vector_store %arg41[%c40_144, %c0_145], %125 {strides = array<i32>} : memref<288x256xf32, #tpu.memory_space<vmem>>, vector<8x256xf32>,
    %c0_146 = arith.constant 0 : index
    %c137 = arith.constant 137 : index
    %127 = vector.load %arg38[%c0_146, %c137] : memref<32x512xf32, #tpu.memory_space<vmem>>, vector<8x256xf32>
    %c48_147 = arith.constant 48 : index
    %c0_148 = arith.constant 0 : index
    %128 = vector.load %arg41[%c48_147, %c0_148] : memref<288x256xf32, #tpu.memory_space<vmem>>, vector<8x256xf32>
    tpu.vector_store %arg41[%c48_147, %c0_148], %127 {strides = array<i32>} : memref<288x256xf32, #tpu.memory_space<vmem>>, vector<8x256xf32>,
    %c0_149 = arith.constant 0 : index
    %c138 = arith.constant 138 : index
    %129 = vector.load %arg38[%c0_149, %c138] : memref<32x512xf32, #tpu.memory_space<vmem>>, vector<8x256xf32>
    %c56_150 = arith.constant 56 : index
    %c0_151 = arith.constant 0 : index
    %130 = vector.load %arg41[%c56_150, %c0_151] : memref<288x256xf32, #tpu.memory_space<vmem>>, vector<8x256xf32>
    tpu.vector_store %arg41[%c56_150, %c0_151], %129 {strides = array<i32>} : memref<288x256xf32, #tpu.memory_space<vmem>>, vector<8x256xf32>,
    %c0_152 = arith.constant 0 : index
    %c139 = arith.constant 139 : index
    %131 = vector.load %arg38[%c0_152, %c139] : memref<32x512xf32, #tpu.memory_space<vmem>>, vector<8x256xf32>
    %c64_153 = arith.constant 64 : index
    %c0_154 = arith.constant 0 : index
    %132 = vector.load %arg41[%c64_153, %c0_154] : memref<288x256xf32, #tpu.memory_space<vmem>>, vector<8x256xf32>
    tpu.vector_store %arg41[%c64_153, %c0_154], %131 {strides = array<i32>} : memref<288x256xf32, #tpu.memory_space<vmem>>, vector<8x256xf32>,
    %c0_155 = arith.constant 0 : index
    %c0_156 = arith.constant 0 : index
    %133 = vector.load %arg10[%c0_155, %c0_156] : memref<16x72xf32, #tpu.memory_space<vmem>>, vector<16x72xf32>
    %c0_157 = arith.constant 0 : index
    %c0_158 = arith.constant 0 : index
    %134 = vector.load %arg41[%c0_157, %c0_158] : memref<288x256xf32, #tpu.memory_space<vmem>>, vector<72x256xf32>
    %cst_159 = arith.constant dense<0.000000e+00> : vector<16x256xf32>
    %135 = tpu.matmul %133, %134, %cst_159 {dimension_numbers = #tpu.dot_dimension_numbers<[1], [0], [0], [1], [0, 0, 1, 1], [], []>} : vector<16x72xf32>, vector<72x256xf32>, vector<16x256xf32> -> vector<16x256xf32>
    %c0_160 = arith.constant 0 : index
    %c0_161 = arith.constant 0 : index
    %136 = vector.load %arg11[%c0_160, %c0_161] : memref<16x1xf32, #tpu.memory_space<vmem>>, vector<16x1xf32>
    %137 = vector.broadcast %136 : vector<16x1xf32> to vector<16x256xf32>
    %138 = arith.addf %135, %137 : vector<16x256xf32>
    %cst_162 = arith.constant 0.000000e+00 : f32
    %139 = vector.broadcast %cst_162 : f32 to vector<16x256xf32>
    %140 = arith.maximumf %138, %139 : vector<16x256xf32>
    %c0_163 = arith.constant 0 : index
    %c0_164 = arith.constant 0 : index
    %141 = vector.load %arg4[%c0_163, %c0_164] : memref<1x256xf32, #tpu.memory_space<vmem>>, vector<1x256xf32>
    %142 = vector.broadcast %141 : vector<1x256xf32> to vector<16x256xf32>
    %143 = arith.mulf %140, %142 : vector<16x256xf32>
    %c0_165 = arith.constant 0 : index
    %c128_166 = arith.constant 128 : index
    %144 = vector.load %arg38[%c0_165, %c128_166] : memref<32x512xf32, #tpu.memory_space<vmem>>, vector<16x256xf32>
    tpu.vector_store %arg38[%c0_165, %c128_166], %143 {strides = array<i32>} : memref<32x512xf32, #tpu.memory_space<vmem>>, vector<16x256xf32>,
    %c0_167 = arith.constant 0 : index
    %c117_168 = arith.constant 117 : index
    %145 = vector.load %arg38[%c0_167, %c117_168] : memref<32x512xf32, #tpu.memory_space<vmem>>, vector<16x256xf32>
    %c0_169 = arith.constant 0 : index
    %c0_170 = arith.constant 0 : index
    %146 = vector.load %arg41[%c0_169, %c0_170] : memref<288x256xf32, #tpu.memory_space<vmem>>, vector<16x256xf32>
    tpu.vector_store %arg41[%c0_169, %c0_170], %145 {strides = array<i32>} : memref<288x256xf32, #tpu.memory_space<vmem>>, vector<16x256xf32>,
    %c0_171 = arith.constant 0 : index
    %c118_172 = arith.constant 118 : index
    %147 = vector.load %arg38[%c0_171, %c118_172] : memref<32x512xf32, #tpu.memory_space<vmem>>, vector<16x256xf32>
    %c16_173 = arith.constant 16 : index
    %c0_174 = arith.constant 0 : index
    %148 = vector.load %arg41[%c16_173, %c0_174] : memref<288x256xf32, #tpu.memory_space<vmem>>, vector<16x256xf32>
    tpu.vector_store %arg41[%c16_173, %c0_174], %147 {strides = array<i32>} : memref<288x256xf32, #tpu.memory_space<vmem>>, vector<16x256xf32>,
    %c0_175 = arith.constant 0 : index
    %c119_176 = arith.constant 119 : index
    %149 = vector.load %arg38[%c0_175, %c119_176] : memref<32x512xf32, #tpu.memory_space<vmem>>, vector<16x256xf32>
    %c32_177 = arith.constant 32 : index
    %c0_178 = arith.constant 0 : index
    %150 = vector.load %arg41[%c32_177, %c0_178] : memref<288x256xf32, #tpu.memory_space<vmem>>, vector<16x256xf32>
    tpu.vector_store %arg41[%c32_177, %c0_178], %149 {strides = array<i32>} : memref<288x256xf32, #tpu.memory_space<vmem>>, vector<16x256xf32>,
    %c0_179 = arith.constant 0 : index
    %c127_180 = arith.constant 127 : index
    %151 = vector.load %arg38[%c0_179, %c127_180] : memref<32x512xf32, #tpu.memory_space<vmem>>, vector<16x256xf32>
    %c48_181 = arith.constant 48 : index
    %c0_182 = arith.constant 0 : index
    %152 = vector.load %arg41[%c48_181, %c0_182] : memref<288x256xf32, #tpu.memory_space<vmem>>, vector<16x256xf32>
    tpu.vector_store %arg41[%c48_181, %c0_182], %151 {strides = array<i32>} : memref<288x256xf32, #tpu.memory_space<vmem>>, vector<16x256xf32>,
    %c0_183 = arith.constant 0 : index
    %c128_184 = arith.constant 128 : index
    %153 = vector.load %arg38[%c0_183, %c128_184] : memref<32x512xf32, #tpu.memory_space<vmem>>, vector<16x256xf32>
    %c64_185 = arith.constant 64 : index
    %c0_186 = arith.constant 0 : index
    %154 = vector.load %arg41[%c64_185, %c0_186] : memref<288x256xf32, #tpu.memory_space<vmem>>, vector<16x256xf32>
    tpu.vector_store %arg41[%c64_185, %c0_186], %153 {strides = array<i32>} : memref<288x256xf32, #tpu.memory_space<vmem>>, vector<16x256xf32>,
    %c0_187 = arith.constant 0 : index
    %c129_188 = arith.constant 129 : index
    %155 = vector.load %arg38[%c0_187, %c129_188] : memref<32x512xf32, #tpu.memory_space<vmem>>, vector<16x256xf32>
    %c80 = arith.constant 80 : index
    %c0_189 = arith.constant 0 : index
    %156 = vector.load %arg41[%c80, %c0_189] : memref<288x256xf32, #tpu.memory_space<vmem>>, vector<16x256xf32>
    tpu.vector_store %arg41[%c80, %c0_189], %155 {strides = array<i32>} : memref<288x256xf32, #tpu.memory_space<vmem>>, vector<16x256xf32>,
    %c0_190 = arith.constant 0 : index
    %c137_191 = arith.constant 137 : index
    %157 = vector.load %arg38[%c0_190, %c137_191] : memref<32x512xf32, #tpu.memory_space<vmem>>, vector<16x256xf32>
    %c96 = arith.constant 96 : index
    %c0_192 = arith.constant 0 : index
    %158 = vector.load %arg41[%c96, %c0_192] : memref<288x256xf32, #tpu.memory_space<vmem>>, vector<16x256xf32>
    tpu.vector_store %arg41[%c96, %c0_192], %157 {strides = array<i32>} : memref<288x256xf32, #tpu.memory_space<vmem>>, vector<16x256xf32>,
    %c0_193 = arith.constant 0 : index
    %c138_194 = arith.constant 138 : index
    %159 = vector.load %arg38[%c0_193, %c138_194] : memref<32x512xf32, #tpu.memory_space<vmem>>, vector<16x256xf32>
    %c112 = arith.constant 112 : index
    %c0_195 = arith.constant 0 : index
    %160 = vector.load %arg41[%c112, %c0_195] : memref<288x256xf32, #tpu.memory_space<vmem>>, vector<16x256xf32>
    tpu.vector_store %arg41[%c112, %c0_195], %159 {strides = array<i32>} : memref<288x256xf32, #tpu.memory_space<vmem>>, vector<16x256xf32>,
    %c0_196 = arith.constant 0 : index
    %c139_197 = arith.constant 139 : index
    %161 = vector.load %arg38[%c0_196, %c139_197] : memref<32x512xf32, #tpu.memory_space<vmem>>, vector<16x256xf32>
    %c128_198 = arith.constant 128 : index
    %c0_199 = arith.constant 0 : index
    %162 = vector.load %arg41[%c128_198, %c0_199] : memref<288x256xf32, #tpu.memory_space<vmem>>, vector<16x256xf32>
    tpu.vector_store %arg41[%c128_198, %c0_199], %161 {strides = array<i32>} : memref<288x256xf32, #tpu.memory_space<vmem>>, vector<16x256xf32>,
    %c0_200 = arith.constant 0 : index
    %c0_201 = arith.constant 0 : index
    %163 = vector.load %arg12[%c0_200, %c0_201] : memref<16x144xf32, #tpu.memory_space<vmem>>, vector<16x144xf32>
    %c0_202 = arith.constant 0 : index
    %c0_203 = arith.constant 0 : index
    %164 = vector.load %arg41[%c0_202, %c0_203] : memref<288x256xf32, #tpu.memory_space<vmem>>, vector<144x256xf32>
    %cst_204 = arith.constant dense<0.000000e+00> : vector<16x256xf32>
    %165 = tpu.matmul %163, %164, %cst_204 {dimension_numbers = #tpu.dot_dimension_numbers<[1], [0], [0], [1], [0, 0, 1, 1], [], []>} : vector<16x144xf32>, vector<144x256xf32>, vector<16x256xf32> -> vector<16x256xf32>
    %c0_205 = arith.constant 0 : index
    %c0_206 = arith.constant 0 : index
    %166 = vector.load %arg13[%c0_205, %c0_206] : memref<16x1xf32, #tpu.memory_space<vmem>>, vector<16x1xf32>
    %167 = vector.broadcast %166 : vector<16x1xf32> to vector<16x256xf32>
    %168 = arith.addf %165, %167 : vector<16x256xf32>
    %cst_207 = arith.constant 0.000000e+00 : f32
    %169 = vector.broadcast %cst_207 : f32 to vector<16x256xf32>
    %170 = arith.maximumf %168, %169 : vector<16x256xf32>
    %c0_208 = arith.constant 0 : index
    %c0_209 = arith.constant 0 : index
    %171 = vector.load %arg4[%c0_208, %c0_209] : memref<1x256xf32, #tpu.memory_space<vmem>>, vector<1x256xf32>
    %172 = vector.broadcast %171 : vector<1x256xf32> to vector<16x256xf32>
    %173 = arith.mulf %170, %172 : vector<16x256xf32>
    %c16_210 = arith.constant 16 : index
    %c128_211 = arith.constant 128 : index
    %174 = vector.load %arg38[%c16_210, %c128_211] : memref<32x512xf32, #tpu.memory_space<vmem>>, vector<16x256xf32>
    tpu.vector_store %arg38[%c16_210, %c128_211], %173 {strides = array<i32>} : memref<32x512xf32, #tpu.memory_space<vmem>>, vector<16x256xf32>,
    %c16_212 = arith.constant 16 : index
    %c128_213 = arith.constant 128 : index
    %175 = vector.load %arg38[%c16_212, %c128_213] : memref<32x512xf32, #tpu.memory_space<vmem>>, vector<16x256xf32>
    %c16_214 = arith.constant 16 : index
    %c129_215 = arith.constant 129 : index
    %176 = vector.load %arg38[%c16_214, %c129_215] : memref<32x512xf32, #tpu.memory_space<vmem>>, vector<16x256xf32>
    %c16_216 = arith.constant 16 : index
    %c138_217 = arith.constant 138 : index
    %177 = vector.load %arg38[%c16_216, %c138_217] : memref<32x512xf32, #tpu.memory_space<vmem>>, vector<16x256xf32>
    %c16_218 = arith.constant 16 : index
    %c139_219 = arith.constant 139 : index
    %178 = vector.load %arg38[%c16_218, %c139_219] : memref<32x512xf32, #tpu.memory_space<vmem>>, vector<16x256xf32>
    %179 = arith.maximumf %175, %176 : vector<16x256xf32>
    %180 = arith.maximumf %177, %178 : vector<16x256xf32>
    %181 = arith.maximumf %179, %180 : vector<16x256xf32>
    %182 = vector.extract_strided_slice %181 {offsets = [0, 0], sizes = [16, 128], strides = [1, 1]} : vector<16x256xf32> to vector<16x128xf32>
    %c0_220 = arith.constant 0 : index
    %c0_221 = arith.constant 0 : index
    %183 = vector.load %arg33[%c0_220, %c0_221] : memref<128x128xf32, #tpu.memory_space<vmem>>, vector<128x128xf32>
    %cst_222 = arith.constant dense<0.000000e+00> : vector<16x128xf32>
    %184 = tpu.matmul %182, %183, %cst_222 {dimension_numbers = #tpu.dot_dimension_numbers<[1], [0], [0], [1], [0, 0, 1, 1], [], []>} : vector<16x128xf32>, vector<128x128xf32>, vector<16x128xf32> -> vector<16x128xf32>
    %c0_223 = arith.constant 0 : index
    %c128_224 = arith.constant 128 : index
    %185 = vector.load %arg39[%c0_223, %c128_224] : memref<32x512xf32, #tpu.memory_space<vmem>>, vector<16x128xf32>
    tpu.vector_store %arg39[%c0_223, %c128_224], %184 {strides = array<i32>} : memref<32x512xf32, #tpu.memory_space<vmem>>, vector<16x128xf32>,
    %186 = vector.extract_strided_slice %181 {offsets = [0, 128], sizes = [16, 128], strides = [1, 1]} : vector<16x256xf32> to vector<16x128xf32>
    %c0_225 = arith.constant 0 : index
    %c0_226 = arith.constant 0 : index
    %187 = vector.load %arg33[%c0_225, %c0_226] : memref<128x128xf32, #tpu.memory_space<vmem>>, vector<128x128xf32>
    %cst_227 = arith.constant dense<0.000000e+00> : vector<16x128xf32>
    %188 = tpu.matmul %186, %187, %cst_227 {dimension_numbers = #tpu.dot_dimension_numbers<[1], [0], [0], [1], [0, 0, 1, 1], [], []>} : vector<16x128xf32>, vector<128x128xf32>, vector<16x128xf32> -> vector<16x128xf32>
    %c0_228 = arith.constant 0 : index
    %c256_229 = arith.constant 256 : index
    %189 = vector.load %arg39[%c0_228, %c256_229] : memref<32x512xf32, #tpu.memory_space<vmem>>, vector<16x128xf32>
    tpu.vector_store %arg39[%c0_228, %c256_229], %188 {strides = array<i32>} : memref<32x512xf32, #tpu.memory_space<vmem>>, vector<16x128xf32>,
    %c0_230 = arith.constant 0 : index
    %c121 = arith.constant 121 : index
    %190 = vector.load %arg39[%c0_230, %c121] : memref<32x512xf32, #tpu.memory_space<vmem>>, vector<16x256xf32>
    %c0_231 = arith.constant 0 : index
    %c0_232 = arith.constant 0 : index
    %191 = vector.load %arg42[%c0_231, %c0_232] : memref<288x256xf32, #tpu.memory_space<vmem>>, vector<16x256xf32>
    tpu.vector_store %arg42[%c0_231, %c0_232], %190 {strides = array<i32>} : memref<288x256xf32, #tpu.memory_space<vmem>>, vector<16x256xf32>,
    %c0_233 = arith.constant 0 : index
    %c122 = arith.constant 122 : index
    %192 = vector.load %arg39[%c0_233, %c122] : memref<32x512xf32, #tpu.memory_space<vmem>>, vector<16x256xf32>
    %c16_234 = arith.constant 16 : index
    %c0_235 = arith.constant 0 : index
    %193 = vector.load %arg42[%c16_234, %c0_235] : memref<288x256xf32, #tpu.memory_space<vmem>>, vector<16x256xf32>
    tpu.vector_store %arg42[%c16_234, %c0_235], %192 {strides = array<i32>} : memref<288x256xf32, #tpu.memory_space<vmem>>, vector<16x256xf32>,
    %c0_236 = arith.constant 0 : index
    %c123 = arith.constant 123 : index
    %194 = vector.load %arg39[%c0_236, %c123] : memref<32x512xf32, #tpu.memory_space<vmem>>, vector<16x256xf32>
    %c32_237 = arith.constant 32 : index
    %c0_238 = arith.constant 0 : index
    %195 = vector.load %arg42[%c32_237, %c0_238] : memref<288x256xf32, #tpu.memory_space<vmem>>, vector<16x256xf32>
    tpu.vector_store %arg42[%c32_237, %c0_238], %194 {strides = array<i32>} : memref<288x256xf32, #tpu.memory_space<vmem>>, vector<16x256xf32>,
    %c0_239 = arith.constant 0 : index
    %c127_240 = arith.constant 127 : index
    %196 = vector.load %arg39[%c0_239, %c127_240] : memref<32x512xf32, #tpu.memory_space<vmem>>, vector<16x256xf32>
    %c48_241 = arith.constant 48 : index
    %c0_242 = arith.constant 0 : index
    %197 = vector.load %arg42[%c48_241, %c0_242] : memref<288x256xf32, #tpu.memory_space<vmem>>, vector<16x256xf32>
    tpu.vector_store %arg42[%c48_241, %c0_242], %196 {strides = array<i32>} : memref<288x256xf32, #tpu.memory_space<vmem>>, vector<16x256xf32>,
    %c0_243 = arith.constant 0 : index
    %c128_244 = arith.constant 128 : index
    %198 = vector.load %arg39[%c0_243, %c128_244] : memref<32x512xf32, #tpu.memory_space<vmem>>, vector<16x256xf32>
    %c64_245 = arith.constant 64 : index
    %c0_246 = arith.constant 0 : index
    %199 = vector.load %arg42[%c64_245, %c0_246] : memref<288x256xf32, #tpu.memory_space<vmem>>, vector<16x256xf32>
    tpu.vector_store %arg42[%c64_245, %c0_246], %198 {strides = array<i32>} : memref<288x256xf32, #tpu.memory_space<vmem>>, vector<16x256xf32>,
    %c0_247 = arith.constant 0 : index
    %c129_248 = arith.constant 129 : index
    %200 = vector.load %arg39[%c0_247, %c129_248] : memref<32x512xf32, #tpu.memory_space<vmem>>, vector<16x256xf32>
    %c80_249 = arith.constant 80 : index
    %c0_250 = arith.constant 0 : index
    %201 = vector.load %arg42[%c80_249, %c0_250] : memref<288x256xf32, #tpu.memory_space<vmem>>, vector<16x256xf32>
    tpu.vector_store %arg42[%c80_249, %c0_250], %200 {strides = array<i32>} : memref<288x256xf32, #tpu.memory_space<vmem>>, vector<16x256xf32>,
    %c0_251 = arith.constant 0 : index
    %c133 = arith.constant 133 : index
    %202 = vector.load %arg39[%c0_251, %c133] : memref<32x512xf32, #tpu.memory_space<vmem>>, vector<16x256xf32>
    %c96_252 = arith.constant 96 : index
    %c0_253 = arith.constant 0 : index
    %203 = vector.load %arg42[%c96_252, %c0_253] : memref<288x256xf32, #tpu.memory_space<vmem>>, vector<16x256xf32>
    tpu.vector_store %arg42[%c96_252, %c0_253], %202 {strides = array<i32>} : memref<288x256xf32, #tpu.memory_space<vmem>>, vector<16x256xf32>,
    %c0_254 = arith.constant 0 : index
    %c134 = arith.constant 134 : index
    %204 = vector.load %arg39[%c0_254, %c134] : memref<32x512xf32, #tpu.memory_space<vmem>>, vector<16x256xf32>
    %c112_255 = arith.constant 112 : index
    %c0_256 = arith.constant 0 : index
    %205 = vector.load %arg42[%c112_255, %c0_256] : memref<288x256xf32, #tpu.memory_space<vmem>>, vector<16x256xf32>
    tpu.vector_store %arg42[%c112_255, %c0_256], %204 {strides = array<i32>} : memref<288x256xf32, #tpu.memory_space<vmem>>, vector<16x256xf32>,
    %c0_257 = arith.constant 0 : index
    %c135 = arith.constant 135 : index
    %206 = vector.load %arg39[%c0_257, %c135] : memref<32x512xf32, #tpu.memory_space<vmem>>, vector<16x256xf32>
    %c128_258 = arith.constant 128 : index
    %c0_259 = arith.constant 0 : index
    %207 = vector.load %arg42[%c128_258, %c0_259] : memref<288x256xf32, #tpu.memory_space<vmem>>, vector<16x256xf32>
    tpu.vector_store %arg42[%c128_258, %c0_259], %206 {strides = array<i32>} : memref<288x256xf32, #tpu.memory_space<vmem>>, vector<16x256xf32>,
    %c0_260 = arith.constant 0 : index
    %c0_261 = arith.constant 0 : index
    %208 = vector.load %arg14[%c0_260, %c0_261] : memref<32x144xf32, #tpu.memory_space<vmem>>, vector<32x144xf32>
    %c0_262 = arith.constant 0 : index
    %c0_263 = arith.constant 0 : index
    %209 = vector.load %arg42[%c0_262, %c0_263] : memref<288x256xf32, #tpu.memory_space<vmem>>, vector<144x256xf32>
    %cst_264 = arith.constant dense<0.000000e+00> : vector<32x256xf32>
    %210 = tpu.matmul %208, %209, %cst_264 {dimension_numbers = #tpu.dot_dimension_numbers<[1], [0], [0], [1], [0, 0, 1, 1], [], []>} : vector<32x144xf32>, vector<144x256xf32>, vector<32x256xf32> -> vector<32x256xf32>
    %c0_265 = arith.constant 0 : index
    %c0_266 = arith.constant 0 : index
    %211 = vector.load %arg15[%c0_265, %c0_266] : memref<32x1xf32, #tpu.memory_space<vmem>>, vector<32x1xf32>
    %212 = vector.broadcast %211 : vector<32x1xf32> to vector<32x256xf32>
    %213 = arith.addf %210, %212 : vector<32x256xf32>
    %cst_267 = arith.constant 0.000000e+00 : f32
    %214 = vector.broadcast %cst_267 : f32 to vector<32x256xf32>
    %215 = arith.maximumf %213, %214 : vector<32x256xf32>
    %c0_268 = arith.constant 0 : index
    %c0_269 = arith.constant 0 : index
    %216 = vector.load %arg5[%c0_268, %c0_269] : memref<1x256xf32, #tpu.memory_space<vmem>>, vector<1x256xf32>
    %217 = vector.broadcast %216 : vector<1x256xf32> to vector<32x256xf32>
    %218 = arith.mulf %215, %217 : vector<32x256xf32>
    %c0_270 = arith.constant 0 : index
    %c128_271 = arith.constant 128 : index
    %219 = vector.load %arg39[%c0_270, %c128_271] : memref<32x512xf32, #tpu.memory_space<vmem>>, vector<32x256xf32>
    tpu.vector_store %arg39[%c0_270, %c128_271], %218 {strides = array<i32>} : memref<32x512xf32, #tpu.memory_space<vmem>>, vector<32x256xf32>,
    %c0_272 = arith.constant 0 : index
    %c121_273 = arith.constant 121 : index
    %220 = vector.load %arg39[%c0_272, %c121_273] : memref<32x512xf32, #tpu.memory_space<vmem>>, vector<32x256xf32>
    %c0_274 = arith.constant 0 : index
    %c0_275 = arith.constant 0 : index
    %221 = vector.load %arg42[%c0_274, %c0_275] : memref<288x256xf32, #tpu.memory_space<vmem>>, vector<32x256xf32>
    tpu.vector_store %arg42[%c0_274, %c0_275], %220 {strides = array<i32>} : memref<288x256xf32, #tpu.memory_space<vmem>>, vector<32x256xf32>,
    %c0_276 = arith.constant 0 : index
    %c122_277 = arith.constant 122 : index
    %222 = vector.load %arg39[%c0_276, %c122_277] : memref<32x512xf32, #tpu.memory_space<vmem>>, vector<32x256xf32>
    %c32_278 = arith.constant 32 : index
    %c0_279 = arith.constant 0 : index
    %223 = vector.load %arg42[%c32_278, %c0_279] : memref<288x256xf32, #tpu.memory_space<vmem>>, vector<32x256xf32>
    tpu.vector_store %arg42[%c32_278, %c0_279], %222 {strides = array<i32>} : memref<288x256xf32, #tpu.memory_space<vmem>>, vector<32x256xf32>,
    %c0_280 = arith.constant 0 : index
    %c123_281 = arith.constant 123 : index
    %224 = vector.load %arg39[%c0_280, %c123_281] : memref<32x512xf32, #tpu.memory_space<vmem>>, vector<32x256xf32>
    %c64_282 = arith.constant 64 : index
    %c0_283 = arith.constant 0 : index
    %225 = vector.load %arg42[%c64_282, %c0_283] : memref<288x256xf32, #tpu.memory_space<vmem>>, vector<32x256xf32>
    tpu.vector_store %arg42[%c64_282, %c0_283], %224 {strides = array<i32>} : memref<288x256xf32, #tpu.memory_space<vmem>>, vector<32x256xf32>,
    %c0_284 = arith.constant 0 : index
    %c127_285 = arith.constant 127 : index
    %226 = vector.load %arg39[%c0_284, %c127_285] : memref<32x512xf32, #tpu.memory_space<vmem>>, vector<32x256xf32>
    %c96_286 = arith.constant 96 : index
    %c0_287 = arith.constant 0 : index
    %227 = vector.load %arg42[%c96_286, %c0_287] : memref<288x256xf32, #tpu.memory_space<vmem>>, vector<32x256xf32>
    tpu.vector_store %arg42[%c96_286, %c0_287], %226 {strides = array<i32>} : memref<288x256xf32, #tpu.memory_space<vmem>>, vector<32x256xf32>,
    %c0_288 = arith.constant 0 : index
    %c128_289 = arith.constant 128 : index
    %228 = vector.load %arg39[%c0_288, %c128_289] : memref<32x512xf32, #tpu.memory_space<vmem>>, vector<32x256xf32>
    %c128_290 = arith.constant 128 : index
    %c0_291 = arith.constant 0 : index
    %229 = vector.load %arg42[%c128_290, %c0_291] : memref<288x256xf32, #tpu.memory_space<vmem>>, vector<32x256xf32>
    tpu.vector_store %arg42[%c128_290, %c0_291], %228 {strides = array<i32>} : memref<288x256xf32, #tpu.memory_space<vmem>>, vector<32x256xf32>,
    %c0_292 = arith.constant 0 : index
    %c129_293 = arith.constant 129 : index
    %230 = vector.load %arg39[%c0_292, %c129_293] : memref<32x512xf32, #tpu.memory_space<vmem>>, vector<32x256xf32>
    %c160 = arith.constant 160 : index
    %c0_294 = arith.constant 0 : index
    %231 = vector.load %arg42[%c160, %c0_294] : memref<288x256xf32, #tpu.memory_space<vmem>>, vector<32x256xf32>
    tpu.vector_store %arg42[%c160, %c0_294], %230 {strides = array<i32>} : memref<288x256xf32, #tpu.memory_space<vmem>>, vector<32x256xf32>,
    %c0_295 = arith.constant 0 : index
    %c133_296 = arith.constant 133 : index
    %232 = vector.load %arg39[%c0_295, %c133_296] : memref<32x512xf32, #tpu.memory_space<vmem>>, vector<32x256xf32>
    %c192 = arith.constant 192 : index
    %c0_297 = arith.constant 0 : index
    %233 = vector.load %arg42[%c192, %c0_297] : memref<288x256xf32, #tpu.memory_space<vmem>>, vector<32x256xf32>
    tpu.vector_store %arg42[%c192, %c0_297], %232 {strides = array<i32>} : memref<288x256xf32, #tpu.memory_space<vmem>>, vector<32x256xf32>,
    %c0_298 = arith.constant 0 : index
    %c134_299 = arith.constant 134 : index
    %234 = vector.load %arg39[%c0_298, %c134_299] : memref<32x512xf32, #tpu.memory_space<vmem>>, vector<32x256xf32>
    %c224 = arith.constant 224 : index
    %c0_300 = arith.constant 0 : index
    %235 = vector.load %arg42[%c224, %c0_300] : memref<288x256xf32, #tpu.memory_space<vmem>>, vector<32x256xf32>
    tpu.vector_store %arg42[%c224, %c0_300], %234 {strides = array<i32>} : memref<288x256xf32, #tpu.memory_space<vmem>>, vector<32x256xf32>,
    %c0_301 = arith.constant 0 : index
    %c135_302 = arith.constant 135 : index
    %236 = vector.load %arg39[%c0_301, %c135_302] : memref<32x512xf32, #tpu.memory_space<vmem>>, vector<32x256xf32>
    %c256_303 = arith.constant 256 : index
    %c0_304 = arith.constant 0 : index
    %237 = vector.load %arg42[%c256_303, %c0_304] : memref<288x256xf32, #tpu.memory_space<vmem>>, vector<32x256xf32>
    tpu.vector_store %arg42[%c256_303, %c0_304], %236 {strides = array<i32>} : memref<288x256xf32, #tpu.memory_space<vmem>>, vector<32x256xf32>,
    %c0_305 = arith.constant 0 : index
    %c0_306 = arith.constant 0 : index
    %238 = vector.load %arg16[%c0_305, %c0_306] : memref<32x288xf32, #tpu.memory_space<vmem>>, vector<32x288xf32>
    %c0_307 = arith.constant 0 : index
    %c0_308 = arith.constant 0 : index
    %239 = vector.load %arg42[%c0_307, %c0_308] : memref<288x256xf32, #tpu.memory_space<vmem>>, vector<288x256xf32>
    %cst_309 = arith.constant dense<0.000000e+00> : vector<32x256xf32>
    %240 = tpu.matmul %238, %239, %cst_309 {dimension_numbers = #tpu.dot_dimension_numbers<[1], [0], [0], [1], [0, 0, 1, 1], [], []>} : vector<32x288xf32>, vector<288x256xf32>, vector<32x256xf32> -> vector<32x256xf32>
    %c0_310 = arith.constant 0 : index
    %c0_311 = arith.constant 0 : index
    %241 = vector.load %arg17[%c0_310, %c0_311] : memref<32x1xf32, #tpu.memory_space<vmem>>, vector<32x1xf32>
    %242 = vector.broadcast %241 : vector<32x1xf32> to vector<32x256xf32>
    %243 = arith.addf %240, %242 : vector<32x256xf32>
    %cst_312 = arith.constant 0.000000e+00 : f32
    %244 = vector.broadcast %cst_312 : f32 to vector<32x256xf32>
    %245 = arith.maximumf %243, %244 : vector<32x256xf32>
    %c0_313 = arith.constant 0 : index
    %c0_314 = arith.constant 0 : index
    %246 = vector.load %arg5[%c0_313, %c0_314] : memref<1x256xf32, #tpu.memory_space<vmem>>, vector<1x256xf32>
    %247 = vector.broadcast %246 : vector<1x256xf32> to vector<32x256xf32>
    %248 = arith.mulf %245, %247 : vector<32x256xf32>
    %c0_315 = arith.constant 0 : index
    %c128_316 = arith.constant 128 : index
    %249 = vector.load %arg39[%c0_315, %c128_316] : memref<32x512xf32, #tpu.memory_space<vmem>>, vector<32x256xf32>
    tpu.vector_store %arg39[%c0_315, %c128_316], %248 {strides = array<i32>} : memref<32x512xf32, #tpu.memory_space<vmem>>, vector<32x256xf32>,
    %c0_317 = arith.constant 0 : index
    %c128_318 = arith.constant 128 : index
    %250 = vector.load %arg39[%c0_317, %c128_318] : memref<32x512xf32, #tpu.memory_space<vmem>>, vector<32x256xf32>
    %c0_319 = arith.constant 0 : index
    %c0_320 = arith.constant 0 : index
    %251 = vector.load %arg18[%c0_319, %c0_320] : memref<64x32xf32, #tpu.memory_space<vmem>>, vector<64x32xf32>
    %cst_321 = arith.constant dense<0.000000e+00> : vector<64x256xf32>
    %252 = tpu.matmul %251, %250, %cst_321 {dimension_numbers = #tpu.dot_dimension_numbers<[1], [0], [0], [1], [0, 0, 1, 1], [], []>} : vector<64x32xf32>, vector<32x256xf32>, vector<64x256xf32> -> vector<64x256xf32>
    %253 = vector.extract_strided_slice %252 {offsets = [0, 0], sizes = [64, 128], strides = [1, 1]} : vector<64x256xf32> to vector<64x128xf32>
    %c0_322 = arith.constant 0 : index
    %c0_323 = arith.constant 0 : index
    %254 = vector.load %arg34[%c0_322, %c0_323] : memref<128x128xf32, #tpu.memory_space<vmem>>, vector<128x128xf32>
    %cst_324 = arith.constant dense<0.000000e+00> : vector<64x128xf32>
    %255 = tpu.matmul %253, %254, %cst_324 {dimension_numbers = #tpu.dot_dimension_numbers<[1], [0], [0], [1], [0, 0, 1, 1], [], []>} : vector<64x128xf32>, vector<128x128xf32>, vector<64x128xf32> -> vector<64x128xf32>
    %c0_325 = arith.constant 0 : index
    %c128_326 = arith.constant 128 : index
    %256 = vector.load %arg43[%c0_325, %c128_326] : memref<64x512xf32, #tpu.memory_space<vmem>>, vector<64x128xf32>
    tpu.vector_store %arg43[%c0_325, %c128_326], %255 {strides = array<i32>} : memref<64x512xf32, #tpu.memory_space<vmem>>, vector<64x128xf32>,
    %c0_327 = arith.constant 0 : index
    %c128_328 = arith.constant 128 : index
    %257 = vector.load %arg43[%c0_327, %c128_328] : memref<64x512xf32, #tpu.memory_space<vmem>>, vector<16x128xf32>
    %c16_329 = arith.constant 16 : index
    %c127_330 = arith.constant 127 : index
    %258 = vector.load %arg43[%c16_329, %c127_330] : memref<64x512xf32, #tpu.memory_space<vmem>>, vector<16x128xf32>
    %259 = arith.addf %257, %258 : vector<16x128xf32>
    %c32_331 = arith.constant 32 : index
    %c118_332 = arith.constant 118 : index
    %260 = vector.load %arg43[%c32_331, %c118_332] : memref<64x512xf32, #tpu.memory_space<vmem>>, vector<16x128xf32>
    %261 = arith.addf %259, %260 : vector<16x128xf32>
    %c48_333 = arith.constant 48 : index
    %c117_334 = arith.constant 117 : index
    %262 = vector.load %arg43[%c48_333, %c117_334] : memref<64x512xf32, #tpu.memory_space<vmem>>, vector<16x128xf32>
    %263 = arith.addf %261, %262 : vector<16x128xf32>
    %c0_335 = arith.constant 0 : index
    %c0_336 = arith.constant 0 : index
    %264 = vector.load %arg4[%c0_335, %c0_336] : memref<1x256xf32, #tpu.memory_space<vmem>>, vector<1x128xf32>
    %c0_337 = arith.constant 0 : index
    %c0_338 = arith.constant 0 : index
    %265 = vector.load %arg19[%c0_337, %c0_338] : memref<16x1xf32, #tpu.memory_space<vmem>>, vector<16x1xf32>
    %266 = vector.broadcast %265 : vector<16x1xf32> to vector<16x128xf32>
    %267 = arith.addf %263, %266 : vector<16x128xf32>
    %268 = vector.broadcast %264 : vector<1x128xf32> to vector<16x128xf32>
    %269 = arith.mulf %267, %268 : vector<16x128xf32>
    %c0_339 = arith.constant 0 : index
    %c128_340 = arith.constant 128 : index
    %270 = vector.load %arg38[%c0_339, %c128_340] : memref<32x512xf32, #tpu.memory_space<vmem>>, vector<16x128xf32>
    tpu.vector_store %arg38[%c0_339, %c128_340], %269 {strides = array<i32>} : memref<32x512xf32, #tpu.memory_space<vmem>>, vector<16x128xf32>,
    %271 = vector.extract_strided_slice %252 {offsets = [0, 128], sizes = [64, 128], strides = [1, 1]} : vector<64x256xf32> to vector<64x128xf32>
    %c0_341 = arith.constant 0 : index
    %c0_342 = arith.constant 0 : index
    %272 = vector.load %arg34[%c0_341, %c0_342] : memref<128x128xf32, #tpu.memory_space<vmem>>, vector<128x128xf32>
    %cst_343 = arith.constant dense<0.000000e+00> : vector<64x128xf32>
    %273 = tpu.matmul %271, %272, %cst_343 {dimension_numbers = #tpu.dot_dimension_numbers<[1], [0], [0], [1], [0, 0, 1, 1], [], []>} : vector<64x128xf32>, vector<128x128xf32>, vector<64x128xf32> -> vector<64x128xf32>
    %c0_344 = arith.constant 0 : index
    %c128_345 = arith.constant 128 : index
    %274 = vector.load %arg43[%c0_344, %c128_345] : memref<64x512xf32, #tpu.memory_space<vmem>>, vector<64x128xf32>
    tpu.vector_store %arg43[%c0_344, %c128_345], %273 {strides = array<i32>} : memref<64x512xf32, #tpu.memory_space<vmem>>, vector<64x128xf32>,
    %c0_346 = arith.constant 0 : index
    %c128_347 = arith.constant 128 : index
    %275 = vector.load %arg43[%c0_346, %c128_347] : memref<64x512xf32, #tpu.memory_space<vmem>>, vector<16x128xf32>
    %c16_348 = arith.constant 16 : index
    %c127_349 = arith.constant 127 : index
    %276 = vector.load %arg43[%c16_348, %c127_349] : memref<64x512xf32, #tpu.memory_space<vmem>>, vector<16x128xf32>
    %277 = arith.addf %275, %276 : vector<16x128xf32>
    %c32_350 = arith.constant 32 : index
    %c118_351 = arith.constant 118 : index
    %278 = vector.load %arg43[%c32_350, %c118_351] : memref<64x512xf32, #tpu.memory_space<vmem>>, vector<16x128xf32>
    %279 = arith.addf %277, %278 : vector<16x128xf32>
    %c48_352 = arith.constant 48 : index
    %c117_353 = arith.constant 117 : index
    %280 = vector.load %arg43[%c48_352, %c117_353] : memref<64x512xf32, #tpu.memory_space<vmem>>, vector<16x128xf32>
    %281 = arith.addf %279, %280 : vector<16x128xf32>
    %c0_354 = arith.constant 0 : index
    %c128_355 = arith.constant 128 : index
    %282 = vector.load %arg4[%c0_354, %c128_355] : memref<1x256xf32, #tpu.memory_space<vmem>>, vector<1x128xf32>
    %c0_356 = arith.constant 0 : index
    %c0_357 = arith.constant 0 : index
    %283 = vector.load %arg19[%c0_356, %c0_357] : memref<16x1xf32, #tpu.memory_space<vmem>>, vector<16x1xf32>
    %284 = vector.broadcast %283 : vector<16x1xf32> to vector<16x128xf32>
    %285 = arith.addf %281, %284 : vector<16x128xf32>
    %286 = vector.broadcast %282 : vector<1x128xf32> to vector<16x128xf32>
    %287 = arith.mulf %285, %286 : vector<16x128xf32>
    %c0_358 = arith.constant 0 : index
    %c256_359 = arith.constant 256 : index
    %288 = vector.load %arg38[%c0_358, %c256_359] : memref<32x512xf32, #tpu.memory_space<vmem>>, vector<16x128xf32>
    tpu.vector_store %arg38[%c0_358, %c256_359], %287 {strides = array<i32>} : memref<32x512xf32, #tpu.memory_space<vmem>>, vector<16x128xf32>,
    %c0_360 = arith.constant 0 : index
    %c117_361 = arith.constant 117 : index
    %289 = vector.load %arg38[%c0_360, %c117_361] : memref<32x512xf32, #tpu.memory_space<vmem>>, vector<32x256xf32>
    %c0_362 = arith.constant 0 : index
    %c0_363 = arith.constant 0 : index
    %290 = vector.load %arg41[%c0_362, %c0_363] : memref<288x256xf32, #tpu.memory_space<vmem>>, vector<32x256xf32>
    tpu.vector_store %arg41[%c0_362, %c0_363], %289 {strides = array<i32>} : memref<288x256xf32, #tpu.memory_space<vmem>>, vector<32x256xf32>,
    %c0_364 = arith.constant 0 : index
    %c118_365 = arith.constant 118 : index
    %291 = vector.load %arg38[%c0_364, %c118_365] : memref<32x512xf32, #tpu.memory_space<vmem>>, vector<32x256xf32>
    %c32_366 = arith.constant 32 : index
    %c0_367 = arith.constant 0 : index
    %292 = vector.load %arg41[%c32_366, %c0_367] : memref<288x256xf32, #tpu.memory_space<vmem>>, vector<32x256xf32>
    tpu.vector_store %arg41[%c32_366, %c0_367], %291 {strides = array<i32>} : memref<288x256xf32, #tpu.memory_space<vmem>>, vector<32x256xf32>,
    %c0_368 = arith.constant 0 : index
    %c119_369 = arith.constant 119 : index
    %293 = vector.load %arg38[%c0_368, %c119_369] : memref<32x512xf32, #tpu.memory_space<vmem>>, vector<32x256xf32>
    %c64_370 = arith.constant 64 : index
    %c0_371 = arith.constant 0 : index
    %294 = vector.load %arg41[%c64_370, %c0_371] : memref<288x256xf32, #tpu.memory_space<vmem>>, vector<32x256xf32>
    tpu.vector_store %arg41[%c64_370, %c0_371], %293 {strides = array<i32>} : memref<288x256xf32, #tpu.memory_space<vmem>>, vector<32x256xf32>,
    %c0_372 = arith.constant 0 : index
    %c127_373 = arith.constant 127 : index
    %295 = vector.load %arg38[%c0_372, %c127_373] : memref<32x512xf32, #tpu.memory_space<vmem>>, vector<32x256xf32>
    %c96_374 = arith.constant 96 : index
    %c0_375 = arith.constant 0 : index
    %296 = vector.load %arg41[%c96_374, %c0_375] : memref<288x256xf32, #tpu.memory_space<vmem>>, vector<32x256xf32>
    tpu.vector_store %arg41[%c96_374, %c0_375], %295 {strides = array<i32>} : memref<288x256xf32, #tpu.memory_space<vmem>>, vector<32x256xf32>,
    %c0_376 = arith.constant 0 : index
    %c128_377 = arith.constant 128 : index
    %297 = vector.load %arg38[%c0_376, %c128_377] : memref<32x512xf32, #tpu.memory_space<vmem>>, vector<32x256xf32>
    %c128_378 = arith.constant 128 : index
    %c0_379 = arith.constant 0 : index
    %298 = vector.load %arg41[%c128_378, %c0_379] : memref<288x256xf32, #tpu.memory_space<vmem>>, vector<32x256xf32>
    tpu.vector_store %arg41[%c128_378, %c0_379], %297 {strides = array<i32>} : memref<288x256xf32, #tpu.memory_space<vmem>>, vector<32x256xf32>,
    %c0_380 = arith.constant 0 : index
    %c129_381 = arith.constant 129 : index
    %299 = vector.load %arg38[%c0_380, %c129_381] : memref<32x512xf32, #tpu.memory_space<vmem>>, vector<32x256xf32>
    %c160_382 = arith.constant 160 : index
    %c0_383 = arith.constant 0 : index
    %300 = vector.load %arg41[%c160_382, %c0_383] : memref<288x256xf32, #tpu.memory_space<vmem>>, vector<32x256xf32>
    tpu.vector_store %arg41[%c160_382, %c0_383], %299 {strides = array<i32>} : memref<288x256xf32, #tpu.memory_space<vmem>>, vector<32x256xf32>,
    %c0_384 = arith.constant 0 : index
    %c137_385 = arith.constant 137 : index
    %301 = vector.load %arg38[%c0_384, %c137_385] : memref<32x512xf32, #tpu.memory_space<vmem>>, vector<32x256xf32>
    %c192_386 = arith.constant 192 : index
    %c0_387 = arith.constant 0 : index
    %302 = vector.load %arg41[%c192_386, %c0_387] : memref<288x256xf32, #tpu.memory_space<vmem>>, vector<32x256xf32>
    tpu.vector_store %arg41[%c192_386, %c0_387], %301 {strides = array<i32>} : memref<288x256xf32, #tpu.memory_space<vmem>>, vector<32x256xf32>,
    %c0_388 = arith.constant 0 : index
    %c138_389 = arith.constant 138 : index
    %303 = vector.load %arg38[%c0_388, %c138_389] : memref<32x512xf32, #tpu.memory_space<vmem>>, vector<32x256xf32>
    %c224_390 = arith.constant 224 : index
    %c0_391 = arith.constant 0 : index
    %304 = vector.load %arg41[%c224_390, %c0_391] : memref<288x256xf32, #tpu.memory_space<vmem>>, vector<32x256xf32>
    tpu.vector_store %arg41[%c224_390, %c0_391], %303 {strides = array<i32>} : memref<288x256xf32, #tpu.memory_space<vmem>>, vector<32x256xf32>,
    %c0_392 = arith.constant 0 : index
    %c139_393 = arith.constant 139 : index
    %305 = vector.load %arg38[%c0_392, %c139_393] : memref<32x512xf32, #tpu.memory_space<vmem>>, vector<32x256xf32>
    %c256_394 = arith.constant 256 : index
    %c0_395 = arith.constant 0 : index
    %306 = vector.load %arg41[%c256_394, %c0_395] : memref<288x256xf32, #tpu.memory_space<vmem>>, vector<32x256xf32>
    tpu.vector_store %arg41[%c256_394, %c0_395], %305 {strides = array<i32>} : memref<288x256xf32, #tpu.memory_space<vmem>>, vector<32x256xf32>,
    %c0_396 = arith.constant 0 : index
    %c0_397 = arith.constant 0 : index
    %307 = vector.load %arg20[%c0_396, %c0_397] : memref<16x288xf32, #tpu.memory_space<vmem>>, vector<16x288xf32>
    %c0_398 = arith.constant 0 : index
    %c0_399 = arith.constant 0 : index
    %308 = vector.load %arg41[%c0_398, %c0_399] : memref<288x256xf32, #tpu.memory_space<vmem>>, vector<288x256xf32>
    %cst_400 = arith.constant dense<0.000000e+00> : vector<16x256xf32>
    %309 = tpu.matmul %307, %308, %cst_400 {dimension_numbers = #tpu.dot_dimension_numbers<[1], [0], [0], [1], [0, 0, 1, 1], [], []>} : vector<16x288xf32>, vector<288x256xf32>, vector<16x256xf32> -> vector<16x256xf32>
    %c0_401 = arith.constant 0 : index
    %c0_402 = arith.constant 0 : index
    %310 = vector.load %arg21[%c0_401, %c0_402] : memref<16x1xf32, #tpu.memory_space<vmem>>, vector<16x1xf32>
    %311 = vector.broadcast %310 : vector<16x1xf32> to vector<16x256xf32>
    %312 = arith.addf %309, %311 : vector<16x256xf32>
    %cst_403 = arith.constant 0.000000e+00 : f32
    %313 = vector.broadcast %cst_403 : f32 to vector<16x256xf32>
    %314 = arith.maximumf %312, %313 : vector<16x256xf32>
    %c0_404 = arith.constant 0 : index
    %c0_405 = arith.constant 0 : index
    %315 = vector.load %arg4[%c0_404, %c0_405] : memref<1x256xf32, #tpu.memory_space<vmem>>, vector<1x256xf32>
    %316 = vector.broadcast %315 : vector<1x256xf32> to vector<16x256xf32>
    %317 = arith.mulf %314, %316 : vector<16x256xf32>
    %c0_406 = arith.constant 0 : index
    %c128_407 = arith.constant 128 : index
    %318 = vector.load %arg38[%c0_406, %c128_407] : memref<32x512xf32, #tpu.memory_space<vmem>>, vector<16x256xf32>
    tpu.vector_store %arg38[%c0_406, %c128_407], %317 {strides = array<i32>} : memref<32x512xf32, #tpu.memory_space<vmem>>, vector<16x256xf32>,
    %c0_408 = arith.constant 0 : index
    %c117_409 = arith.constant 117 : index
    %319 = vector.load %arg38[%c0_408, %c117_409] : memref<32x512xf32, #tpu.memory_space<vmem>>, vector<16x256xf32>
    %c0_410 = arith.constant 0 : index
    %c0_411 = arith.constant 0 : index
    %320 = vector.load %arg41[%c0_410, %c0_411] : memref<288x256xf32, #tpu.memory_space<vmem>>, vector<16x256xf32>
    tpu.vector_store %arg41[%c0_410, %c0_411], %319 {strides = array<i32>} : memref<288x256xf32, #tpu.memory_space<vmem>>, vector<16x256xf32>,
    %c0_412 = arith.constant 0 : index
    %c118_413 = arith.constant 118 : index
    %321 = vector.load %arg38[%c0_412, %c118_413] : memref<32x512xf32, #tpu.memory_space<vmem>>, vector<16x256xf32>
    %c16_414 = arith.constant 16 : index
    %c0_415 = arith.constant 0 : index
    %322 = vector.load %arg41[%c16_414, %c0_415] : memref<288x256xf32, #tpu.memory_space<vmem>>, vector<16x256xf32>
    tpu.vector_store %arg41[%c16_414, %c0_415], %321 {strides = array<i32>} : memref<288x256xf32, #tpu.memory_space<vmem>>, vector<16x256xf32>,
    %c0_416 = arith.constant 0 : index
    %c119_417 = arith.constant 119 : index
    %323 = vector.load %arg38[%c0_416, %c119_417] : memref<32x512xf32, #tpu.memory_space<vmem>>, vector<16x256xf32>
    %c32_418 = arith.constant 32 : index
    %c0_419 = arith.constant 0 : index
    %324 = vector.load %arg41[%c32_418, %c0_419] : memref<288x256xf32, #tpu.memory_space<vmem>>, vector<16x256xf32>
    tpu.vector_store %arg41[%c32_418, %c0_419], %323 {strides = array<i32>} : memref<288x256xf32, #tpu.memory_space<vmem>>, vector<16x256xf32>,
    %c0_420 = arith.constant 0 : index
    %c127_421 = arith.constant 127 : index
    %325 = vector.load %arg38[%c0_420, %c127_421] : memref<32x512xf32, #tpu.memory_space<vmem>>, vector<16x256xf32>
    %c48_422 = arith.constant 48 : index
    %c0_423 = arith.constant 0 : index
    %326 = vector.load %arg41[%c48_422, %c0_423] : memref<288x256xf32, #tpu.memory_space<vmem>>, vector<16x256xf32>
    tpu.vector_store %arg41[%c48_422, %c0_423], %325 {strides = array<i32>} : memref<288x256xf32, #tpu.memory_space<vmem>>, vector<16x256xf32>,
    %c0_424 = arith.constant 0 : index
    %c128_425 = arith.constant 128 : index
    %327 = vector.load %arg38[%c0_424, %c128_425] : memref<32x512xf32, #tpu.memory_space<vmem>>, vector<16x256xf32>
    %c64_426 = arith.constant 64 : index
    %c0_427 = arith.constant 0 : index
    %328 = vector.load %arg41[%c64_426, %c0_427] : memref<288x256xf32, #tpu.memory_space<vmem>>, vector<16x256xf32>
    tpu.vector_store %arg41[%c64_426, %c0_427], %327 {strides = array<i32>} : memref<288x256xf32, #tpu.memory_space<vmem>>, vector<16x256xf32>,
    %c0_428 = arith.constant 0 : index
    %c129_429 = arith.constant 129 : index
    %329 = vector.load %arg38[%c0_428, %c129_429] : memref<32x512xf32, #tpu.memory_space<vmem>>, vector<16x256xf32>
    %c80_430 = arith.constant 80 : index
    %c0_431 = arith.constant 0 : index
    %330 = vector.load %arg41[%c80_430, %c0_431] : memref<288x256xf32, #tpu.memory_space<vmem>>, vector<16x256xf32>
    tpu.vector_store %arg41[%c80_430, %c0_431], %329 {strides = array<i32>} : memref<288x256xf32, #tpu.memory_space<vmem>>, vector<16x256xf32>,
    %c0_432 = arith.constant 0 : index
    %c137_433 = arith.constant 137 : index
    %331 = vector.load %arg38[%c0_432, %c137_433] : memref<32x512xf32, #tpu.memory_space<vmem>>, vector<16x256xf32>
    %c96_434 = arith.constant 96 : index
    %c0_435 = arith.constant 0 : index
    %332 = vector.load %arg41[%c96_434, %c0_435] : memref<288x256xf32, #tpu.memory_space<vmem>>, vector<16x256xf32>
    tpu.vector_store %arg41[%c96_434, %c0_435], %331 {strides = array<i32>} : memref<288x256xf32, #tpu.memory_space<vmem>>, vector<16x256xf32>,
    %c0_436 = arith.constant 0 : index
    %c138_437 = arith.constant 138 : index
    %333 = vector.load %arg38[%c0_436, %c138_437] : memref<32x512xf32, #tpu.memory_space<vmem>>, vector<16x256xf32>
    %c112_438 = arith.constant 112 : index
    %c0_439 = arith.constant 0 : index
    %334 = vector.load %arg41[%c112_438, %c0_439] : memref<288x256xf32, #tpu.memory_space<vmem>>, vector<16x256xf32>
    tpu.vector_store %arg41[%c112_438, %c0_439], %333 {strides = array<i32>} : memref<288x256xf32, #tpu.memory_space<vmem>>, vector<16x256xf32>,
    %c0_440 = arith.constant 0 : index
    %c139_441 = arith.constant 139 : index
    %335 = vector.load %arg38[%c0_440, %c139_441] : memref<32x512xf32, #tpu.memory_space<vmem>>, vector<16x256xf32>
    %c128_442 = arith.constant 128 : index
    %c0_443 = arith.constant 0 : index
    %336 = vector.load %arg41[%c128_442, %c0_443] : memref<288x256xf32, #tpu.memory_space<vmem>>, vector<16x256xf32>
    tpu.vector_store %arg41[%c128_442, %c0_443], %335 {strides = array<i32>} : memref<288x256xf32, #tpu.memory_space<vmem>>, vector<16x256xf32>,
    %c0_444 = arith.constant 0 : index
    %c0_445 = arith.constant 0 : index
    %337 = vector.load %arg22[%c0_444, %c0_445] : memref<16x144xf32, #tpu.memory_space<vmem>>, vector<16x144xf32>
    %c0_446 = arith.constant 0 : index
    %c0_447 = arith.constant 0 : index
    %338 = vector.load %arg41[%c0_446, %c0_447] : memref<288x256xf32, #tpu.memory_space<vmem>>, vector<144x256xf32>
    %cst_448 = arith.constant dense<0.000000e+00> : vector<16x256xf32>
    %339 = tpu.matmul %337, %338, %cst_448 {dimension_numbers = #tpu.dot_dimension_numbers<[1], [0], [0], [1], [0, 0, 1, 1], [], []>} : vector<16x144xf32>, vector<144x256xf32>, vector<16x256xf32> -> vector<16x256xf32>
    %c0_449 = arith.constant 0 : index
    %c0_450 = arith.constant 0 : index
    %340 = vector.load %arg23[%c0_449, %c0_450] : memref<16x1xf32, #tpu.memory_space<vmem>>, vector<16x1xf32>
    %341 = vector.broadcast %340 : vector<16x1xf32> to vector<16x256xf32>
    %342 = arith.addf %339, %341 : vector<16x256xf32>
    %cst_451 = arith.constant 0.000000e+00 : f32
    %343 = vector.broadcast %cst_451 : f32 to vector<16x256xf32>
    %344 = arith.maximumf %342, %343 : vector<16x256xf32>
    %c0_452 = arith.constant 0 : index
    %c0_453 = arith.constant 0 : index
    %345 = vector.load %arg4[%c0_452, %c0_453] : memref<1x256xf32, #tpu.memory_space<vmem>>, vector<1x256xf32>
    %346 = vector.broadcast %345 : vector<1x256xf32> to vector<16x256xf32>
    %347 = arith.mulf %344, %346 : vector<16x256xf32>
    %c0_454 = arith.constant 0 : index
    %c128_455 = arith.constant 128 : index
    %348 = vector.load %arg38[%c0_454, %c128_455] : memref<32x512xf32, #tpu.memory_space<vmem>>, vector<16x256xf32>
    tpu.vector_store %arg38[%c0_454, %c128_455], %347 {strides = array<i32>} : memref<32x512xf32, #tpu.memory_space<vmem>>, vector<16x256xf32>,
    %c0_456 = arith.constant 0 : index
    %c128_457 = arith.constant 128 : index
    %349 = vector.load %arg38[%c0_456, %c128_457] : memref<32x512xf32, #tpu.memory_space<vmem>>, vector<16x256xf32>
    %c0_458 = arith.constant 0 : index
    %c0_459 = arith.constant 0 : index
    %350 = vector.load %arg24[%c0_458, %c0_459] : memref<32x16xf32, #tpu.memory_space<vmem>>, vector<32x16xf32>
    %cst_460 = arith.constant dense<0.000000e+00> : vector<32x256xf32>
    %351 = tpu.matmul %350, %349, %cst_460 {dimension_numbers = #tpu.dot_dimension_numbers<[1], [0], [0], [1], [0, 0, 1, 1], [], []>} : vector<32x16xf32>, vector<16x256xf32>, vector<32x256xf32> -> vector<32x256xf32>
    %352 = vector.extract_strided_slice %351 {offsets = [0, 0], sizes = [32, 128], strides = [1, 1]} : vector<32x256xf32> to vector<32x128xf32>
    %c0_461 = arith.constant 0 : index
    %c0_462 = arith.constant 0 : index
    %353 = vector.load %arg35[%c0_461, %c0_462] : memref<128x384xf32, #tpu.memory_space<vmem>>, vector<128x384xf32>
    %cst_463 = arith.constant dense<0.000000e+00> : vector<32x384xf32>
    %354 = tpu.matmul %352, %353, %cst_463 {dimension_numbers = #tpu.dot_dimension_numbers<[1], [0], [0], [1], [0, 0, 1, 1], [], []>} : vector<32x128xf32>, vector<128x384xf32>, vector<32x384xf32> -> vector<32x384xf32>
    %c0_464 = arith.constant 0 : index
    %c128_465 = arith.constant 128 : index
    %355 = vector.load %arg43[%c0_464, %c128_465] : memref<64x512xf32, #tpu.memory_space<vmem>>, vector<32x384xf32>
    tpu.vector_store %arg43[%c0_464, %c128_465], %354 {strides = array<i32>} : memref<64x512xf32, #tpu.memory_space<vmem>>, vector<32x384xf32>,
    %c0_466 = arith.constant 0 : index
    %c128_467 = arith.constant 128 : index
    %356 = vector.load %arg43[%c0_466, %c128_467] : memref<64x512xf32, #tpu.memory_space<vmem>>, vector<8x384xf32>
    %c8_468 = arith.constant 8 : index
    %c127_469 = arith.constant 127 : index
    %357 = vector.load %arg43[%c8_468, %c127_469] : memref<64x512xf32, #tpu.memory_space<vmem>>, vector<8x384xf32>
    %358 = arith.addf %356, %357 : vector<8x384xf32>
    %c16_470 = arith.constant 16 : index
    %c110_471 = arith.constant 110 : index
    %359 = vector.load %arg43[%c16_470, %c110_471] : memref<64x512xf32, #tpu.memory_space<vmem>>, vector<8x384xf32>
    %360 = arith.addf %358, %359 : vector<8x384xf32>
    %c24_472 = arith.constant 24 : index
    %c109_473 = arith.constant 109 : index
    %361 = vector.load %arg43[%c24_472, %c109_473] : memref<64x512xf32, #tpu.memory_space<vmem>>, vector<8x384xf32>
    %362 = arith.addf %360, %361 : vector<8x384xf32>
    %c0_474 = arith.constant 0 : index
    %c0_475 = arith.constant 0 : index
    %363 = vector.load %arg3[%c0_474, %c0_475] : memref<1x768xf32, #tpu.memory_space<vmem>>, vector<1x384xf32>
    %c0_476 = arith.constant 0 : index
    %c0_477 = arith.constant 0 : index
    %364 = vector.load %arg25[%c0_476, %c0_477] : memref<8x1xf32, #tpu.memory_space<vmem>>, vector<8x1xf32>
    %365 = vector.broadcast %364 : vector<8x1xf32> to vector<8x384xf32>
    %366 = arith.addf %362, %365 : vector<8x384xf32>
    %367 = vector.broadcast %363 : vector<1x384xf32> to vector<8x384xf32>
    %368 = arith.mulf %366, %367 : vector<8x384xf32>
    %c0_478 = arith.constant 0 : index
    %c128_479 = arith.constant 128 : index
    %369 = vector.load %arg37[%c0_478, %c128_479] : memref<16x1024xf32, #tpu.memory_space<vmem>>, vector<8x384xf32>
    tpu.vector_store %arg37[%c0_478, %c128_479], %368 {strides = array<i32>} : memref<16x1024xf32, #tpu.memory_space<vmem>>, vector<8x384xf32>,
    %370 = vector.extract_strided_slice %351 {offsets = [0, 128], sizes = [32, 128], strides = [1, 1]} : vector<32x256xf32> to vector<32x128xf32>
    %c0_480 = arith.constant 0 : index
    %c0_481 = arith.constant 0 : index
    %371 = vector.load %arg35[%c0_480, %c0_481] : memref<128x384xf32, #tpu.memory_space<vmem>>, vector<128x384xf32>
    %cst_482 = arith.constant dense<0.000000e+00> : vector<32x384xf32>
    %372 = tpu.matmul %370, %371, %cst_482 {dimension_numbers = #tpu.dot_dimension_numbers<[1], [0], [0], [1], [0, 0, 1, 1], [], []>} : vector<32x128xf32>, vector<128x384xf32>, vector<32x384xf32> -> vector<32x384xf32>
    %c0_483 = arith.constant 0 : index
    %c128_484 = arith.constant 128 : index
    %373 = vector.load %arg43[%c0_483, %c128_484] : memref<64x512xf32, #tpu.memory_space<vmem>>, vector<32x384xf32>
    tpu.vector_store %arg43[%c0_483, %c128_484], %372 {strides = array<i32>} : memref<64x512xf32, #tpu.memory_space<vmem>>, vector<32x384xf32>,
    %c0_485 = arith.constant 0 : index
    %c128_486 = arith.constant 128 : index
    %374 = vector.load %arg43[%c0_485, %c128_486] : memref<64x512xf32, #tpu.memory_space<vmem>>, vector<8x384xf32>
    %c8_487 = arith.constant 8 : index
    %c127_488 = arith.constant 127 : index
    %375 = vector.load %arg43[%c8_487, %c127_488] : memref<64x512xf32, #tpu.memory_space<vmem>>, vector<8x384xf32>
    %376 = arith.addf %374, %375 : vector<8x384xf32>
    %c16_489 = arith.constant 16 : index
    %c110_490 = arith.constant 110 : index
    %377 = vector.load %arg43[%c16_489, %c110_490] : memref<64x512xf32, #tpu.memory_space<vmem>>, vector<8x384xf32>
    %378 = arith.addf %376, %377 : vector<8x384xf32>
    %c24_491 = arith.constant 24 : index
    %c109_492 = arith.constant 109 : index
    %379 = vector.load %arg43[%c24_491, %c109_492] : memref<64x512xf32, #tpu.memory_space<vmem>>, vector<8x384xf32>
    %380 = arith.addf %378, %379 : vector<8x384xf32>
    %c0_493 = arith.constant 0 : index
    %c384_494 = arith.constant 384 : index
    %381 = vector.load %arg3[%c0_493, %c384_494] : memref<1x768xf32, #tpu.memory_space<vmem>>, vector<1x384xf32>
    %c0_495 = arith.constant 0 : index
    %c0_496 = arith.constant 0 : index
    %382 = vector.load %arg25[%c0_495, %c0_496] : memref<8x1xf32, #tpu.memory_space<vmem>>, vector<8x1xf32>
    %383 = vector.broadcast %382 : vector<8x1xf32> to vector<8x384xf32>
    %384 = arith.addf %380, %383 : vector<8x384xf32>
    %385 = vector.broadcast %381 : vector<1x384xf32> to vector<8x384xf32>
    %386 = arith.mulf %384, %385 : vector<8x384xf32>
    %c0_497 = arith.constant 0 : index
    %c512 = arith.constant 512 : index
    %387 = vector.load %arg37[%c0_497, %c512] : memref<16x1024xf32, #tpu.memory_space<vmem>>, vector<8x384xf32>
    tpu.vector_store %arg37[%c0_497, %c512], %386 {strides = array<i32>} : memref<16x1024xf32, #tpu.memory_space<vmem>>, vector<8x384xf32>,
    %c0_498 = arith.constant 0 : index
    %c109_499 = arith.constant 109 : index
    %388 = vector.load %arg37[%c0_498, %c109_499] : memref<16x1024xf32, #tpu.memory_space<vmem>>, vector<16x768xf32>
    %c0_500 = arith.constant 0 : index
    %c0_501 = arith.constant 0 : index
    %389 = vector.load %arg40[%c0_500, %c0_501] : memref<144x768xf32, #tpu.memory_space<vmem>>, vector<16x768xf32>
    tpu.vector_store %arg40[%c0_500, %c0_501], %388 {strides = array<i32>} : memref<144x768xf32, #tpu.memory_space<vmem>>, vector<16x768xf32>,
    %c0_502 = arith.constant 0 : index
    %c110_503 = arith.constant 110 : index
    %390 = vector.load %arg37[%c0_502, %c110_503] : memref<16x1024xf32, #tpu.memory_space<vmem>>, vector<16x768xf32>
    %c16_504 = arith.constant 16 : index
    %c0_505 = arith.constant 0 : index
    %391 = vector.load %arg40[%c16_504, %c0_505] : memref<144x768xf32, #tpu.memory_space<vmem>>, vector<16x768xf32>
    tpu.vector_store %arg40[%c16_504, %c0_505], %390 {strides = array<i32>} : memref<144x768xf32, #tpu.memory_space<vmem>>, vector<16x768xf32>,
    %c0_506 = arith.constant 0 : index
    %c111_507 = arith.constant 111 : index
    %392 = vector.load %arg37[%c0_506, %c111_507] : memref<16x1024xf32, #tpu.memory_space<vmem>>, vector<16x768xf32>
    %c32_508 = arith.constant 32 : index
    %c0_509 = arith.constant 0 : index
    %393 = vector.load %arg40[%c32_508, %c0_509] : memref<144x768xf32, #tpu.memory_space<vmem>>, vector<16x768xf32>
    tpu.vector_store %arg40[%c32_508, %c0_509], %392 {strides = array<i32>} : memref<144x768xf32, #tpu.memory_space<vmem>>, vector<16x768xf32>,
    %c0_510 = arith.constant 0 : index
    %c127_511 = arith.constant 127 : index
    %394 = vector.load %arg37[%c0_510, %c127_511] : memref<16x1024xf32, #tpu.memory_space<vmem>>, vector<16x768xf32>
    %c48_512 = arith.constant 48 : index
    %c0_513 = arith.constant 0 : index
    %395 = vector.load %arg40[%c48_512, %c0_513] : memref<144x768xf32, #tpu.memory_space<vmem>>, vector<16x768xf32>
    tpu.vector_store %arg40[%c48_512, %c0_513], %394 {strides = array<i32>} : memref<144x768xf32, #tpu.memory_space<vmem>>, vector<16x768xf32>,
    %c0_514 = arith.constant 0 : index
    %c128_515 = arith.constant 128 : index
    %396 = vector.load %arg37[%c0_514, %c128_515] : memref<16x1024xf32, #tpu.memory_space<vmem>>, vector<16x768xf32>
    %c64_516 = arith.constant 64 : index
    %c0_517 = arith.constant 0 : index
    %397 = vector.load %arg40[%c64_516, %c0_517] : memref<144x768xf32, #tpu.memory_space<vmem>>, vector<16x768xf32>
    tpu.vector_store %arg40[%c64_516, %c0_517], %396 {strides = array<i32>} : memref<144x768xf32, #tpu.memory_space<vmem>>, vector<16x768xf32>,
    %c0_518 = arith.constant 0 : index
    %c129_519 = arith.constant 129 : index
    %398 = vector.load %arg37[%c0_518, %c129_519] : memref<16x1024xf32, #tpu.memory_space<vmem>>, vector<16x768xf32>
    %c80_520 = arith.constant 80 : index
    %c0_521 = arith.constant 0 : index
    %399 = vector.load %arg40[%c80_520, %c0_521] : memref<144x768xf32, #tpu.memory_space<vmem>>, vector<16x768xf32>
    tpu.vector_store %arg40[%c80_520, %c0_521], %398 {strides = array<i32>} : memref<144x768xf32, #tpu.memory_space<vmem>>, vector<16x768xf32>,
    %c0_522 = arith.constant 0 : index
    %c145_523 = arith.constant 145 : index
    %400 = vector.load %arg37[%c0_522, %c145_523] : memref<16x1024xf32, #tpu.memory_space<vmem>>, vector<16x768xf32>
    %c96_524 = arith.constant 96 : index
    %c0_525 = arith.constant 0 : index
    %401 = vector.load %arg40[%c96_524, %c0_525] : memref<144x768xf32, #tpu.memory_space<vmem>>, vector<16x768xf32>
    tpu.vector_store %arg40[%c96_524, %c0_525], %400 {strides = array<i32>} : memref<144x768xf32, #tpu.memory_space<vmem>>, vector<16x768xf32>,
    %c0_526 = arith.constant 0 : index
    %c146_527 = arith.constant 146 : index
    %402 = vector.load %arg37[%c0_526, %c146_527] : memref<16x1024xf32, #tpu.memory_space<vmem>>, vector<16x768xf32>
    %c112_528 = arith.constant 112 : index
    %c0_529 = arith.constant 0 : index
    %403 = vector.load %arg40[%c112_528, %c0_529] : memref<144x768xf32, #tpu.memory_space<vmem>>, vector<16x768xf32>
    tpu.vector_store %arg40[%c112_528, %c0_529], %402 {strides = array<i32>} : memref<144x768xf32, #tpu.memory_space<vmem>>, vector<16x768xf32>,
    %c0_530 = arith.constant 0 : index
    %c147_531 = arith.constant 147 : index
    %404 = vector.load %arg37[%c0_530, %c147_531] : memref<16x1024xf32, #tpu.memory_space<vmem>>, vector<16x768xf32>
    %c128_532 = arith.constant 128 : index
    %c0_533 = arith.constant 0 : index
    %405 = vector.load %arg40[%c128_532, %c0_533] : memref<144x768xf32, #tpu.memory_space<vmem>>, vector<16x768xf32>
    tpu.vector_store %arg40[%c128_532, %c0_533], %404 {strides = array<i32>} : memref<144x768xf32, #tpu.memory_space<vmem>>, vector<16x768xf32>,
    %c0_534 = arith.constant 0 : index
    %c0_535 = arith.constant 0 : index
    %406 = vector.load %arg26[%c0_534, %c0_535] : memref<8x144xf32, #tpu.memory_space<vmem>>, vector<8x144xf32>
    %c0_536 = arith.constant 0 : index
    %c0_537 = arith.constant 0 : index
    %407 = vector.load %arg40[%c0_536, %c0_537] : memref<144x768xf32, #tpu.memory_space<vmem>>, vector<144x768xf32>
    %cst_538 = arith.constant dense<0.000000e+00> : vector<8x768xf32>
    %408 = tpu.matmul %406, %407, %cst_538 {dimension_numbers = #tpu.dot_dimension_numbers<[1], [0], [0], [1], [0, 0, 1, 1], [], []>} : vector<8x144xf32>, vector<144x768xf32>, vector<8x768xf32> -> vector<8x768xf32>
    %c0_539 = arith.constant 0 : index
    %c0_540 = arith.constant 0 : index
    %409 = vector.load %arg27[%c0_539, %c0_540] : memref<8x1xf32, #tpu.memory_space<vmem>>, vector<8x1xf32>
    %410 = vector.broadcast %409 : vector<8x1xf32> to vector<8x768xf32>
    %411 = arith.addf %408, %410 : vector<8x768xf32>
    %cst_541 = arith.constant 0.000000e+00 : f32
    %412 = vector.broadcast %cst_541 : f32 to vector<8x768xf32>
    %413 = arith.maximumf %411, %412 : vector<8x768xf32>
    %c0_542 = arith.constant 0 : index
    %c0_543 = arith.constant 0 : index
    %414 = vector.load %arg3[%c0_542, %c0_543] : memref<1x768xf32, #tpu.memory_space<vmem>>, vector<1x768xf32>
    %415 = vector.broadcast %414 : vector<1x768xf32> to vector<8x768xf32>
    %416 = arith.mulf %413, %415 : vector<8x768xf32>
    %c0_544 = arith.constant 0 : index
    %c128_545 = arith.constant 128 : index
    %417 = vector.load %arg37[%c0_544, %c128_545] : memref<16x1024xf32, #tpu.memory_space<vmem>>, vector<8x768xf32>
    tpu.vector_store %arg37[%c0_544, %c128_545], %416 {strides = array<i32>} : memref<16x1024xf32, #tpu.memory_space<vmem>>, vector<8x768xf32>,
    %c0_546 = arith.constant 0 : index
    %c109_547 = arith.constant 109 : index
    %418 = vector.load %arg37[%c0_546, %c109_547] : memref<16x1024xf32, #tpu.memory_space<vmem>>, vector<8x768xf32>
    %c0_548 = arith.constant 0 : index
    %c0_549 = arith.constant 0 : index
    %419 = vector.load %arg40[%c0_548, %c0_549] : memref<144x768xf32, #tpu.memory_space<vmem>>, vector<8x768xf32>
    tpu.vector_store %arg40[%c0_548, %c0_549], %418 {strides = array<i32>} : memref<144x768xf32, #tpu.memory_space<vmem>>, vector<8x768xf32>,
    %c0_550 = arith.constant 0 : index
    %c110_551 = arith.constant 110 : index
    %420 = vector.load %arg37[%c0_550, %c110_551] : memref<16x1024xf32, #tpu.memory_space<vmem>>, vector<8x768xf32>
    %c8_552 = arith.constant 8 : index
    %c0_553 = arith.constant 0 : index
    %421 = vector.load %arg40[%c8_552, %c0_553] : memref<144x768xf32, #tpu.memory_space<vmem>>, vector<8x768xf32>
    tpu.vector_store %arg40[%c8_552, %c0_553], %420 {strides = array<i32>} : memref<144x768xf32, #tpu.memory_space<vmem>>, vector<8x768xf32>,
    %c0_554 = arith.constant 0 : index
    %c111_555 = arith.constant 111 : index
    %422 = vector.load %arg37[%c0_554, %c111_555] : memref<16x1024xf32, #tpu.memory_space<vmem>>, vector<8x768xf32>
    %c16_556 = arith.constant 16 : index
    %c0_557 = arith.constant 0 : index
    %423 = vector.load %arg40[%c16_556, %c0_557] : memref<144x768xf32, #tpu.memory_space<vmem>>, vector<8x768xf32>
    tpu.vector_store %arg40[%c16_556, %c0_557], %422 {strides = array<i32>} : memref<144x768xf32, #tpu.memory_space<vmem>>, vector<8x768xf32>,
    %c0_558 = arith.constant 0 : index
    %c127_559 = arith.constant 127 : index
    %424 = vector.load %arg37[%c0_558, %c127_559] : memref<16x1024xf32, #tpu.memory_space<vmem>>, vector<8x768xf32>
    %c24_560 = arith.constant 24 : index
    %c0_561 = arith.constant 0 : index
    %425 = vector.load %arg40[%c24_560, %c0_561] : memref<144x768xf32, #tpu.memory_space<vmem>>, vector<8x768xf32>
    tpu.vector_store %arg40[%c24_560, %c0_561], %424 {strides = array<i32>} : memref<144x768xf32, #tpu.memory_space<vmem>>, vector<8x768xf32>,
    %c0_562 = arith.constant 0 : index
    %c128_563 = arith.constant 128 : index
    %426 = vector.load %arg37[%c0_562, %c128_563] : memref<16x1024xf32, #tpu.memory_space<vmem>>, vector<8x768xf32>
    %c32_564 = arith.constant 32 : index
    %c0_565 = arith.constant 0 : index
    %427 = vector.load %arg40[%c32_564, %c0_565] : memref<144x768xf32, #tpu.memory_space<vmem>>, vector<8x768xf32>
    tpu.vector_store %arg40[%c32_564, %c0_565], %426 {strides = array<i32>} : memref<144x768xf32, #tpu.memory_space<vmem>>, vector<8x768xf32>,
    %c0_566 = arith.constant 0 : index
    %c129_567 = arith.constant 129 : index
    %428 = vector.load %arg37[%c0_566, %c129_567] : memref<16x1024xf32, #tpu.memory_space<vmem>>, vector<8x768xf32>
    %c40_568 = arith.constant 40 : index
    %c0_569 = arith.constant 0 : index
    %429 = vector.load %arg40[%c40_568, %c0_569] : memref<144x768xf32, #tpu.memory_space<vmem>>, vector<8x768xf32>
    tpu.vector_store %arg40[%c40_568, %c0_569], %428 {strides = array<i32>} : memref<144x768xf32, #tpu.memory_space<vmem>>, vector<8x768xf32>,
    %c0_570 = arith.constant 0 : index
    %c145_571 = arith.constant 145 : index
    %430 = vector.load %arg37[%c0_570, %c145_571] : memref<16x1024xf32, #tpu.memory_space<vmem>>, vector<8x768xf32>
    %c48_572 = arith.constant 48 : index
    %c0_573 = arith.constant 0 : index
    %431 = vector.load %arg40[%c48_572, %c0_573] : memref<144x768xf32, #tpu.memory_space<vmem>>, vector<8x768xf32>
    tpu.vector_store %arg40[%c48_572, %c0_573], %430 {strides = array<i32>} : memref<144x768xf32, #tpu.memory_space<vmem>>, vector<8x768xf32>,
    %c0_574 = arith.constant 0 : index
    %c146_575 = arith.constant 146 : index
    %432 = vector.load %arg37[%c0_574, %c146_575] : memref<16x1024xf32, #tpu.memory_space<vmem>>, vector<8x768xf32>
    %c56_576 = arith.constant 56 : index
    %c0_577 = arith.constant 0 : index
    %433 = vector.load %arg40[%c56_576, %c0_577] : memref<144x768xf32, #tpu.memory_space<vmem>>, vector<8x768xf32>
    tpu.vector_store %arg40[%c56_576, %c0_577], %432 {strides = array<i32>} : memref<144x768xf32, #tpu.memory_space<vmem>>, vector<8x768xf32>,
    %c0_578 = arith.constant 0 : index
    %c147_579 = arith.constant 147 : index
    %434 = vector.load %arg37[%c0_578, %c147_579] : memref<16x1024xf32, #tpu.memory_space<vmem>>, vector<8x768xf32>
    %c64_580 = arith.constant 64 : index
    %c0_581 = arith.constant 0 : index
    %435 = vector.load %arg40[%c64_580, %c0_581] : memref<144x768xf32, #tpu.memory_space<vmem>>, vector<8x768xf32>
    tpu.vector_store %arg40[%c64_580, %c0_581], %434 {strides = array<i32>} : memref<144x768xf32, #tpu.memory_space<vmem>>, vector<8x768xf32>,
    %c0_582 = arith.constant 0 : index
    %c0_583 = arith.constant 0 : index
    %436 = vector.load %arg28[%c0_582, %c0_583] : memref<8x72xf32, #tpu.memory_space<vmem>>, vector<8x72xf32>
    %c0_584 = arith.constant 0 : index
    %c0_585 = arith.constant 0 : index
    %437 = vector.load %arg40[%c0_584, %c0_585] : memref<144x768xf32, #tpu.memory_space<vmem>>, vector<72x768xf32>
    %cst_586 = arith.constant dense<0.000000e+00> : vector<8x768xf32>
    %438 = tpu.matmul %436, %437, %cst_586 {dimension_numbers = #tpu.dot_dimension_numbers<[1], [0], [0], [1], [0, 0, 1, 1], [], []>} : vector<8x72xf32>, vector<72x768xf32>, vector<8x768xf32> -> vector<8x768xf32>
    %c0_587 = arith.constant 0 : index
    %c0_588 = arith.constant 0 : index
    %439 = vector.load %arg29[%c0_587, %c0_588] : memref<8x1xf32, #tpu.memory_space<vmem>>, vector<8x1xf32>
    %440 = vector.broadcast %439 : vector<8x1xf32> to vector<8x768xf32>
    %441 = arith.addf %438, %440 : vector<8x768xf32>
    %cst_589 = arith.constant 0.000000e+00 : f32
    %442 = vector.broadcast %cst_589 : f32 to vector<8x768xf32>
    %443 = arith.maximumf %441, %442 : vector<8x768xf32>
    %c0_590 = arith.constant 0 : index
    %c0_591 = arith.constant 0 : index
    %444 = vector.load %arg3[%c0_590, %c0_591] : memref<1x768xf32, #tpu.memory_space<vmem>>, vector<1x768xf32>
    %445 = vector.broadcast %444 : vector<1x768xf32> to vector<8x768xf32>
    %446 = arith.mulf %443, %445 : vector<8x768xf32>
    %c0_592 = arith.constant 0 : index
    %c0_593 = arith.constant 0 : index
    %447 = vector.load %arg30[%c0_592, %c0_593] : memref<8x1xf32, #tpu.memory_space<vmem>>, vector<8x1xf32>
    %448 = vector.broadcast %447 : vector<8x1xf32> to vector<8x768xf32>
    %449 = arith.mulf %448, %446 : vector<8x768xf32>
    %cst_594 = arith.constant dense<0.000000e+00> : vector<768xf32>
    %450 = vector.multi_reduction <add>, %449, %cst_594 [0] : vector<8x768xf32> to vector<768xf32>
    %451 = vector.shape_cast %450 : vector<768xf32> to vector<1x768xf32>
    %c0_595 = arith.constant 0 : index
    %c0_596 = arith.constant 0 : index
    %452 = vector.load %arg31[%c0_595, %c0_596] : memref<1x1xf32, #tpu.memory_space<vmem>>, vector<1x1xf32>
    %453 = vector.broadcast %452 : vector<1x1xf32> to vector<1x768xf32>
    %454 = arith.addf %451, %453 : vector<1x768xf32>
    %cst_597 = arith.constant 0.000000e+00 : f32
    %455 = vector.broadcast %cst_597 : f32 to vector<1x768xf32>
    %456 = arith.subf %455, %454 : vector<1x768xf32>
    %457 = math.exp %456 : vector<1x768xf32>
    %cst_598 = arith.constant 1.000000e+00 : f32
    %458 = vector.broadcast %cst_598 : f32 to vector<1x768xf32>
    %459 = arith.addf %458, %457 : vector<1x768xf32>
    %cst_599 = arith.constant 1.000000e+00 : f32
    %460 = vector.broadcast %cst_599 : f32 to vector<1x768xf32>
    %461 = arith.divf %460, %459 : vector<1x768xf32>
    %c0_600 = arith.constant 0 : index
    %c0_601 = arith.constant 0 : index
    %462 = vector.load %arg36[%c0_600, %c0_601] : memref<1x768xf32, #tpu.memory_space<vmem>>, vector<1x768xf32>
    tpu.vector_store %arg36[%c0_600, %c0_601], %461 {strides = array<i32>} : memref<1x768xf32, #tpu.memory_space<vmem>>, vector<1x768xf32>,
    return
  }
}

</mosaic_0001>

<bundles_post_ra>
// kernel: unet_wrapper_forward.1
= control target key start
LH: loop header
LB: loop body
LE: loop exit
PB: predicated region body
PF: predicated region fallthrough
CT: control target
= control target key end

     0   :  { %v10460_v11 = vmov 0   ;;  %s10461_s6 = smov 1   ;;  %s10462_s10 = smov 2   ;;  %v14629_v14 = vlaneseq  ;;  %v14650_v54 = vmov 0.0   ;;  %vm14657_vm0 = vcmask 891904   ;;  %s14628_s0 = inlined_call_operand.smem [shape: u32[37], index: -1, kind: input, shape index: {}] }
   0x1   :  { %s1_s5 = sld [smem:[%s14628_s0]]   ;;  %10017 = vset.pattern.permute.xlu1 %v10460_v11  ;;  %10018 = vset.pattern.permute.xlu0 %v10460_v11  ;;  %s10463_s14 = smov 3   ;;  %vm618_vm1 = vcmask 900096   ;;  %vm14659_vm2 = vcmask 908288   ;;  %vm524_vm3 = vcmask 1039360   ;;  %vm465_vm4 = vcmask 7168  }
   0x2   :  { %s9357_s9 = sld [smem:[%s14628_s0 + %s10461_s6]]   ;;  %v10531_v15 = vshrl.u32 %v14629_v14, 7  ;;  %813 = vmatprep.mubr.f32.mxu0 %v14650_v54  ;;  %884 = vmatprep.mubr.f32.mxu1 %v14650_v54  ;;  %s10465_s18 = smov 17   ;;  %vm14658_vm5 = vcmask 138240   ;;  %vm14661_vm6 = vcmask 146432   ;;  %vm14660_vm7 = vcmask 154624  }
   0x3   :  { %s9358_s13 = sld [smem:[%s14628_s0 + %s10462_s10]]   ;;  %s10466_s19 = smov 19   ;;  %vm14656_vm8 = vcmask 588800   ;;  %vm10477_vm9 = vmmov 0   ;;  %vm2343_vm10 = vcmask 957440   ;;  %vm2324_vm11 = vcmask 965632  }
   0x4   :  { %s10528_s17 = sld [smem:[%s14628_s0 + %s10463_s14]]   ;;  %14682 = vst [vmem:[#allocation10_spill] sm:$0xff] %v10531_v15  ;;  %v10534_v16 = vsub.s32 0, %v10531_v15  ;;  %v10537_v17 = vsub.s32 1, %v10531_v15  ;;  %v10540_v18 = vsub.s32 2, %v10531_v15  ;;  %v10544_v20 = vsub.s32 3, %v10531_v15  ;;  %s10467_s20 = smov 109  }
   0x5   :  { %v10547_v22 = vsub.s32 4, %v10531_v15  ;;  %v10562_v28 = vsub.s32 5, %v10531_v15  ;;  %s10468_s21 = smov 18   ;;  %s10469_s22 = smov 110   ;;  %vm2305_vm12 = vcmask 973824   ;;  %vm2246_vm13 = vcmask 72704  }
   0x6   :  { %14683 = vst [vmem:[#allocation11_spill] sm:$0xff] %v10534_v16  ;;  %14684 = vst [vmem:[#allocation12_spill] sm:$0xff] %v10537_v17  ;;  %s10470_s23 = smov 111   ;;  %s10471_s24 = smov 127   ;;  %vm2227_vm14 = vcmask 80896   ;;  %vm2208_vm15 = vcmask 89088  }
   0x7   :  { %v180_v0 = vld [vmem:[%s1_s5] sm:$0xff]  ;;  %v181_v1 = vld [vmem:[%s1_s5 + $0x8] sm:$0xff]  ;;  %v182_v2 = vld [vmem:[%s1_s5 + $0x10] sm:$0xff]  ;;  %14685 = vst [vmem:[#allocation13_spill] sm:$0xff] %v10540_v18  ;;  %s10472_s25 = smov 7   ;;  %s10473_s29 = smov 6  }
   0x8   :  { %v187_v3 = vadd.f32 %v181_v1, %v180_v0  ;;  %v183_v4 = vld [vmem:[%s1_s5 + $0x18] sm:$0xff]  ;;  %v184_v6 = vld [vmem:[%s1_s5 + $0x20] sm:$0xff]  ;;  %v185_v8 = vld [vmem:[%s1_s5 + $0x28] sm:$0xff]  ;;  %14686 = vst [vmem:[#allocation14_spill] sm:$0xff] %v10544_v20  ;;  %s9363_s28 = sld [smem:[%s14628_s0 + %s10472_s25]]   ;;  %s10474_s3 = smov 9  }
   0x9   :  { %v260_v12 = vld [vmem:[%s9357_s9] sm:$0xff]  ;;  %14687 = vst [vmem:[#allocation15_spill] sm:$0xff] %v10547_v22  ;;  %14688 = vst [vmem:[#allocation16_spill] sm:$0xff] %v10562_v28  ;;  %s9362_s2 = sld [smem:[%s14628_s0 + %s10473_s29]]   ;;  %s10475_s8 = smov 8  }
   0xa   :  { %v188_v5 = vadd.f32 %v187_v3, %v182_v2  ;;  %263 = vperm.xlu1 %10017, %v260_v12   ;;  %v272_v13 = vld [vmem:[%s9358_s13] sm:$0xff]  ;;  %s9365_s7 = sld [smem:[%s14628_s0 + %s10474_s3]]   ;;  %s10476_s12 = smov 32  }
   0xb   :  { %v186_v19 = vld [vmem:[%s10528_s17] sm:$0x3f]  ;;  %s9364_s11 = sld [smem:[%s14628_s0 + %s10475_s8]]   ;;  %s10478_s16 = smov 118  }
   0xc   :  { %v189_v7 = vadd.f32 %v188_v5, %v183_v4  ;;  %v10550_v24 = vrot.slane %v186_v19, %v10534_v16  ;;  %v10553_v25 = vrot.slane %v186_v19, %v10537_v17  ;;  %v10556_v26 = vrot.slane %v186_v19, %v10540_v18  ;;  %s11145_s15 = sld [smem:[%s14628_s0 + %s10476_s12]]   ;;  %s10479_s26 = smov 117  }
   0xd   :  { %v10559_v27 = vrot.slane %v186_v19, %v10544_v20  ;;  %v10565_v33 = vrot.slane %v186_v19, %v10547_v22  ;;  %v10571_v38 = vrot.slane %v186_v19, %v10562_v28  ;;  %s10480_s27 = smov 119   ;;  %s10482_s30 = smov 11  }
   0xe   :  { %v190_v9 = vadd.f32 %v189_v7, %v184_v6  ;;  %275 = vperm.xlu1 %10017, %v272_v13   ;;  %s9367_s4 = sld [smem:[%s14628_s0 + %s10482_s30]]   ;;  %s10483_s9 = smov 4  }
   0xf   :  { %s11544_s12 = sld [smem:[%s14628_s0 + %s10483_s9]]   ;;  %s10484_s13 = smov 12  }
  0x10   :  { %v191_v10 = vadd.f32 %v190_v9, %v185_v8  ;;  %s11612_s1 = sld [smem:[%s14628_s0 + %s10484_s13]]   ;;  %s10487_s13 = smov 122  }
  0x11   :  { %s10488_s14 = smov 123   ;;  %s10496_s9 = smov 21  }
  0x12   :  { %192 = vadd.xlane.f32.xlu0 %v191_v10  ;;  %451 = vrot.lane.b32.xlu1 %v14650_v54, %s10461_s6 }
  0x16   :  { %357 = vrot.lane.b32.xlu1 %v14650_v54, %s10468_s21 }
  0x85   :  { %v264_v58 = vpop.permute.xlu1 %263 }
  0x9b   :  { %v193_v21 = vpop.xlane.xlu0 %192 }
  0x9c   :  { %v194_v23 = vmul.f32 0.001953125, %v193_v21 }
  0x9e   :  { %v195_v29 = vsub.f32 %v180_v0, %v194_v23  ;;  %v196_v30 = vsub.f32 %v181_v1, %v194_v23  ;;  %v197_v31 = vsub.f32 %v182_v2, %v194_v23  ;;  %v198_v32 = vsub.f32 %v183_v4, %v194_v23  ;;  %v276_v2 = vpop.permute.xlu1 %275 }
  0x9f   :  { %v199_v34 = vsub.f32 %v184_v6, %v194_v23  ;;  %v200_v39 = vsub.f32 %v185_v8, %v194_v23 }
  0xa0   :  { %v232_v35 = vmul.f32 %v10550_v24, %v195_v29  ;;  %v233_v36 = vmul.f32 %v10553_v25, %v196_v30  ;;  %v234_v37 = vmul.f32 %v10556_v26, %v197_v31  ;;  %v10574_v40 = vmul.f32 %v10559_v27, %v198_v32 }
  0xa1   :  { %v236_v43 = vmul.f32 %v10565_v33, %v199_v34  ;;  %v10578_v46 = vmul.f32 %v10571_v38, %v200_v39 }
  0xa2   :  { %v238_v41 = vmul.f32 %v232_v35, %v232_v35  ;;  %v239_v42 = vmul.f32 %v233_v36, %v233_v36  ;;  %v240_v44 = vmul.f32 %v234_v37, %v234_v37  ;;  %v241_v47 = vmul.f32 %v10574_v40, %v10574_v40 }
  0xa3   :  { %v242_v49 = vmul.f32 %v236_v43, %v236_v43  ;;  %v243_v51 = vmul.f32 %v10578_v46, %v10578_v46 }
  0xa4   :  { %v244_v45 = vadd.f32 %v239_v42, %v238_v41 }
  0xa6   :  { %v245_v48 = vadd.f32 %v244_v45, %v240_v44 }
  0xa8   :  { %v246_v50 = vadd.f32 %v245_v48, %v241_v47 }
  0xaa   :  { %v247_v52 = vadd.f32 %v246_v50, %v242_v49 }
  0xac   :  { %v248_v53 = vadd.f32 %v247_v52, %v243_v51 }
  0xae   :  { %249 = vadd.xlane.f32.xlu0 %v248_v53 }
  0xc4   :  { %404 = vrot.lane.b32.xlu0 %v14650_v54, %s10465_s18 }
  0xc8   :  { %310 = vrot.lane.b32.xlu0 %v14650_v54, %s10466_s19 }
  0xcc   :  { %663 = vrot.lane.b32.xlu0 %v14650_v54, %s10467_s20 }
  0xd0   :  { %616 = vrot.lane.b32.xlu0 %v14650_v54, %s10469_s22 }
  0xd4   :  { %569 = vrot.lane.b32.xlu0 %v14650_v54, %s10470_s23 }
  0xd8   :  { %522 = vrot.lane.b32.xlu0 %v14650_v54, %s10471_s24 }
 0x137   :  { %v250_v55 = vpop.xlane.xlu0 %249 }
 0x138   :  { %v251_v56 = vmul.f32 0.001953125, %v250_v55 }
 0x13a   :  { %v252_v57 = vadd.f32 1e-05, %v251_v56 }
 0x13b   :  { %v10702_v29 = vpop.permute.xlu0 %404 }
 0x13c   :  { %10434 = vrsqrt.f32 %v252_v57 }
 0x13f   :  { %v10710_v30 = vpop.permute.xlu0 %310 }
 0x143   :  { %v10716_v31 = vpop.permute.xlu0 %663 }
 0x147   :  { %v10722_v32 = vpop.permute.xlu0 %616 }
 0x149   :  { %v10435_v59 = vpop.eup %10434 }
 0x14a   :  { %v254_v60 = vmul.f32 %v10435_v59, %v232_v35  ;;  %v255_v61 = vmul.f32 %v10435_v59, %v233_v36  ;;  %v256_v62 = vmul.f32 %v10435_v59, %v234_v37  ;;  %v258_v8 = vmul.f32 %v10435_v59, %v236_v43  ;;  %v739_v37 = vld [vmem:[%s9363_s28] sm:$0xff]  ;;  %s10481_s28 = smov 10  }
 0x14b   :  { %v257_v12 = vmul.f32 %v10435_v59, %v10574_v40  ;;  %v10732_v34 = vpop.permute.xlu0 %569  ;;  %s9366_s8 = sld [smem:[%s14628_s0 + %s10481_s28]]  }
 0x14c   :  { %v266_v63 = vmul.f32 %v264_v58, %v254_v60  ;;  %v267_v0 = vmul.f32 %v264_v58, %v255_v61  ;;  %v268_v1 = vmul.f32 %v264_v58, %v256_v62  ;;  %v270_v10 = vmul.f32 %v264_v58, %v258_v8 }
 0x14d   :  { %v269_v19 = vmul.f32 %v264_v58, %v257_v12 }
 0x14e   :  { %v279_v3 = vadd.f32 %v276_v2, %v267_v0  ;;  %v280_v4 = vadd.f32 %v276_v2, %v268_v1  ;;  %v278_v5 = vadd.f32 %v276_v2, %v266_v63  ;;  %v282_v11 = vadd.f32 %v276_v2, %v270_v10 }
 0x14f   :  { %v281_v21 = vadd.f32 %v276_v2, %v269_v19  ;;  %v10740_v36 = vpop.permute.xlu0 %522 }
 0x150   :  { %v10603_v6 = vmul.f32 %v279_v3, %v10553_v25  ;;  %v10606_v7 = vmul.f32 %v280_v4, %v10556_v26  ;;  %v10613_v9 = vmul.f32 %v278_v5, %v10550_v24  ;;  %v10629_v13 = vmul.f32 %v282_v11, %v10565_v33  ;;  %v10730_v33 = vpop.permute.xlu1 %451 }
 0x151   :  { %v10644_v23 = vmul.f32 %v281_v21, %v10559_v27  ;;  %v259_v24 = vmul.f32 %v10435_v59, %v10578_v46 }
 0x152   :  { %655 = vrot.lane.b32.xlu1 %v10606_v7, %s10467_s20  ;;  %653 = vrot.lane.b32.xlu0 %v10603_v6, %s10467_s20 }
 0x153   :  { %v271_v25 = vmul.f32 %v264_v58, %v259_v24 }
 0x154   :  { %v10738_v35 = vpop.permute.xlu1 %357 }
 0x155   :  { %v283_v26 = vadd.f32 %v276_v2, %v271_v25 }
 0x156   :  { %561 = vrot.lane.b32.xlu0 %v10606_v7, %s10470_s23  ;;  %651 = vrot.lane.b32.xlu1 %v10613_v9, %s10467_s20 }
 0x157   :  { %v10684_v27 = vmul.f32 %v283_v26, %v10571_v38 }
 0x15a   :  { %512 = vrot.lane.b32.xlu0 %v10603_v6, %s10471_s24  ;;  %606 = vrot.lane.b32.xlu1 %v10603_v6, %s10469_s22 }
 0x15e   :  { %510 = vrot.lane.b32.xlu0 %v10613_v9, %s10471_s24  ;;  %608 = vrot.lane.b32.xlu1 %v10606_v7, %s10469_s22 }
 0x162   :  { %659 = vrot.lane.b32.xlu0 %v10629_v13, %s10467_s20  ;;  %604 = vrot.lane.b32.xlu1 %v10613_v9, %s10469_s22 }
 0x166   :  { %612 = vrot.lane.b32.xlu0 %v10629_v13, %s10469_s22  ;;  %559 = vrot.lane.b32.xlu1 %v10603_v6, %s10470_s23 }
 0x16a   :  { %455 = vrot.lane.b32.xlu0 %v10603_v6, %s10461_s6  ;;  %557 = vrot.lane.b32.xlu1 %v10613_v9, %s10470_s23 }
 0x16e   :  { %563 = vrot.lane.b32.xlu0 %v10644_v23, %s10470_s23  ;;  %514 = vrot.lane.b32.xlu1 %v10606_v7, %s10471_s24 }
 0x172   :  { %406 = vrot.lane.b32.xlu0 %v10613_v9, %s10465_s18  ;;  %657 = vrot.lane.b32.xlu1 %v10644_v23, %s10467_s20 }
 0x176   :  { %518 = vrot.lane.b32.xlu0 %v10629_v13, %s10471_s24  ;;  %610 = vrot.lane.b32.xlu1 %v10644_v23, %s10469_s22 }
 0x17a   :  { %361 = vrot.lane.b32.xlu0 %v10603_v6, %s10468_s21  ;;  %453 = vrot.lane.b32.xlu1 %v10613_v9, %s10461_s6 }
 0x17e   :  { %312 = vrot.lane.b32.xlu0 %v10613_v9, %s10466_s19  ;;  %565 = vrot.lane.b32.xlu1 %v10629_v13, %s10470_s23 }
 0x182   :  { %459 = vrot.lane.b32.xlu0 %v10644_v23, %s10461_s6  ;;  %408 = vrot.lane.b32.xlu1 %v10603_v6, %s10465_s18 }
 0x186   :  { %412 = vrot.lane.b32.xlu0 %v10644_v23, %s10465_s18  ;;  %516 = vrot.lane.b32.xlu1 %v10644_v23, %s10471_s24 }
 0x18a   :  { %365 = vrot.lane.b32.xlu0 %v10644_v23, %s10468_s21  ;;  %359 = vrot.lane.b32.xlu1 %v10613_v9, %s10468_s21 }
 0x18e   :  { %318 = vrot.lane.b32.xlu0 %v10644_v23, %s10466_s19  ;;  %314 = vrot.lane.b32.xlu1 %v10603_v6, %s10466_s19 }
 0x192   :  { %463 = vrot.lane.b32.xlu0 %v10684_v27, %s10461_s6  ;;  %457 = vrot.lane.b32.xlu1 %v10606_v7, %s10461_s6 }
 0x196   :  { %416 = vrot.lane.b32.xlu0 %v10684_v27, %s10465_s18  ;;  %661 = vrot.lane.b32.xlu1 %v10684_v27, %s10467_s20 }
 0x19a   :  { %369 = vrot.lane.b32.xlu0 %v10684_v27, %s10468_s21  ;;  %410 = vrot.lane.b32.xlu1 %v10606_v7, %s10465_s18 }
 0x19e   :  { %322 = vrot.lane.b32.xlu0 %v10684_v27, %s10466_s19  ;;  %614 = vrot.lane.b32.xlu1 %v10684_v27, %s10469_s22 }
 0x1a2   :  { %363 = vrot.lane.b32.xlu1 %v10606_v7, %s10468_s21  ;;  %1164 = vrot.lane.b32.xlu0 %v14650_v54, %s10461_s6 }
 0x1a6   :  { %567 = vrot.lane.b32.xlu1 %v10684_v27, %s10470_s23  ;;  %1072 = vrot.lane.b32.xlu0 %v14650_v54, %s10468_s21 }
 0x1aa   :  { %316 = vrot.lane.b32.xlu1 %v10606_v7, %s10466_s19 }
 0x1ae   :  { %520 = vrot.lane.b32.xlu1 %v10684_v27, %s10471_s24 }
 0x1b2   :  { %461 = vrot.lane.b32.xlu1 %v10629_v13, %s10461_s6 }
 0x1b6   :  { %414 = vrot.lane.b32.xlu1 %v10629_v13, %s10465_s18 }
 0x1ba   :  { %367 = vrot.lane.b32.xlu1 %v10629_v13, %s10468_s21 }
 0x1be   :  { %320 = vrot.lane.b32.xlu1 %v10629_v13, %s10466_s19 }
 0x1c2   :  { %742 = vperm.xlu1 %10017, %v739_v37  }
 0x1c4   :  { %v656_v38 = vpop.permute.xlu1 %655  ;;  %v654_v39 = vpop.permute.xlu0 %653 }
 0x1c5   :  { %v667_v40 = vsel %vm14657_vm0, %v654_v39, %v656_v38 }
 0x1c6   :  { %763 = vmatprep.subr.mxu0 %v667_v40  ;;  %1118 = vrot.lane.b32.xlu1 %v14650_v54, %s10465_s18 }
 0x1c8   :  { %v652_v41 = vpop.permute.xlu1 %651  ;;  %v562_v42 = vpop.permute.xlu0 %561 }
 0x1c9   :  { %v666_v43 = vsel %vm14657_vm0, %v652_v41, %v654_v39 }
 0x1ca   :  { %764 = vmatpush1.msra.mxu0 %v666_v43  ;;  %1026 = vrot.lane.b32.xlu1 %v14650_v54, %s10466_s19 }
 0x1cc   :  { %v607_v44 = vpop.permute.xlu1 %606  ;;  %v513_v45 = vpop.permute.xlu0 %512 }
 0x1ce   :  { %1372 = vrot.lane.b32.xlu1 %v14650_v54, %s10467_s20 }
 0x1d0   :  { %v609_v46 = vpop.permute.xlu1 %608  ;;  %v511_v47 = vpop.permute.xlu0 %510 }
 0x1d1   :  { %v620_v48 = vsel %vm618_vm1, %v607_v44, %v609_v46  ;;  %v525_v61 = vsel %vm524_vm3, %v511_v47, %v513_v45 }
 0x1d2   :  { %765 = vmatprep.subr.mxu0 %v620_v48  ;;  %1326 = vrot.lane.b32.xlu1 %v14650_v54, %s10469_s22 }
 0x1d4   :  { %v605_v49 = vpop.permute.xlu1 %604  ;;  %v10753_v50 = vpop.permute.xlu0 %659 }
 0x1d5   :  { %v619_v51 = vsel %vm618_vm1, %v605_v49, %v607_v44  ;;  %v10803_v44 = vld [vmem:[%s9362_s2] sm:$0xff]  ;;  %s10485_s2 = smov 13  }
 0x1d6   :  { %766 = vmatpush1.msra.mxu0 %v619_v51  ;;  %1280 = vrot.lane.b32.xlu1 %v14650_v54, %s10470_s23 }
 0x1d8   :  { %v560_v52 = vpop.permute.xlu1 %559  ;;  %v10759_v55 = vpop.permute.xlu0 %612 }
 0x1d9   :  { %v573_v53 = vsel %vm14659_vm2, %v560_v52, %v562_v42 }
 0x1da   :  { %767 = vmatprep.subr.mxu0 %v573_v53  ;;  %1234 = vrot.lane.b32.xlu1 %v14650_v54, %s10471_s24 }
 0x1dc   :  { %v558_v56 = vpop.permute.xlu1 %557  ;;  %v10764_v58 = vpop.permute.xlu0 %455 }
 0x1dd   :  { %v572_v57 = vsel %vm14659_vm2, %v558_v56, %v560_v52 }
 0x1de   :  { %768 = vmatpush1.msra.mxu0 %v572_v57 }
 0x1e0   :  { %v515_v59 = vpop.permute.xlu1 %514  ;;  %v564_v1 = vpop.permute.xlu0 %563 }
 0x1e1   :  { %v526_v60 = vsel %vm524_vm3, %v513_v45, %v515_v59  ;;  %v574_v19 = vsel %vm14659_vm2, %v562_v42, %v564_v1 }
 0x1e2   :  { %769 = vmatprep.subr.mxu0 %v526_v60 }
 0x1e3   :  { %770 = vmatpush1.msra.mxu0 %v525_v61 }
 0x1e4   :  { %v658_v62 = vpop.permute.xlu1 %657  ;;  %771 = vmatprep.subr.mxu0 %v10603_v6  ;;  %v407_v5 = vpop.permute.xlu0 %406 }
 0x1e5   :  { %772 = vmatpush1.msra.mxu0 %v10613_v9  ;;  %v669_v63 = vsel %vm14657_vm0, %v658_v62, %v10753_v50  ;;  %v668_v0 = vsel %vm14657_vm0, %v656_v38, %v658_v62  ;;  %v419_v25 = vsel %vm14658_vm5, %v10702_v29, %v407_v5 }
 0x1e6   :  { %834 = vmatprep.subr.mxu1 %v669_v63 }
 0x1e7   :  { %835 = vmatpush1.msra.mxu1 %v668_v0 }
 0x1e8   :  { %v611_v2 = vpop.permute.xlu1 %610  ;;  %v10784_v12 = vpop.permute.xlu0 %518 }
 0x1e9   :  { %v622_v3 = vsel %vm618_vm1, %v611_v2, %v10759_v55  ;;  %v621_v4 = vsel %vm618_vm1, %v609_v46, %v611_v2 }
 0x1ea   :  { %836 = vmatprep.subr.mxu1 %v622_v3 }
 0x1eb   :  { %837 = vmatpush1.msra.mxu1 %v621_v4 }
 0x1ec   :  { %v454_v6 = vpop.permute.xlu1 %453  ;;  %v362_v26 = vpop.permute.xlu0 %361 }
 0x1ed   :  { %v467_v8 = vsel %vm465_vm4, %v454_v6, %v10764_v58  ;;  %v466_v9 = vsel %vm465_vm4, %v10730_v33, %v454_v6 }
 0x1ee   :  { %773 = vmatprep.subr.mxu0 %v467_v8 }
 0x1ef   :  { %774 = vmatpush1.msra.mxu0 %v466_v9 }
 0x1f0   :  { %v10780_v10 = vpop.permute.xlu1 %565  ;;  %v313_v41 = vpop.permute.xlu0 %312 }
 0x1f1   :  { %v575_v11 = vsel %vm14659_vm2, %v564_v1, %v10780_v10 }
 0x1f2   :  { %838 = vmatprep.subr.mxu1 %v575_v11 }
 0x1f3   :  { %839 = vmatpush1.msra.mxu1 %v574_v19 }
 0x1f4   :  { %v409_v21 = vpop.permute.xlu1 %408 }
 0x1f5   :  { %v420_v24 = vsel %vm14658_vm5, %v407_v5, %v409_v21 }
 0x1f6   :  { %775 = vmatprep.subr.mxu0 %v420_v24 }
 0x1f7   :  { %776 = vmatpush1.msra.mxu0 %v419_v25 }
 0x1f8   :  { %v517_v33 = vpop.permute.xlu1 %516 }
 0x1f9   :  { %v528_v37 = vsel %vm524_vm3, %v517_v33, %v10784_v12  ;;  %v527_v38 = vsel %vm524_vm3, %v515_v59, %v517_v33  ;;  %v10852_v33 = vld [vmem:[%s10528_s17] sm:$0x3f] }
 0x1fa   :  { %840 = vmatprep.subr.mxu1 %v528_v37 }
 0x1fb   :  { %841 = vmatpush1.msra.mxu1 %v527_v38 }
 0x1fc   :  { %v360_v39 = vpop.permute.xlu1 %359  ;;  %842 = vmatprep.subr.mxu1 %v10644_v23  ;;  %v325_v23 = vsel %vm14660_vm7, %v10710_v30, %v313_v41 }
 0x1fd   :  { %843 = vmatpush1.msra.mxu1 %v10606_v7  ;;  %v373_v29 = vsel %vm14661_vm6, %v360_v39, %v362_v26  ;;  %v372_v40 = vsel %vm14661_vm6, %v10738_v35, %v360_v39  ;;  %v460_v7 = vpop.permute.xlu0 %459 }
 0x1fe   :  { %777 = vmatprep.subr.mxu0 %v373_v29  ;;  %v973_v29 = vrot.slane %v10852_v33, %v10534_v16 }
 0x1ff   :  { %778 = vmatpush1.msra.mxu0 %v372_v40 }
 0x200   :  { %v315_v42 = vpop.permute.xlu1 %314 }
 0x201   :  { %v326_v43 = vsel %vm14660_vm7, %v313_v41, %v315_v42  ;;  %v413_v49 = vpop.permute.xlu0 %412 }
 0x202   :  { %779 = vmatprep.subr.mxu0 %v326_v43 }
 0x203   :  { %780 = vmatpush1.msra.mxu0 %v325_v23 }
 0x204   :  { %v458_v45 = vpop.permute.xlu1 %457  ;;  %9393 = vmatmul.mubr.msk.f32.vlgmr.msra.gmra.mxu0 %vm14656_vm8, %v10803_v44 }
 0x205   :  { %v469_v35 = vsel %vm465_vm4, %v458_v45, %v460_v7  ;;  %v468_v46 = vsel %vm465_vm4, %v10764_v58, %v458_v45  ;;  %955 = vmatprep.mubr.f32.mxu0 %v14650_v54  ;;  %v366_v58 = vpop.permute.xlu0 %365 }
 0x206   :  { %844 = vmatprep.subr.mxu1 %v469_v35 }
 0x207   :  { %845 = vmatpush1.msra.mxu1 %v468_v46 }
 0x208   :  { %v662_v47 = vpop.permute.xlu1 %661 }
 0x209   :  { %v671_v48 = vsel %vm14657_vm0, %v662_v47, %v10716_v31  ;;  %v670_v30 = vsel %vm14657_vm0, %v10753_v50, %v662_v47  ;;  %v319_v61 = vpop.permute.xlu0 %318  ;;  %v977_v47 = vrot.slane %v10852_v33, %v10537_v17 }
 0x20a   :  { %905 = vmatprep.subr.mxu0 %v671_v48 }
 0x20b   :  { %906 = vmatpush1.msra.mxu0 %v670_v30 }
 0x20c   :  { %v411_v51 = vpop.permute.xlu1 %410 }
 0x20d   :  { %v422_v52 = vsel %vm14658_vm5, %v411_v51, %v413_v49  ;;  %v421_v53 = vsel %vm14658_vm5, %v409_v21, %v411_v51  ;;  %v464_v2 = vpop.permute.xlu0 %463 }
 0x20e   :  { %846 = vmatprep.subr.mxu1 %v422_v52  ;;  %v985_v52 = vrot.slane %v10852_v33, %v10544_v20 }
 0x20f   :  { %847 = vmatpush1.msra.mxu1 %v421_v53 }
 0x210   :  { %v615_v56 = vpop.permute.xlu1 %614 }
 0x211   :  { %v624_v57 = vsel %vm618_vm1, %v615_v56, %v10722_v32  ;;  %v623_v31 = vsel %vm618_vm1, %v10759_v55, %v615_v56  ;;  %v417_v5 = vpop.permute.xlu0 %416 }
 0x212   :  { %907 = vmatprep.subr.mxu0 %v624_v57 }
 0x213   :  { %908 = vmatpush1.msra.mxu0 %v623_v31 }
 0x214   :  { %v364_v50 = vpop.permute.xlu1 %363 }
 0x215   :  { %v375_v59 = vsel %vm14661_vm6, %v364_v50, %v366_v58  ;;  %v374_v60 = vsel %vm14661_vm6, %v362_v26, %v364_v50 }
 0x216   :  { %848 = vmatprep.subr.mxu1 %v375_v59 }
 0x217   :  { %849 = vmatpush1.msra.mxu1 %v374_v60 }
 0x218   :  { %v568_v62 = vpop.permute.xlu1 %567 }
 0x219   :  { %v577_v63 = vsel %vm14659_vm2, %v568_v62, %v10732_v34  ;;  %v576_v32 = vsel %vm14659_vm2, %v10780_v10, %v568_v62  ;;  %v993_v62 = vrot.slane %v10852_v33, %v10562_v28 }
 0x21a   :  { %909 = vmatprep.subr.mxu0 %v577_v63 }
 0x21b   :  { %910 = vmatpush1.msra.mxu0 %v576_v32 }
 0x21c   :  { %v317_v55 = vpop.permute.xlu1 %316 }
 0x21d   :  { %v328_v0 = vsel %vm14660_vm7, %v317_v55, %v319_v61  ;;  %v327_v1 = vsel %vm14660_vm7, %v315_v42, %v317_v55 }
 0x21e   :  { %850 = vmatprep.subr.mxu1 %v328_v0 }
 0x21f   :  { %851 = vmatpush1.msra.mxu1 %v327_v1 }
 0x220   :  { %v521_v3 = vpop.permute.xlu1 %520  ;;  %9394 = vmatmul.mubr.msk.f32.vlgmr.msra.gmra.mxu1 %vm14656_vm8, %v10803_v44 }
 0x221   :  { %v530_v34 = vsel %vm524_vm3, %v521_v3, %v10740_v36  ;;  %v529_v4 = vsel %vm524_vm3, %v10784_v12, %v521_v3  ;;  %1520 = vmatprep.mubr.f32.mxu1 %v14650_v54  ;;  %v370_v12 = vpop.permute.xlu0 %369 }
 0x222   :  { %911 = vmatprep.subr.mxu0 %v530_v34 }
 0x223   :  { %912 = vmatpush1.msra.mxu0 %v529_v4 }
 0x224   :  { %v462_v6 = vpop.permute.xlu1 %461  ;;  %913 = vmatprep.subr.mxu0 %v10684_v27 }
 0x225   :  { %914 = vmatpush1.msra.mxu0 %v10629_v13  ;;  %v471_v8 = vsel %vm465_vm4, %v462_v6, %v464_v2  ;;  %v470_v9 = vsel %vm465_vm4, %v460_v7, %v462_v6  ;;  %v323_v21 = vpop.permute.xlu0 %322  ;;  %v1447_v2 = vld [vmem:[%s9365_s7] sm:$0xff]  ;;  %s9369_s7 = sld [smem:[%s14628_s0 + %s10485_s2]]   ;;  %s10491_s2 = smov 14  }
 0x226   :  { %915 = vmatprep.subr.mxu0 %v471_v8 }
 0x227   :  { %916 = vmatpush1.msra.mxu0 %v470_v9 }
 0x228   :  { %v415_v36 = vpop.permute.xlu1 %414 }
 0x229   :  { %v424_v10 = vsel %vm14658_vm5, %v415_v36, %v417_v5  ;;  %v423_v11 = vsel %vm14658_vm5, %v413_v49, %v415_v36  ;;  %v1165_v3 = vpop.permute.xlu0 %1164 }
 0x22a   :  { %917 = vmatprep.subr.mxu0 %v424_v10 }
 0x22b   :  { %918 = vmatpush1.msra.mxu0 %v423_v11 }
 0x22c   :  { %v368_v19 = vpop.permute.xlu1 %367 }
 0x22d   :  { %v377_v27 = vsel %vm14661_vm6, %v368_v19, %v370_v12  ;;  %v376_v13 = vsel %vm14661_vm6, %v366_v58, %v368_v19  ;;  %v989_v58 = vrot.slane %v10852_v33, %v10547_v22  ;;  %v1073_v4 = vpop.permute.xlu0 %1072 }
 0x22e   :  { %919 = vmatprep.subr.mxu0 %v377_v27 }
 0x22f   :  { %920 = vmatpush1.msra.mxu0 %v376_v13 }
 0x230   :  { %v321_v24 = vpop.permute.xlu1 %320 }
 0x231   :  { %v330_v25 = vsel %vm14660_vm7, %v321_v24, %v323_v21  ;;  %v329_v26 = vsel %vm14660_vm7, %v319_v61, %v321_v24 }
 0x232   :  { %921 = vmatprep.subr.mxu0 %v330_v25 }
 0x233   :  { %922 = vmatpush1.msra.mxu0 %v329_v26 }
 0x234   :  { %9395 = vmatmul.mubr.msk.f32.vlgmr.msra.gmra.mxu0 %vm14656_vm8, %v10803_v44  ;;  %v981_v44 = vrot.slane %v10852_v33, %v10540_v18 }
 0x235   :  { %1591 = vmatprep.mubr.f32.mxu0 %v14650_v54 }
 0x23d   :  { %v743_v37 = vpop.permute.xlu1 %742 }
 0x241   :  { %v10960_v32 = vpop.permute.xlu1 %1118 }
 0x245   :  { %v10970_v55 = vpop.permute.xlu1 %1026 }
 0x249   :  { %v10978_v0 = vpop.permute.xlu1 %1372 }
 0x24d   :  { %v10984_v1 = vpop.permute.xlu1 %1326 }
 0x251   :  { %v10986_v34 = vpop.permute.xlu1 %1280 }
 0x255   :  { %v10988_v5 = vpop.permute.xlu1 %1234 }
 0x2c4   :  { %v815_v38 = vpop.f32.mrf.mxu0 }
 0x2c5   :  { %v816_v39 = vadd.f32 %v815_v38, %v743_v37 }
 0x2c6   :  { %v817_v45 = vpop.f32.mrf.mxu0 }
 0x2c7   :  { %v962_v40 = vmax.f32 %v816_v39, 0.0  ;;  %v818_v35 = vadd.f32 %v817_v45, %v743_v37 }
 0x2c9   :  { %v10856_v41 = vmul.f32 %v973_v29, %v962_v40  ;;  %v963_v46 = vmax.f32 %v818_v35, 0.0 }
 0x2cb   :  { %1360 = vrot.lane.b32.xlu0 %v10856_v41, %s10467_s20  ;;  %v10890_v48 = vmul.f32 %v977_v47, %v963_v46 }
 0x2e0   :  { %v886_v42 = vpop.f32.mrf.mxu1 }
 0x2e1   :  { %v887_v43 = vadd.f32 %v886_v42, %v743_v37 }
 0x2e2   :  { %v888_v30 = vpop.f32.mrf.mxu1 }
 0x2e3   :  { %v964_v23 = vmax.f32 %v887_v43, 0.0  ;;  %v889_v49 = vadd.f32 %v888_v30, %v743_v37 }
 0x2e5   :  { %v10862_v7 = vmul.f32 %v981_v44, %v964_v23  ;;  %v965_v51 = vmax.f32 %v889_v49, 0.0 }
 0x2e7   :  { %1318 = vrot.lane.b32.xlu0 %v10862_v7, %s10469_s22  ;;  %1364 = vrot.lane.b32.xlu1 %v10862_v7, %s10467_s20  ;;  %v10906_v53 = vmul.f32 %v985_v52, %v965_v51 }
 0x2eb   :  { %1268 = vrot.lane.b32.xlu0 %v10856_v41, %s10470_s23  ;;  %1314 = vrot.lane.b32.xlu1 %v10856_v41, %s10469_s22 }
 0x2ef   :  { %1226 = vrot.lane.b32.xlu0 %v10862_v7, %s10471_s24  ;;  %1272 = vrot.lane.b32.xlu1 %v10862_v7, %s10470_s23 }
 0x2f3   :  { %1166 = vrot.lane.b32.xlu0 %v10856_v41, %s10461_s6  ;;  %1222 = vrot.lane.b32.xlu1 %v10856_v41, %s10471_s24 }
 0x2f4   :  { %v957_v56 = vpop.f32.mrf.mxu0 }
 0x2f5   :  { %v958_v57 = vadd.f32 %v957_v56, %v743_v37 }
 0x2f6   :  { %v959_v59 = vpop.f32.mrf.mxu0 }
 0x2f7   :  { %1074 = vrot.lane.b32.xlu0 %v10856_v41, %s10468_s21  ;;  %1120 = vrot.lane.b32.xlu1 %v10856_v41, %s10465_s18  ;;  %v966_v31 = vmax.f32 %v958_v57, 0.0  ;;  %v960_v60 = vadd.f32 %v959_v59, %v743_v37 }
 0x2f9   :  { %v10934_v50 = vmul.f32 %v989_v58, %v966_v31  ;;  %v967_v61 = vmax.f32 %v960_v60, 0.0 }
 0x2fb   :  { %1170 = vrot.lane.b32.xlu0 %v10862_v7, %s10461_s6  ;;  %1028 = vrot.lane.b32.xlu1 %v10856_v41, %s10466_s19  ;;  %v10950_v63 = vmul.f32 %v993_v62, %v967_v61 }
 0x2ff   :  { %1124 = vrot.lane.b32.xlu0 %v10862_v7, %s10465_s18  ;;  %1316 = vrot.lane.b32.xlu1 %v10890_v48, %s10469_s22 }
 0x303   :  { %1078 = vrot.lane.b32.xlu0 %v10862_v7, %s10468_s21  ;;  %1224 = vrot.lane.b32.xlu1 %v10890_v48, %s10471_s24 }
 0x307   :  { %1032 = vrot.lane.b32.xlu0 %v10862_v7, %s10466_s19  ;;  %1168 = vrot.lane.b32.xlu1 %v10890_v48, %s10461_s6 }
 0x30b   :  { %1362 = vrot.lane.b32.xlu0 %v10890_v48, %s10467_s20  ;;  %1366 = vrot.lane.b32.xlu1 %v10906_v53, %s10467_s20 }
 0x30f   :  { %1270 = vrot.lane.b32.xlu0 %v10890_v48, %s10470_s23  ;;  %1076 = vrot.lane.b32.xlu1 %v10890_v48, %s10468_s21 }
 0x313   :  { %1122 = vrot.lane.b32.xlu0 %v10890_v48, %s10465_s18  ;;  %1274 = vrot.lane.b32.xlu1 %v10906_v53, %s10470_s23 }
 0x317   :  { %1320 = vrot.lane.b32.xlu0 %v10906_v53, %s10469_s22  ;;  %1172 = vrot.lane.b32.xlu1 %v10906_v53, %s10461_s6 }
 0x31b   :  { %1030 = vrot.lane.b32.xlu0 %v10890_v48, %s10466_s19  ;;  %1126 = vrot.lane.b32.xlu1 %v10906_v53, %s10465_s18 }
 0x31f   :  { %1228 = vrot.lane.b32.xlu0 %v10906_v53, %s10471_s24  ;;  %1080 = vrot.lane.b32.xlu1 %v10906_v53, %s10468_s21 }
 0x323   :  { %1322 = vrot.lane.b32.xlu1 %v10934_v50, %s10469_s22  ;;  %1368 = vrot.lane.b32.xlu0 %v10934_v50, %s10467_s20 }
 0x327   :  { %1230 = vrot.lane.b32.xlu1 %v10934_v50, %s10471_s24  ;;  %1276 = vrot.lane.b32.xlu0 %v10934_v50, %s10470_s23 }
 0x32b   :  { %1034 = vrot.lane.b32.xlu1 %v10906_v53, %s10466_s19  ;;  %1174 = vrot.lane.b32.xlu0 %v10934_v50, %s10461_s6 }
 0x32f   :  { %1176 = vrot.lane.b32.xlu1 %v10950_v63, %s10461_s6  ;;  %1370 = vrot.lane.b32.xlu0 %v10950_v63, %s10467_s20 }
 0x333   :  { %1130 = vrot.lane.b32.xlu1 %v10950_v63, %s10465_s18  ;;  %1324 = vrot.lane.b32.xlu0 %v10950_v63, %s10469_s22 }
 0x337   :  { %1084 = vrot.lane.b32.xlu1 %v10950_v63, %s10468_s21  ;;  %1278 = vrot.lane.b32.xlu0 %v10950_v63, %s10470_s23 }
 0x33b   :  { %1038 = vrot.lane.b32.xlu1 %v10950_v63, %s10466_s19  ;;  %1232 = vrot.lane.b32.xlu0 %v10950_v63, %s10471_s24 }
 0x33d   :  { %v1361_v6 = vpop.permute.xlu0 %1360 }
 0x33f   :  { %1128 = vrot.lane.b32.xlu0 %v10934_v50, %s10465_s18 }
 0x343   :  { %1082 = vrot.lane.b32.xlu0 %v10934_v50, %s10468_s21 }
 0x347   :  { %1036 = vrot.lane.b32.xlu0 %v10934_v50, %s10466_s19 }
 0x34b   :  { %1450 = vperm.xlu0 %10018, %v1447_v2  }
 0x359   :  { %v10990_v8 = vpop.permute.xlu1 %1364  ;;  %v10992_v9 = vpop.permute.xlu0 %1318 }
 0x35d   :  { %v1315_v36 = vpop.permute.xlu1 %1314  ;;  %v1269_v10 = vpop.permute.xlu0 %1268 }
 0x361   :  { %v10994_v11 = vpop.permute.xlu1 %1272  ;;  %v10996_v12 = vpop.permute.xlu0 %1226 }
 0x365   :  { %v1223_v19 = vpop.permute.xlu1 %1222  ;;  %v1167_v27 = vpop.permute.xlu0 %1166 }
 0x366   :  { %v1178_v59 = vsel %vm465_vm4, %v1165_v3, %v1167_v27 }
 0x369   :  { %v1121_v13 = vpop.permute.xlu1 %1120  ;;  %v1075_v21 = vpop.permute.xlu0 %1074 }
 0x36a   :  { %v1132_v61 = vsel %vm14658_vm5, %v10960_v32, %v1121_v13  ;;  %v1086_v2 = vsel %vm14661_vm6, %v1073_v4, %v1075_v21 }
 0x36d   :  { %v1029_v24 = vpop.permute.xlu1 %1028  ;;  %v10998_v25 = vpop.permute.xlu0 %1170 }
 0x371   :  { %v1317_v26 = vpop.permute.xlu1 %1316  ;;  %v11000_v33 = vpop.permute.xlu0 %1124 }
 0x372   :  { %v1329_v23 = vsel %vm618_vm1, %v1317_v26, %v10992_v9  ;;  %v1328_v46 = vsel %vm618_vm1, %v1315_v36, %v1317_v26  ;;  %v1040_v36 = vsel %vm14660_vm7, %v10970_v55, %v1029_v24 }
 0x375   :  { %v1225_v37 = vpop.permute.xlu1 %1224  ;;  %v11002_v38 = vpop.permute.xlu0 %1078 }
 0x376   :  { %v1237_v49 = vsel %vm524_vm3, %v1225_v37, %v10996_v12  ;;  %v1236_v56 = vsel %vm524_vm3, %v1223_v19, %v1225_v37 }
 0x379   :  { %v11004_v39 = vpop.permute.xlu1 %1168  ;;  %v11006_v29 = vpop.permute.xlu0 %1032 }
 0x37a   :  { %v1179_v57 = vsel %vm465_vm4, %v1167_v27, %v11004_v39 }
 0x37d   :  { %v1367_v40 = vpop.permute.xlu1 %1366  ;;  %v1363_v42 = vpop.permute.xlu0 %1362 }
 0x37e   :  { %v1375_v43 = vsel %vm14657_vm0, %v1363_v42, %v10990_v8  ;;  %v1374_v44 = vsel %vm14657_vm0, %v1361_v6, %v1363_v42  ;;  %v11044_v6 = vld [vmem:[%s9364_s11] sm:$0xff] }
 0x37f   :  { %1470 = vmatprep.subr.mxu1 %v1375_v43 }
 0x380   :  { %1471 = vmatpush1.msra.mxu1 %v1374_v44 }
 0x381   :  { %v11013_v45 = vpop.permute.xlu1 %1076  ;;  %1472 = vmatprep.subr.mxu1 %v1329_v23  ;;  %v1271_v35 = vpop.permute.xlu0 %1270  ;;  %v1180_v23 = vsel %vm465_vm4, %v11004_v39, %v10998_v25 }
 0x382   :  { %1473 = vmatpush1.msra.mxu1 %v1328_v46  ;;  %v1283_v47 = vsel %vm14659_vm2, %v1271_v35, %v10994_v11  ;;  %v1282_v30 = vsel %vm14659_vm2, %v1269_v10, %v1271_v35 }
 0x383   :  { %1474 = vmatprep.subr.mxu1 %v1283_v47 }
 0x384   :  { %1475 = vmatpush1.msra.mxu1 %v1282_v30 }
 0x385   :  { %v1275_v51 = vpop.permute.xlu1 %1274  ;;  %1476 = vmatprep.subr.mxu1 %v1237_v49  ;;  %v11021_v52 = vpop.permute.xlu0 %1122 }
 0x386   :  { %1477 = vmatpush1.msra.mxu1 %v1236_v56  ;;  %v1133_v60 = vsel %vm14658_vm5, %v1121_v13, %v11021_v52  ;;  %v1376_v13 = vsel %vm14657_vm0, %v10990_v8, %v1367_v40  ;;  %v1284_v42 = vsel %vm14659_vm2, %v10994_v11, %v1275_v51  ;;  %v1134_v35 = vsel %vm14658_vm5, %v11021_v52, %v11000_v33 }
 0x387   :  { %1478 = vmatprep.subr.mxu1 %v10890_v48 }
 0x388   :  { %1479 = vmatpush1.msra.mxu1 %v10856_v41  ;;  %v1087_v41 = vsel %vm14661_vm6, %v1075_v21, %v11013_v45 }
 0x389   :  { %v11031_v31 = vpop.permute.xlu1 %1172  ;;  %1480 = vmatprep.subr.mxu1 %v1179_v57  ;;  %v1321_v58 = vpop.permute.xlu0 %1320 }
 0x38a   :  { %1481 = vmatpush1.msra.mxu1 %v1178_v59  ;;  %v1330_v26 = vsel %vm618_vm1, %v10992_v9, %v1321_v58  ;;  %v1181_v9 = vsel %vm465_vm4, %v10998_v25, %v11031_v31 }
 0x38b   :  { %1482 = vmatprep.subr.mxu1 %v1133_v60 }
 0x38c   :  { %1483 = vmatpush1.msra.mxu1 %v1132_v61 }
 0x38d   :  { %v11040_v48 = vpop.permute.xlu1 %1126  ;;  %1484 = vmatprep.subr.mxu1 %v1087_v41  ;;  %v1031_v62 = vpop.permute.xlu0 %1030 }
 0x38e   :  { %1485 = vmatpush1.msra.mxu1 %v1086_v2  ;;  %v1041_v3 = vsel %vm14660_vm7, %v1029_v24, %v1031_v62  ;;  %v1042_v49 = vsel %vm14660_vm7, %v1031_v62, %v11006_v29 }
 0x38f   :  { %1486 = vmatprep.subr.mxu1 %v1041_v3 }
 0x390   :  { %1487 = vmatpush1.msra.mxu1 %v1040_v36 }
 0x391   :  { %v11048_v32 = vpop.permute.xlu1 %1080  ;;  %v1229_v10 = vpop.permute.xlu0 %1228  ;;  %9396 = vmatmul.mubr.msk.f32.vlgmr.msra.gmra.mxu1 %vm14656_vm8, %v11044_v6 }
 0x392   :  { %1662 = vmatprep.mubr.f32.mxu1 %v14650_v54  ;;  %v1089_v25 = vsel %vm14661_vm6, %v11002_v38, %v11048_v32 }
 0x395   :  { %v1323_v19 = vpop.permute.xlu1 %1322  ;;  %v1369_v4 = vpop.permute.xlu0 %1368 }
 0x396   :  { %v1377_v27 = vsel %vm14657_vm0, %v1367_v40, %v1369_v4  ;;  %v1331_v55 = vsel %vm618_vm1, %v1321_v58, %v1323_v19  ;;  %v1238_v40 = vsel %vm524_vm3, %v10996_v12, %v1229_v10  ;;  %v1135_v12 = vsel %vm14658_vm5, %v11000_v33, %v11040_v48 }
 0x397   :  { %1541 = vmatprep.subr.mxu0 %v1377_v27 }
 0x398   :  { %1542 = vmatpush1.msra.mxu0 %v1376_v13 }
 0x399   :  { %v1231_v21 = vpop.permute.xlu1 %1230  ;;  %1543 = vmatprep.subr.mxu0 %v1331_v55  ;;  %v1277_v24 = vpop.permute.xlu0 %1276 }
 0x39a   :  { %1544 = vmatpush1.msra.mxu0 %v1330_v26  ;;  %v1285_v37 = vsel %vm14659_vm2, %v1275_v51, %v1277_v24  ;;  %v1239_v43 = vsel %vm524_vm3, %v1229_v10, %v1231_v21 }
 0x39b   :  { %1545 = vmatprep.subr.mxu0 %v1285_v37 }
 0x39c   :  { %1546 = vmatpush1.msra.mxu0 %v1284_v42 }
 0x39d   :  { %1547 = vmatprep.subr.mxu0 %v1239_v43  ;;  %v1175_v8 = vpop.permute.xlu0 %1174  ;;  %v1035_v44 = vpop.permute.xlu1 %1034 }
 0x39e   :  { %1548 = vmatpush1.msra.mxu0 %v1238_v40  ;;  %v1043_v46 = vsel %vm14660_vm7, %v11006_v29, %v1035_v44  ;;  %v1182_v59 = vsel %vm465_vm4, %v11031_v31, %v1175_v8 }
 0x39f   :  { %1549 = vmatprep.subr.mxu0 %v10906_v53 }
 0x3a0   :  { %1550 = vmatpush1.msra.mxu0 %v10862_v7 }
 0x3a1   :  { %1551 = vmatprep.subr.mxu0 %v1181_v9  ;;  %v1371_v11 = vpop.permute.xlu0 %1370  ;;  %v1177_v30 = vpop.permute.xlu1 %1176 }
 0x3a2   :  { %1552 = vmatpush1.msra.mxu0 %v1180_v23  ;;  %v1379_v53 = vsel %vm14657_vm0, %v1371_v11, %v10978_v0  ;;  %v1378_v7 = vsel %vm14657_vm0, %v1369_v4, %v1371_v11  ;;  %v1088_v0 = vsel %vm14661_vm6, %v11013_v45, %v11002_v38  ;;  %vm3424_vm0 = vcmask 1006592  }
 0x3a3   :  { %1553 = vmatprep.subr.mxu0 %v1135_v12  ;;  %1612 = vmatprep.subr.mxu1 %v1379_v53 }
 0x3a4   :  { %1554 = vmatpush1.msra.mxu0 %v1134_v35  ;;  %1613 = vmatpush1.msra.mxu1 %v1378_v7 }
 0x3a5   :  { %1555 = vmatprep.subr.mxu0 %v1089_v25  ;;  %v1325_v39 = vpop.permute.xlu0 %1324 }
 0x3a6   :  { %1556 = vmatpush1.msra.mxu0 %v1088_v0  ;;  %v1333_v47 = vsel %vm618_vm1, %v1325_v39, %v10984_v1  ;;  %v1332_v33 = vsel %vm618_vm1, %v1323_v19, %v1325_v39  ;;  %v1131_v1 = vpop.permute.xlu1 %1130 }
 0x3a7   :  { %1557 = vmatprep.subr.mxu0 %v1043_v46  ;;  %1614 = vmatprep.subr.mxu1 %v1333_v47 }
 0x3a8   :  { %1558 = vmatpush1.msra.mxu0 %v1042_v49  ;;  %1615 = vmatpush1.msra.mxu1 %v1332_v33 }
 0x3a9   :  { %9397 = vmatmul.mubr.msk.f32.vlgmr.msra.gmra.mxu0 %vm14656_vm8, %v11044_v6  ;;  %v1279_v38 = vpop.permute.xlu0 %1278 }
 0x3aa   :  { %v1287_v45 = vsel %vm14659_vm2, %v1279_v38, %v10986_v34  ;;  %v1286_v51 = vsel %vm14659_vm2, %v1277_v24, %v1279_v38  ;;  %v1183_v34 = vsel %vm465_vm4, %v1175_v8, %v1177_v30  ;;  %v1085_v58 = vpop.permute.xlu1 %1084  ;;  %v11155_v38 = vld [vmem:[%s11145_s15 + $0xf8] sm:$0xff]  ;;  %vm3270_vm2 = vcmask 48128  }
 0x3ab   :  { %1616 = vmatprep.subr.mxu1 %v1287_v45  ;;  %v11158_v45 = vld [vmem:[%s11145_s15 + $0x78] sm:$0xff]  ;;  %9435 = vmatprep.subr.mxu0 %v11155_v38 }
 0x3ac   :  { %1617 = vmatpush1.msra.mxu1 %v1286_v51  ;;  %v11161_v51 = vld [vmem:[%s11145_s15 + $0xf0] sm:$0xff]  ;;  %9436 = vmatpush3.msra.mxu0 %v11158_v45 }
 0x3ad   :  { %v1233_v52 = vpop.permute.xlu0 %1232  ;;  %9437 = vmatprep.subr.mxu0 %v11161_v51 }
 0x3ae   :  { %v1241_v56 = vsel %vm524_vm3, %v1233_v52, %v10988_v5  ;;  %v1240_v29 = vsel %vm524_vm3, %v1231_v21, %v1233_v52  ;;  %v1039_v41 = vpop.permute.xlu1 %1038  ;;  %v11169_v52 = vld [vmem:[%s11145_s15 + $0xe8] sm:$0xff] }
 0x3af   :  { %1618 = vmatprep.subr.mxu1 %v1241_v56  ;;  %v11173_v56 = vld [vmem:[%s11145_s15 + $0x68] sm:$0xff] }
 0x3b0   :  { %1619 = vmatpush1.msra.mxu1 %v1240_v29  ;;  %v11176_v29 = vld [vmem:[%s11145_s15 + $0x178] sm:$0xff] }
 0x3b1   :  { %1620 = vmatprep.subr.mxu1 %v10950_v63  ;;  %v1129_v57 = vpop.permute.xlu0 %1128 }
 0x3b2   :  { %1621 = vmatpush1.msra.mxu1 %v10934_v50  ;;  %v1137_v60 = vsel %vm14658_vm5, %v1129_v57, %v1131_v1  ;;  %v1136_v61 = vsel %vm14658_vm5, %v11040_v48, %v1129_v57  ;;  %v11165_v1 = vld [vmem:[%s11145_s15 + $0x70] sm:$0xff]  ;;  %v11180_v57 = vld [vmem:[%s11145_s15 + $0xe0] sm:$0xff]  ;;  %vm3307_vm5 = vcmask 39936  }
 0x3b3   :  { %1622 = vmatprep.subr.mxu1 %v1183_v34  ;;  %9438 = vmatpush3.msra.mxu0 %v11165_v1  ;;  %v11184_v34 = vld [vmem:[%s11145_s15 + $0x170] sm:$0xff] }
 0x3b4   :  { %1623 = vmatpush1.msra.mxu1 %v1182_v59  ;;  %9439 = vmatprep.subr.mxu0 %v11169_v52  ;;  %v11192_v59 = vld [vmem:[%s11145_s15 + $0x168] sm:$0xff] }
 0x3b5   :  { %1624 = vmatprep.subr.mxu1 %v1137_v60  ;;  %v1083_v5 = vpop.permute.xlu0 %1082  ;;  %9440 = vmatpush3.msra.mxu0 %v11173_v56  ;;  %v11196_v60 = vld [vmem:[%s11145_s15 + $0xd8] sm:$0xff] }
 0x3b6   :  { %1625 = vmatpush1.msra.mxu1 %v1136_v61  ;;  %v1091_v63 = vsel %vm14661_vm6, %v1083_v5, %v1085_v58  ;;  %v1090_v50 = vsel %vm14661_vm6, %v11048_v32, %v1083_v5  ;;  %v1675_v32 = vld [vmem:[%s10528_s17] sm:$0x3f]  ;;  %9441 = vmatprep.subr.mxu0 %v11180_v57  ;;  %v11201_v5 = vld [vmem:[%s11145_s15 + $0x58] sm:$0xff]  ;;  %vm3498_vm6 = vcmask 990208  }
 0x3b7   :  { %1626 = vmatprep.subr.mxu1 %v1091_v63  ;;  %v1684_v27 = vrot.slane %v1675_v32, %v10537_v17  ;;  %v1688_v21 = vrot.slane %v1675_v32, %v10540_v18  ;;  %v1680_v26 = vrot.slane %v1675_v32, %v10534_v16  ;;  %v1696_v35 = vrot.slane %v1675_v32, %v10547_v22  ;;  %v11188_v58 = vld [vmem:[%s11145_s15 + $0x60] sm:$0xff]  ;;  %v11209_v63 = vld [vmem:[%s11145_s15 + $0xd0] sm:$0xff]  ;;  %v11360_v16 = vld [vmem:[%s11145_s15 + $0x108] sm:$0xff] }
 0x3b8   :  { %1627 = vmatpush1.msra.mxu1 %v1090_v50  ;;  %v1700_v46 = vrot.slane %v1675_v32, %v10562_v28  ;;  %v11205_v61 = vld [vmem:[%s11145_s15 + $0x160] sm:$0xff]  ;;  %9442 = vmatpush3.msra.mxu0 %v11188_v58  ;;  %v11214_v50 = vld [vmem:[%s11145_s15 + $0x50] sm:$0xff] }
 0x3b9   :  { %v1037_v62 = vpop.permute.xlu0 %1036  ;;  %9443 = vmatprep.subr.mxu0 %v11196_v60  ;;  %v11350_v28 = vld [vmem:[%s11145_s15 + $0x110] sm:$0xff] }
 0x3ba   :  { %v1045_v31 = vsel %vm14660_vm7, %v1037_v62, %v1039_v41  ;;  %v1044_v2 = vsel %vm14660_vm7, %v1035_v44, %v1037_v62  ;;  %v11218_v41 = vld [vmem:[%s11145_s15 + $0x158] sm:$0xff]  ;;  %9444 = vmatpush3.msra.mxu0 %v11201_v5  ;;  %v11222_v62 = vld [vmem:[%s11145_s15 + $0xc8] sm:$0xff]  ;;  %vm3233_vm7 = vcmask 56320  }
 0x3bb   :  { %1628 = vmatprep.subr.mxu1 %v1045_v31  ;;  %9445 = vmatprep.subr.mxu0 %v11209_v63  ;;  %v11227_v31 = vld [vmem:[%s11145_s15 + $0x48] sm:$0xff] }
 0x3bc   :  { %1629 = vmatpush1.msra.mxu1 %v1044_v2  ;;  %v11231_v2 = vld [vmem:[%s11145_s15 + $0x150] sm:$0xff]  ;;  %9446 = vmatpush3.msra.mxu0 %v11214_v50 }
 0x3bd   :  { %9398 = vmatmul.mubr.msk.f32.vlgmr.msra.gmra.mxu1 %vm14656_vm8, %v11044_v6  ;;  %9663 = vmatprep.subr.mxu1 %v14650_v54  ;;  %v1692_v6 = vrot.slane %v1675_v32, %v10544_v20  ;;  %v11253_v32 = vld [vmem:[%s11145_s15 + $0x38] sm:$0xff] }
 0x3be   :  { %9664 = vmatpush3.msra.mxu1 %v11176_v29  ;;  %9447 = vmatprep.subr.mxu0 %v11222_v62 }
 0x3bf   :  { %9665 = vmatprep.subr.mxu1 %v14650_v54  ;;  %9448 = vmatpush3.msra.mxu0 %v11227_v31 }
 0x3c0   :  { %9666 = vmatpush3.msra.mxu1 %v11184_v34  ;;  %9695 = vmatprep.mubr.msk.f32.mxu1 %vm10477_vm9, %v14650_v54 }
 0x3c1   :  { %9667 = vmatprep.subr.mxu1 %v14650_v54 }
 0x3c2   :  { %9668 = vmatpush3.msra.mxu1 %v11192_v59 }
 0x3c3   :  { %9669 = vmatprep.subr.mxu1 %v14650_v54 }
 0x3c4   :  { %9670 = vmatpush3.msra.mxu1 %v11205_v61 }
 0x3c5   :  { %9671 = vmatprep.subr.mxu1 %v14650_v54 }
 0x3c6   :  { %v1451_v36 = vpop.permute.xlu0 %1450  ;;  %9672 = vmatpush3.msra.mxu1 %v11218_v41 }
 0x3c7   :  { %9673 = vmatprep.subr.mxu1 %v14650_v54 }
 0x3c8   :  { %9674 = vmatpush3.msra.mxu1 %v11231_v2 }
 0x3c9   :  { %9675 = vmatprep.subr.mxu1 %v14650_v54 }
 0x451   :  { %v1522_v48 = vpop.f32.mrf.mxu1 }
 0x452   :  { %v1523_v19 = vadd.f32 %v1522_v48, %v1451_v36  ;;  %v11235_v48 = vld [vmem:[%s11145_s15 + $0xc0] sm:$0xff] }
 0x453   :  { %v1524_v3 = vpop.f32.mrf.mxu1  ;;  %9449 = vmatprep.subr.mxu0 %v11235_v48 }
 0x454   :  { %v1525_v10 = vadd.f32 %v1524_v3, %v1451_v36  ;;  %v1669_v37 = vmax.f32 %v1523_v19, 0.0  ;;  %v11240_v3 = vld [vmem:[%s11145_s15 + $0x40] sm:$0xff] }
 0x455   :  { %v11257_v19 = vld [vmem:[%s11145_s15 + $0x140] sm:$0xff]  ;;  %9450 = vmatpush3.msra.mxu0 %v11240_v3 }
 0x456   :  { %v1670_v4 = vmax.f32 %v1525_v10, 0.0  ;;  %v11128_v44 = vmul.f32 %v1680_v26, %v1669_v37  ;;  %v11248_v10 = vld [vmem:[%s11145_s15 + $0xb8] sm:$0xff]  ;;  %v11289_v26 = vld [vmem:[%s11145_s15 + $0x20] sm:$0xff] }
 0x457   :  { %9451 = vmatprep.subr.mxu0 %v11248_v10  ;;  %v11300_v37 = vld [vmem:[%s11145_s15 + $0x18] sm:$0xff] }
 0x458   :  { %v11124_v8 = vmul.f32 %v1684_v27, %v1670_v4  ;;  %14691 = vst [vmem:[#allocation19_spill] sm:$0xff] %v11128_v44  ;;  %v11261_v4 = vld [vmem:[%s11145_s15 + $0xb0] sm:$0xff]  ;;  %9452 = vmatpush3.msra.mxu0 %v11253_v32 }
 0x459   :  { %v11266_v27 = vld [vmem:[%s11145_s15 + $0x30] sm:$0xff]  ;;  %9453 = vmatprep.subr.mxu0 %v11261_v4 }
 0x45a   :  { %14689 = vst [vmem:[#allocation17_spill] sm:$0xff] %v11124_v8  ;;  %9454 = vmatpush3.msra.mxu0 %v11266_v27 }
 0x469   :  { %v1593_v13 = vpop.f32.mrf.mxu0 }
 0x46a   :  { %v1594_v55 = vadd.f32 %v1593_v13, %v1451_v36  ;;  %v11270_v13 = vld [vmem:[%s11145_s15 + $0x138] sm:$0xff] }
 0x46b   :  { %v1595_v24 = vpop.f32.mrf.mxu0 }
 0x46c   :  { %v1671_v42 = vmax.f32 %v1594_v55, 0.0  ;;  %v1596_v43 = vadd.f32 %v1595_v24, %v1451_v36  ;;  %v11274_v55 = vld [vmem:[%s11145_s15 + $0xa8] sm:$0xff]  ;;  %v11284_v24 = vld [vmem:[%s11145_s15 + $0xa0] sm:$0xff] }
 0x46d   :  { %9455 = vmatprep.subr.mxu0 %v11274_v55 }
 0x46e   :  { %v1672_v40 = vmax.f32 %v1596_v43, 0.0  ;;  %v11126_v9 = vmul.f32 %v1688_v21, %v1671_v42  ;;  %v11279_v21 = vld [vmem:[%s11145_s15 + $0x28] sm:$0xff]  ;;  %v11303_v42 = vld [vmem:[%s11145_s15 + $0x90] sm:$0xff] }
 0x46f   :  { %9456 = vmatpush3.msra.mxu0 %v11279_v21  ;;  %v11306_v43 = vld [vmem:[%s11145_s15 + $0x130] sm:$0xff] }
 0x470   :  { %14690 = vst [vmem:[#allocation18_spill] sm:$0xff] %v11126_v9  ;;  %v11130_v11 = vmul.f32 %v1692_v6, %v1672_v40  ;;  %v10019_v23 = vpack.i.bf16 %v11126_v9, %v11124_v8  ;;  %v11294_v6 = vld [vmem:[%s11145_s15 + $0x98] sm:$0xff]  ;;  %9457 = vmatprep.subr.mxu0 %v11284_v24  ;;  %v11313_v40 = vld [vmem:[%s11145_s15 + $0x10] sm:$0xff] }
 0x471   :  { %9458 = vmatpush3.msra.mxu0 %v11289_v26 }
 0x472   :  { %14692 = vst [vmem:[#allocation20_spill] sm:$0xff] %v11130_v11  ;;  %10020 = vrot.lane.b32.xlu1 %v10019_v23, %s10471_s24  ;;  %v10024_v12 = vpack.i.bf16 %v11128_v44, %v11130_v11  ;;  %9459 = vmatprep.subr.mxu0 %v11294_v6 }
 0x473   :  { %9460 = vmatpush3.msra.mxu0 %v11300_v37 }
 0x474   :  { %9461 = vmatprep.subr.mxu0 %v11303_v42 }
 0x475   :  { %9462 = vmatpush3.msra.mxu0 %v11313_v40 }
 0x476   :  { %10025 = vrot.lane.b32.xlu1 %v10024_v12, %s10471_s24  ;;  %v11317_v12 = vld [vmem:[%s11145_s15 + $0x88] sm:$0xff] }
 0x477   :  { %9463 = vmatprep.subr.mxu0 %v11317_v12 }
 0x47d   :  { %v1664_v53 = vpop.f32.mrf.mxu1 }
 0x47e   :  { %v1665_v7 = vadd.f32 %v1664_v53, %v1451_v36  ;;  %v11320_v53 = vld [vmem:[%s11145_s15 + $0x128] sm:$0xff] }
 0x47f   :  { %v1666_v25 = vpop.f32.mrf.mxu1 }
 0x480   :  { %v1673_v39 = vmax.f32 %v1665_v7, 0.0  ;;  %v1667_v0 = vadd.f32 %v1666_v25, %v1451_v36  ;;  %v11244_v36 = vld [vmem:[%s11145_s15 + $0x148] sm:$0xff] }
 0x481   :  { %9676 = vmatpush3.msra.mxu1 %v11244_v36  ;;  %v11325_v25 = vld [vmem:[%s11145_s15 + $0x8] sm:$0xff] }
 0x482   :  { %v11140_v47 = vmul.f32 %v1696_v35, %v1673_v39  ;;  %v1674_v33 = vmax.f32 %v1667_v0, 0.0  ;;  %9677 = vmatprep.subr.mxu1 %v14650_v54  ;;  %v11328_v39 = vld [vmem:[%s11145_s15 + $0x80] sm:$0xff]  ;;  %9464 = vmatpush3.msra.mxu0 %v11325_v25 }
 0x483   :  { %9678 = vmatpush3.msra.mxu1 %v11257_v19  ;;  %v11331_v0 = vld [vmem:[%s11145_s15 + $0x120] sm:$0xff]  ;;  %9465 = vmatprep.subr.mxu0 %v11328_v39 }
 0x484   :  { %14693 = vst [vmem:[#allocation21_spill] sm:$0xff] %v11140_v47  ;;  %v11147_v30 = vmul.f32 %v1700_v46, %v1674_v33  ;;  %1747 = vrot.lane.b32.xlu0 %v11140_v47, %s10471_s24  ;;  %9679 = vmatprep.subr.mxu1 %v14650_v54  ;;  %v11336_v46 = vld [vmem:[%s11145_s15] sm:$0xff] }
 0x485   :  { %9680 = vmatpush3.msra.mxu1 %v11270_v13  ;;  %9466 = vmatpush3.msra.mxu0 %v11336_v46 }
 0x486   :  { %14694 = vst [vmem:[#allocation22_spill] sm:$0xff] %v11147_v30  ;;  %v10029_v49 = vpack.i.bf16 %v14650_v54, %v11147_v30  ;;  %9681 = vmatprep.subr.mxu1 %v14650_v54  ;;  %9487 = vmatprep.subr.mxu0 %v11155_v38 }
 0x487   :  { %9682 = vmatpush3.msra.mxu1 %v11306_v43 }
 0x488   :  { %10030 = vrot.lane.b32.xlu1 %v10029_v49, %s10471_s24  ;;  %9683 = vmatprep.subr.mxu1 %v14650_v54  ;;  %v11343_v49 = vld [vmem:[%s11145_s15 + $0x118] sm:$0xff] }
 0x489   :  { %9684 = vmatpush3.msra.mxu1 %v11320_v53 }
 0x48a   :  { %9685 = vmatprep.subr.mxu1 %v14650_v54 }
 0x48b   :  { %9686 = vmatpush3.msra.mxu1 %v11331_v0 }
 0x48c   :  { %9687 = vmatprep.subr.mxu1 %v14650_v54 }
 0x48d   :  { %9688 = vmatpush3.msra.mxu1 %v11343_v49 }
 0x48e   :  { %9689 = vmatprep.subr.mxu1 %v14650_v54 }
 0x48f   :  { %9690 = vmatpush3.msra.mxu1 %v11350_v28 }
 0x490   :  { %9691 = vmatprep.subr.mxu1 %v14650_v54 }
 0x491   :  { %9692 = vmatpush3.msra.mxu1 %v11360_v16 }
 0x492   :  { %9693 = vmatprep.subr.mxu1 %v14650_v54 }
 0x4e4   :  { %v10021_v23 = vpop.permute.xlu1 %10020 }
 0x4e5   :  { %v10023_v7 = vunpack.i.h.bf16 %v10021_v23  ;;  %v10022_v35 = vunpack.i.l.bf16 %v10021_v23 }
 0x4e7   :  { %v1754_v23 = vsel %vm524_vm3, %v10022_v35, %v10023_v7 }
 0x4e8   :  { %v10026_v33 = vpop.permute.xlu1 %10025  ;;  %v1766_v18 = vmax.f32 %v11124_v8, %v1754_v23 }
 0x4e9   :  { %v10028_v14 = vunpack.i.h.bf16 %v10026_v33  ;;  %v10027_v15 = vunpack.i.l.bf16 %v10026_v33 }
 0x4eb   :  { %v1753_v22 = vsel %vm524_vm3, %v10028_v14, %v10022_v35  ;;  %v1755_v20 = vsel %vm524_vm3, %v10023_v7, %v10027_v15  ;;  %v11366_v14 = vld [vmem:[%s11145_s15 + $0x100] sm:$0xff]  ;;  %s10489_s15 = smov 5  }
 0x4ec   :  { %v1767_v17 = vmax.f32 %v11126_v9, %v1755_v20  ;;  %v1765_v33 = vmax.f32 %v11128_v44, %v1753_v22  ;;  %14695 = vst [vmem:[#allocation23_spill] sm:$0xff] %v11366_v14  ;;  %9694 = vmatpush3.msra.mxu1 %v11366_v14  ;;  %s11984_s5 = sld [smem:[%s14628_s0 + %s10489_s15]]  }
 0x4ed   :  { %9698 = vmatprep.subr.mxu1 %v14650_v54 }
 0x4ee   :  { %1786 = vrot.lane.b32.xlu1 %v1765_v33, %s10469_s22  ;;  %v10034_v38 = vpack.i.bf16 %v1767_v17, %v1766_v18 }
 0x4f0   :  { %10035 = vrot.lane.b32.xlu0 %v10034_v38, %s10469_s22 }
 0x4f6   :  { %v1748_v20 = vpop.permute.xlu0 %1747 }
 0x4f7   :  { %v1756_v22 = vsel %vm524_vm3, %v10027_v15, %v1748_v20 }
 0x4f8   :  { %v11375_v7 = vmax.f32 %v11130_v11, %v1756_v22  ;;  %v14696_v22 = vmov 0.0  }
 0x4fa   :  { %v10031_v35 = vpop.permute.xlu1 %10030  ;;  %1792 = vrot.lane.b32.xlu0 %v11375_v7, %s10469_s22 }
 0x4fb   :  { %v10033_v23 = vunpack.i.h.bf16 %v10031_v35  ;;  %v10032_v44 = vunpack.i.l.bf16 %v10031_v35 }
 0x4fd   :  { %v1778_v9 = vmax.f32 %v10033_v23, 0.0  ;;  %v1757_v38 = vsel %vm524_vm3, %v1748_v20, %v10032_v44  ;;  %v1758_v8 = vsel %vm524_vm3, %v10032_v44, %v10033_v23 }
 0x4fe   :  { %v1769_v14 = vmax.f32 %v11140_v47, %v1757_v38  ;;  %v11383_v54 = vmax.f32 %v11147_v30, %v1758_v8 }
 0x4ff   :  { %1798 = vrot.lane.b32.xlu0 %v1778_v9, %s10469_s22 }
 0x500   :  { %v10039_v15 = vpack.i.bf16 %v11383_v54, %v1769_v14 }
 0x502   :  { %10040 = vrot.lane.b32.xlu1 %v10039_v15, %s10469_s22 }
 0x503   :  { %2341 = vrot.lane.b32.xlu0 %v14696_v22, %s10479_s26 }
 0x506   :  { %2322 = vrot.lane.b32.xlu1 %v14696_v22, %s10478_s16 }
 0x507   :  { %2303 = vrot.lane.b32.xlu0 %v14696_v22, %s10480_s27 }
 0x50a   :  { %2285 = vrot.lane.b32.xlu1 %v14696_v22, %s10471_s24 }
 0x50b   :  { %2240 = vrot.lane.b32.xlu0 %v14696_v22, %s10474_s3 }
 0x50e   :  { %2259 = vrot.lane.b32.xlu1 %v14696_v22, %s10461_s6 }
 0x560   :  { %v1787_v20 = vpop.permute.xlu1 %1786 }
 0x562   :  { %v10036_v8 = vpop.permute.xlu0 %10035 }
 0x563   :  { %v10038_v9 = vunpack.i.h.bf16 %v10036_v8  ;;  %v10037_v44 = vunpack.i.l.bf16 %v10036_v8 }
 0x565   :  { %v1800_v35 = vsel %vm618_vm1, %v1787_v20, %v10037_v44  ;;  %v1801_v23 = vsel %vm618_vm1, %v10037_v44, %v10038_v9 }
 0x566   :  { %v1813_v38 = vmax.f32 %v1766_v18, %v1801_v23  ;;  %v1812_v15 = vmax.f32 %v1765_v33, %v1800_v35 }
 0x568   :  { %1930 = vmatprep.mubr.f32.mxu0 %v1813_v38 }
 0x569   :  { %1931 = vmatmul.mubr.f32.vlgmr.msra.gmra.mxu0 %v1812_v15 }
 0x56a   :  { %9488 = vmatpush3.msra.mxu0 %v11158_v45 }
 0x56b   :  { %9489 = vmatprep.subr.mxu0 %v11161_v51 }
 0x56c   :  { %9490 = vmatpush3.msra.mxu0 %v11165_v1  ;;  %v1793_v30 = vpop.permute.xlu0 %1792 }
 0x56d   :  { %v1802_v47 = vsel %vm618_vm1, %v10038_v9, %v1793_v30  ;;  %9491 = vmatprep.subr.mxu0 %v11169_v52 }
 0x56e   :  { %v1814_v8 = vmax.f32 %v1767_v17, %v1802_v47  ;;  %9492 = vmatpush3.msra.mxu0 %v11173_v56 }
 0x56f   :  { %9493 = vmatprep.subr.mxu0 %v11180_v57  ;;  %v14697_v57 = vld [vmem:[#allocation23_spill] sm:$0xff] }
 0x570   :  { %9494 = vmatpush3.msra.mxu0 %v11188_v58  ;;  %9696 = vmatmul.mubr.f32.vlgmr.msra.gmra.mxu1 %v1814_v8 }
 0x571   :  { %9495 = vmatprep.subr.mxu0 %v11196_v60  ;;  %9699 = vmatpush3.msra.mxu1 %v11176_v29 }
 0x572   :  { %9496 = vmatpush3.msra.mxu0 %v11201_v5  ;;  %9700 = vmatprep.subr.mxu1 %v14696_v22 }
 0x573   :  { %9497 = vmatprep.subr.mxu0 %v11209_v63  ;;  %9701 = vmatpush3.msra.mxu1 %v11184_v34 }
 0x574   :  { %9498 = vmatpush3.msra.mxu0 %v11214_v50  ;;  %9702 = vmatprep.subr.mxu1 %v14696_v22  ;;  %v10041_v17 = vpop.permute.xlu1 %10040 }
 0x575   :  { %v10043_v18 = vunpack.i.h.bf16 %v10041_v17  ;;  %v10042_v47 = vunpack.i.l.bf16 %v10041_v17  ;;  %9499 = vmatprep.subr.mxu0 %v11222_v62  ;;  %9703 = vmatpush3.msra.mxu1 %v11192_v59  ;;  %v2371_v62 = vld [vmem:[%s9367_s4 + $0x8] sm:$0xff] }
 0x576   :  { %9500 = vmatpush3.msra.mxu0 %v11227_v31  ;;  %9704 = vmatprep.subr.mxu1 %v14696_v22  ;;  %v2370_v31 = vld [vmem:[%s9367_s4] sm:$0xff] }
 0x577   :  { %9501 = vmatprep.subr.mxu0 %v11235_v48  ;;  %9705 = vmatpush3.msra.mxu1 %v11205_v61  ;;  %v1804_v45 = vsel %vm618_vm1, %v10042_v47, %v10043_v18  ;;  %v1803_v1 = vsel %vm618_vm1, %v1793_v30, %v10042_v47  ;;  %v1799_v30 = vpop.permute.xlu0 %1798  ;;  %v2350_v47 = vld [vmem:[%s9366_s8] sm:$0xff] }
 0x578   :  { %9502 = vmatpush3.msra.mxu0 %v11240_v3  ;;  %9706 = vmatprep.subr.mxu1 %v14696_v22  ;;  %v1816_v51 = vmax.f32 %v1769_v14, %v1804_v45  ;;  %v1815_v52 = vmax.f32 %v11375_v7, %v1803_v1  ;;  %v1805_v56 = vsel %vm618_vm1, %v10043_v18, %v1799_v30  ;;  %v2469_v1 = vld [vmem:[%s11544_s12] sm:$0x3] }
 0x579   :  { %9503 = vmatprep.subr.mxu0 %v11248_v10  ;;  %9707 = vmatpush3.msra.mxu1 %v11218_v41  ;;  %v1817_v29 = vmax.f32 %v11383_v54, %v1805_v56 }
 0x57a   :  { %9504 = vmatpush3.msra.mxu0 %v11253_v32  ;;  %9708 = vmatprep.subr.mxu1 %v14696_v22 }
 0x57b   :  { %9505 = vmatprep.subr.mxu0 %v11261_v4  ;;  %2119 = vmatprep.mubr.f32.mxu0 %v1816_v51  ;;  %v2342_v48 = vpop.permute.xlu0 %2341  ;;  %v2351_v51 = vld [vmem:[%s9366_s8 + $0x8] sm:$0xff]  ;;  %s10486_s8 = smov 33  }
 0x57c   :  { %9709 = vmatpush3.msra.mxu1 %v11231_v2  ;;  %9506 = vmatpush3.msra.mxu0 %v11266_v27  ;;  %v2323_v2 = vpop.permute.xlu1 %2322  ;;  %s11724_s11 = sld [smem:[%s14628_s0 + %s10486_s8]]   ;;  %s10492_s8 = smov 15  }
 0x57d   :  { %9710 = vmatprep.subr.mxu1 %v14696_v22  ;;  %9507 = vmatprep.subr.mxu0 %v11274_v55 }
 0x57e   :  { %9711 = vmatpush3.msra.mxu1 %v11244_v36  ;;  %9508 = vmatpush3.msra.mxu0 %v11279_v21 }
 0x57f   :  { %9712 = vmatprep.subr.mxu1 %v14696_v22  ;;  %9509 = vmatprep.subr.mxu0 %v11284_v24  ;;  %v2304_v36 = vpop.permute.xlu0 %2303 }
 0x580   :  { %9713 = vmatpush3.msra.mxu1 %v11257_v19  ;;  %9510 = vmatpush3.msra.mxu0 %v11289_v26  ;;  %v2286_v3 = vpop.permute.xlu1 %2285 }
 0x581   :  { %9714 = vmatprep.subr.mxu1 %v14696_v22  ;;  %9511 = vmatprep.subr.mxu0 %v11294_v6 }
 0x582   :  { %9715 = vmatpush3.msra.mxu1 %v11270_v13  ;;  %9512 = vmatpush3.msra.mxu0 %v11300_v37 }
 0x583   :  { %9716 = vmatprep.subr.mxu1 %v14696_v22  ;;  %9513 = vmatprep.subr.mxu0 %v11303_v42  ;;  %v2241_v32 = vpop.permute.xlu0 %2240 }
 0x584   :  { %9717 = vmatpush3.msra.mxu1 %v11306_v43  ;;  %9514 = vmatpush3.msra.mxu0 %v11313_v40  ;;  %v2260_v10 = vpop.permute.xlu1 %2259 }
 0x585   :  { %9718 = vmatprep.subr.mxu1 %v14696_v22  ;;  %9515 = vmatprep.subr.mxu0 %v11317_v12 }
 0x586   :  { %9719 = vmatpush3.msra.mxu1 %v11320_v53  ;;  %9516 = vmatpush3.msra.mxu0 %v11325_v25 }
 0x587   :  { %9720 = vmatprep.subr.mxu1 %v14696_v22  ;;  %9517 = vmatprep.subr.mxu0 %v11328_v39 }
 0x588   :  { %9721 = vmatpush3.msra.mxu1 %v11331_v0  ;;  %9518 = vmatpush3.msra.mxu0 %v11336_v46 }
 0x589   :  { %9722 = vmatprep.subr.mxu1 %v14696_v22  ;;  %2120 = vmatmul.mubr.f32.vlgmr.msra.gmra.mxu0 %v1815_v52 }
 0x58a   :  { %9723 = vmatpush3.msra.mxu1 %v11343_v49  ;;  %9730 = vmatprep.mubr.msk.f32.mxu1 %vm10477_vm9, %v14696_v22  ;;  %vm2837_vm9 = vcmask 130048  }
 0x58b   :  { %9724 = vmatprep.subr.mxu1 %v14696_v22  ;;  %2452 = vmatprep.mubr.f32.mxu0 %v14696_v22 }
 0x58c   :  { %9725 = vmatpush3.msra.mxu1 %v11350_v28 }
 0x58d   :  { %9726 = vmatprep.subr.mxu1 %v14696_v22 }
 0x58e   :  { %9727 = vmatpush3.msra.mxu1 %v11360_v16 }
 0x58f   :  { %9728 = vmatprep.subr.mxu1 %v14696_v22 }
 0x590   :  { %9729 = vmatpush3.msra.mxu1 %v14697_v57 }
 0x591   :  { %9731 = vmatmul.mubr.f32.vlgmr.msra.gmra.mxu1 %v1817_v29  ;;  %v14698_v29 = vld [vmem:[#allocation11_spill] sm:$0xff] }
 0x592   :  { %v2474_v57 = vrot.slane %v2469_v1, %v14698_v29 }
 0x629   :  { %v9467_v34 = vpop.f32.mrf.mxu0 }
 0x62b   :  { %v9468_v28 = vpop.f32.mrf.mxu0 }
 0x62c   :  { %v9469_v58 = vadd.f32 %v9468_v28, %v9467_v34 }
 0x630   :  { %v2002_v59 = vpop.f32.mrf.mxu1 }
 0x631   :  { %v11473_v60 = vadd.f32 %v9469_v58, %v2002_v59 }
 0x632   :  { %v9697_v16 = vpop.f32.mrf.mxu1 }
 0x633   :  { %2318 = vrot.lane.b32.xlu0 %v11473_v60, %s10478_s16  ;;  %2337 = vrot.lane.b32.xlu1 %v11473_v60, %s10479_s26  ;;  %v14699_v16 = vld [vmem:[#allocation12_spill] sm:$0xff] }
 0x637   :  { %2281 = vrot.lane.b32.xlu0 %v11473_v60, %s10471_s24  ;;  %2299 = vrot.lane.b32.xlu1 %v11473_v60, %s10480_s27 }
 0x63b   :  { %2242 = vrot.lane.b32.xlu0 %v11473_v60, %s10474_s3  ;;  %2261 = vrot.lane.b32.xlu1 %v11473_v60, %s10461_s6 }
 0x63f   :  { %2223 = vrot.lane.b32.xlu1 %v11473_v60, %s10481_s28 }
 0x649   :  { %v9519_v54 = vpop.f32.mrf.mxu0 }
 0x64b   :  { %v9520_v5 = vpop.f32.mrf.mxu0 }
 0x64c   :  { %v9521_v61 = vadd.f32 %v9520_v5, %v9519_v54  ;;  %v2478_v54 = vrot.slane %v2469_v1, %v14699_v16 }
 0x651   :  { %v2191_v63 = vpop.f32.mrf.mxu1 }
 0x652   :  { %v2192_v50 = vadd.f32 %v9521_v61, %v2191_v63 }
 0x653   :  { %v9732_v41 = vpop.f32.mrf.mxu1 }
 0x654   :  { %2320 = vrot.lane.b32.xlu0 %v2192_v50, %s10478_s16  ;;  %2339 = vrot.lane.b32.xlu1 %v2192_v50, %s10479_s26 }
 0x658   :  { %2204 = vrot.lane.b32.xlu0 %v11473_v60, %s10482_s30  ;;  %2301 = vrot.lane.b32.xlu1 %v2192_v50, %s10480_s27 }
 0x65c   :  { %2283 = vrot.lane.b32.xlu0 %v2192_v50, %s10471_s24  ;;  %2221 = vrot.lane.b32.xlu1 %v14696_v22, %s10481_s28 }
 0x660   :  { %2263 = vrot.lane.b32.xlu0 %v2192_v50, %s10461_s6  ;;  %2244 = vrot.lane.b32.xlu1 %v2192_v50, %s10474_s3 }
 0x664   :  { %2225 = vrot.lane.b32.xlu0 %v2192_v50, %s10481_s28  ;;  %2206 = vrot.lane.b32.xlu1 %v2192_v50, %s10482_s30 }
 0x668   :  { %2202 = vrot.lane.b32.xlu0 %v14696_v22, %s10482_s30  ;;  %2379 = vperm.xlu1 %10017, %v2371_v62  }
 0x66c   :  { %2374 = vperm.xlu0 %10018, %v2370_v31   ;;  %10050 = vrot.lane.b32.xlu1 %v14696_v22, %s10480_s27 }
 0x670   :  { %10045 = vrot.lane.b32.xlu0 %v14696_v22, %s10478_s16  ;;  %10065 = vrot.lane.b32.xlu1 %v14696_v22, %s10474_s3 }
 0x674   :  { %10055 = vrot.lane.b32.xlu0 %v14696_v22, %s10471_s24 }
 0x678   :  { %10060 = vrot.lane.b32.xlu0 %v14696_v22, %s10461_s6 }
 0x6a5   :  { %v2338_v19 = vpop.permute.xlu1 %2337  ;;  %v2319_v4 = vpop.permute.xlu0 %2318 }
 0x6a9   :  { %v2300_v27 = vpop.permute.xlu1 %2299  ;;  %v2282_v13 = vpop.permute.xlu0 %2281 }
 0x6ad   :  { %v2262_v55 = vpop.permute.xlu1 %2261  ;;  %v2243_v21 = vpop.permute.xlu0 %2242 }
 0x6ae   :  { %v2265_v44 = vsel %vm465_vm4, %v2260_v10, %v2262_v55  ;;  %v2247_v38 = vsel %vm2246_vm13, %v2241_v32, %v2243_v21  ;;  %v2826_v10 = vld [vmem:[%s9369_s7 + $0x8] sm:$0xff]  ;;  %v2825_v32 = vld [vmem:[%s9369_s7] sm:$0xff]  ;;  %s11841_s7 = sld [smem:[%s14628_s0 + %s10491_s2]]  }
 0x6b1   :  { %v2224_v24 = vpop.permute.xlu1 %2223 }
 0x6c6   :  { %v2321_v26 = vpop.permute.xlu0 %2320  ;;  %v2340_v6 = vpop.permute.xlu1 %2339 }
 0x6c7   :  { %v2345_v37 = vsel %vm2343_vm10, %v2340_v6, %v2342_v48  ;;  %v2344_v42 = vsel %vm2343_vm10, %v2338_v19, %v2340_v6  ;;  %v2326_v43 = vsel %vm2324_vm11, %v2321_v26, %v2323_v2  ;;  %v2325_v53 = vsel %vm2324_vm11, %v2319_v4, %v2321_v26 }
 0x6c8   :  { %2402 = vmatprep.subr.mxu0 %v2345_v37 }
 0x6c9   :  { %2403 = vmatpush1.msra.mxu0 %v2344_v42 }
 0x6ca   :  { %v2205_v40 = vpop.permute.xlu0 %2204  ;;  %2404 = vmatprep.subr.mxu0 %v2326_v43  ;;  %v2302_v12 = vpop.permute.xlu1 %2301 }
 0x6cb   :  { %2405 = vmatpush1.msra.mxu0 %v2325_v53  ;;  %v2307_v25 = vsel %vm2305_vm12, %v2302_v12, %v2304_v36  ;;  %v2306_v39 = vsel %vm2305_vm12, %v2300_v27, %v2302_v12  ;;  %v2786_v36 = vld [vmem:[%s11612_s1 + $0x8] sm:$0xff] }
 0x6cc   :  { %2406 = vmatprep.subr.mxu0 %v2307_v25  ;;  %9401 = vmatprep.mubr.msk.f32.mxu1 %vm2837_vm9, %v2786_v36 }
 0x6cd   :  { %2407 = vmatpush1.msra.mxu0 %v2306_v39 }
 0x6ce   :  { %v2284_v0 = vpop.permute.xlu0 %2283  ;;  %v2222_v46 = vpop.permute.xlu1 %2221 }
 0x6cf   :  { %v2288_v49 = vsel %vm524_vm3, %v2284_v0, %v2286_v3  ;;  %v2287_v33 = vsel %vm524_vm3, %v2282_v13, %v2284_v0  ;;  %v2228_v8 = vsel %vm2227_vm14, %v2222_v46, %v2224_v24 }
 0x6d0   :  { %2408 = vmatprep.subr.mxu0 %v2288_v49 }
 0x6d1   :  { %2409 = vmatpush1.msra.mxu0 %v2287_v33 }
 0x6d2   :  { %v2264_v14 = vpop.permute.xlu0 %2263  ;;  %2410 = vmatprep.subr.mxu0 %v2192_v50  ;;  %v2245_v7 = vpop.permute.xlu1 %2244 }
 0x6d3   :  { %2411 = vmatpush1.msra.mxu0 %v11473_v60  ;;  %v2266_v9 = vsel %vm465_vm4, %v2262_v55, %v2264_v14  ;;  %v2248_v20 = vsel %vm2246_vm13, %v2243_v21, %v2245_v7 }
 0x6d4   :  { %2412 = vmatprep.subr.mxu0 %v2266_v9 }
 0x6d5   :  { %2413 = vmatpush1.msra.mxu0 %v2265_v44 }
 0x6d6   :  { %v2226_v35 = vpop.permute.xlu0 %2225  ;;  %2414 = vmatprep.subr.mxu0 %v2248_v20  ;;  %v2207_v23 = vpop.permute.xlu1 %2206 }
 0x6d7   :  { %2415 = vmatpush1.msra.mxu0 %v2247_v38  ;;  %v2229_v15 = vsel %vm2227_vm14, %v2224_v24, %v2226_v35  ;;  %v2210_v17 = vsel %vm2208_vm15, %v2205_v40, %v2207_v23 }
 0x6d8   :  { %2416 = vmatprep.subr.mxu0 %v2229_v15 }
 0x6d9   :  { %2417 = vmatpush1.msra.mxu0 %v2228_v8 }
 0x6da   :  { %v2203_v18 = vpop.permute.xlu0 %2202  ;;  %2418 = vmatprep.subr.mxu0 %v2210_v17 }
 0x6db   :  { %v2209_v45 = vsel %vm2208_vm15, %v2203_v18, %v2205_v40 }
 0x6dc   :  { %2419 = vmatpush1.msra.mxu0 %v2209_v45 }
 0x6dd   :  { %9399 = vmatmul.mubr.msk.f32.vlgmr.msra.gmra.mxu0 %vm14656_vm8, %v2350_v47 }
 0x6de   :  { %2458 = vmatprep.mubr.f32.mxu0 %v14696_v22 }
 0x6e1   :  { %9400 = vmatmul.mubr.msk.f32.gmra.mxu0 %vm14656_vm8, %v2351_v51  ;;  %vm3461_vm8 = vcmask 998400  }
 0x6e3   :  { %v2380_v63 = vpop.permute.xlu1 %2379 }
 0x6e7   :  { %v2375_v52 = vpop.permute.xlu0 %2374  ;;  %v10051_v27 = vpop.permute.xlu1 %10050 }
 0x6e8   :  { %v10052_v23 = vunpack.i.l.bf16 %v10051_v27  ;;  %v10053_v18 = vunpack.i.h.bf16 %v10051_v27 }
 0x6eb   :  { %v10046_v19 = vpop.permute.xlu0 %10045  ;;  %v11639_v55 = vpop.permute.xlu1 %10065 }
 0x6ec   :  { %v10047_v14 = vunpack.i.l.bf16 %v10046_v19  ;;  %v10048_v44 = vunpack.i.h.bf16 %v10046_v19 }
 0x6ef   :  { %v10056_v4 = vpop.permute.xlu0 %10055 }
 0x6f0   :  { %v10057_v51 = vunpack.i.l.bf16 %v10056_v4 }
 0x6f3   :  { %v11637_v13 = vpop.permute.xlu0 %10060 }
 0x79d   :  { %v2454_v30 = vpop.f32.mrf.mxu0 }
 0x79e   :  { %v2455_v56 = vadd.f32 %v2454_v30, %v2375_v52 }
 0x79f   :  { %v2456_v34 = vpop.f32.mrf.mxu0 }
 0x7a0   :  { %v2465_v28 = vmax.f32 %v2455_v56, 0.0  ;;  %v2457_v59 = vadd.f32 %v2456_v34, %v2375_v52 }
 0x7a1   :  { %v2460_v61 = vpop.f32.mrf.mxu0 }
 0x7a2   :  { %v11548_v58 = vmul.f32 %v2474_v57, %v2465_v28  ;;  %v2466_v60 = vmax.f32 %v2457_v59, 0.0  ;;  %v2461_v50 = vadd.f32 %v2460_v61, %v2380_v63 }
 0x7a3   :  { %v2462_v31 = vpop.f32.mrf.mxu0 }
 0x7a4   :  { %2689 = vrot.lane.b32.xlu0 %v11548_v58, %s10480_s27  ;;  %2725 = vrot.lane.b32.xlu1 %v11548_v58, %s10478_s16  ;;  %v11559_v5 = vmul.f32 %v2478_v54, %v2466_v60  ;;  %v2467_v41 = vmax.f32 %v2461_v50, 0.0  ;;  %v2463_v2 = vadd.f32 %v2462_v31, %v2380_v63  ;;  %v10062_v63 = vunpack.i.l.bf16 %v11637_v13 }
 0x7a6   :  { %v11573_v62 = vmul.f32 %v2474_v57, %v2467_v41  ;;  %v2468_v48 = vmax.f32 %v2463_v2, 0.0  ;;  %v10058_v57 = vunpack.i.h.bf16 %v10056_v4  ;;  %v10063_v2 = vunpack.i.h.bf16 %v11637_v13 }
 0x7a8   :  { %2575 = vrot.lane.b32.xlu0 %v11548_v58, %s10474_s3  ;;  %2653 = vrot.lane.b32.xlu1 %v11548_v58, %s10471_s24  ;;  %v11587_v3 = vmul.f32 %v2478_v54, %v2468_v48 }
 0x7ac   :  { %2727 = vrot.lane.b32.xlu0 %v11559_v5, %s10478_s16  ;;  %2611 = vrot.lane.b32.xlu1 %v11548_v58, %s10461_s6 }
 0x7b0   :  { %2655 = vrot.lane.b32.xlu0 %v11559_v5, %s10471_s24  ;;  %2691 = vrot.lane.b32.xlu1 %v11559_v5, %s10480_s27 }
 0x7b4   :  { %2613 = vrot.lane.b32.xlu0 %v11559_v5, %s10461_s6  ;;  %2577 = vrot.lane.b32.xlu1 %v11559_v5, %s10474_s3 }
 0x7b8   :  { %2695 = vrot.lane.b32.xlu0 %v11573_v62, %s10480_s27  ;;  %2731 = vrot.lane.b32.xlu1 %v11573_v62, %s10478_s16 }
 0x7bc   :  { %2617 = vrot.lane.b32.xlu0 %v11573_v62, %s10461_s6  ;;  %2659 = vrot.lane.b32.xlu1 %v11573_v62, %s10471_s24 }
 0x7c0   :  { %2545 = vrot.lane.b32.xlu0 %v11573_v62, %s10481_s28  ;;  %2581 = vrot.lane.b32.xlu1 %v11573_v62, %s10474_s3 }
 0x7c4   :  { %2697 = vrot.lane.b32.xlu0 %v11587_v3, %s10480_s27  ;;  %2733 = vrot.lane.b32.xlu1 %v11587_v3, %s10478_s16 }
 0x7c8   :  { %10070 = vrot.lane.b32.xlu0 %v14696_v22, %s10481_s28  ;;  %2539 = vrot.lane.b32.xlu1 %v11548_v58, %s10481_s28 }
 0x7cc   :  { %2541 = vrot.lane.b32.xlu0 %v11559_v5, %s10481_s28  ;;  %2661 = vrot.lane.b32.xlu1 %v11587_v3, %s10471_s24 }
 0x7d0   :  { %2503 = vrot.lane.b32.xlu0 %v11548_v58, %s10482_s30  ;;  %2509 = vrot.lane.b32.xlu1 %v11573_v62, %s10482_s30 }
 0x7d4   :  { %2583 = vrot.lane.b32.xlu0 %v11587_v3, %s10474_s3  ;;  %2619 = vrot.lane.b32.xlu1 %v11587_v3, %s10461_s6 }
 0x7d8   :  { %2767 = vrot.lane.b32.xlu0 %v11573_v62, %s10479_s26  ;;  %10075 = vrot.lane.b32.xlu1 %v14696_v22, %s10482_s30 }
 0x7dc   :  { %2511 = vrot.lane.b32.xlu0 %v11587_v3, %s10482_s30  ;;  %2547 = vrot.lane.b32.xlu1 %v11587_v3, %s10481_s28 }
 0x7e0   :  { %2769 = vrot.lane.b32.xlu0 %v11587_v3, %s10479_s26  ;;  %2505 = vrot.lane.b32.xlu1 %v11559_v5, %s10482_s30 }
 0x7e4   :  { %2761 = vrot.lane.b32.xlu0 %v11548_v58, %s10479_s26  ;;  %10080 = vrot.lane.b32.xlu1 %v14696_v22, %s10479_s26 }
 0x7e8   :  { %2834 = vperm.xlu0 %10018, %v2826_v10   ;;  %2763 = vrot.lane.b32.xlu1 %v11559_v5, %s10479_s26 }
 0x7ec   :  { %2829 = vperm.xlu1 %10017, %v2825_v32   ;;  %v10068_v32 = vunpack.i.h.bf16 %v11639_v55 }
 0x816   :  { %v2690_v21 = vpop.permute.xlu0 %2689  ;;  %v2726_v24 = vpop.permute.xlu1 %2725 }
 0x81a   :  { %v11641_v26 = vpop.permute.xlu0 %2575  ;;  %v2654_v6 = vpop.permute.xlu1 %2653 }
 0x81e   :  { %v2728_v37 = vpop.permute.xlu0 %2727  ;;  %v11643_v42 = vpop.permute.xlu1 %2611 }
 0x81f   :  { %v2738_v38 = vsel %vm2324_vm11, %v2728_v37, %v10048_v44  ;;  %v2737_v17 = vsel %vm2324_vm11, %v2726_v24, %v2728_v37 }
 0x822   :  { %v2656_v43 = vpop.permute.xlu0 %2655  ;;  %v2692_v40 = vpop.permute.xlu1 %2691 }
 0x823   :  { %v2702_v1 = vsel %vm2305_vm12, %v2692_v40, %v10053_v18  ;;  %v2701_v56 = vsel %vm2305_vm12, %v2690_v21, %v2692_v40  ;;  %v2666_v59 = vsel %vm524_vm3, %v2656_v43, %v10058_v57  ;;  %v2665_v61 = vsel %vm524_vm3, %v2654_v6, %v2656_v43 }
 0x824   :  { %v2585_v6 = vsel %vm2246_vm13, %v10068_v32, %v11641_v26  ;;  %v3127_v32 = vld [vmem:[%s11724_s11 + $0x58] sm:$0xff] }
 0x826   :  { %v2614_v12 = vpop.permute.xlu0 %2613  ;;  %v11645_v53 = vpop.permute.xlu1 %2577 }
 0x827   :  { %v2586_v27 = vsel %vm2246_vm13, %v11641_v26, %v11645_v53 }
 0x82a   :  { %v2696_v25 = vpop.permute.xlu0 %2695  ;;  %v2732_v39 = vpop.permute.xlu1 %2731 }
 0x82e   :  { %v2618_v0 = vpop.permute.xlu0 %2617  ;;  %v2660_v46 = vpop.permute.xlu1 %2659 }
 0x82f   :  { %v2623_v48 = vsel %vm465_vm4, %v10062_v63, %v2618_v0 }
 0x832   :  { %v11647_v49 = vpop.permute.xlu0 %2545  ;;  %v11649_v33 = vpop.permute.xlu1 %2581 }
 0x836   :  { %v2698_v7 = vpop.permute.xlu0 %2697  ;;  %v2734_v9 = vpop.permute.xlu1 %2733 }
 0x837   :  { %v2740_v20 = vsel %vm2324_vm11, %v2734_v9, %v10047_v14  ;;  %v2739_v35 = vsel %vm2324_vm11, %v2732_v39, %v2734_v9  ;;  %v2704_v47 = vsel %vm2305_vm12, %v2698_v7, %v10052_v23  ;;  %v2703_v45 = vsel %vm2305_vm12, %v2696_v25, %v2698_v7 }
 0x838   :  { %2844 = vmatprep.subr.mxu1 %v2740_v20 }
 0x839   :  { %2845 = vmatpush1.msra.mxu1 %v2739_v35 }
 0x83a   :  { %v11654_v15 = vpop.permute.xlu0 %10070  ;;  %2846 = vmatprep.subr.mxu1 %v2738_v38  ;;  %v11656_v8 = vpop.permute.xlu1 %2539  ;;  %v2785_v38 = vld [vmem:[%s11612_s1] sm:$0xff] }
 0x83b   :  { %2847 = vmatpush1.msra.mxu1 %v2737_v17  ;;  %v10072_v19 = vunpack.i.l.bf16 %v11654_v15  ;;  %v10073_v13 = vunpack.i.h.bf16 %v11654_v15  ;;  %v2788_v15 = vld [vmem:[%s11612_s1 + $0x18] sm:$0xff] }
 0x83c   :  { %2848 = vmatprep.subr.mxu1 %v2704_v47  ;;  %v2925_v47 = vld [vmem:[%s11544_s12] sm:$0x3] }
 0x83d   :  { %2849 = vmatpush1.msra.mxu1 %v2703_v45  ;;  %v2549_v53 = vsel %vm2227_vm14, %v10073_v13, %v11656_v8  ;;  %v3123_v13 = vld [vmem:[%s11724_s11 + $0x38] sm:$0xff] }
 0x83e   :  { %v2542_v52 = vpop.permute.xlu0 %2541  ;;  %v2662_v30 = vpop.permute.xlu1 %2661  ;;  %2850 = vmatprep.subr.mxu1 %v2702_v1 }
 0x83f   :  { %2851 = vmatpush1.msra.mxu1 %v2701_v56  ;;  %v2668_v34 = vsel %vm524_vm3, %v2662_v30, %v10057_v51  ;;  %v2667_v28 = vsel %vm524_vm3, %v2660_v46, %v2662_v30  ;;  %v2550_v43 = vsel %vm2227_vm14, %v11656_v8, %v2542_v52  ;;  %v2787_v8 = vld [vmem:[%s11612_s1 + $0x10] sm:$0xff]  ;;  %v2934_v52 = vrot.slane %v2925_v47, %v14699_v16  ;;  %s10490_s1 = smov 121  }
 0x840   :  { %2852 = vmatprep.subr.mxu1 %v2668_v34 }
 0x841   :  { %2853 = vmatpush1.msra.mxu1 %v2667_v28  ;;  %v2930_v28 = vrot.slane %v2925_v47, %v14698_v29 }
 0x842   :  { %v2504_v60 = vpop.permute.xlu0 %2503  ;;  %v2510_v54 = vpop.permute.xlu1 %2509  ;;  %2854 = vmatprep.subr.mxu1 %v2666_v59 }
 0x843   :  { %2855 = vmatpush1.msra.mxu1 %v2665_v61 }
 0x844   :  { %2856 = vmatprep.subr.mxu1 %v11587_v3  ;;  %v2622_v3 = vsel %vm465_vm4, %v11643_v42, %v2614_v12 }
 0x845   :  { %2857 = vmatpush1.msra.mxu1 %v11573_v62  ;;  %v10067_v62 = vunpack.i.l.bf16 %v11639_v55 }
 0x846   :  { %v2584_v50 = vpop.permute.xlu0 %2583  ;;  %v2620_v41 = vpop.permute.xlu1 %2619  ;;  %2858 = vmatprep.subr.mxu1 %v11559_v5  ;;  %v2621_v5 = vsel %vm465_vm4, %v10063_v2, %v11643_v42  ;;  %v2551_v42 = vsel %vm2227_vm14, %v10072_v19, %v11647_v49  ;;  %v3126_v19 = vld [vmem:[%s11724_s11 + $0x50] sm:$0xff] }
 0x847   :  { %2859 = vmatpush1.msra.mxu1 %v11548_v58  ;;  %v2624_v31 = vsel %vm465_vm4, %v2618_v0, %v2620_v41  ;;  %v2588_v58 = vsel %vm2246_vm13, %v11649_v33, %v2584_v50  ;;  %v2587_v4 = vsel %vm2246_vm13, %v10067_v62, %v11649_v33 }
 0x848   :  { %2860 = vmatprep.subr.mxu1 %v2624_v31 }
 0x849   :  { %2861 = vmatpush1.msra.mxu1 %v2623_v48 }
 0x84a   :  { %v2768_v36 = vpop.permute.xlu0 %2767  ;;  %v10076_v10 = vpop.permute.xlu1 %10075  ;;  %2862 = vmatprep.subr.mxu1 %v2622_v3 }
 0x84b   :  { %2863 = vmatpush1.msra.mxu1 %v2621_v5  ;;  %v10077_v37 = vunpack.i.l.bf16 %v10076_v10  ;;  %v10078_v40 = vunpack.i.h.bf16 %v10076_v10  ;;  %v3130_v10 = vld [vmem:[%s11724_s11 + $0x70] sm:$0xff]  ;;  %v3129_v5 = vld [vmem:[%s11724_s11 + $0x68] sm:$0xff] }
 0x84c   :  { %2864 = vmatprep.subr.mxu1 %v2588_v58  ;;  %v3128_v58 = vld [vmem:[%s11724_s11 + $0x60] sm:$0xff] }
 0x84d   :  { %2865 = vmatpush1.msra.mxu1 %v2587_v4  ;;  %v2515_v39 = vsel %vm2208_vm15, %v10077_v37, %v2510_v54  ;;  %v3125_v4 = vld [vmem:[%s11724_s11 + $0x48] sm:$0xff]  ;;  %v3118_v37 = vld [vmem:[%s11724_s11 + $0x10] sm:$0xff] }
 0x84e   :  { %v2512_v21 = vpop.permute.xlu0 %2511  ;;  %v2548_v24 = vpop.permute.xlu1 %2547  ;;  %2866 = vmatprep.subr.mxu1 %v2586_v27  ;;  %v3124_v27 = vld [vmem:[%s11724_s11 + $0x40] sm:$0xff] }
 0x84f   :  { %2867 = vmatpush1.msra.mxu1 %v2585_v6  ;;  %v2552_v55 = vsel %vm2227_vm14, %v11647_v49, %v2548_v24  ;;  %v2516_v26 = vsel %vm2208_vm15, %v2510_v54, %v2512_v21  ;;  %v2513_v49 = vsel %vm2208_vm15, %v10078_v40, %v2504_v60  ;;  %v3122_v21 = vld [vmem:[%s11724_s11 + $0x30] sm:$0xff]  ;;  %v3121_v24 = vld [vmem:[%s11724_s11 + $0x28] sm:$0xff]  ;;  %v3120_v6 = vld [vmem:[%s11724_s11 + $0x20] sm:$0xff] }
 0x850   :  { %2868 = vmatprep.subr.mxu1 %v2552_v55  ;;  %v3119_v55 = vld [vmem:[%s11724_s11 + $0x18] sm:$0xff] }
 0x851   :  { %2869 = vmatpush1.msra.mxu1 %v2551_v42  ;;  %v3117_v42 = vld [vmem:[%s11724_s11 + $0x8] sm:$0xff] }
 0x852   :  { %v2506_v12 = vpop.permute.xlu1 %2505  ;;  %2870 = vmatprep.subr.mxu1 %v2550_v43  ;;  %v2770_v25 = vpop.permute.xlu0 %2769 }
 0x853   :  { %2871 = vmatpush1.msra.mxu1 %v2549_v53  ;;  %v2514_v0 = vsel %vm2208_vm15, %v2504_v60, %v2506_v12  ;;  %v2775_v20 = vsel %vm2343_vm10, %v2768_v36, %v2770_v25  ;;  %v3131_v36 = vld [vmem:[%s11724_s11 + $0x78] sm:$0xff]  ;;  %v3116_v53 = vld [vmem:[%s11724_s11] sm:$0xff]  ;;  %s9371_s11 = sld [smem:[%s14628_s0 + %s10492_s8]]  }
 0x854   :  { %2872 = vmatprep.subr.mxu1 %v2516_v26  ;;  %9733 = vmatprep.subr.mxu0 %v3131_v36  ;;  %s9373_s8 = sld [smem:[%s14628_s0 + %s10465_s18]]  }
 0x855   :  { %2873 = vmatpush1.msra.mxu1 %v2515_v39  ;;  %9734 = vmatpush3.msra.mxu0 %v3131_v36 }
 0x856   :  { %v10081_v46 = vpop.permute.xlu1 %10080  ;;  %2874 = vmatprep.subr.mxu1 %v2514_v0  ;;  %v2762_v9 = vpop.permute.xlu0 %2761  ;;  %9735 = vmatprep.subr.mxu0 %v3130_v10 }
 0x857   :  { %v10082_v33 = vunpack.i.l.bf16 %v10081_v46  ;;  %2875 = vmatpush1.msra.mxu1 %v2513_v49  ;;  %v10083_v14 = vunpack.i.h.bf16 %v10081_v46  ;;  %9736 = vmatpush3.msra.mxu0 %v3130_v10 }
 0x858   :  { %9737 = vmatprep.subr.mxu0 %v3129_v5 }
 0x859   :  { %v2776_v7 = vsel %vm2343_vm10, %v2770_v25, %v10082_v33  ;;  %9738 = vmatpush3.msra.mxu0 %v3129_v5 }
 0x85a   :  { %v2764_v44 = vpop.permute.xlu1 %2763  ;;  %2904 = vmatprep.subr.mxu1 %v2776_v7  ;;  %9739 = vmatprep.subr.mxu0 %v3128_v58 }
 0x85b   :  { %2905 = vmatpush2.msra.mxu1 %v2775_v20  ;;  %v2774_v35 = vsel %vm2343_vm10, %v2764_v44, %v10083_v14  ;;  %v2773_v23 = vsel %vm2343_vm10, %v2762_v9, %v2764_v44  ;;  %9740 = vmatpush3.msra.mxu0 %v3128_v58 }
 0x85c   :  { %2906 = vmatprep.subr.mxu1 %v2774_v35  ;;  %9741 = vmatprep.subr.mxu0 %v3127_v32 }
 0x85d   :  { %2907 = vmatpush2.msra.mxu1 %v2773_v23  ;;  %9742 = vmatpush3.msra.mxu0 %v3127_v32 }
 0x85e   :  { %2909 = vmatmul.mubr.f32.vlgmr.msra.gmra.mxu1 %v2785_v38  ;;  %9768 = vmatprep.subr.mxu1 %v3131_v36 }
 0x85f   :  { %9402 = vmatprep.mubr.msk.f32.mxu1 %vm2837_vm9, %v2788_v15  ;;  %9769 = vmatpush3.msra.mxu1 %v3131_v36 }
 0x860   :  { %9770 = vmatprep.subr.mxu1 %v3130_v10  ;;  %9743 = vmatprep.subr.mxu0 %v3126_v19 }
 0x861   :  { %9771 = vmatpush3.msra.mxu1 %v3130_v10  ;;  %9744 = vmatpush3.msra.mxu0 %v3126_v19 }
 0x862   :  { %2915 = vmatmul.mubr.f32.gmra.mxu1 %v2787_v8  ;;  %9772 = vmatprep.subr.mxu1 %v3129_v5 }
 0x863   :  { %v2835_v30 = vpop.permute.xlu0 %2834  ;;  %9773 = vmatpush3.msra.mxu1 %v3129_v5  ;;  %9745 = vmatprep.subr.mxu0 %v3125_v4 }
 0x864   :  { %9774 = vmatprep.subr.mxu1 %v3128_v58  ;;  %9746 = vmatpush3.msra.mxu0 %v3125_v4 }
 0x865   :  { %9775 = vmatpush3.msra.mxu1 %v3128_v58  ;;  %9747 = vmatprep.subr.mxu0 %v3124_v27  ;;  %v3512_v58 = vld [vmem:[%s11841_s7 + $0x8] sm:$0xff] }
 0x866   :  { %9776 = vmatprep.subr.mxu1 %v3127_v32  ;;  %9748 = vmatpush3.msra.mxu0 %v3124_v27 }
 0x867   :  { %v2830_v18 = vpop.permute.xlu1 %2829  ;;  %9777 = vmatpush3.msra.mxu1 %v3127_v32  ;;  %9749 = vmatprep.subr.mxu0 %v3123_v13  ;;  %v3557_v32 = vld [vmem:[%s9371_s11 + $0x10] sm:$0xff] }
 0x868   :  { %9778 = vmatprep.subr.mxu1 %v3126_v19  ;;  %9750 = vmatpush3.msra.mxu0 %v3123_v13 }
 0x869   :  { %9779 = vmatpush3.msra.mxu1 %v3126_v19  ;;  %9751 = vmatprep.subr.mxu0 %v3122_v21  ;;  %v3555_v19 = vld [vmem:[%s9371_s11] sm:$0xff] }
 0x86a   :  { %9780 = vmatprep.subr.mxu1 %v3125_v4  ;;  %9752 = vmatpush3.msra.mxu0 %v3122_v21 }
 0x86b   :  { %9781 = vmatpush3.msra.mxu1 %v3125_v4  ;;  %9753 = vmatprep.subr.mxu0 %v3121_v24  ;;  %v3558_v4 = vld [vmem:[%s9371_s11 + $0x18] sm:$0xff] }
 0x86c   :  { %9782 = vmatprep.subr.mxu1 %v3124_v27  ;;  %9754 = vmatpush3.msra.mxu0 %v3121_v24 }
 0x86d   :  { %9783 = vmatpush3.msra.mxu1 %v3124_v27  ;;  %9755 = vmatprep.subr.mxu0 %v3120_v6  ;;  %v3556_v27 = vld [vmem:[%s9371_s11 + $0x8] sm:$0xff]  ;;  %s9375_s11 = sld [smem:[%s14628_s0 + %s10466_s19]]  }
 0x86e   :  { %9784 = vmatprep.subr.mxu1 %v3123_v13  ;;  %9756 = vmatpush3.msra.mxu0 %v3120_v6 }
 0x86f   :  { %9785 = vmatpush3.msra.mxu1 %v3123_v13  ;;  %9757 = vmatprep.subr.mxu0 %v3119_v55 }
 0x870   :  { %9786 = vmatprep.subr.mxu1 %v3122_v21  ;;  %9758 = vmatpush3.msra.mxu0 %v3119_v55 }
 0x871   :  { %9787 = vmatpush3.msra.mxu1 %v3122_v21  ;;  %9759 = vmatprep.subr.mxu0 %v3118_v37 }
 0x872   :  { %9788 = vmatprep.subr.mxu1 %v3121_v24  ;;  %9760 = vmatpush3.msra.mxu0 %v3118_v37 }
 0x873   :  { %9789 = vmatpush3.msra.mxu1 %v3121_v24  ;;  %9761 = vmatprep.subr.mxu0 %v3117_v42 }
 0x874   :  { %9790 = vmatprep.subr.mxu1 %v3120_v6  ;;  %9762 = vmatpush3.msra.mxu0 %v3117_v42 }
 0x875   :  { %9791 = vmatpush3.msra.mxu1 %v3120_v6  ;;  %9763 = vmatprep.subr.mxu0 %v3116_v53 }
 0x876   :  { %9792 = vmatprep.subr.mxu1 %v3119_v55  ;;  %9764 = vmatpush3.msra.mxu0 %v3116_v53 }
 0x877   :  { %9793 = vmatpush3.msra.mxu1 %v3119_v55 }
 0x878   :  { %9794 = vmatprep.subr.mxu1 %v3118_v37 }
 0x879   :  { %9795 = vmatpush3.msra.mxu1 %v3118_v37 }
 0x87a   :  { %9796 = vmatprep.subr.mxu1 %v3117_v42 }
 0x87b   :  { %9797 = vmatpush3.msra.mxu1 %v3117_v42 }
 0x87c   :  { %9798 = vmatprep.subr.mxu1 %v3116_v53 }
 0x87d   :  { %9799 = vmatpush3.msra.mxu1 %v3116_v53 }
 0x91e   :  { %v2910_v17 = vpop.f32.mrf.mxu1 }
 0x91f   :  { %v2911_v51 = vadd.f32 %v2910_v17, %v2830_v18 }
 0x920   :  { %v2912_v45 = vpop.f32.mrf.mxu1 }
 0x921   :  { %v2913_v1 = vadd.f32 %v2912_v45, %v2830_v18  ;;  %v2921_v60 = vmax.f32 %v2911_v51, 0.0 }
 0x922   :  { %v2916_v56 = vpop.f32.mrf.mxu1 }
 0x923   :  { %v2922_v57 = vmax.f32 %v2913_v1, 0.0  ;;  %v2917_v34 = vadd.f32 %v2916_v56, %v2835_v30  ;;  %v11726_v2 = vmul.f32 %v2930_v28, %v2921_v60 }
 0x924   :  { %v2918_v59 = vpop.f32.mrf.mxu1 }
 0x925   :  { %v11715_v54 = vmul.f32 %v2934_v52, %v2922_v57  ;;  %v2923_v61 = vmax.f32 %v2917_v34, 0.0  ;;  %v2919_v63 = vadd.f32 %v2918_v59, %v2835_v30 }
 0x927   :  { %v11717_v50 = vmul.f32 %v2930_v28, %v2923_v61  ;;  %v2924_v41 = vmax.f32 %v2919_v63, 0.0  ;;  %v10084_v31 = vpack.i.bf16 %v14696_v22, %v11715_v54 }
 0x929   :  { %v11728_v48 = vmul.f32 %v2934_v52, %v2924_v41  ;;  %10085 = vrot.lane.b32.xlu1 %v10084_v31, %s10471_s24  ;;  %v10094_v3 = vpack.i.bf16 %v11717_v50, %v14696_v22 }
 0x92b   :  { %v10089_v62 = vpack.i.bf16 %v11728_v48, %v11726_v2 }
 0x92d   :  { %10095 = vrot.lane.b32.xlu1 %v10094_v3, %s10471_s24  ;;  %10090 = vrot.lane.b32.xlu0 %v10089_v62, %s10471_s24 }
 0x99b   :  { %v10086_v43 = vpop.permute.xlu1 %10085 }
 0x99c   :  { %v10088_v40 = vunpack.i.h.bf16 %v10086_v43  ;;  %v10087_v12 = vunpack.i.l.bf16 %v10086_v43 }
 0x99e   :  { %v2989_v26 = vmax.f32 %v10088_v40, 0.0  ;;  %v2974_v25 = vsel %vm524_vm3, %v10087_v12, %v10088_v40 }
 0x99f   :  { %v2982_v39 = vmax.f32 %v11715_v54, %v2974_v25  ;;  %v10096_v0 = vpop.permute.xlu1 %10095  ;;  %v10091_v46 = vpop.permute.xlu0 %10090 }
 0x9a0   :  { %v10098_v49 = vunpack.i.h.bf16 %v10096_v0  ;;  %v10097_v33 = vunpack.i.l.bf16 %v10096_v0  ;;  %v10093_v14 = vunpack.i.h.bf16 %v10091_v46  ;;  %v10092_v7 = vunpack.i.l.bf16 %v10091_v46 }
 0x9a1   :  { %v10099_v9 = vpack.i.bf16 %v2989_v26, %v2982_v39 }
 0x9a2   :  { %v2992_v44 = vmax.f32 %v10097_v33, 0.0  ;;  %v2975_v20 = vsel %vm524_vm3, %v10098_v49, %v10093_v14  ;;  %v2976_v35 = vsel %vm524_vm3, %v10093_v14, %v10097_v33  ;;  %v2973_v23 = vsel %vm524_vm3, %v10092_v7, %v10087_v12 }
 0x9a3   :  { %v2983_v38 = vmax.f32 %v11717_v50, %v2975_v20  ;;  %v2984_v15 = vmax.f32 %v11728_v48, %v2976_v35  ;;  %v2981_v8 = vmax.f32 %v11726_v2, %v2973_v23  ;;  %10100 = vrot.lane.b32.xlu0 %v10099_v9, %s10478_s16 }
 0x9a5   :  { %v10109_v17 = vpack.i.bf16 %v2983_v38, %v2992_v44  ;;  %v10104_v18 = vpack.i.bf16 %v2984_v15, %v2981_v8 }
 0x9a7   :  { %10110 = vrot.lane.b32.xlu0 %v10109_v17, %s10478_s16  ;;  %10105 = vrot.lane.b32.xlu1 %v10104_v18, %s10478_s16 }
 0x9ab   :  { %10115 = vrot.lane.b32.xlu0 %v14696_v22, %s10487_s13  ;;  %10120 = vrot.lane.b32.xlu1 %v14696_v22, %s10488_s14 }
 0x9af   :  { %10125 = vrot.lane.b32.xlu0 %v14696_v22, %s10471_s24  ;;  %10135 = vrot.lane.b32.xlu1 %v14696_v22, %s10489_s15 }
 0x9b3   :  { %10130 = vrot.lane.b32.xlu0 %v14696_v22, %s10461_s6  ;;  %10145 = vrot.lane.b32.xlu1 %v14696_v22, %s10472_s25 }
 0x9b7   :  { %10140 = vrot.lane.b32.xlu0 %v14696_v22, %s10473_s29 }
 0xa15   :  { %v10101_v47 = vpop.permute.xlu0 %10100 }
 0xa16   :  { %v10103_v45 = vunpack.i.h.bf16 %v10101_v47  ;;  %v10102_v51 = vunpack.i.l.bf16 %v10101_v47 }
 0xa18   :  { %v3012_v1 = vsel %vm2324_vm11, %v10102_v51, %v10103_v45 }
 0xa19   :  { %v10111_v52 = vpop.permute.xlu0 %10110  ;;  %v10106_v30 = vpop.permute.xlu1 %10105  ;;  %v3020_v56 = vmax.f32 %v2982_v39, %v3012_v1 }
 0xa1a   :  { %v10113_v57 = vunpack.i.h.bf16 %v10111_v52  ;;  %v10112_v34 = vunpack.i.l.bf16 %v10111_v52  ;;  %v10108_v28 = vunpack.i.h.bf16 %v10106_v30  ;;  %v10107_v59 = vunpack.i.l.bf16 %v10106_v30 }
 0xa1b   :  { %9800 = vmatprep.mubr.f32.mxu1 %v3020_v56 }
 0xa1c   :  { %v3013_v60 = vsel %vm2324_vm11, %v10113_v57, %v10108_v28  ;;  %v3014_v61 = vsel %vm2324_vm11, %v10108_v28, %v10112_v34  ;;  %v3011_v63 = vsel %vm2324_vm11, %v10107_v59, %v10102_v51 }
 0xa1d   :  { %v3021_v41 = vmax.f32 %v2983_v38, %v3013_v60  ;;  %v3022_v31 = vmax.f32 %v2984_v15, %v3014_v61  ;;  %v3019_v3 = vmax.f32 %v2981_v8, %v3011_v63  ;;  %v10116_v13 = vpop.permute.xlu0 %10115  ;;  %v10121_v24 = vpop.permute.xlu1 %10120 }
 0xa1e   :  { %v10117_v43 = vunpack.i.l.bf16 %v10116_v13  ;;  %v10118_v20 = vunpack.i.h.bf16 %v10116_v13  ;;  %v10122_v17 = vunpack.i.l.bf16 %v10121_v24  ;;  %v10123_v1 = vunpack.i.h.bf16 %v10121_v24 }
 0xa1f   :  { %9765 = vmatprep.mubr.f32.mxu0 %v3019_v3  ;;  %9801 = vmatmul.mubr.f32.vlgmr.msra.gmra.mxu1 %v3022_v31 }
 0xa20   :  { %9766 = vmatmul.mubr.f32.vlgmr.msra.gmra.mxu0 %v3021_v41 }
 0xa21   :  { %9403 = vmatprep.mubr.msk.f32.mxu0 %vm2837_vm9, %v3512_v58  ;;  %v10126_v21 = vpop.permute.xlu0 %10125  ;;  %v11886_v55 = vpop.permute.xlu1 %10135 }
 0xa22   :  { %v10127_v57 = vunpack.i.l.bf16 %v10126_v21  ;;  %v10128_v59 = vunpack.i.h.bf16 %v10126_v21 }
 0xa25   :  { %v11884_v6 = vpop.permute.xlu0 %10130  ;;  %v11890_v42 = vpop.permute.xlu1 %10145 }
 0xa29   :  { %v11888_v37 = vpop.permute.xlu0 %10140 }
 0xadf   :  { %v11782_v62 = vpop.f32.mrf.mxu1 }
 0xae0   :  { %3420 = vrot.lane.b32.xlu0 %v11782_v62, %s10488_s14  ;;  %3457 = vrot.lane.b32.xlu1 %v11782_v62, %s10487_s13  ;;  %v11788_v36 = vpop.f32.mrf.mxu0 }
 0xae1   :  { %v11810_v10 = vpop.f32.mrf.mxu1 }
 0xae2   :  { %v11816_v5 = vpop.f32.mrf.mxu0 }
 0xae4   :  { %3418 = vrot.lane.b32.xlu0 %v11788_v36, %s10488_s14  ;;  %3455 = vrot.lane.b32.xlu1 %v11788_v36, %s10487_s13 }
 0xae8   :  { %3340 = vrot.lane.b32.xlu0 %v11788_v36, %s10461_s6  ;;  %3384 = vrot.lane.b32.xlu1 %v11782_v62, %s10471_s24 }
 0xaec   :  { %3305 = vrot.lane.b32.xlu0 %v11782_v62, %s10489_s15  ;;  %3382 = vrot.lane.b32.xlu1 %v11788_v36, %s10471_s24 }
 0xaf0   :  { %3266 = vrot.lane.b32.xlu0 %v11788_v36, %s10473_s29  ;;  %3342 = vrot.lane.b32.xlu1 %v11782_v62, %s10461_s6 }
 0xaf4   :  { %3231 = vrot.lane.b32.xlu0 %v11782_v62, %s10472_s25  ;;  %3303 = vrot.lane.b32.xlu1 %v11788_v36, %s10489_s15 }
 0xaf8   :  { %3451 = vrot.lane.b32.xlu0 %v11810_v10, %s10487_s13  ;;  %3268 = vrot.lane.b32.xlu1 %v11782_v62, %s10473_s29 }
 0xafc   :  { %3229 = vrot.lane.b32.xlu1 %v11788_v36, %s10472_s25  ;;  %3412 = vrot.lane.b32.xlu0 %v11816_v5, %s10488_s14 }
 0xb00   :  { %3378 = vrot.lane.b32.xlu0 %v11810_v10, %s10471_s24  ;;  %3449 = vrot.lane.b32.xlu1 %v11816_v5, %s10487_s13 }
 0xb04   :  { %3494 = vrot.lane.b32.xlu0 %v11782_v62, %s10490_s1  ;;  %3414 = vrot.lane.b32.xlu1 %v11810_v10, %s10488_s14 }
 0xb08   :  { %3336 = vrot.lane.b32.xlu0 %v11810_v10, %s10461_s6  ;;  %3376 = vrot.lane.b32.xlu1 %v11816_v5, %s10471_s24 }
 0xb0c   :  { %3297 = vrot.lane.b32.xlu0 %v11816_v5, %s10489_s15  ;;  %10150 = vrot.lane.b32.xlu1 %v14696_v22, %s10490_s1 }
 0xb10   :  { %3262 = vrot.lane.b32.xlu0 %v11810_v10, %s10473_s29  ;;  %3334 = vrot.lane.b32.xlu1 %v11816_v5, %s10461_s6 }
 0xb14   :  { %3223 = vrot.lane.b32.xlu0 %v11816_v5, %s10472_s25  ;;  %3299 = vrot.lane.b32.xlu1 %v11810_v10, %s10489_s15 }
 0xb18   :  { %3492 = vrot.lane.b32.xlu0 %v11788_v36, %s10490_s1  ;;  %3260 = vrot.lane.b32.xlu1 %v11816_v5, %s10473_s29 }
 0xb1c   :  { %3486 = vrot.lane.b32.xlu0 %v11816_v5, %s10490_s1  ;;  %3225 = vrot.lane.b32.xlu1 %v11810_v10, %s10472_s25 }
 0xb20   :  { %3571 = vperm.xlu0 %10018, %v3557_v32   ;;  %3488 = vrot.lane.b32.xlu1 %v11810_v10, %s10490_s1 }
 0xb24   :  { %3561 = vperm.xlu0 %10018, %v3555_v19   ;;  %3576 = vperm.xlu1 %10017, %v3558_v4   ;;  %v10132_v19 = vunpack.i.l.bf16 %v11884_v6  ;;  %v10133_v4 = vunpack.i.h.bf16 %v11884_v6 }
 0xb28   :  { %3566 = vperm.xlu1 %10017, %v3556_v27   ;;  %10160 = vrot.lane.b32.xlu0 %v14696_v22, %s10461_s6 }
 0xb2c   :  { %10170 = vrot.lane.b32.xlu0 %v14696_v22, %s10489_s15  ;;  %10155 = vrot.lane.b32.xlu1 %v14696_v22, %s10461_s6 }
 0xb30   :  { %10180 = vrot.lane.b32.xlu0 %v14696_v22, %s10473_s29  ;;  %10165 = vrot.lane.b32.xlu1 %v14696_v22, %s10489_s15 }
 0xb34   :  { %10190 = vrot.lane.b32.xlu0 %v14696_v22, %s10472_s25  ;;  %10175 = vrot.lane.b32.xlu1 %v14696_v22, %s10473_s29 }
 0xb38   :  { %10195 = vrot.lane.b32.xlu0 %v14696_v22, %s10487_s13  ;;  %10185 = vrot.lane.b32.xlu1 %v14696_v22, %s10472_s25 }
 0xb3c   :  { %10205 = vrot.lane.b32.xlu0 %v14696_v22, %s10488_s14  ;;  %10200 = vrot.lane.b32.xlu1 %v14696_v22, %s10487_s13 }
 0xb52   :  { %v3421_v40 = vpop.permute.xlu0 %3420  ;;  %v3458_v12 = vpop.permute.xlu1 %3457 }
 0xb53   :  { %v3465_v53 = vsel %vm3461_vm8, %v3458_v12, %v10117_v43  ;;  %v3428_v51 = vsel %vm3424_vm0, %v3421_v40, %v10122_v17  ;;  %v10137_v43 = vunpack.i.l.bf16 %v11886_v55 }
 0xb54   :  { %3591 = vmatprep.subr.mxu0 %v3465_v53 }
 0xb56   :  { %v3419_v26 = vpop.permute.xlu0 %3418  ;;  %v3456_v25 = vpop.permute.xlu1 %3455 }
 0xb57   :  { %v3464_v39 = vsel %vm3461_vm8, %v3456_v25, %v3458_v12  ;;  %v3427_v52 = vsel %vm3424_vm0, %v3419_v26, %v3421_v40  ;;  %v10142_v26 = vunpack.i.l.bf16 %v11888_v37 }
 0xb58   :  { %3592 = vmatpush1.msra.mxu0 %v3464_v39  ;;  %v10143_v39 = vunpack.i.h.bf16 %v11888_v37 }
 0xb5a   :  { %v3341_v0 = vpop.permute.xlu0 %3340  ;;  %v3385_v46 = vpop.permute.xlu1 %3384 }
 0xb5b   :  { %v3391_v60 = vsel %vm524_vm3, %v3385_v46, %v10127_v57  ;;  %v3346_v24 = vsel %vm465_vm4, %v10132_v19, %v3341_v0  ;;  %v3518_v57 = vld [vmem:[%s11841_s7 + $0x38] sm:$0xff] }
 0xb5e   :  { %v11894_v49 = vpop.permute.xlu0 %3305  ;;  %v3383_v33 = vpop.permute.xlu1 %3382 }
 0xb5f   :  { %v3390_v61 = vsel %vm524_vm3, %v3383_v33, %v3385_v46 }
 0xb62   :  { %v11896_v14 = vpop.permute.xlu0 %3266  ;;  %v3343_v7 = vpop.permute.xlu1 %3342 }
 0xb63   :  { %v3347_v27 = vsel %vm465_vm4, %v3341_v0, %v3343_v7  ;;  %v3273_v46 = vsel %vm3270_vm2, %v10142_v26, %v11896_v14  ;;  %v10147_v7 = vunpack.i.l.bf16 %v11890_v42 }
 0xb66   :  { %v11898_v9 = vpop.permute.xlu0 %3231  ;;  %v11900_v44 = vpop.permute.xlu1 %3303 }
 0xb67   :  { %v3310_v12 = vsel %vm3307_vm5, %v10137_v43, %v11900_v44 }
 0xb6a   :  { %v3452_v35 = vpop.permute.xlu0 %3451  ;;  %v11902_v23 = vpop.permute.xlu1 %3268 }
 0xb6b   :  { %v3463_v38 = vsel %vm3461_vm8, %v3452_v35, %v10118_v20 }
 0xb6c   :  { %3593 = vmatprep.subr.mxu0 %v3463_v38 }
 0xb6e   :  { %v11905_v15 = vpop.permute.xlu1 %3229  ;;  %v3413_v8 = vpop.permute.xlu0 %3412 }
 0xb6f   :  { %v3237_v20 = vsel %vm3233_vm7, %v11905_v15, %v11898_v9 }
 0xb72   :  { %v3379_v18 = vpop.permute.xlu0 %3378  ;;  %v3450_v47 = vpop.permute.xlu1 %3449 }
 0xb73   :  { %v3462_v45 = vsel %vm3461_vm8, %v3450_v47, %v3452_v35  ;;  %v3389_v3 = vsel %vm524_vm3, %v3379_v18, %v10128_v59  ;;  %v10148_v35 = vunpack.i.h.bf16 %v11890_v42  ;;  %v3688_v59 = vld [vmem:[%s11984_s5] sm:$0x3] }
 0xb74   :  { %3594 = vmatpush1.msra.mxu0 %v3462_v45 }
 0xb75   :  { %3595 = vmatprep.subr.mxu0 %v3428_v51  ;;  %v3511_v51 = vld [vmem:[%s11841_s7] sm:$0xff] }
 0xb76   :  { %v11910_v30 = vpop.permute.xlu0 %3494  ;;  %3596 = vmatpush1.msra.mxu0 %v3427_v52  ;;  %v3415_v56 = vpop.permute.xlu1 %3414  ;;  %v3513_v52 = vld [vmem:[%s11841_s7 + $0x10] sm:$0xff] }
 0xb77   :  { %v3426_v34 = vsel %vm3424_vm0, %v3415_v56, %v10123_v1  ;;  %v3425_v28 = vsel %vm3424_vm0, %v3413_v8, %v3415_v56  ;;  %v3514_v1 = vld [vmem:[%s11841_s7 + $0x18] sm:$0xff]  ;;  %v3515_v56 = vld [vmem:[%s11841_s7 + $0x20] sm:$0xff] }
 0xb78   :  { %3597 = vmatprep.subr.mxu0 %v3426_v34  ;;  %v3517_v34 = vld [vmem:[%s11841_s7 + $0x30] sm:$0xff] }
 0xb79   :  { %3598 = vmatpush1.msra.mxu0 %v3425_v28 }
 0xb7a   :  { %v3337_v63 = vpop.permute.xlu0 %3336  ;;  %3599 = vmatprep.subr.mxu0 %v3391_v60  ;;  %v3377_v41 = vpop.permute.xlu1 %3376 }
 0xb7b   :  { %v3388_v31 = vsel %vm524_vm3, %v3377_v41, %v3379_v18  ;;  %3600 = vmatpush1.msra.mxu0 %v3390_v61  ;;  %v3693_v41 = vrot.slane %v3688_v59, %v14698_v29 }
 0xb7c   :  { %3601 = vmatprep.subr.mxu0 %v3389_v3 }
 0xb7d   :  { %3602 = vmatpush1.msra.mxu0 %v3388_v31 }
 0xb7e   :  { %v3298_v58 = vpop.permute.xlu0 %3297  ;;  %3603 = vmatprep.subr.mxu0 %v11782_v62  ;;  %v11919_v32 = vpop.permute.xlu1 %10150 }
 0xb7f   :  { %3604 = vmatpush1.msra.mxu0 %v11788_v36  ;;  %v10152_v37 = vunpack.i.l.bf16 %v11919_v32  ;;  %v10153_v17 = vunpack.i.h.bf16 %v11919_v32 }
 0xb80   :  { %3605 = vmatprep.subr.mxu0 %v11810_v10  ;;  %v3311_v10 = vsel %vm3307_vm5, %v11900_v44, %v11894_v49 }
 0xb81   :  { %3606 = vmatpush1.msra.mxu0 %v11816_v5  ;;  %v10138_v5 = vunpack.i.h.bf16 %v11886_v55  ;;  %v3274_v55 = vsel %vm3270_vm2, %v11896_v14, %v11902_v23  ;;  %v3236_v23 = vsel %vm3233_vm7, %v10147_v7, %v11905_v15  ;;  %v3502_v42 = vsel %vm3498_vm6, %v11910_v30, %v10152_v37 }
 0xb82   :  { %v3263_v13 = vpop.permute.xlu0 %3262  ;;  %3607 = vmatprep.subr.mxu0 %v3347_v27  ;;  %v3335_v21 = vpop.permute.xlu1 %3334 }
 0xb83   :  { %3608 = vmatpush1.msra.mxu0 %v3346_v24  ;;  %v3345_v62 = vsel %vm465_vm4, %v3335_v21, %v3337_v63  ;;  %v3344_v36 = vsel %vm465_vm4, %v10133_v4, %v3335_v21  ;;  %v3308_v25 = vsel %vm3307_vm5, %v10138_v5, %v3298_v58  ;;  %v3697_v4 = vrot.slane %v3688_v59, %v14699_v16 }
 0xb84   :  { %3609 = vmatprep.subr.mxu0 %v3345_v62 }
 0xb85   :  { %3610 = vmatpush1.msra.mxu0 %v3344_v36 }
 0xb86   :  { %v3224_v6 = vpop.permute.xlu0 %3223  ;;  %3611 = vmatprep.subr.mxu0 %v3311_v10  ;;  %v3300_v40 = vpop.permute.xlu1 %3299 }
 0xb87   :  { %3612 = vmatpush1.msra.mxu0 %v3310_v12  ;;  %v3309_v53 = vsel %vm3307_vm5, %v3298_v58, %v3300_v40  ;;  %v3234_v8 = vsel %vm3233_vm7, %v10148_v35, %v3224_v6 }
 0xb88   :  { %3613 = vmatprep.subr.mxu0 %v3309_v53 }
 0xb89   :  { %3614 = vmatpush1.msra.mxu0 %v3308_v25 }
 0xb8a   :  { %3615 = vmatprep.subr.mxu0 %v3274_v55  ;;  %v3261_v0 = vpop.permute.xlu1 %3260  ;;  %v3493_v44 = vpop.permute.xlu0 %3492 }
 0xb8b   :  { %3616 = vmatpush1.msra.mxu0 %v3273_v46  ;;  %v3272_v49 = vsel %vm3270_vm2, %v3261_v0, %v3263_v13  ;;  %v3271_v33 = vsel %vm3270_vm2, %v10143_v39, %v3261_v0  ;;  %v3501_v9 = vsel %vm3498_vm6, %v3493_v44, %v11910_v30  ;;  %v3516_v30 = vld [vmem:[%s11841_s7 + $0x28] sm:$0xff] }
 0xb8c   :  { %3617 = vmatprep.subr.mxu0 %v3272_v49 }
 0xb8d   :  { %3618 = vmatpush1.msra.mxu0 %v3271_v33 }
 0xb8e   :  { %3619 = vmatprep.subr.mxu0 %v3237_v20  ;;  %v3226_v14 = vpop.permute.xlu1 %3225  ;;  %v3487_v18 = vpop.permute.xlu0 %3486 }
 0xb8f   :  { %3620 = vmatpush1.msra.mxu0 %v3236_v23  ;;  %v3235_v38 = vsel %vm3233_vm7, %v3224_v6, %v3226_v14 }
 0xb90   :  { %3621 = vmatprep.subr.mxu0 %v3235_v38 }
 0xb91   :  { %3622 = vmatpush1.msra.mxu0 %v3234_v8 }
 0xb92   :  { %v3489_v15 = vpop.permute.xlu1 %3488  ;;  %3651 = vmatprep.subr.mxu0 %v3502_v42 }
 0xb93   :  { %3652 = vmatpush2.msra.mxu0 %v3501_v9  ;;  %v3500_v47 = vsel %vm3498_vm6, %v3489_v15, %v10153_v17  ;;  %v3499_v45 = vsel %vm3498_vm6, %v3487_v18, %v3489_v15 }
 0xb94   :  { %3653 = vmatprep.subr.mxu0 %v3500_v47 }
 0xb95   :  { %3654 = vmatpush2.msra.mxu0 %v3499_v45 }
 0xb96   :  { %3656 = vmatmul.mubr.f32.vlgmr.msra.gmra.mxu0 %v3511_v51 }
 0xb97   :  { %9404 = vmatprep.mubr.msk.f32.mxu0 %vm2837_vm9, %v3514_v1 }
 0xb9a   :  { %3662 = vmatmul.mubr.f32.gmra.mxu0 %v3513_v52 }
 0xb9b   :  { %9405 = vmatprep.mubr.msk.f32.mxu0 %vm2837_vm9, %v3516_v30  ;;  %v3572_v28 = vpop.permute.xlu0 %3571 }
 0xb9e   :  { %3668 = vmatmul.mubr.f32.gmra.mxu0 %v3515_v56 }
 0xb9f   :  { %9406 = vmatprep.mubr.msk.f32.mxu0 %vm2837_vm9, %v3518_v57  ;;  %v3562_v60 = vpop.permute.xlu0 %3561  ;;  %v3577_v13 = vpop.permute.xlu1 %3576 }
 0xba2   :  { %3674 = vmatmul.mubr.f32.gmra.mxu0 %v3517_v34 }
 0xba3   :  { %4582 = vmatprep.mubr.f32.mxu0 %v14696_v22  ;;  %v3567_v62 = vpop.permute.xlu1 %3566  ;;  %v12085_v23 = vpop.permute.xlu0 %10160 }
 0xba7   :  { %v12095_v38 = vpop.permute.xlu0 %10170  ;;  %v12097_v8 = vpop.permute.xlu1 %10155 }
 0xbab   :  { %v12103_v17 = vpop.permute.xlu0 %10180  ;;  %v12105_v42 = vpop.permute.xlu1 %10165 }
 0xbaf   :  { %v12115_v9 = vpop.permute.xlu0 %10190  ;;  %v12117_v18 = vpop.permute.xlu1 %10175 }
 0xbb3   :  { %v12123_v15 = vpop.permute.xlu0 %10195  ;;  %v12125_v47 = vpop.permute.xlu1 %10185 }
 0xbb7   :  { %v12135_v45 = vpop.permute.xlu0 %10205  ;;  %v12137_v51 = vpop.permute.xlu1 %10200 }
 0xc56   :  { %v3657_v61 = vpop.f32.mrf.mxu0 }
 0xc57   :  { %v3658_v63 = vadd.f32 %v3657_v61, %v3562_v60 }
 0xc58   :  { %v3659_v31 = vpop.f32.mrf.mxu0 }
 0xc59   :  { %v3680_v3 = vmax.f32 %v3658_v63, 0.0  ;;  %v3660_v58 = vadd.f32 %v3659_v31, %v3562_v60 }
 0xc5a   :  { %v3663_v21 = vpop.f32.mrf.mxu0 }
 0xc5b   :  { %v11988_v32 = vmul.f32 %v3693_v41, %v3680_v3  ;;  %v3681_v19 = vmax.f32 %v3660_v58, 0.0  ;;  %v3664_v36 = vadd.f32 %v3663_v21, %v3567_v62  ;;  %v4392_v58 = vld [vmem:[%s9373_s8] sm:$0xff]  ;;  %v4393_v21 = vld [vmem:[%s9373_s8 + $0x8] sm:$0xff] }
 0xc5c   :  { %v3665_v24 = vpop.f32.mrf.mxu0 }
 0xc5d   :  { %14700 = vst [vmem:[#allocation23_spill] sm:$0xff] %v11988_v32  ;;  %4188 = vrot.lane.b32.xlu0 %v11988_v32, %s10487_s13  ;;  %3958 = vrot.lane.b32.xlu1 %v11988_v32, %s10461_s6  ;;  %v11995_v27 = vmul.f32 %v3697_v4, %v3681_v19  ;;  %v3666_v43 = vadd.f32 %v3665_v24, %v3567_v62  ;;  %v3682_v10 = vmax.f32 %v3664_v36, 0.0  ;;  %v4395_v19 = vld [vmem:[%s9373_s8 + $0x18] sm:$0xff] }
 0xc5e   :  { %v3669_v12 = vpop.f32.mrf.mxu0 }
 0xc5f   :  { %14701 = vst [vmem:[#allocation24_spill] sm:$0xff] %v11995_v27  ;;  %v3683_v5 = vmax.f32 %v3666_v43, 0.0  ;;  %v12013_v6 = vmul.f32 %v3693_v41, %v3682_v10  ;;  %v3670_v53 = vadd.f32 %v3669_v12, %v3572_v28  ;;  %v4995_v10 = vld [vmem:[%s9375_s11 + $0x8] sm:$0xff] }
 0xc60   :  { %v3671_v26 = vpop.f32.mrf.mxu0 }
 0xc61   :  { %3960 = vrot.lane.b32.xlu0 %v11995_v27, %s10461_s6  ;;  %3886 = vrot.lane.b32.xlu1 %v11988_v32, %s10489_s15  ;;  %v12015_v40 = vmul.f32 %v3697_v4, %v3683_v5  ;;  %v3684_v25 = vmax.f32 %v3670_v53, 0.0  ;;  %v3672_v39 = vadd.f32 %v3671_v26, %v3572_v28  ;;  %v5216_v53 = vld [vmem:[%s9375_s11] sm:$0xff] }
 0xc62   :  { %v3675_v49 = vpop.f32.mrf.mxu0 }
 0xc63   :  { %v12033_v55 = vmul.f32 %v3693_v41, %v3684_v25  ;;  %v3685_v0 = vmax.f32 %v3672_v39, 0.0  ;;  %v3676_v33 = vadd.f32 %v3675_v49, %v3577_v13 }
 0xc64   :  { %v3677_v44 = vpop.f32.mrf.mxu0 }
 0xc65   :  { %3888 = vrot.lane.b32.xlu0 %v11995_v27, %s10489_s15  ;;  %3814 = vrot.lane.b32.xlu1 %v11988_v32, %s10473_s29  ;;  %v12039_v46 = vmul.f32 %v3697_v4, %v3685_v0  ;;  %v3686_v7 = vmax.f32 %v3676_v33, 0.0  ;;  %v3678_v20 = vadd.f32 %v3677_v44, %v3577_v13 }
 0xc67   :  { %v12057_v37 = vmul.f32 %v3693_v41, %v3686_v7  ;;  %v3687_v35 = vmax.f32 %v3678_v20, 0.0  ;;  %v4394_v41 = vld [vmem:[%s9373_s8 + $0x10] sm:$0xff] }
 0xc69   :  { %3816 = vrot.lane.b32.xlu0 %v11995_v27, %s10473_s29  ;;  %3742 = vrot.lane.b32.xlu1 %v11988_v32, %s10472_s25  ;;  %v12067_v14 = vmul.f32 %v3697_v4, %v3687_v35 }
 0xc6d   :  { %3744 = vrot.lane.b32.xlu0 %v11995_v27, %s10472_s25  ;;  %4190 = vrot.lane.b32.xlu1 %v11995_v27, %s10487_s13 }
 0xc71   :  { %3964 = vrot.lane.b32.xlu0 %v12013_v6, %s10461_s6  ;;  %3966 = vrot.lane.b32.xlu1 %v12015_v40, %s10461_s6 }
 0xc75   :  { %3892 = vrot.lane.b32.xlu0 %v12013_v6, %s10489_s15  ;;  %3894 = vrot.lane.b32.xlu1 %v12015_v40, %s10489_s15 }
 0xc79   :  { %3820 = vrot.lane.b32.xlu0 %v12013_v6, %s10473_s29  ;;  %3822 = vrot.lane.b32.xlu1 %v12015_v40, %s10473_s29 }
 0xc7d   :  { %3748 = vrot.lane.b32.xlu0 %v12013_v6, %s10472_s25  ;;  %3750 = vrot.lane.b32.xlu1 %v12015_v40, %s10472_s25 }
 0xc81   :  { %4194 = vrot.lane.b32.xlu0 %v12013_v6, %s10487_s13  ;;  %4200 = vrot.lane.b32.xlu1 %v12033_v55, %s10487_s13 }
 0xc85   :  { %4196 = vrot.lane.b32.xlu0 %v12015_v40, %s10487_s13  ;;  %3972 = vrot.lane.b32.xlu1 %v12039_v46, %s10461_s6 }
 0xc89   :  { %3970 = vrot.lane.b32.xlu0 %v12033_v55, %s10461_s6  ;;  %3900 = vrot.lane.b32.xlu1 %v12039_v46, %s10489_s15 }
 0xc8d   :  { %3898 = vrot.lane.b32.xlu0 %v12033_v55, %s10489_s15  ;;  %3828 = vrot.lane.b32.xlu1 %v12039_v46, %s10473_s29 }
 0xc91   :  { %3826 = vrot.lane.b32.xlu0 %v12033_v55, %s10473_s29  ;;  %3756 = vrot.lane.b32.xlu1 %v12039_v46, %s10472_s25 }
 0xc95   :  { %3754 = vrot.lane.b32.xlu0 %v12033_v55, %s10472_s25  ;;  %3976 = vrot.lane.b32.xlu1 %v12057_v37, %s10461_s6 }
 0xc99   :  { %4202 = vrot.lane.b32.xlu0 %v12039_v46, %s10487_s13  ;;  %3904 = vrot.lane.b32.xlu1 %v12057_v37, %s10489_s15 }
 0xc9d   :  { %3978 = vrot.lane.b32.xlu0 %v12067_v14, %s10461_s6  ;;  %3832 = vrot.lane.b32.xlu1 %v12057_v37, %s10473_s29 }
 0xca1   :  { %4130 = vrot.lane.b32.xlu0 %v12039_v46, %s10488_s14  ;;  %3760 = vrot.lane.b32.xlu1 %v12057_v37, %s10472_s25 }
 0xca5   :  { %3906 = vrot.lane.b32.xlu0 %v12067_v14, %s10489_s15  ;;  %4206 = vrot.lane.b32.xlu1 %v12057_v37, %s10487_s13 }
 0xca9   :  { %4124 = vrot.lane.b32.xlu0 %v12015_v40, %s10488_s14  ;;  %4134 = vrot.lane.b32.xlu1 %v12057_v37, %s10488_s14 }
 0xcad   :  { %3834 = vrot.lane.b32.xlu0 %v12067_v14, %s10473_s29  ;;  %4128 = vrot.lane.b32.xlu1 %v12033_v55, %s10488_s14 }
 0xcb1   :  { %4122 = vrot.lane.b32.xlu0 %v12013_v6, %s10488_s14  ;;  %10210 = vrot.lane.b32.xlu1 %v14696_v22, %s10488_s14 }
 0xcb5   :  { %3762 = vrot.lane.b32.xlu0 %v12067_v14, %s10472_s25  ;;  %4118 = vrot.lane.b32.xlu1 %v11995_v27, %s10488_s14  ;;  %s10493_s25 = smov 16  }
 0xcb6   :  { %s12154_s15 = sld [smem:[%s14628_s0 + %s10493_s25]]  }
 0xcb9   :  { %4116 = vrot.lane.b32.xlu0 %v11988_v32, %s10488_s14  ;;  %4062 = vrot.lane.b32.xlu1 %v12057_v37, %s10471_s24 }
 0xcbc   :  { %v4309_v28 = vld [vmem:[%s12154_s15 + $0x8] sm:$0xff] }
 0xcbd   :  { %10215 = vrot.lane.b32.xlu0 %v14696_v22, %s10471_s24  ;;  %4056 = vrot.lane.b32.xlu1 %v12033_v55, %s10471_s24 }
 0xcbe   :  { %4493 = vmatprep.mubr.f32.mxu1 %v4309_v28 }
 0xcc1   :  { %4058 = vrot.lane.b32.xlu0 %v12039_v46, %s10471_s24  ;;  %10220 = vrot.lane.b32.xlu1 %v14696_v22, %s10471_s24 }
 0xcc5   :  { %4052 = vrot.lane.b32.xlu0 %v12015_v40, %s10471_s24  ;;  %4208 = vrot.lane.b32.xlu1 %v12067_v14, %s10487_s13 }
 0xcc9   :  { %4050 = vrot.lane.b32.xlu0 %v12013_v6, %s10471_s24  ;;  %4046 = vrot.lane.b32.xlu1 %v11995_v27, %s10471_s24 }
 0xccd   :  { %4044 = vrot.lane.b32.xlu0 %v11988_v32, %s10471_s24  ;;  %4136 = vrot.lane.b32.xlu1 %v12067_v14, %s10488_s14 }
 0xccf   :  { %v12143_v1 = vpop.permute.xlu0 %4188  ;;  %v12145_v52 = vpop.permute.xlu1 %3958 }
 0xcd1   :  { %10225 = vrot.lane.b32.xlu0 %v14696_v22, %s10490_s1  ;;  %4278 = vrot.lane.b32.xlu1 %v12057_v37, %s10490_s1 }
 0xcd3   :  { %v12156_v30 = vpop.permute.xlu0 %3960  ;;  %v12158_v56 = vpop.permute.xlu1 %3886 }
 0xcd5   :  { %4274 = vrot.lane.b32.xlu0 %v12039_v46, %s10490_s1  ;;  %4064 = vrot.lane.b32.xlu1 %v12067_v14, %s10471_s24 }
 0xcd7   :  { %v12164_v57 = vpop.permute.xlu0 %3888  ;;  %v12166_v34 = vpop.permute.xlu1 %3814 }
 0xcd9   :  { %4268 = vrot.lane.b32.xlu0 %v12015_v40, %s10490_s1  ;;  %4272 = vrot.lane.b32.xlu1 %v12033_v55, %s10490_s1 }
 0xcdb   :  { %v12177_v59 = vpop.permute.xlu0 %3816  ;;  %v12179_v60 = vpop.permute.xlu1 %3742 }
 0xcdd   :  { %4266 = vrot.lane.b32.xlu0 %v12013_v6, %s10490_s1  ;;  %4280 = vrot.lane.b32.xlu1 %v12067_v14, %s10490_s1 }
 0xcdf   :  { %v12185_v61 = vpop.permute.xlu0 %3744  ;;  %v12187_v63 = vpop.permute.xlu1 %4190 }
 0xce1   :  { %4260 = vrot.lane.b32.xlu0 %v11988_v32, %s10490_s1  ;;  %10230 = vrot.lane.b32.xlu1 %v14696_v22, %s10490_s1 }
 0xce3   :  { %v12193_v31 = vpop.permute.xlu0 %3964  ;;  %v12195_v3 = vpop.permute.xlu1 %3966 }
 0xce5   :  { %4408 = vperm.xlu0 %10018, %v4394_v41   ;;  %4262 = vrot.lane.b32.xlu1 %v11995_v27, %s10490_s1  ;;  %s10494_s1 = smov 34  }
 0xce6   :  { %s12483_s25 = sld [smem:[%s14628_s0 + %s10494_s1]]  }
 0xce7   :  { %v12199_v4 = vpop.permute.xlu0 %3892  ;;  %v12201_v13 = vpop.permute.xlu1 %3894  ;;  %s9377_s1 = sld [smem:[%s14628_s0 + %s10496_s9]]   ;;  %s10501_s9 = smov 24  }
 0xce9   :  { %4398 = vperm.xlu0 %10018, %v4392_v58   ;;  %4413 = vperm.xlu1 %10017, %v4395_v19  }
 0xceb   :  { %v12207_v24 = vpop.permute.xlu0 %3820  ;;  %v12209_v62 = vpop.permute.xlu1 %3822 }
 0xced   :  { %10240 = vrot.lane.b32.xlu0 %v14696_v22, %s10461_s6  ;;  %4403 = vperm.xlu1 %10017, %v4393_v21   ;;  %v10157_v21 = vunpack.i.l.bf16 %v12097_v8 }
 0xcef   :  { %v12213_v36 = vpop.permute.xlu0 %3748  ;;  %v12215_v43 = vpop.permute.xlu1 %3750 }
 0xcf1   :  { %10245 = vrot.lane.b32.xlu0 %v14696_v22, %s10481_s28  ;;  %10235 = vrot.lane.b32.xlu1 %v14696_v22, %s10461_s6 }
 0xcf3   :  { %v12221_v5 = vpop.permute.xlu0 %4194  ;;  %v12223_v12 = vpop.permute.xlu1 %4200 }
 0xcf5   :  { %5003 = vperm.xlu0 %10018, %v4995_v10   ;;  %5225 = vperm.xlu1 %10017, %v4995_v10  }
 0xcf7   :  { %v12225_v26 = vpop.permute.xlu0 %4196  ;;  %v3973_v25 = vpop.permute.xlu1 %3972 }
 0xcf9   :  { %10250 = vrot.lane.b32.xlu0 %v14696_v22, %s10481_s28  ;;  %5220 = vperm.xlu1 %10017, %v5216_v53  }
 0xcfb   :  { %v3971_v39 = vpop.permute.xlu0 %3970  ;;  %v3901_v0 = vpop.permute.xlu1 %3900 }
 0xcfc   :  { %v3985_v16 = vsel %vm465_vm4, %v3971_v39, %v3973_v25 }
 0xcfd   :  { %10255 = vrot.lane.b32.xlu0 %v14696_v22, %s10482_s30  ;;  %5500 = vrot.lane.b32.xlu1 %v11717_v50, %s10461_s6 }
 0xcff   :  { %v3899_v49 = vpop.permute.xlu0 %3898  ;;  %v12233_v33 = vpop.permute.xlu1 %3828 }
 0xd01   :  { %4998 = vperm.xlu0 %10018, %v5216_v53   ;;  %10265 = vrot.lane.b32.xlu1 %v14696_v22, %s10461_s6  ;;  %v10158_v53 = vunpack.i.h.bf16 %v12097_v8  ;;  %v3983_v8 = vsel %vm465_vm4, %v12193_v31, %v12195_v3 }
 0xd03   :  { %v12237_v7 = vpop.permute.xlu0 %3826  ;;  %v12239_v44 = vpop.permute.xlu1 %3756  ;;  %v3984_v27 = vsel %vm465_vm4, %v10158_v53, %v3971_v39 }
 0xd05   :  { %10260 = vrot.lane.b32.xlu0 %v14696_v22, %s10482_s30  ;;  %5496 = vrot.lane.b32.xlu1 %v11715_v54, %s10461_s6 }
 0xd07   :  { %v12245_v20 = vpop.permute.xlu0 %3754  ;;  %v3977_v35 = vpop.permute.xlu1 %3976 }
 0xd08   :  { %v3986_v11 = vsel %vm465_vm4, %v10157_v21, %v3977_v35 }
 0xd09   :  { %5502 = vrot.lane.b32.xlu0 %v11728_v48, %s10461_s6  ;;  %5428 = vrot.lane.b32.xlu1 %v11717_v50, %s10474_s3 }
 0xd0b   :  { %v12251_v28 = vpop.permute.xlu0 %4202  ;;  %v3905_v41 = vpop.permute.xlu1 %3904 }
 0xd0d   :  { %5494 = vrot.lane.b32.xlu0 %v11726_v2, %s10461_s6  ;;  %10275 = vrot.lane.b32.xlu1 %v14696_v22, %s10474_s3 }
 0xd0f   :  { %v3979_v58 = vpop.permute.xlu0 %3978  ;;  %v3833_v19 = vpop.permute.xlu1 %3832 }
 0xd10   :  { %v3987_v10 = vsel %vm465_vm4, %v3977_v35, %v3979_v58  ;;  %v10162_v58 = vunpack.i.l.bf16 %v12085_v23  ;;  %v10167_v35 = vunpack.i.l.bf16 %v12105_v42 }
 0xd11   :  { %10270 = vrot.lane.b32.xlu0 %v14696_v22, %s10461_s6  ;;  %5424 = vrot.lane.b32.xlu1 %v11715_v54, %s10474_s3 }
 0xd12   :  { %4429 = vmatprep.subr.mxu1 %v3987_v10  ;;  %v3982_v25 = vsel %vm465_vm4, %v10162_v58, %v12193_v31  ;;  %v10168_v31 = vunpack.i.h.bf16 %v12105_v42  ;;  %v3914_v21 = vsel %vm3307_vm5, %v10167_v35, %v3905_v41  ;;  %v3913_v10 = vsel %vm3307_vm5, %v3899_v49, %v3901_v0 }
 0xd13   :  { %4430 = vmatpush1.msra.mxu1 %v3986_v11  ;;  %v12265_v29 = vpop.permute.xlu0 %4130  ;;  %v12268_v32 = vpop.permute.xlu1 %3760  ;;  %v10163_v11 = vunpack.i.h.bf16 %v12085_v23  ;;  %v3911_v42 = vsel %vm3307_vm5, %v12199_v4, %v12201_v13 }
 0xd14   :  { %4431 = vmatprep.subr.mxu1 %v3985_v16  ;;  %v3912_v58 = vsel %vm3307_vm5, %v10168_v31, %v3899_v49  ;;  %v3909_v49 = vsel %vm3307_vm5, %v12158_v56, %v12164_v57  ;;  %v3837_v31 = vsel %vm3270_vm2, %v12166_v34, %v12177_v59 }
 0xd15   :  { %4432 = vmatpush1.msra.mxu1 %v3984_v27  ;;  %5430 = vrot.lane.b32.xlu0 %v11728_v48, %s10474_s3  ;;  %v3981_v27 = vsel %vm465_vm4, %v12145_v52, %v12156_v30  ;;  %v3980_v23 = vsel %vm465_vm4, %v10163_v11, %v12145_v52  ;;  %v10172_v52 = vunpack.i.l.bf16 %v12095_v38 }
 0xd16   :  { %5356 = vrot.lane.b32.xlu1 %v11717_v50, %s10481_s28  ;;  %4433 = vmatprep.subr.mxu1 %v3983_v8 }
 0xd17   :  { %4434 = vmatpush1.msra.mxu1 %v3982_v25  ;;  %v3907_v16 = vpop.permute.xlu0 %3906  ;;  %v12285_v39 = vpop.permute.xlu1 %4206  ;;  %v3910_v0 = vsel %vm3307_vm5, %v10172_v52, %v12199_v4  ;;  %v10177_v25 = vunpack.i.l.bf16 %v12117_v18  ;;  %v10178_v4 = vunpack.i.h.bf16 %v12117_v18  ;;  %v3839_v18 = vsel %vm3270_vm2, %v12207_v24, %v12209_v62 }
 0xd18   :  { %4435 = vmatprep.subr.mxu1 %v3981_v27  ;;  %v3915_v3 = vsel %vm3307_vm5, %v3905_v41, %v3907_v16  ;;  %v10173_v41 = vunpack.i.h.bf16 %v12095_v38  ;;  %v3841_v27 = vsel %vm3270_vm2, %v12237_v7, %v12233_v33  ;;  %v3769_v52 = vsel %vm3233_vm7, %v12245_v20, %v12239_v44 }
 0xd19   :  { %4436 = vmatpush1.msra.mxu1 %v3980_v23  ;;  %5422 = vrot.lane.b32.xlu0 %v11726_v2, %s10474_s3  ;;  %v3842_v16 = vsel %vm3270_vm2, %v10177_v25, %v3833_v19  ;;  %v3840_v23 = vsel %vm3270_vm2, %v10178_v4, %v12237_v7  ;;  %v10187_v7 = vunpack.i.l.bf16 %v12125_v47 }
 0xd1a   :  { %4437 = vmatprep.subr.mxu1 %v3915_v3  ;;  %v3908_v13 = vsel %vm3307_vm5, %v10173_v41, %v12158_v56  ;;  %v10182_v56 = vunpack.i.l.bf16 %v12103_v17  ;;  %vm14723_vm5 = vcmask 154624  }
 0xd1b   :  { %4438 = vmatpush1.msra.mxu1 %v3914_v21  ;;  %v12295_v30 = vpop.permute.xlu0 %4124  ;;  %v12298_v53 = vpop.permute.xlu1 %4134 }
 0xd1c   :  { %4439 = vmatprep.subr.mxu1 %v3913_v10  ;;  %v3838_v3 = vsel %vm3270_vm2, %v10182_v56, %v12207_v24  ;;  %v10188_v24 = vunpack.i.h.bf16 %v12125_v47  ;;  %v3770_v10 = vsel %vm3233_vm7, %v10187_v7, %v12268_v32  ;;  %v10193_v47 = vunpack.i.h.bf16 %v12115_v9 }
 0xd1d   :  { %4440 = vmatpush1.msra.mxu1 %v3912_v58  ;;  %10280 = vrot.lane.b32.xlu0 %v14696_v22, %s10474_s3  ;;  %v4216_v56 = vsel %vm3461_vm8, %v12223_v12, %v12251_v28 }
 0xd1e   :  { %4441 = vmatprep.subr.mxu1 %v3911_v42  ;;  %v3768_v42 = vsel %vm3233_vm7, %v10188_v24, %v12245_v20  ;;  %v3764_v20 = vsel %vm3233_vm7, %v10193_v47, %v12179_v60 }
 0xd1f   :  { %4442 = vmatpush1.msra.mxu1 %v3910_v0  ;;  %v3835_v8 = vpop.permute.xlu0 %3834  ;;  %v12313_v11 = vpop.permute.xlu1 %4128  ;;  %v3765_v0 = vsel %vm3233_vm7, %v12179_v60, %v12185_v61  ;;  %v10202_v60 = vunpack.i.l.bf16 %v12137_v51 }
 0xd20   :  { %4443 = vmatprep.subr.mxu1 %v3909_v49  ;;  %v3843_v38 = vsel %vm3270_vm2, %v3833_v19, %v3835_v8  ;;  %v10183_v19 = vunpack.i.h.bf16 %v12103_v17  ;;  %v4144_v7 = vsel %vm3424_vm0, %v12313_v11, %v12265_v29 }
 0xd21   :  { %4444 = vmatpush1.msra.mxu1 %v3908_v13  ;;  %5358 = vrot.lane.b32.xlu0 %v11728_v48, %s10481_s28  ;;  %v10198_v13 = vunpack.i.h.bf16 %v12123_v15 }
 0xd22   :  { %4445 = vmatprep.subr.mxu1 %v3843_v38  ;;  %v3836_v62 = vsel %vm3270_vm2, %v10183_v19, %v12166_v34  ;;  %v10192_v34 = vunpack.i.l.bf16 %v12115_v9  ;;  %vm14722_vm2 = vcmask 146432  }
 0xd23   :  { %4446 = vmatpush1.msra.mxu1 %v3842_v16  ;;  %v12323_v57 = vpop.permute.xlu0 %4122  ;;  %v12328_v35 = vpop.permute.xlu1 %10210  ;;  %v4217_v4 = vsel %vm3461_vm8, %v12251_v28, %v10198_v13  ;;  %v10208_v28 = vunpack.i.h.bf16 %v12135_v45 }
 0xd24   :  { %4447 = vmatprep.subr.mxu1 %v3841_v27  ;;  %v3766_v41 = vsel %vm3233_vm7, %v10192_v34, %v12213_v36 }
 0xd25   :  { %4448 = vmatpush1.msra.mxu1 %v3840_v23  ;;  %v4214_v23 = vsel %vm3461_vm8, %v12221_v5, %v12225_v26 }
 0xd26   :  { %4449 = vmatprep.subr.mxu1 %v3839_v18  ;;  %v10207_v18 = vunpack.i.l.bf16 %v12135_v45 }
 0xd27   :  { %4450 = vmatpush1.msra.mxu1 %v3838_v3  ;;  %v3763_v33 = vpop.permute.xlu0 %3762  ;;  %v12342_v21 = vpop.permute.xlu1 %4118 }
 0xd28   :  { %4451 = vmatprep.subr.mxu1 %v3837_v31  ;;  %v3771_v17 = vsel %vm3233_vm7, %v12268_v32, %v3763_v33  ;;  %v3767_v32 = vsel %vm3233_vm7, %v12213_v36, %v12215_v43  ;;  %v10197_v36 = vunpack.i.l.bf16 %v12123_v15  ;;  %v10203_v15 = vunpack.i.h.bf16 %v12137_v51  ;;  %vm14725_vm7 = vmmov %vm14722_vm2 }
 0xd29   :  { %4452 = vmatpush1.msra.mxu1 %v3836_v62  ;;  %v4212_v51 = vsel %vm3461_vm8, %v12143_v1, %v12187_v63  ;;  %v10212_v33 = vunpack.i.l.bf16 %v12328_v35  ;;  %v4145_v31 = vsel %vm3424_vm0, %v12265_v29, %v10208_v28  ;;  %v12486_v28 = vld [vmem:[%s12483_s25 + $0x78] sm:$0xff] }
 0xd2a   :  { %4453 = vmatprep.subr.mxu1 %v3771_v17  ;;  %v4213_v19 = vsel %vm3461_vm8, %v12187_v63, %v10203_v15  ;;  %v10213_v63 = vunpack.i.h.bf16 %v12328_v35  ;;  %v4311_v15 = vld [vmem:[%s12154_s15 + $0x18] sm:$0xff] }
 0xd2b   :  { %4454 = vmatpush1.msra.mxu1 %v3770_v10  ;;  %v12352_v59 = vpop.permute.xlu0 %4116  ;;  %v12357_v58 = vpop.permute.xlu1 %4062  ;;  %v4143_v62 = vsel %vm3424_vm0, %v12295_v30, %v10212_v33  ;;  %v12490_v33 = vld [vmem:[%s12483_s25 + $0x70] sm:$0xff] }
 0xd2c   :  { %4455 = vmatprep.subr.mxu1 %v3769_v52  ;;  %v4141_v29 = vsel %vm3424_vm0, %v12342_v21, %v10213_v63  ;;  %v4140_v11 = vsel %vm3424_vm0, %v12352_v59, %v12342_v21  ;;  %v12525_v63 = vld [vmem:[%s12483_s25 + $0x38] sm:$0xff] }
 0xd2d   :  { %4456 = vmatpush1.msra.mxu1 %v3768_v42 }
 0xd2e   :  { %4457 = vmatprep.subr.mxu1 %v3767_v32 }
 0xd2f   :  { %4458 = vmatpush1.msra.mxu1 %v3766_v41  ;;  %v12368_v44 = vpop.permute.xlu0 %10215  ;;  %v12373_v8 = vpop.permute.xlu1 %4056 }
 0xd30   :  { %4459 = vmatprep.subr.mxu1 %v3765_v0  ;;  %v10218_v17 = vunpack.i.h.bf16 %v12368_v44  ;;  %v10217_v24 = vunpack.i.l.bf16 %v12368_v44 }
 0xd31   :  { %4460 = vmatpush1.msra.mxu1 %v3764_v20 }
 0xd33   :  { %v12377_v43 = vpop.permute.xlu0 %4058  ;;  %v12379_v9 = vpop.permute.xlu1 %10220 }
 0xd34   :  { %v4073_v34 = vsel %vm524_vm3, %v12377_v43, %v10218_v17  ;;  %v4072_v21 = vsel %vm524_vm3, %v12373_v8, %v12377_v43  ;;  %v10223_v59 = vunpack.i.h.bf16 %v12379_v9  ;;  %v12540_v17 = vld [vmem:[%s12483_s25 + $0x20] sm:$0xff] }
 0xd37   :  { %v12382_v49 = vpop.permute.xlu0 %4052  ;;  %v4209_v25 = vpop.permute.xlu1 %4208 }
 0xd38   :  { %v4219_v61 = vsel %vm3461_vm8, %v4209_v25, %v10197_v36  ;;  %v4218_v38 = vsel %vm3461_vm8, %v12285_v39, %v4209_v25  ;;  %v4215_v39 = vsel %vm3461_vm8, %v12225_v26, %v10202_v60  ;;  %vm14726_vm8 = vmmov %vm14723_vm5 }
 0xd39   :  { %4461 = vmatprep.subr.mxu1 %v4219_v61 }
 0xd3a   :  { %4462 = vmatpush2.msra.mxu1 %v4218_v38  ;;  %v4308_v38 = vld [vmem:[%s12154_s15] sm:$0xff] }
 0xd3b   :  { %v4051_v16 = vpop.permute.xlu0 %4050  ;;  %4463 = vmatprep.subr.mxu1 %v4217_v4  ;;  %v4047_v27 = vpop.permute.xlu1 %4046 }
 0xd3c   :  { %4464 = vmatpush2.msra.mxu1 %v4216_v56  ;;  %v4070_v47 = vsel %vm524_vm3, %v4051_v16, %v12382_v49  ;;  %v4069_v0 = vsel %vm524_vm3, %v4047_v27, %v10223_v59  ;;  %v4310_v56 = vld [vmem:[%s12154_s15 + $0x10] sm:$0xff] }
 0xd3d   :  { %4465 = vmatprep.subr.mxu1 %v4215_v39  ;;  %v4315_v39 = vld [vmem:[%s12154_s15 + $0x38] sm:$0xff] }
 0xd3e   :  { %4466 = vmatpush2.msra.mxu1 %v4214_v23  ;;  %v4313_v23 = vld [vmem:[%s12154_s15 + $0x28] sm:$0xff] }
 0xd3f   :  { %v4045_v3 = vpop.permute.xlu0 %4044  ;;  %4467 = vmatprep.subr.mxu1 %v4213_v19  ;;  %v4137_v12 = vpop.permute.xlu1 %4136  ;;  %v4318_v19 = vld [vmem:[%s12154_s15 + $0x50] sm:$0xff] }
 0xd40   :  { %4468 = vmatpush2.msra.mxu1 %v4212_v51  ;;  %v4147_v5 = vsel %vm3424_vm0, %v4137_v12, %v10207_v18  ;;  %v4146_v26 = vsel %vm3424_vm0, %v12298_v53, %v4137_v12  ;;  %v4142_v53 = vsel %vm3424_vm0, %v12323_v57, %v12295_v30  ;;  %v10222_v57 = vunpack.i.l.bf16 %v12379_v9  ;;  %v4314_v18 = vld [vmem:[%s12154_s15 + $0x30] sm:$0xff]  ;;  %v4317_v12 = vld [vmem:[%s12154_s15 + $0x48] sm:$0xff]  ;;  %v4319_v51 = vld [vmem:[%s12154_s15 + $0x58] sm:$0xff] }
 0xd41   :  { %4469 = vmatprep.subr.mxu1 %v4147_v5  ;;  %v4068_v20 = vsel %vm524_vm3, %v4045_v3, %v4047_v27  ;;  %v14702_v27 = vld [vmem:[#allocation24_spill] sm:$0xff]  ;;  %vm4416_vm0 = vcmask 261120   ;;  %v4316_v3 = vld [vmem:[%s12154_s15 + $0x40] sm:$0xff]  ;;  %v12495_v5 = vld [vmem:[%s12483_s25 + $0x68] sm:$0xff] }
 0xd42   :  { %4470 = vmatpush2.msra.mxu1 %v4146_v26  ;;  %v12500_v26 = vld [vmem:[%s12483_s25 + $0x60] sm:$0xff] }
 0xd43   :  { %v10226_v1 = vpop.permute.xlu0 %10225  ;;  %4471 = vmatprep.subr.mxu1 %v4145_v31  ;;  %v4279_v45 = vpop.permute.xlu1 %4278  ;;  %v12505_v31 = vld [vmem:[%s12483_s25 + $0x58] sm:$0xff] }
 0xd44   :  { %4472 = vmatpush2.msra.mxu1 %v4144_v7  ;;  %v10228_v41 = vunpack.i.h.bf16 %v10226_v1  ;;  %v10227_v44 = vunpack.i.l.bf16 %v10226_v1  ;;  %v12510_v7 = vld [vmem:[%s12483_s25 + $0x50] sm:$0xff]  ;;  %v12515_v1 = vld [vmem:[%s12483_s25 + $0x48] sm:$0xff] }
 0xd45   :  { %4473 = vmatprep.subr.mxu1 %v4143_v62  ;;  %v12530_v62 = vld [vmem:[%s12483_s25 + $0x30] sm:$0xff] }
 0xd46   :  { %4474 = vmatpush2.msra.mxu1 %v4142_v53  ;;  %v12535_v53 = vld [vmem:[%s12483_s25 + $0x28] sm:$0xff] }
 0xd47   :  { %v4275_v35 = vpop.permute.xlu0 %4274  ;;  %v4065_v10 = vpop.permute.xlu1 %4064  ;;  %4475 = vmatprep.subr.mxu1 %v4141_v29  ;;  %v12550_v29 = vld [vmem:[%s12483_s25 + $0x10] sm:$0xff] }
 0xd48   :  { %4476 = vmatpush2.msra.mxu1 %v4140_v11  ;;  %v4075_v52 = vsel %vm524_vm3, %v4065_v10, %v10217_v24  ;;  %v4074_v30 = vsel %vm524_vm3, %v12357_v58, %v4065_v10  ;;  %v4071_v58 = vsel %vm524_vm3, %v12382_v49, %v10222_v57  ;;  %v4289_v49 = vsel %vm3498_vm6, %v4275_v35, %v10228_v41  ;;  %v12545_v24 = vld [vmem:[%s12483_s25 + $0x18] sm:$0xff]  ;;  %v12555_v11 = vld [vmem:[%s12483_s25 + $0x8] sm:$0xff] }
 0xd49   :  { %4477 = vmatprep.subr.mxu1 %v4075_v52 }
 0xd4a   :  { %4478 = vmatpush2.msra.mxu1 %v4074_v30 }
 0xd4b   :  { %v4269_v42 = vpop.permute.xlu0 %4268  ;;  %v4273_v32 = vpop.permute.xlu1 %4272  ;;  %4479 = vmatprep.subr.mxu1 %v4073_v34 }
 0xd4c   :  { %4480 = vmatpush2.msra.mxu1 %v4072_v21  ;;  %v4288_v25 = vsel %vm3498_vm6, %v4273_v32, %v4275_v35  ;;  %v12560_v35 = vld [vmem:[%s12483_s25] sm:$0xff] }
 0xd4d   :  { %4481 = vmatprep.subr.mxu1 %v4071_v58 }
 0xd4e   :  { %4482 = vmatpush2.msra.mxu1 %v4070_v47 }
 0xd4f   :  { %v4281_v36 = vpop.permute.xlu1 %4280  ;;  %4483 = vmatprep.subr.mxu1 %v4069_v0  ;;  %v4267_v9 = vpop.permute.xlu0 %4266 }
 0xd50   :  { %4484 = vmatpush2.msra.mxu1 %v4068_v20  ;;  %v4291_v8 = vsel %vm3498_vm6, %v4281_v36, %v10227_v44  ;;  %v4290_v43 = vsel %vm3498_vm6, %v4279_v45, %v4281_v36  ;;  %v4286_v60 = vsel %vm3498_vm6, %v4267_v9, %v4269_v42  ;;  %v12520_v45 = vld [vmem:[%s12483_s25 + $0x40] sm:$0xff] }
 0xd51   :  { %4485 = vmatprep.subr.mxu1 %v12067_v14  ;;  %4542 = vmatprep.subr.mxu0 %v4291_v8 }
 0xd52   :  { %4486 = vmatpush2.msra.mxu1 %v12057_v37  ;;  %4543 = vmatpush1.msra.mxu0 %v4290_v43 }
 0xd53   :  { %4544 = vmatprep.subr.mxu0 %v4289_v49  ;;  %v10231_v13 = vpop.permute.xlu1 %10230  ;;  %4487 = vmatprep.subr.mxu1 %v12039_v46  ;;  %v4261_v4 = vpop.permute.xlu0 %4260  ;;  %v14703_v46 = vld [vmem:[#allocation23_spill] sm:$0xff] }
 0xd54   :  { %v10232_v61 = vunpack.i.l.bf16 %v10231_v13  ;;  %4488 = vmatpush2.msra.mxu1 %v12033_v55  ;;  %4545 = vmatpush1.msra.mxu0 %v4288_v25  ;;  %v10233_v14 = vunpack.i.h.bf16 %v10231_v13  ;;  %v4312_v55 = vld [vmem:[%s12154_s15 + $0x20] sm:$0xff]  ;;  %s12574_s15 = sld [smem:[%s14628_s0 + %s10468_s21]]  }
 0xd55   :  { %4489 = vmatprep.subr.mxu1 %v12015_v40 }
 0xd56   :  { %4490 = vmatpush2.msra.mxu1 %v12013_v6  ;;  %v4287_v37 = vsel %vm3498_vm6, %v4269_v42, %v10232_v61 }
 0xd57   :  { %v4263_v16 = vpop.permute.xlu1 %4262  ;;  %4491 = vmatprep.subr.mxu1 %v14702_v27  ;;  %4546 = vmatprep.subr.mxu0 %v4287_v37 }
 0xd58   :  { %4492 = vmatpush2.msra.mxu1 %v14703_v46  ;;  %4547 = vmatpush1.msra.mxu0 %v4286_v60  ;;  %v4285_v6 = vsel %vm3498_vm6, %v4263_v16, %v10233_v14  ;;  %v4284_v40 = vsel %vm3498_vm6, %v4261_v4, %v4263_v16  ;;  %vm14724_vm6 = vmmov %vm14722_vm2 }
 0xd59   :  { %4494 = vmatmul.mubr.f32.vlgmr.msra.gmra.mxu1 %v4308_v38  ;;  %4548 = vmatprep.subr.mxu0 %v4285_v6  ;;  %v4615_v6 = vld [vmem:[%s11984_s5] sm:$0x3]  ;;  %s10495_s5 = smov 20  }
 0xd5a   :  { %4549 = vmatpush1.msra.mxu0 %v4284_v40  ;;  %4499 = vmatprep.mubr.f32.mxu1 %v4312_v55  ;;  %s12848_s8 = sld [smem:[%s14628_s0 + %s10495_s5]]  }
 0xd5b   :  { %9407 = vmatmul.mubr.msk.f32.vlgmr.msra.gmra.mxu0 %vm4416_vm0, %v4310_v56  ;;  %9847 = vmatprep.subr.mxu1 %v12486_v28 }
 0xd5c   :  { %4588 = vmatprep.mubr.f32.mxu0 %v14696_v22  ;;  %9848 = vmatpush3.msra.mxu1 %v12486_v28 }
 0xd5d   :  { %4500 = vmatmul.mubr.f32.gmra.mxu1 %v4311_v15  ;;  %9849 = vmatprep.subr.mxu1 %v12490_v33 }
 0xd5e   :  { %4505 = vmatprep.mubr.f32.mxu1 %v4315_v39  ;;  %9850 = vmatpush3.msra.mxu1 %v12490_v33 }
 0xd5f   :  { %9408 = vmatmul.mubr.msk.f32.gmra.mxu0 %vm4416_vm0, %v4313_v23  ;;  %9851 = vmatprep.subr.mxu1 %v12495_v5 }
 0xd60   :  { %4594 = vmatprep.mubr.f32.mxu0 %v14696_v22  ;;  %9852 = vmatpush3.msra.mxu1 %v12495_v5  ;;  %v4409_v42 = vpop.permute.xlu0 %4408 }
 0xd61   :  { %4506 = vmatmul.mubr.f32.gmra.mxu1 %v4314_v18  ;;  %9853 = vmatprep.subr.mxu1 %v12500_v26  ;;  %v14704_v18 = vld [vmem:[#allocation12_spill] sm:$0xff] }
 0xd62   :  { %4511 = vmatprep.mubr.f32.mxu1 %v4318_v19  ;;  %9854 = vmatpush3.msra.mxu1 %v12500_v26  ;;  %v4624_v19 = vrot.slane %v4615_v6, %v14704_v18 }
 0xd63   :  { %9409 = vmatmul.mubr.msk.f32.gmra.mxu0 %vm4416_vm0, %v4316_v3  ;;  %9855 = vmatprep.subr.mxu1 %v12505_v31 }
 0xd64   :  { %4600 = vmatprep.mubr.f32.mxu0 %v14696_v22  ;;  %9856 = vmatpush3.msra.mxu1 %v12505_v31  ;;  %v4414_v32 = vpop.permute.xlu1 %4413  ;;  %v4399_v0 = vpop.permute.xlu0 %4398 }
 0xd65   :  { %4512 = vmatmul.mubr.f32.gmra.mxu1 %v4317_v12  ;;  %9857 = vmatprep.subr.mxu1 %v12510_v7 }
 0xd66   :  { %9858 = vmatpush3.msra.mxu1 %v12510_v7 }
 0xd67   :  { %9410 = vmatmul.mubr.msk.f32.gmra.mxu0 %vm4416_vm0, %v4319_v51  ;;  %9859 = vmatprep.subr.mxu1 %v12515_v1 }
 0xd68   :  { %4747 = vmatprep.mubr.f32.mxu0 %v14696_v22  ;;  %9860 = vmatpush3.msra.mxu1 %v12515_v1  ;;  %v4404_v20 = vpop.permute.xlu1 %4403  ;;  %v12565_v46 = vpop.permute.xlu0 %10240 }
 0xd69   :  { %9861 = vmatprep.subr.mxu1 %v12520_v45 }
 0xd6a   :  { %9862 = vmatpush3.msra.mxu1 %v12520_v45 }
 0xd6b   :  { %9863 = vmatprep.subr.mxu1 %v12525_v63 }
 0xd6c   :  { %9864 = vmatpush3.msra.mxu1 %v12525_v63 }
 0xd6d   :  { %9865 = vmatprep.subr.mxu1 %v12530_v62 }
 0xd6e   :  { %9866 = vmatpush3.msra.mxu1 %v12530_v62 }
 0xd6f   :  { %9867 = vmatprep.subr.mxu1 %v12535_v53 }
 0xd70   :  { %9868 = vmatpush3.msra.mxu1 %v12535_v53 }
 0xd71   :  { %9869 = vmatprep.subr.mxu1 %v12540_v17 }
 0xd72   :  { %9870 = vmatpush3.msra.mxu1 %v12540_v17 }
 0xd73   :  { %9871 = vmatprep.subr.mxu1 %v12545_v24 }
 0xd74   :  { %9872 = vmatpush3.msra.mxu1 %v12545_v24 }
 0xd75   :  { %9873 = vmatprep.subr.mxu1 %v12550_v29 }
 0xd76   :  { %9874 = vmatpush3.msra.mxu1 %v12550_v29 }
 0xd77   :  { %9875 = vmatprep.subr.mxu1 %v12555_v11 }
 0xd78   :  { %9876 = vmatpush3.msra.mxu1 %v12555_v11 }
 0xd79   :  { %9877 = vmatprep.subr.mxu1 %v12560_v35 }
 0xd7a   :  { %9878 = vmatpush3.msra.mxu1 %v12560_v35 }
 0xe19   :  { %v4495_v10 = vpop.f32.mrf.mxu1 }
 0xe1a   :  { %v4496_v16 = vadd.f32 %v4495_v10, %v4399_v0 }
 0xe1b   :  { %v4497_v52 = vpop.f32.mrf.mxu1  ;;  %v4584_v30 = vpop.f32.mrf.mxu0 }
 0xe1c   :  { %v4498_v37 = vadd.f32 %v4497_v52, %v4399_v0  ;;  %v4585_v51 = vadd.f32 %v4584_v30, %v4496_v16  ;;  %v14705_v52 = vld [vmem:[#allocation11_spill] sm:$0xff] }
 0xe1d   :  { %v4501_v57 = vpop.f32.mrf.mxu1  ;;  %v4586_v34 = vpop.f32.mrf.mxu0 }
 0xe1e   :  { %v4502_v13 = vadd.f32 %v4501_v57, %v4404_v20  ;;  %v4587_v23 = vadd.f32 %v4586_v34, %v4498_v37  ;;  %v4620_v57 = vrot.slane %v4615_v6, %v14705_v52  ;;  %v12576_v34 = vpop.permute.xlu0 %10245  ;;  %v4607_v30 = vmax.f32 %v4585_v51, 0.0 }
 0xe1f   :  { %v4503_v21 = vpop.f32.mrf.mxu1  ;;  %v4590_v59 = vpop.f32.mrf.mxu0 }
 0xe20   :  { %v4504_v49 = vadd.f32 %v4503_v21, %v4404_v20  ;;  %v4591_v15 = vadd.f32 %v4590_v59, %v4502_v13 }
 0xe21   :  { %v4507_v58 = vpop.f32.mrf.mxu1  ;;  %v4592_v47 = vpop.f32.mrf.mxu0 }
 0xe22   :  { %v4508_v8 = vadd.f32 %v4507_v58, %v4409_v42  ;;  %v4593_v40 = vadd.f32 %v4592_v47, %v4504_v49  ;;  %v4609_v21 = vmax.f32 %v4591_v15, 0.0  ;;  %v4608_v58 = vmax.f32 %v4587_v23, 0.0 }
 0xe23   :  { %v4509_v41 = vpop.f32.mrf.mxu1  ;;  %v4596_v44 = vpop.f32.mrf.mxu0 }
 0xe24   :  { %v4510_v36 = vadd.f32 %v4509_v41, %v4409_v42  ;;  %v4597_v27 = vadd.f32 %v4596_v44, %v4508_v8  ;;  %v4610_v10 = vmax.f32 %v4593_v40, 0.0  ;;  %v4629_v0 = vmul.f32 %v4620_v57, %v4609_v21  ;;  %v4651_v8 = vld [vmem:[%s12574_s15] sm:$0xff] }
 0xe25   :  { %v4513_v43 = vpop.f32.mrf.mxu1  ;;  %v4598_v9 = vpop.f32.mrf.mxu0  ;;  %v4628_v20 = vmul.f32 %v4624_v19, %v4608_v58 }
 0xe26   :  { %v4514_v25 = vadd.f32 %v4513_v43, %v4414_v32  ;;  %v4599_v38 = vadd.f32 %v4598_v9, %v4510_v36  ;;  %v4611_v42 = vmax.f32 %v4597_v27, 0.0  ;;  %v4630_v44 = vmul.f32 %v4624_v19, %v4610_v10  ;;  %v12579_v43 = vpop.permute.xlu0 %5003  ;;  %v4652_v9 = vld [vmem:[%s12574_s15 + $0x8] sm:$0xff] }
 0xe27   :  { %v4515_v61 = vpop.f32.mrf.mxu1  ;;  %v4602_v14 = vpop.f32.mrf.mxu0  ;;  %v4627_v36 = vmul.f32 %v4620_v57, %v4607_v30 }
 0xe28   :  { %v4516_v60 = vadd.f32 %v4515_v61, %v4414_v32  ;;  %v4603_v4 = vadd.f32 %v4602_v14, %v4514_v25  ;;  %v4612_v3 = vmax.f32 %v4599_v38, 0.0  ;;  %v4631_v41 = vmul.f32 %v4620_v57, %v4611_v42  ;;  %v4653_v25 = vld [vmem:[%s12574_s15 + $0x10] sm:$0xff] }
 0xe29   :  { %v4604_v55 = vpop.f32.mrf.mxu0 }
 0xe2a   :  { %v4605_v56 = vadd.f32 %v4604_v55, %v4516_v60  ;;  %v4613_v39 = vmax.f32 %v4603_v4, 0.0  ;;  %v4632_v47 = vmul.f32 %v4624_v19, %v4612_v3  ;;  %v12588_v49 = vpop.permute.xlu0 %10250 }
 0xe2c   :  { %v4614_v12 = vmax.f32 %v4605_v56, 0.0  ;;  %v4633_v59 = vmul.f32 %v4620_v57, %v4613_v39 }
 0xe2e   :  { %v4634_v32 = vmul.f32 %v4624_v19, %v4614_v12 }
 0xe30   :  { %4707 = vmatprep.subr.mxu0 %v4634_v32 }
 0xe31   :  { %4708 = vmatpush1.msra.mxu0 %v4633_v59 }
 0xe32   :  { %4709 = vmatprep.subr.mxu0 %v4632_v47 }
 0xe33   :  { %4710 = vmatpush1.msra.mxu0 %v4631_v41 }
 0xe34   :  { %4711 = vmatprep.subr.mxu0 %v4630_v44 }
 0xe35   :  { %4712 = vmatpush1.msra.mxu0 %v4629_v0 }
 0xe36   :  { %4713 = vmatprep.subr.mxu0 %v4628_v20 }
 0xe37   :  { %4714 = vmatpush1.msra.mxu0 %v4627_v36 }
 0xe38   :  { %9411 = vmatmul.mubr.msk.f32.vlgmr.msra.gmra.mxu0 %vm4416_vm0, %v4651_v8  ;;  %9803 = vmatprep.subr.mxu0 %v12486_v28 }
 0xe39   :  { %9804 = vmatpush3.msra.mxu0 %v12486_v28  ;;  %4753 = vmatprep.mubr.f32.mxu0 %v14696_v22  ;;  %v4654_v28 = vld [vmem:[%s12574_s15 + $0x18] sm:$0xff] }
 0xe3a   :  { %9805 = vmatprep.subr.mxu0 %v12490_v33 }
 0xe3b   :  { %9806 = vmatpush3.msra.mxu0 %v12490_v33  ;;  %v12602_v33 = vpop.permute.xlu0 %10255 }
 0xe3c   :  { %9412 = vmatmul.mubr.msk.f32.gmra.mxu0 %vm4416_vm0, %v4652_v9  ;;  %9807 = vmatprep.subr.mxu0 %v12495_v5 }
 0xe3d   :  { %9808 = vmatpush3.msra.mxu0 %v12495_v5  ;;  %4759 = vmatprep.mubr.f32.mxu0 %v14696_v22  ;;  %v12606_v5 = vpop.permute.xlu1 %10235 }
 0xe3e   :  { %9809 = vmatprep.subr.mxu0 %v12500_v26 }
 0xe3f   :  { %9810 = vmatpush3.msra.mxu0 %v12500_v26  ;;  %v4655_v26 = vld [vmem:[%s12574_s15 + $0x20] sm:$0xff] }
 0xe40   :  { %9413 = vmatmul.mubr.msk.f32.gmra.mxu0 %vm4416_vm0, %v4653_v25  ;;  %9811 = vmatprep.subr.mxu0 %v12505_v31 }
 0xe41   :  { %9812 = vmatpush3.msra.mxu0 %v12505_v31  ;;  %4765 = vmatprep.mubr.f32.mxu0 %v14696_v22  ;;  %v12615_v31 = vpop.permute.xlu0 %4998 }
 0xe42   :  { %9813 = vmatprep.subr.mxu0 %v12510_v7 }
 0xe43   :  { %9814 = vmatpush3.msra.mxu0 %v12510_v7  ;;  %v4656_v7 = vld [vmem:[%s12574_s15 + $0x28] sm:$0xff] }
 0xe44   :  { %9414 = vmatmul.mubr.msk.f32.gmra.mxu0 %vm4416_vm0, %v4654_v28  ;;  %9815 = vmatprep.subr.mxu0 %v12515_v1 }
 0xe45   :  { %9816 = vmatpush3.msra.mxu0 %v12515_v1  ;;  %4771 = vmatprep.mubr.f32.mxu0 %v14696_v22  ;;  %v12622_v1 = vpop.permute.xlu1 %5225 }
 0xe46   :  { %9817 = vmatprep.subr.mxu0 %v12520_v45 }
 0xe47   :  { %9818 = vmatpush3.msra.mxu0 %v12520_v45  ;;  %v4657_v45 = vld [vmem:[%s12574_s15 + $0x30] sm:$0xff] }
 0xe48   :  { %9415 = vmatmul.mubr.msk.f32.gmra.mxu0 %vm4416_vm0, %v4655_v26  ;;  %9819 = vmatprep.subr.mxu0 %v12525_v63 }
 0xe49   :  { %9820 = vmatpush3.msra.mxu0 %v12525_v63  ;;  %4777 = vmatprep.mubr.f32.mxu0 %v14696_v22  ;;  %v12631_v63 = vpop.permute.xlu0 %10260  ;;  %v12635_v13 = vpop.permute.xlu1 %5220 }
 0xe4a   :  { %9821 = vmatprep.subr.mxu0 %v12530_v62 }
 0xe4b   :  { %9822 = vmatpush3.msra.mxu0 %v12530_v62  ;;  %v4658_v62 = vld [vmem:[%s12574_s15 + $0x38] sm:$0xff] }
 0xe4c   :  { %9416 = vmatmul.mubr.msk.f32.gmra.mxu0 %vm4416_vm0, %v4656_v7  ;;  %9823 = vmatprep.subr.mxu0 %v12535_v53 }
 0xe4d   :  { %9824 = vmatpush3.msra.mxu0 %v12535_v53  ;;  %4783 = vmatprep.mubr.f32.mxu0 %v14696_v22  ;;  %v5503_v53 = vpop.permute.xlu0 %5502 }
 0xe4e   :  { %9825 = vmatprep.subr.mxu0 %v12540_v17 }
 0xe4f   :  { %9826 = vmatpush3.msra.mxu0 %v12540_v17  ;;  %v5501_v17 = vpop.permute.xlu1 %5500 }
 0xe50   :  { %9417 = vmatmul.mubr.msk.f32.gmra.mxu0 %vm4416_vm0, %v4657_v45  ;;  %9827 = vmatprep.subr.mxu0 %v12545_v24 }
 0xe51   :  { %9828 = vmatpush3.msra.mxu0 %v12545_v24  ;;  %4789 = vmatprep.mubr.f32.mxu0 %v14696_v22  ;;  %v5511_v24 = vsel %vm465_vm4, %v5501_v17, %v5503_v53  ;;  %v5495_v60 = vpop.permute.xlu0 %5494 }
 0xe52   :  { %9829 = vmatprep.subr.mxu0 %v12550_v29 }
 0xe53   :  { %9830 = vmatpush3.msra.mxu0 %v12550_v29  ;;  %v10266_v61 = vpop.permute.xlu1 %10265 }
 0xe54   :  { %9418 = vmatmul.mubr.msk.f32.gmra.mxu0 %vm4416_vm0, %v4658_v62  ;;  %9831 = vmatprep.subr.mxu0 %v12555_v11  ;;  %v10267_v37 = vunpack.i.l.bf16 %v10266_v61  ;;  %v10268_v38 = vunpack.i.h.bf16 %v10266_v61 }
 0xe55   :  { %9832 = vmatpush3.msra.mxu0 %v12555_v11  ;;  %v12713_v7 = vpop.permute.xlu0 %10270 }
 0xe56   :  { %9833 = vmatprep.subr.mxu0 %v12560_v35  ;;  %v5510_v11 = vsel %vm465_vm4, %v10267_v37, %v5501_v17  ;;  %v5508_v55 = vsel %vm465_vm4, %v10268_v38, %v5495_v60 }
 0xe57   :  { %9834 = vmatpush3.msra.mxu0 %v12560_v35  ;;  %v5497_v16 = vpop.permute.xlu1 %5496 }
 0xe58   :  { %5928 = vmatprep.subr.mxu0 %v5511_v24  ;;  %v5509_v35 = vsel %vm465_vm4, %v5495_v60, %v5497_v16 }
 0xe59   :  { %v12717_v62 = vpop.permute.xlu0 %5430 }
 0xe5b   :  { %v12711_v26 = vpop.permute.xlu1 %5428 }
 0xe5d   :  { %v12721_v17 = vpop.permute.xlu0 %5422 }
 0xe5f   :  { %v12715_v45 = vpop.permute.xlu1 %10275 }
 0xe61   :  { %v12725_v61 = vpop.permute.xlu0 %10280 }
 0xe63   :  { %v12719_v53 = vpop.permute.xlu1 %5424 }
 0xe65   :  { %v12727_v37 = vpop.permute.xlu0 %5358 }
 0xe67   :  { %v12723_v24 = vpop.permute.xlu1 %5356 }
 0xef8   :  { %v4749_v14 = vpop.f32.mrf.mxu0 }
 0xef9   :  { %9835 = vmatprep.mubr.f32.mxu0 %v4749_v14 }
 0xefa   :  { %v4751_v29 = vpop.f32.mrf.mxu0 }
 0xefb   :  { %9879 = vmatprep.mubr.f32.mxu1 %v4751_v29 }
 0xefc   :  { %v4755_v4 = vpop.f32.mrf.mxu0 }
 0xefd   :  { %9836 = vmatmul.mubr.f32.vlgmr.msra.gmra.mxu0 %v4755_v4  ;;  %v10238_v4 = vunpack.i.h.bf16 %v12606_v5 }
 0xefe   :  { %5929 = vmatpush1.msra.mxu0 %v5510_v11  ;;  %v4757_v27 = vpop.f32.mrf.mxu0  ;;  %v10248_v11 = vunpack.i.h.bf16 %v12576_v34 }
 0xeff   :  { %5930 = vmatprep.subr.mxu0 %v5509_v35  ;;  %9880 = vmatmul.mubr.f32.vlgmr.msra.gmra.mxu1 %v4757_v27 }
 0xf00   :  { %5931 = vmatpush1.msra.mxu0 %v5508_v55  ;;  %v4761_v6 = vpop.f32.mrf.mxu0 }
 0xf01   :  { %9838 = vmatprep.mubr.f32.mxu0 %v4761_v6 }
 0xf02   :  { %v4763_v40 = vpop.f32.mrf.mxu0 }
 0xf03   :  { %9882 = vmatprep.mubr.f32.mxu1 %v4763_v40  ;;  %v10258_v40 = vunpack.i.h.bf16 %v12602_v33 }
 0xf04   :  { %v4767_v56 = vpop.f32.mrf.mxu0 }
 0xf05   :  { %9839 = vmatmul.mubr.f32.gmra.mxu0 %v4767_v56 }
 0xf06   :  { %v4769_v15 = vpop.f32.mrf.mxu0 }
 0xf07   :  { %9883 = vmatmul.mubr.f32.gmra.mxu1 %v4769_v15 }
 0xf08   :  { %v4773_v39 = vpop.f32.mrf.mxu0 }
 0xf09   :  { %9841 = vmatprep.mubr.f32.mxu0 %v4773_v39 }
 0xf0a   :  { %v4775_v23 = vpop.f32.mrf.mxu0 }
 0xf0b   :  { %9885 = vmatprep.mubr.f32.mxu1 %v4775_v23  ;;  %v10237_v23 = vunpack.i.l.bf16 %v12606_v5  ;;  %v10252_v5 = vunpack.i.l.bf16 %v12588_v49 }
 0xf0c   :  { %v4779_v19 = vpop.f32.mrf.mxu0 }
 0xf0d   :  { %9842 = vmatmul.mubr.f32.gmra.mxu0 %v4779_v19 }
 0xf0e   :  { %v4781_v3 = vpop.f32.mrf.mxu0 }
 0xf0f   :  { %9886 = vmatmul.mubr.f32.gmra.mxu1 %v4781_v3 }
 0xf10   :  { %v4785_v12 = vpop.f32.mrf.mxu0 }
 0xf11   :  { %9844 = vmatprep.mubr.f32.mxu0 %v4785_v12  ;;  %v10247_v12 = vunpack.i.l.bf16 %v12576_v34 }
 0xf12   :  { %v4787_v51 = vpop.f32.mrf.mxu0 }
 0xf13   :  { %9888 = vmatprep.mubr.f32.mxu1 %v4787_v51 }
 0xf14   :  { %v4791_v57 = vpop.f32.mrf.mxu0 }
 0xf15   :  { %9845 = vmatmul.mubr.f32.gmra.mxu0 %v4791_v57  ;;  %v9420_v57 = vld [vmem:[%s11544_s12 + $0x1] ss:$0 sm:$0xff] }
 0xf16   :  { %v4793_v42 = vpop.f32.mrf.mxu0 }
 0xf17   :  { %9889 = vmatmul.mubr.f32.gmra.mxu1 %v4793_v42 }
 0xfbd   :  { %v12653_v10 = vpop.f32.mrf.mxu0 }
 0xfbf   :  { %v12655_v32 = vpop.f32.mrf.mxu1  ;;  %v12657_v21 = vpop.f32.mrf.mxu0 }
 0xfc1   :  { %v12659_v59 = vpop.f32.mrf.mxu1 }
 0xfc5   :  { %v9840_v58 = vpop.f32.mrf.mxu0 }
 0xfc6   :  { %4941 = vrot.lane.b32.xlu0 %v9840_v58, %s10461_s6 }
 0xfc7   :  { %v9884_v47 = vpop.f32.mrf.mxu1  ;;  %v4888_v30 = vpop.f32.mrf.mxu0 }
 0xfc8   :  { %5163 = vrot.lane.b32.xlu1 %v9884_v47, %s10461_s6 }
 0xfc9   :  { %v5110_v41 = vpop.f32.mrf.mxu1 }
 0xfcc   :  { %4937 = vrot.lane.b32.xlu1 %v4888_v30, %s10461_s6 }
 0xfcd   :  { %v9843_v0 = vpop.f32.mrf.mxu0 }
 0xfcf   :  { %v9887_v44 = vpop.f32.mrf.mxu1  ;;  %v4898_v36 = vpop.f32.mrf.mxu0 }
 0xfd0   :  { %5185 = vrot.lane.b32.xlu0 %v9887_v44, %s10481_s28  ;;  %5159 = vrot.lane.b32.xlu1 %v5110_v41, %s10461_s6  ;;  %v10257_v44 = vunpack.i.l.bf16 %v12602_v33 }
 0xfd1   :  { %v5120_v20 = vpop.f32.mrf.mxu1 }
 0xfd4   :  { %4963 = vrot.lane.b32.xlu1 %v9843_v0, %s10481_s28 }
 0xfd5   :  { %v9846_v25 = vpop.f32.mrf.mxu0 }
 0xfd7   :  { %v9890_v8 = vpop.f32.mrf.mxu1  ;;  %v4908_v28 = vpop.f32.mrf.mxu0 }
 0xfd8   :  { %5207 = vrot.lane.b32.xlu0 %v9890_v8, %s10482_s30  ;;  %4959 = vrot.lane.b32.xlu1 %v4898_v36, %s10481_s28 }
 0xfd9   :  { %v5130_v9 = vpop.f32.mrf.mxu1 }
 0xfdc   :  { %5203 = vrot.lane.b32.xlu0 %v5130_v9, %s10482_s30  ;;  %5181 = vrot.lane.b32.xlu1 %v5120_v20, %s10481_s28  ;;  %v10262_v9 = vunpack.i.l.bf16 %v12631_v63 }
 0xfe0   :  { %5350 = vrot.lane.b32.xlu0 %v11726_v2, %s10481_s28  ;;  %4985 = vrot.lane.b32.xlu1 %v9846_v25, %s10482_s30  ;;  %v9419_v25 = vld [vmem:[%s11544_s12] ss:$0 sm:$0xff] }
 0xfe4   :  { %10290 = vrot.lane.b32.xlu0 %v14696_v22, %s10481_s28  ;;  %4981 = vrot.lane.b32.xlu1 %v4908_v28, %s10482_s30 }
 0xfe8   :  { %5286 = vrot.lane.b32.xlu0 %v11728_v48, %s10482_s30  ;;  %10285 = vrot.lane.b32.xlu1 %v14696_v22, %s10481_s28 }
 0xfec   :  { %5278 = vrot.lane.b32.xlu0 %v11726_v2, %s10482_s30  ;;  %5352 = vrot.lane.b32.xlu1 %v11715_v54, %s10481_s28 }
 0xff0   :  { %10300 = vrot.lane.b32.xlu0 %v14696_v22, %s10482_s30  ;;  %5284 = vrot.lane.b32.xlu1 %v11717_v50, %s10482_s30 }
 0xff4   :  { %10305 = vrot.lane.b32.xlu0 %v14696_v22, %s10478_s16  ;;  %10295 = vrot.lane.b32.xlu1 %v14696_v22, %s10482_s30 }
 0xff8   :  { %5726 = vrot.lane.b32.xlu0 %v11715_v54, %s10478_s16  ;;  %5280 = vrot.lane.b32.xlu1 %v11715_v54, %s10482_s30 }
 0xffc   :  { %5732 = vrot.lane.b32.xlu1 %v11728_v48, %s10478_s16  ;;  %10315 = vrot.lane.b32.xlu0 %v14696_v22, %s10480_s27 }
0x1000   :  { %5730 = vrot.lane.b32.xlu1 %v11717_v50, %s10478_s16 }
0x1004   :  { %5724 = vrot.lane.b32.xlu1 %v11726_v2, %s10478_s16 }
0x1008   :  { %10310 = vrot.lane.b32.xlu1 %v14696_v22, %s10478_s16 }
0x100c   :  { %5660 = vrot.lane.b32.xlu1 %v11728_v48, %s10480_s27 }
0x1010   :  { %5658 = vrot.lane.b32.xlu1 %v11717_v50, %s10480_s27 }
0x1038   :  { %v4942_v38 = vpop.permute.xlu0 %4941 }
0x1039   :  { %v4944_v51 = vsel %vm465_vm4, %v10237_v23, %v4942_v38  ;;  %v5833_v23 = vld [vmem:[%s12848_s8 + $0x8] sm:$0xff] }
0x103a   :  { %v5164_v14 = vpop.permute.xlu1 %5163  ;;  %v4948_v30 = vadd.f32 %v12653_v10, %v4944_v51  ;;  %5992 = vmatprep.mubr.f32.mxu0 %v5833_v23  ;;  %v10278_v23 = vunpack.i.h.bf16 %v12715_v45 }
0x103b   :  { %v5166_v27 = vsel %vm465_vm4, %v10238_v4, %v5164_v14 }
0x103c   :  { %v5170_v6 = vadd.f32 %v12655_v32, %v5166_v27  ;;  %v10242_v32 = vunpack.i.l.bf16 %v12565_v46 }
0x103e   :  { %v4938_v29 = vpop.permute.xlu1 %4937 }
0x103f   :  { %v4943_v34 = vsel %vm465_vm4, %v10242_v32, %v4938_v29 }
0x1040   :  { %v4947_v8 = vadd.f32 %v4943_v34, %v12657_v21 }
0x1042   :  { %v5160_v60 = vpop.permute.xlu1 %5159  ;;  %v5186_v16 = vpop.permute.xlu0 %5185 }
0x1043   :  { %v5188_v55 = vsel %vm2227_vm14, %v10248_v11, %v5186_v16 }
0x1044   :  { %v5192_v56 = vadd.f32 %v5188_v55, %v5170_v6  ;;  %v10263_v6 = vunpack.i.h.bf16 %v12631_v63 }
0x1046   :  { %v4964_v35 = vpop.permute.xlu1 %4963 }
0x1047   :  { %v4966_v47 = vsel %vm2227_vm14, %v10247_v12, %v4964_v35 }
0x1048   :  { %v4970_v0 = vadd.f32 %v4966_v47, %v4948_v30  ;;  %v5910_v30 = vld [vmem:[%s9377_s1] sm:$0xff] }
0x104a   :  { %v5208_v15 = vpop.permute.xlu0 %5207  ;;  %v4960_v39 = vpop.permute.xlu1 %4959 }
0x104b   :  { %v5210_v19 = vsel %vm2208_vm15, %v10258_v40, %v5208_v15 }
0x104c   :  { %v5214_v3 = vadd.f32 %v5210_v19, %v5192_v56 }
0x104e   :  { %v5229_v42 = vadd.f32 %v12622_v1, %v5214_v3  ;;  %v5182_v58 = vpop.permute.xlu1 %5181  ;;  %v4965_v1 = vsel %vm2227_vm14, %v10252_v5, %v4960_v39 }
0x104f   :  { %v4969_v28 = vadd.f32 %v4965_v1, %v4947_v8 }
0x1050   :  { %v12744_v41 = vmul.f32 %v9420_v57, %v5229_v42 }
0x1052   :  { %v4986_v20 = vpop.permute.xlu1 %4985  ;;  %5490 = vrot.lane.b32.xlu1 %v12744_v41, %s10461_s6 }
0x1053   :  { %v4988_v36 = vsel %vm2208_vm15, %v10257_v44, %v4986_v20 }
0x1054   :  { %v4992_v10 = vadd.f32 %v4988_v36, %v4970_v0  ;;  %v10272_v36 = vunpack.i.l.bf16 %v12713_v7 }
0x1056   :  { %v5007_v33 = vadd.f32 %v12579_v43, %v4992_v10  ;;  %v4982_v14 = vpop.permute.xlu1 %4981  ;;  %v10243_v43 = vunpack.i.h.bf16 %v12565_v46  ;;  %v5204_v46 = vpop.permute.xlu0 %5203 }
0x1057   :  { %v4987_v29 = vsel %vm2208_vm15, %v10262_v9, %v4982_v14 }
0x1058   :  { %v12758_v38 = vmul.f32 %v9419_v25, %v5007_v33  ;;  %v4991_v4 = vadd.f32 %v4987_v29, %v4969_v28  ;;  %v5165_v21 = vsel %vm465_vm4, %v10243_v43, %v5160_v60 }
0x1059   :  { %v5169_v35 = vadd.f32 %v5165_v21, %v12659_v59 }
0x105a   :  { %v5006_v16 = vadd.f32 %v12615_v31, %v4991_v4  ;;  %5488 = vrot.lane.b32.xlu0 %v12758_v38, %s10461_s6  ;;  %v10253_v31 = vunpack.i.h.bf16 %v12588_v49  ;;  %v5209_v49 = vsel %vm2208_vm15, %v10263_v6, %v5204_v46  ;;  %v12856_v39 = vpop.permute.xlu0 %5350  ;;  %v10273_v6 = vunpack.i.h.bf16 %v12713_v7 }
0x105c   :  { %v12763_v11 = vmul.f32 %v9419_v25, %v5006_v16  ;;  %v5187_v27 = vsel %vm2227_vm14, %v10253_v31, %v5182_v58 }
0x105d   :  { %v5191_v55 = vadd.f32 %v5187_v27, %v5169_v35 }
0x105e   :  { %5416 = vrot.lane.b32.xlu0 %v12758_v38, %s10474_s3  ;;  %5482 = vrot.lane.b32.xlu1 %v12763_v11, %s10461_s6  ;;  %v12865_v3 = vpop.permute.xlu0 %10290 }
0x105f   :  { %v5213_v60 = vadd.f32 %v5209_v49, %v5191_v55  ;;  %v10277_v55 = vunpack.i.l.bf16 %v12715_v45  ;;  %v5437_v45 = vsel %vm2246_vm13, %v12721_v17, %v12719_v53 }
0x1061   :  { %v5228_v59 = vadd.f32 %v12635_v13, %v5213_v60  ;;  %v12823_v13 = vpop.permute.xlu1 %10285  ;;  %v5438_v7 = vsel %vm2246_vm13, %v10277_v55, %v12711_v26 }
0x1062   :  { %5344 = vrot.lane.b32.xlu0 %v12758_v38, %s10481_s28  ;;  %5418 = vrot.lane.b32.xlu1 %v12744_v41, %s10474_s3  ;;  %v12880_v51 = vpop.permute.xlu0 %5286 }
0x1063   :  { %v12797_v63 = vmul.f32 %v9420_v57, %v5228_v59  ;;  %v5911_v57 = vld [vmem:[%s9377_s1 + $0x8] sm:$0xff]  ;;  %s13460_s1 = sld [smem:[%s14628_s0 + %s10501_s9]]  }
0x1065   :  { %v12829_v40 = vpop.permute.xlu1 %5352 }
0x1066   :  { %5272 = vrot.lane.b32.xlu0 %v12758_v38, %s10482_s30  ;;  %5410 = vrot.lane.b32.xlu1 %v12763_v11, %s10474_s3  ;;  %v12888_v58 = vpop.permute.xlu0 %5278 }
0x1069   :  { %v12839_v56 = vpop.permute.xlu1 %5284 }
0x106a   :  { %5718 = vrot.lane.b32.xlu0 %v12758_v38, %s10478_s16  ;;  %5346 = vrot.lane.b32.xlu1 %v12744_v41, %s10481_s28  ;;  %v12896_v47 = vpop.permute.xlu0 %10300 }
0x106d   :  { %v12850_v15 = vpop.permute.xlu1 %10295 }
0x106e   :  { %5720 = vrot.lane.b32.xlu0 %v12744_v41, %s10478_s16  ;;  %5338 = vrot.lane.b32.xlu1 %v12763_v11, %s10481_s28  ;;  %v12902_v44 = vpop.permute.xlu0 %10305 }
0x1071   :  { %v12863_v19 = vpop.permute.xlu1 %5280 }
0x1072   :  { %5712 = vrot.lane.b32.xlu0 %v12763_v11, %s10478_s16  ;;  %5274 = vrot.lane.b32.xlu1 %v12744_v41, %s10482_s30  ;;  %v12906_v0 = vpop.permute.xlu0 %5726 }
0x1075   :  { %v12874_v12 = vpop.permute.xlu1 %5732 }
0x1076   :  { %5484 = vrot.lane.b32.xlu0 %v12797_v63, %s10461_s6  ;;  %5266 = vrot.lane.b32.xlu1 %v12763_v11, %s10482_s30  ;;  %v12908_v20 = vpop.permute.xlu0 %10315 }
0x1079   :  { %v12886_v42 = vpop.permute.xlu1 %5730 }
0x107a   :  { %5654 = vrot.lane.b32.xlu0 %v11715_v54, %s10480_s27  ;;  %5652 = vrot.lane.b32.xlu1 %v11726_v2, %s10480_s27 }
0x107d   :  { %v12892_v32 = vpop.permute.xlu1 %5724 }
0x107e   :  { %5412 = vrot.lane.b32.xlu0 %v12797_v63, %s10474_s3  ;;  %10320 = vrot.lane.b32.xlu1 %v14696_v22, %s10480_s27 }
0x1081   :  { %v12900_v5 = vpop.permute.xlu1 %10310 }
0x1082   :  { %5648 = vrot.lane.b32.xlu0 %v12744_v41, %s10480_s27  ;;  %5588 = vrot.lane.b32.xlu1 %v11728_v48, %s10471_s24 }
0x1085   :  { %v12904_v34 = vpop.permute.xlu1 %5660 }
0x1086   :  { %5340 = vrot.lane.b32.xlu0 %v12797_v63, %s10481_s28  ;;  %5586 = vrot.lane.b32.xlu1 %v11717_v50, %s10471_s24 }
0x1089   :  { %v12910_v1 = vpop.permute.xlu1 %5658 }
0x108a   :  { %5646 = vrot.lane.b32.xlu0 %v12758_v38, %s10480_s27  ;;  %5580 = vrot.lane.b32.xlu1 %v11726_v2, %s10471_s24 }
0x108e   :  { %5268 = vrot.lane.b32.xlu0 %v12797_v63, %s10482_s30  ;;  %5714 = vrot.lane.b32.xlu1 %v12797_v63, %s10478_s16 }
0x1092   :  { %5640 = vrot.lane.b32.xlu0 %v12763_v11, %s10480_s27  ;;  %10330 = vrot.lane.b32.xlu1 %v14696_v22, %s10471_s24 }
0x1096   :  { %10325 = vrot.lane.b32.xlu0 %v14696_v22, %s10471_s24  ;;  %5642 = vrot.lane.b32.xlu1 %v12797_v63, %s10480_s27 }
0x109a   :  { %5582 = vrot.lane.b32.xlu0 %v11715_v54, %s10471_s24  ;;  %5804 = vrot.lane.b32.xlu1 %v11728_v48, %s10479_s26 }
0x109e   :  { %5576 = vrot.lane.b32.xlu0 %v12744_v41, %s10471_s24  ;;  %5570 = vrot.lane.b32.xlu1 %v12797_v63, %s10471_s24 }
0x10a2   :  { %5574 = vrot.lane.b32.xlu0 %v12758_v38, %s10471_s24  ;;  %5802 = vrot.lane.b32.xlu1 %v11717_v50, %s10479_s26 }
0x10a6   :  { %5568 = vrot.lane.b32.xlu0 %v12763_v11, %s10471_s24  ;;  %5796 = vrot.lane.b32.xlu1 %v11726_v2, %s10479_s26 }
0x10aa   :  { %10335 = vrot.lane.b32.xlu0 %v14696_v22, %s10479_s26  ;;  %10340 = vrot.lane.b32.xlu1 %v14696_v22, %s10479_s26 }
0x10ae   :  { %5798 = vrot.lane.b32.xlu0 %v11715_v54, %s10479_s26  ;;  %5786 = vrot.lane.b32.xlu1 %v12797_v63, %s10479_s26 }
0x10b2   :  { %5792 = vrot.lane.b32.xlu0 %v12744_v41, %s10479_s26  ;;  %5919 = vperm.xlu1 %10017, %v5911_v57  }
0x10b6   :  { %5790 = vrot.lane.b32.xlu0 %v12758_v38, %s10479_s26  ;;  %10350 = vrot.lane.b32.xlu1 %v14696_v22, %s10480_s27 }
0x10ba   :  { %5784 = vrot.lane.b32.xlu0 %v12763_v11, %s10479_s26  ;;  %10365 = vrot.lane.b32.xlu1 %v14696_v22, %s10474_s3 }
0x10be   :  { %5914 = vperm.xlu0 %10018, %v5910_v30   ;;  %v5439_v30 = vsel %vm2246_vm13, %v12711_v26, %v12717_v62 }
0x10c2   :  { %10345 = vrot.lane.b32.xlu0 %v14696_v22, %s10478_s16 }
0x10c4   :  { %v5491_v8 = vpop.permute.xlu1 %5490 }
0x10c6   :  { %10355 = vrot.lane.b32.xlu0 %v14696_v22, %s10471_s24 }
0x10ca   :  { %10360 = vrot.lane.b32.xlu0 %v14696_v22, %s10461_s6 }
0x10cc   :  { %v5489_v10 = vpop.permute.xlu0 %5488 }
0x10cd   :  { %v5507_v9 = vsel %vm465_vm4, %v5489_v10, %v5491_v8  ;;  %v5506_v25 = vsel %vm465_vm4, %v10272_v36, %v5489_v10  ;;  %v10282_v10 = vunpack.i.l.bf16 %v12725_v61 }
0x10ce   :  { %5932 = vmatprep.subr.mxu0 %v5507_v9  ;;  %v5436_v9 = vsel %vm2246_vm13, %v10278_v23, %v12721_v17 }
0x10cf   :  { %5933 = vmatpush1.msra.mxu0 %v5506_v25  ;;  %v10283_v25 = vunpack.i.h.bf16 %v12725_v61  ;;  %v5367_v61 = vsel %vm2227_vm14, %v12723_v24, %v12727_v37 }
0x10d0   :  { %v5417_v28 = vpop.permute.xlu0 %5416  ;;  %v5483_v33 = vpop.permute.xlu1 %5482 }
0x10d1   :  { %v5504_v57 = vsel %vm465_vm4, %v10273_v6, %v5483_v33  ;;  %v5434_v55 = vsel %vm2246_vm13, %v10282_v10, %v5417_v28  ;;  %v10298_v10 = vunpack.i.h.bf16 %v12850_v15 }
0x10d4   :  { %v5345_v14 = vpop.permute.xlu0 %5344  ;;  %v5419_v29 = vpop.permute.xlu1 %5418 }
0x10d5   :  { %v5435_v62 = vsel %vm2246_vm13, %v5417_v28, %v5419_v29 }
0x10d8   :  { %v12915_v4 = vpop.permute.xlu0 %5272  ;;  %v5411_v16 = vpop.permute.xlu1 %5410 }
0x10d9   :  { %v5432_v17 = vsel %vm2246_vm13, %v10283_v25, %v5411_v16 }
0x10dc   :  { %v12917_v43 = vpop.permute.xlu0 %5718  ;;  %v5347_v31 = vpop.permute.xlu1 %5346 }
0x10dd   :  { %v5363_v37 = vsel %vm2227_vm14, %v5345_v14, %v5347_v31 }
0x10e0   :  { %v12919_v21 = vpop.permute.xlu0 %5720  ;;  %v5339_v27 = vpop.permute.xlu1 %5338 }
0x10e4   :  { %v12921_v35 = vpop.permute.xlu0 %5712  ;;  %v12923_v46 = vpop.permute.xlu1 %5274 }
0x10e5   :  { %v5291_v25 = vsel %vm2208_vm15, %v12915_v4, %v12923_v46  ;;  %v5742_v46 = vsel %vm2324_vm11, %v12886_v42, %v12874_v12 }
0x10e8   :  { %v5485_v49 = vpop.permute.xlu0 %5484  ;;  %v12927_v60 = vpop.permute.xlu1 %5266 }
0x10e9   :  { %v5505_v59 = vsel %vm465_vm4, %v5483_v33, %v5485_v49  ;;  %v10287_v33 = vunpack.i.l.bf16 %v12823_v13  ;;  %v10288_v49 = vunpack.i.h.bf16 %v12823_v13  ;;  %v5365_v13 = vsel %vm2227_vm14, %v12856_v39, %v12829_v40 }
0x10ea   :  { %5934 = vmatprep.subr.mxu0 %v5505_v59 }
0x10eb   :  { %5935 = vmatpush1.msra.mxu0 %v5504_v57  ;;  %v5366_v28 = vsel %vm2227_vm14, %v10287_v33, %v12723_v24  ;;  %v5364_v23 = vsel %vm2227_vm14, %v10288_v49, %v12856_v39  ;;  %v10293_v57 = vunpack.i.h.bf16 %v12865_v3 }
0x10ec   :  { %v12935_v36 = vpop.permute.xlu0 %5654  ;;  %5936 = vmatprep.subr.mxu0 %v5439_v30  ;;  %v12937_v8 = vpop.permute.xlu1 %5652  ;;  %v10297_v30 = vunpack.i.l.bf16 %v12850_v15  ;;  %v5293_v15 = vsel %vm2208_vm15, %v12888_v58, %v12863_v19 }
0x10ed   :  { %5937 = vmatpush1.msra.mxu0 %v5438_v7  ;;  %v5360_v39 = vsel %vm2227_vm14, %v10293_v57, %v5339_v27  ;;  %v5670_v57 = vsel %vm2305_vm12, %v12910_v1, %v12904_v34 }
0x10ee   :  { %5938 = vmatprep.subr.mxu0 %v5437_v45 }
0x10ef   :  { %5939 = vmatpush1.msra.mxu0 %v5436_v9 }
0x10f0   :  { %v5413_v6 = vpop.permute.xlu0 %5412  ;;  %5940 = vmatprep.subr.mxu0 %v5435_v62  ;;  %v12950_v26 = vpop.permute.xlu1 %10320  ;;  %v10302_v62 = vunpack.i.l.bf16 %v12896_v47 }
0x10f1   :  { %5941 = vmatpush1.msra.mxu0 %v5434_v55  ;;  %v5433_v53 = vsel %vm2246_vm13, %v5411_v16, %v5413_v6  ;;  %v10292_v16 = vunpack.i.l.bf16 %v12865_v3  ;;  %v5295_v3 = vsel %vm2208_vm15, %v12839_v56, %v12880_v51  ;;  %v10307_v51 = vunpack.i.l.bf16 %v12902_v44 }
0x10f2   :  { %5942 = vmatprep.subr.mxu0 %v5433_v53  ;;  %v5290_v19 = vsel %vm2208_vm15, %v10302_v62, %v12915_v4  ;;  %v10308_v55 = vunpack.i.h.bf16 %v12902_v44  ;;  %v10312_v44 = vunpack.i.l.bf16 %v12900_v5 }
0x10f3   :  { %5943 = vmatpush1.msra.mxu0 %v5432_v17  ;;  %v5362_v45 = vsel %vm2227_vm14, %v10292_v16, %v5345_v14  ;;  %v5294_v14 = vsel %vm2208_vm15, %v10297_v30, %v12839_v56  ;;  %v10303_v56 = vunpack.i.h.bf16 %v12896_v47  ;;  %v5743_v47 = vsel %vm2324_vm11, %v12874_v12, %v10307_v51 }
0x10f4   :  { %v12959_v29 = vpop.permute.xlu0 %5648  ;;  %5944 = vmatprep.subr.mxu0 %v5367_v61  ;;  %v12961_v59 = vpop.permute.xlu1 %5588  ;;  %v5741_v17 = vsel %vm2324_vm11, %v12906_v0, %v10308_v55  ;;  %v10313_v61 = vunpack.i.h.bf16 %v12900_v5  ;;  %v5739_v12 = vsel %vm2324_vm11, %v12919_v21, %v10312_v44  ;;  %v5738_v16 = vsel %vm2324_vm11, %v12917_v43, %v12919_v21  ;;  %v5832_v55 = vld [vmem:[%s12848_s8] sm:$0xff] }
0x10f5   :  { %5945 = vmatpush1.msra.mxu0 %v5366_v28  ;;  %v5288_v53 = vsel %vm2208_vm15, %v10303_v56, %v12927_v60  ;;  %v10317_v28 = vunpack.i.l.bf16 %v12908_v20  ;;  %v10318_v5 = vunpack.i.h.bf16 %v12908_v20  ;;  %v5668_v20 = vsel %vm2305_vm12, %v12937_v8, %v12935_v36 }
0x10f6   :  { %5946 = vmatprep.subr.mxu0 %v5365_v13 }
0x10f7   :  { %5947 = vmatpush1.msra.mxu0 %v5364_v23  ;;  %v5669_v30 = vsel %vm2305_vm12, %v12935_v36, %v10318_v5 }
0x10f8   :  { %v5341_v7 = vpop.permute.xlu0 %5340  ;;  %v12974_v24 = vpop.permute.xlu1 %5586  ;;  %5948 = vmatprep.subr.mxu0 %v5363_v37  ;;  %v5671_v37 = vsel %vm2305_vm12, %v12904_v34, %v10317_v28  ;;  %v5837_v28 = vld [vmem:[%s12848_s8 + $0x28] sm:$0xff] }
0x10f9   :  { %5949 = vmatpush1.msra.mxu0 %v5362_v45  ;;  %v5361_v40 = vsel %vm2227_vm14, %v5339_v27, %v5341_v7  ;;  %v5292_v27 = vsel %vm2208_vm15, %v10298_v10, %v12888_v58 }
0x10fa   :  { %5950 = vmatprep.subr.mxu0 %v5361_v40 }
0x10fb   :  { %5951 = vmatpush1.msra.mxu0 %v5360_v39 }
0x10fc   :  { %v5647_v31 = vpop.permute.xlu0 %5646  ;;  %v12983_v9 = vpop.permute.xlu1 %5580  ;;  %5952 = vmatprep.subr.mxu0 %v5295_v3 }
0x10fd   :  { %5953 = vmatpush1.msra.mxu0 %v5294_v14  ;;  %v5666_v34 = vsel %vm2305_vm12, %v5647_v31, %v12959_v29 }
0x10fe   :  { %5954 = vmatprep.subr.mxu0 %v5293_v15 }
0x10ff   :  { %5955 = vmatpush1.msra.mxu0 %v5292_v27 }
0x1100   :  { %v5269_v33 = vpop.permute.xlu0 %5268  ;;  %v5715_v6 = vpop.permute.xlu1 %5714  ;;  %5956 = vmatprep.subr.mxu0 %v5291_v25 }
0x1101   :  { %5957 = vmatpush1.msra.mxu0 %v5290_v19  ;;  %v5289_v58 = vsel %vm2208_vm15, %v12927_v60, %v5269_v33  ;;  %v5740_v60 = vsel %vm2324_vm11, %v12892_v32, %v12906_v0  ;;  %v5737_v23 = vsel %vm2324_vm11, %v5715_v6, %v10313_v61  ;;  %v5736_v32 = vsel %vm2324_vm11, %v12921_v35, %v5715_v6 }
0x1102   :  { %5958 = vmatprep.subr.mxu0 %v5289_v58  ;;  %v10322_v0 = vunpack.i.l.bf16 %v12950_v26  ;;  %v10323_v35 = vunpack.i.h.bf16 %v12950_v26  ;;  %v5836_v58 = vld [vmem:[%s12848_s8 + $0x20] sm:$0xff] }
0x1103   :  { %5959 = vmatpush1.msra.mxu0 %v5288_v53 }
0x1104   :  { %v5641_v49 = vpop.permute.xlu0 %5640  ;;  %v13010_v4 = vpop.permute.xlu1 %10330  ;;  %5960 = vmatprep.subr.mxu0 %v5743_v47  ;;  %v5667_v45 = vsel %vm2305_vm12, %v12959_v29, %v10322_v0  ;;  %v5598_v29 = vsel %vm524_vm3, %v12974_v24, %v12961_v59 }
0x1105   :  { %5961 = vmatpush2.msra.mxu0 %v5742_v46  ;;  %v10332_v8 = vunpack.i.l.bf16 %v13010_v4  ;;  %v10333_v31 = vunpack.i.h.bf16 %v13010_v4 }
0x1106   :  { %5962 = vmatprep.subr.mxu0 %v5741_v17 }
0x1107   :  { %5963 = vmatpush2.msra.mxu0 %v5740_v60  ;;  %v5834_v60 = vld [vmem:[%s12848_s8 + $0x10] sm:$0xff] }
0x1108   :  { %v10326_v42 = vpop.permute.xlu0 %10325  ;;  %v5643_v13 = vpop.permute.xlu1 %5642  ;;  %5964 = vmatprep.subr.mxu0 %v5739_v12 }
0x1109   :  { %5965 = vmatpush2.msra.mxu0 %v5738_v16  ;;  %v10327_v7 = vunpack.i.l.bf16 %v10326_v42  ;;  %v5665_v10 = vsel %vm2305_vm12, %v5643_v13, %v10323_v35  ;;  %v5664_v36 = vsel %vm2305_vm12, %v5641_v49, %v5643_v13  ;;  %v10328_v26 = vunpack.i.h.bf16 %v10326_v42 }
0x110a   :  { %5966 = vmatprep.subr.mxu0 %v5737_v23 }
0x110b   :  { %5967 = vmatpush2.msra.mxu0 %v5736_v32  ;;  %v5599_v39 = vsel %vm524_vm3, %v12961_v59, %v10327_v7  ;;  %v6086_v32 = vld [vmem:[%s11544_s12] sm:$0x3] }
0x110c   :  { %v5583_v43 = vpop.permute.xlu0 %5582  ;;  %v5805_v21 = vpop.permute.xlu1 %5804  ;;  %5968 = vmatprep.subr.mxu0 %v5671_v37 }
0x110d   :  { %5969 = vmatpush2.msra.mxu0 %v5670_v57  ;;  %v5597_v15 = vsel %vm524_vm3, %v5583_v43, %v10328_v26  ;;  %v5596_v62 = vsel %vm524_vm3, %v12983_v9, %v5583_v43  ;;  %v6091_v57 = vrot.slane %v6086_v32, %v14705_v52 }
0x110e   :  { %5970 = vmatprep.subr.mxu0 %v5669_v30 }
0x110f   :  { %5971 = vmatpush2.msra.mxu0 %v5668_v20 }
0x1110   :  { %v5577_v1 = vpop.permute.xlu0 %5576  ;;  %v5571_v40 = vpop.permute.xlu1 %5570  ;;  %5972 = vmatprep.subr.mxu0 %v5667_v45  ;;  %v6095_v45 = vrot.slane %v6086_v32, %v14704_v18 }
0x1111   :  { %5973 = vmatpush2.msra.mxu0 %v5666_v34  ;;  %v5595_v27 = vsel %vm524_vm3, %v5577_v1, %v10332_v8  ;;  %v5593_v24 = vsel %vm524_vm3, %v5571_v40, %v10333_v31 }
0x1112   :  { %5974 = vmatprep.subr.mxu0 %v5665_v10 }
0x1113   :  { %5975 = vmatpush2.msra.mxu0 %v5664_v36 }
0x1114   :  { %v5575_v3 = vpop.permute.xlu0 %5574  ;;  %5976 = vmatprep.subr.mxu0 %v5599_v39  ;;  %v5803_v14 = vpop.permute.xlu1 %5802 }
0x1115   :  { %5977 = vmatpush2.msra.mxu0 %v5598_v29  ;;  %v5594_v51 = vsel %vm524_vm3, %v5575_v3, %v5577_v1 }
0x1116   :  { %5978 = vmatprep.subr.mxu0 %v5597_v15 }
0x1117   :  { %5979 = vmatpush2.msra.mxu0 %v5596_v62 }
0x1118   :  { %v5569_v25 = vpop.permute.xlu0 %5568  ;;  %5980 = vmatprep.subr.mxu0 %v5595_v27  ;;  %v5797_v56 = vpop.permute.xlu1 %5796 }
0x1119   :  { %v5592_v59 = vsel %vm524_vm3, %v5569_v25, %v5571_v40  ;;  %5981 = vmatpush2.msra.mxu0 %v5594_v51  ;;  %v14706_v25 = vld [vmem:[#allocation17_spill] sm:$0xff] }
0x111a   :  { %5982 = vmatprep.subr.mxu0 %v5593_v24  ;;  %v14708_v24 = vld [vmem:[#allocation19_spill] sm:$0xff] }
0x111b   :  { %5983 = vmatpush2.msra.mxu0 %v5592_v59  ;;  %v14707_v59 = vld [vmem:[#allocation18_spill] sm:$0xff] }
0x111c   :  { %v10336_v33 = vpop.permute.xlu0 %10335  ;;  %5984 = vmatprep.subr.mxu0 %v11728_v48  ;;  %v10341_v19 = vpop.permute.xlu1 %10340 }
0x111d   :  { %5985 = vmatpush2.msra.mxu0 %v11717_v50  ;;  %v10337_v9 = vunpack.i.l.bf16 %v10336_v33  ;;  %v10338_v53 = vunpack.i.h.bf16 %v10336_v33  ;;  %v10342_v48 = vunpack.i.l.bf16 %v10341_v19  ;;  %v5814_v50 = vsel %vm2343_vm10, %v5803_v14, %v5805_v21  ;;  %v14709_v33 = vld [vmem:[#allocation20_spill] sm:$0xff] }
0x111e   :  { %5986 = vmatprep.subr.mxu0 %v11715_v54  ;;  %v10343_v47 = vunpack.i.h.bf16 %v10341_v19 }
0x111f   :  { %5987 = vmatpush2.msra.mxu0 %v11726_v2  ;;  %v5815_v54 = vsel %vm2343_vm10, %v5805_v21, %v10337_v9 }
0x1120   :  { %v5799_v6 = vpop.permute.xlu0 %5798  ;;  %5988 = vmatprep.subr.mxu0 %v12744_v41  ;;  %v5787_v46 = vpop.permute.xlu1 %5786 }
0x1121   :  { %5989 = vmatpush2.msra.mxu0 %v12758_v38  ;;  %v5813_v41 = vsel %vm2343_vm10, %v5799_v6, %v10338_v53  ;;  %v5835_v38 = vld [vmem:[%s12848_s8 + $0x18] sm:$0xff]  ;;  %v5809_v44 = vsel %vm2343_vm10, %v5787_v46, %v10343_v47 }
0x1122   :  { %5990 = vmatprep.subr.mxu0 %v12797_v63  ;;  %v5812_v63 = vsel %vm2343_vm10, %v5797_v56, %v5799_v6 }
0x1123   :  { %5991 = vmatpush2.msra.mxu0 %v12763_v11 }
0x1124   :  { %v5793_v2 = vpop.permute.xlu0 %5792  ;;  %5993 = vmatmul.mubr.f32.vlgmr.msra.gmra.mxu0 %v5832_v55  ;;  %6029 = vmatprep.subr.mxu0 %v5815_v54 }
0x1125   :  { %6030 = vmatpush1.msra.mxu0 %v5814_v50  ;;  %5998 = vmatprep.mubr.f32.mxu0 %v5836_v58  ;;  %v5811_v11 = vsel %vm2343_vm10, %v5793_v2, %v10342_v48  ;;  %v14710_v58 = vld [vmem:[#allocation21_spill] sm:$0xff] }
0x1126   :  { %6031 = vmatprep.subr.mxu0 %v5813_v41 }
0x1127   :  { %6032 = vmatpush1.msra.mxu0 %v5812_v63 }
0x1128   :  { %v5791_v49 = vpop.permute.xlu0 %5790  ;;  %5999 = vmatmul.mubr.f32.gmra.mxu0 %v5835_v38  ;;  %6033 = vmatprep.subr.mxu0 %v5811_v11 }
0x1129   :  { %v5810_v4 = vsel %vm2343_vm10, %v5791_v49, %v5793_v2  ;;  %6069 = vmatprep.mubr.f32.mxu0 %v14696_v22 }
0x112a   :  { %6034 = vmatpush1.msra.mxu0 %v5810_v4 }
0x112b   :  { %6035 = vmatprep.subr.mxu0 %v5809_v44 }
0x112c   :  { %v5785_v17 = vpop.permute.xlu0 %5784 }
0x112d   :  { %v5808_v61 = vsel %vm2343_vm10, %v5785_v17, %v5787_v46  ;;  %v5920_v1 = vpop.permute.xlu1 %5919 }
0x112e   :  { %6036 = vmatpush1.msra.mxu0 %v5808_v61 }
0x112f   :  { %9421 = vmatmul.mubr.msk.f32.vlgmr.msra.gmra.mxu0 %vm4416_vm0, %v5834_v60 }
0x1130   :  { %6075 = vmatprep.mubr.f32.mxu0 %v14696_v22 }
0x1131   :  { %v13218_v6 = vpop.permute.xlu1 %10350 }
0x1132   :  { %v10352_v32 = vunpack.i.l.bf16 %v13218_v6 }
0x1133   :  { %9422 = vmatmul.mubr.msk.f32.gmra.mxu0 %vm4416_vm0, %v5837_v28  ;;  %vm14734_vm0 = vmmov %vm14723_vm5 }
0x1135   :  { %v13230_v55 = vpop.permute.xlu1 %10365 }
0x1139   :  { %v5915_v16 = vpop.permute.xlu0 %5914 }
0x113d   :  { %v10346_v56 = vpop.permute.xlu0 %10345 }
0x113e   :  { %v10347_v61 = vunpack.i.l.bf16 %v10346_v56 }
0x1141   :  { %v13216_v9 = vpop.permute.xlu0 %10355 }
0x1145   :  { %v13228_v19 = vpop.permute.xlu0 %10360 }
0x11e4   :  { %v5994_v12 = vpop.f32.mrf.mxu0 }
0x11e5   :  { %v5995_v5 = vadd.f32 %v5994_v12, %v5915_v16 }
0x11e6   :  { %v5996_v42 = vpop.f32.mrf.mxu0 }
0x11e7   :  { %v5997_v21 = vadd.f32 %v5996_v42, %v5915_v16  ;;  %v10348_v16 = vunpack.i.h.bf16 %v10346_v56  ;;  %v10363_v56 = vunpack.i.h.bf16 %v13228_v19 }
0x11e8   :  { %v6000_v13 = vpop.f32.mrf.mxu0 }
0x11e9   :  { %v6001_v10 = vadd.f32 %v6000_v13, %v5920_v1 }
0x11ea   :  { %v6002_v23 = vpop.f32.mrf.mxu0 }
0x11eb   :  { %v6003_v29 = vadd.f32 %v6002_v23, %v5920_v1  ;;  %v14711_v23 = vld [vmem:[#allocation22_spill] sm:$0xff] }
0x11ef   :  { %v6071_v0 = vpop.f32.mrf.mxu0 }
0x11f0   :  { %v6072_v37 = vadd.f32 %v6071_v0, %v5995_v5 }
0x11f1   :  { %v6073_v43 = vpop.f32.mrf.mxu0 }
0x11f2   :  { %v6082_v30 = vmax.f32 %v6072_v37, 0.0  ;;  %v6074_v35 = vadd.f32 %v6073_v43, %v5997_v21  ;;  %v10353_v43 = vunpack.i.h.bf16 %v13218_v6  ;;  %v10367_v6 = vunpack.i.l.bf16 %v13230_v55 }
0x11f3   :  { %v6077_v40 = vpop.f32.mrf.mxu0 }
0x11f4   :  { %v13098_v20 = vmul.f32 %v6091_v57, %v6082_v30  ;;  %v6083_v7 = vmax.f32 %v6074_v35, 0.0  ;;  %v6078_v36 = vadd.f32 %v6077_v40, %v6001_v10  ;;  %v10357_v30 = vunpack.i.l.bf16 %v13216_v9 }
0x11f5   :  { %v6079_v39 = vpop.f32.mrf.mxu0 }
0x11f6   :  { %6306 = vrot.lane.b32.xlu0 %v13098_v20, %s10480_s27  ;;  %6342 = vrot.lane.b32.xlu1 %v13098_v20, %s10478_s16  ;;  %v13109_v34 = vmul.f32 %v6095_v45, %v6083_v7  ;;  %v6084_v8 = vmax.f32 %v6078_v36, 0.0  ;;  %v6080_v3 = vadd.f32 %v6079_v39, %v6003_v29 }
0x11f8   :  { %v13123_v26 = vmul.f32 %v6091_v57, %v6084_v8  ;;  %v6085_v31 = vmax.f32 %v6080_v3, 0.0  ;;  %v10358_v8 = vunpack.i.h.bf16 %v13216_v9 }
0x11fa   :  { %6192 = vrot.lane.b32.xlu0 %v13098_v20, %s10474_s3  ;;  %6270 = vrot.lane.b32.xlu1 %v13098_v20, %s10471_s24  ;;  %v13137_v14 = vmul.f32 %v6095_v45, %v6085_v31 }
0x11fe   :  { %6344 = vrot.lane.b32.xlu0 %v13109_v34, %s10478_s16  ;;  %6228 = vrot.lane.b32.xlu1 %v13098_v20, %s10461_s6 }
0x1202   :  { %6272 = vrot.lane.b32.xlu0 %v13109_v34, %s10471_s24  ;;  %6308 = vrot.lane.b32.xlu1 %v13109_v34, %s10480_s27 }
0x1206   :  { %6230 = vrot.lane.b32.xlu0 %v13109_v34, %s10461_s6  ;;  %6194 = vrot.lane.b32.xlu1 %v13109_v34, %s10474_s3 }
0x120a   :  { %6312 = vrot.lane.b32.xlu0 %v13123_v26, %s10480_s27  ;;  %6348 = vrot.lane.b32.xlu1 %v13123_v26, %s10478_s16 }
0x120e   :  { %6234 = vrot.lane.b32.xlu0 %v13123_v26, %s10461_s6  ;;  %6276 = vrot.lane.b32.xlu1 %v13123_v26, %s10471_s24 }
0x1212   :  { %6162 = vrot.lane.b32.xlu0 %v13123_v26, %s10481_s28  ;;  %6198 = vrot.lane.b32.xlu1 %v13123_v26, %s10474_s3 }
0x1216   :  { %6314 = vrot.lane.b32.xlu0 %v13137_v14, %s10480_s27  ;;  %6350 = vrot.lane.b32.xlu1 %v13137_v14, %s10478_s16  ;;  %s10497_s16 = smov 22  }
0x1217   :  { %s13162_s4 = sld [smem:[%s14628_s0 + %s10497_s16]]  }
0x121a   :  { %10370 = vrot.lane.b32.xlu0 %v14696_v22, %s10481_s28  ;;  %6156 = vrot.lane.b32.xlu1 %v13098_v20, %s10481_s28 }
0x121d   :  { %v6403_v15 = vld [vmem:[%s13162_s4 + $0x8] sm:$0xff] }
0x121e   :  { %6158 = vrot.lane.b32.xlu0 %v13109_v34, %s10481_s28  ;;  %6278 = vrot.lane.b32.xlu1 %v13137_v14, %s10471_s24 }
0x121f   :  { %9423 = vmatprep.mubr.msk.f32.mxu1 %vm2837_vm9, %v6403_v15 }
0x1222   :  { %6120 = vrot.lane.b32.xlu0 %v13098_v20, %s10482_s30  ;;  %6126 = vrot.lane.b32.xlu1 %v13123_v26, %s10482_s30 }
0x1226   :  { %6200 = vrot.lane.b32.xlu0 %v13137_v14, %s10474_s3  ;;  %6236 = vrot.lane.b32.xlu1 %v13137_v14, %s10461_s6  ;;  %s10498_s3 = smov 23  }
0x1227   :  { %s9379_s13 = sld [smem:[%s14628_s0 + %s10498_s3]]  }
0x122a   :  { %6384 = vrot.lane.b32.xlu0 %v13123_v26, %s10479_s26  ;;  %10375 = vrot.lane.b32.xlu1 %v14696_v22, %s10482_s30 }
0x122d   :  { %v6442_v62 = vld [vmem:[%s9379_s13] sm:$0xff]  ;;  %v6443_v27 = vld [vmem:[%s9379_s13 + $0x8] sm:$0xff]  ;;  %s10504_s13 = smov 31  }
0x122e   :  { %6128 = vrot.lane.b32.xlu0 %v13137_v14, %s10482_s30  ;;  %6164 = vrot.lane.b32.xlu1 %v13137_v14, %s10481_s28  ;;  %s10499_s28 = smov 25   ;;  %s9387_s5 = sld [smem:[%s14628_s0 + %s10504_s13]]  }
0x122f   :  { %s9381_s14 = sld [smem:[%s14628_s0 + %s10499_s28]]  }
0x1232   :  { %6386 = vrot.lane.b32.xlu0 %v13137_v14, %s10479_s26  ;;  %6122 = vrot.lane.b32.xlu1 %v13109_v34, %s10482_s30 }
0x1235   :  { %v6983_v51 = vld [vmem:[%s9381_s14] sm:$0xff]  ;;  %s10505_s14 = smov 30  }
0x1236   :  { %6378 = vrot.lane.b32.xlu0 %v13098_v20, %s10479_s26  ;;  %10380 = vrot.lane.b32.xlu1 %v14696_v22, %s10479_s26  ;;  %s9386_s7 = sld [smem:[%s14628_s0 + %s10505_s14]]  }
0x123a   :  { %6446 = vperm.xlu0 %10018, %v6442_v62   ;;  %6380 = vrot.lane.b32.xlu1 %v13109_v34, %s10479_s26  ;;  %s10500_s26 = smov 35  }
0x123b   :  { %s13385_s8 = sld [smem:[%s14628_s0 + %s10500_s26]]  }
0x123e   :  { %10385 = vrot.lane.b32.xlu0 %v14696_v22, %s10461_s6  ;;  %6451 = vperm.xlu1 %10017, %v6443_v27   ;;  %v10362_v27 = vunpack.i.l.bf16 %v13228_v19 }
0x1242   :  { %6986 = vperm.xlu0 %10018, %v6983_v51   ;;  %10390 = vrot.lane.b32.xlu1 %v14696_v22, %s10468_s21 }
0x1246   :  { %7330 = vperm.xlu0 %10018, %v6983_v51   ;;  %10395 = vrot.lane.b32.xlu1 %v14696_v22, %s10466_s19 }
0x124a   :  { %7978 = vrot.lane.b32.xlu0 %v14706_v25, %s10469_s22  ;;  %7980 = vrot.lane.b32.xlu1 %v14707_v59, %s10469_s22 }
0x124e   :  { %7976 = vrot.lane.b32.xlu0 %v14708_v24, %s10469_s22  ;;  %7888 = vrot.lane.b32.xlu1 %v14707_v59, %s10470_s23 }
0x1252   :  { %7886 = vrot.lane.b32.xlu0 %v14706_v25, %s10470_s23  ;;  %7796 = vrot.lane.b32.xlu1 %v14707_v59, %s10471_s24 }
0x1256   :  { %7884 = vrot.lane.b32.xlu0 %v14708_v24, %s10470_s23  ;;  %7680 = vrot.lane.b32.xlu1 %v14706_v25, %s10461_s6 }
0x125a   :  { %7794 = vrot.lane.b32.xlu0 %v14706_v25, %s10471_s24  ;;  %7982 = vrot.lane.b32.xlu1 %v14709_v33, %s10469_s22 }
0x125e   :  { %7792 = vrot.lane.b32.xlu0 %v14708_v24, %s10471_s24  ;;  %7586 = vrot.lane.b32.xlu1 %v14708_v24, %s10465_s18 }
0x1262   :  { %7678 = vrot.lane.b32.xlu0 %v14708_v24, %s10461_s6  ;;  %10405 = vrot.lane.b32.xlu1 %v14696_v22, %s10465_s18 }
0x1266   :  { %10400 = vrot.lane.b32.xlu0 %v14696_v22, %s10461_s6  ;;  %7892 = vrot.lane.b32.xlu1 %v14710_v58, %s10470_s23 }
0x1268   :  { %v6307_v53 = vpop.permute.xlu0 %6306  ;;  %v6343_v48 = vpop.permute.xlu1 %6342 }
0x126a   :  { %7984 = vrot.lane.b32.xlu0 %v14710_v58, %s10469_s22  ;;  %7496 = vrot.lane.b32.xlu1 %v14706_v25, %s10468_s21 }
0x126c   :  { %v13240_v54 = vpop.permute.xlu0 %6192  ;;  %v13242_v50 = vpop.permute.xlu1 %6270 }
0x126e   :  { %7588 = vrot.lane.b32.xlu0 %v14706_v25, %s10465_s18  ;;  %7798 = vrot.lane.b32.xlu1 %v14709_v33, %s10471_s24 }
0x1270   :  { %v6345_v2 = vpop.permute.xlu0 %6344  ;;  %v13248_v41 = vpop.permute.xlu1 %6228 }
0x1271   :  { %v6355_v0 = vsel %vm2324_vm11, %v6345_v2, %v10348_v16  ;;  %v6354_v57 = vsel %vm2324_vm11, %v6343_v48, %v6345_v2 }
0x1272   :  { %7890 = vrot.lane.b32.xlu0 %v14709_v33, %s10470_s23  ;;  %7402 = vrot.lane.b32.xlu1 %v14708_v24, %s10466_s19 }
0x1274   :  { %v13254_v38 = vpop.permute.xlu0 %6272  ;;  %v6309_v47 = vpop.permute.xlu1 %6308 }
0x1275   :  { %v6319_v45 = vsel %vm2305_vm12, %v6309_v47, %v10353_v43  ;;  %v6318_v40 = vsel %vm2305_vm12, %v6307_v53, %v6309_v47  ;;  %v6283_v29 = vsel %vm524_vm3, %v13254_v38, %v10358_v8  ;;  %v6282_v31 = vsel %vm524_vm3, %v13242_v50, %v13254_v38  ;;  %v13416_v8 = vld [vmem:[%s13385_s8 + $0xe8] sm:$0xff] }
0x1276   :  { %7494 = vrot.lane.b32.xlu0 %v14708_v24, %s10468_s21  ;;  %10415 = vrot.lane.b32.xlu1 %v14696_v22, %s10466_s19  ;;  %v10368_v53 = vunpack.i.h.bf16 %v13230_v55 }
0x1278   :  { %v13260_v63 = vpop.permute.xlu0 %6230  ;;  %v13262_v46 = vpop.permute.xlu1 %6194 }
0x127a   :  { %10410 = vrot.lane.b32.xlu0 %v14696_v22, %s10468_s21  ;;  %8072 = vrot.lane.b32.xlu1 %v14707_v59, %s10467_s20 }
0x127c   :  { %v6313_v11 = vpop.permute.xlu0 %6312  ;;  %v6349_v49 = vpop.permute.xlu1 %6348 }
0x127e   :  { %7800 = vrot.lane.b32.xlu0 %v14710_v58, %s10471_s24  ;;  %7682 = vrot.lane.b32.xlu1 %v14707_v59, %s10461_s6 }
0x1280   :  { %v13272_v4 = vpop.permute.xlu0 %6234  ;;  %v6277_v44 = vpop.permute.xlu1 %6276 }
0x1282   :  { %7404 = vrot.lane.b32.xlu0 %v14706_v25, %s10466_s19  ;;  %10420 = vrot.lane.b32.xlu1 %v14696_v22, %s10469_s22 }
0x1284   :  { %v13278_v17 = vpop.permute.xlu0 %6162  ;;  %v13280_v60 = vpop.permute.xlu1 %6198 }
0x1285   :  { %v6204_v50 = vsel %vm2246_vm13, %v10367_v6, %v13280_v60 }
0x1286   :  { %8070 = vrot.lane.b32.xlu0 %v14706_v25, %s10467_s20  ;;  %7592 = vrot.lane.b32.xlu1 %v14709_v33, %s10465_s18 }
0x1288   :  { %v6315_v28 = vpop.permute.xlu0 %6314  ;;  %v6351_v12 = vpop.permute.xlu1 %6350 }
0x1289   :  { %v6357_v42 = vsel %vm2324_vm11, %v6351_v12, %v10347_v61  ;;  %v6356_v13 = vsel %vm2324_vm11, %v6349_v49, %v6351_v12  ;;  %v6321_v21 = vsel %vm2305_vm12, %v6315_v28, %v10352_v32  ;;  %v6320_v35 = vsel %vm2305_vm12, %v6313_v11, %v6315_v28  ;;  %vm14729_vm11 = vmmov %vm14722_vm2 }
0x128a   :  { %8068 = vrot.lane.b32.xlu0 %v14708_v24, %s10467_s20  ;;  %7894 = vrot.lane.b32.xlu1 %v14711_v23, %s10470_s23  ;;  %vm14730_vm12 = vmmov %vm14723_vm5 }
0x128b   :  { %6460 = vmatprep.subr.mxu1 %v6357_v42 }
0x128c   :  { %6461 = vmatpush1.msra.mxu1 %v6356_v13  ;;  %v13293_v5 = vpop.permute.xlu0 %10370  ;;  %v13296_v37 = vpop.permute.xlu1 %6156 }
0x128d   :  { %6462 = vmatprep.subr.mxu1 %v6355_v0  ;;  %v10372_v48 = vunpack.i.l.bf16 %v13293_v5  ;;  %v10373_v47 = vunpack.i.h.bf16 %v13293_v5 }
0x128e   :  { %6463 = vmatpush1.msra.mxu1 %v6354_v57  ;;  %7684 = vrot.lane.b32.xlu0 %v14709_v33, %s10461_s6 }
0x128f   :  { %7498 = vrot.lane.b32.xlu1 %v14707_v59, %s10468_s21  ;;  %6464 = vmatprep.subr.mxu1 %v6321_v21  ;;  %v6168_v49 = vsel %vm2227_vm14, %v10372_v48, %v13278_v17  ;;  %v6402_v21 = vld [vmem:[%s13162_s4] sm:$0xff] }
0x1290   :  { %6465 = vmatpush1.msra.mxu1 %v6320_v35  ;;  %v6159_v7 = vpop.permute.xlu0 %6158  ;;  %v6279_v1 = vpop.permute.xlu1 %6278  ;;  %v6404_v35 = vld [vmem:[%s13162_s4 + $0x10] sm:$0xff] }
0x1291   :  { %6466 = vmatprep.subr.mxu1 %v6319_v45  ;;  %v6285_v10 = vsel %vm524_vm3, %v6279_v1, %v10357_v30  ;;  %v6284_v36 = vsel %vm524_vm3, %v6277_v44, %v6279_v1  ;;  %v6405_v30 = vld [vmem:[%s13162_s4 + $0x18] sm:$0xff]  ;;  %v13392_v45 = vld [vmem:[%s13385_s8 + $0x160] sm:$0xff]  ;;  %v13396_v1 = vld [vmem:[%s13385_s8 + $0x148] sm:$0xff]  ;;  %s10503_s4 = smov 27  }
0x1292   :  { %6467 = vmatpush1.msra.mxu1 %v6318_v40  ;;  %7986 = vrot.lane.b32.xlu0 %v14711_v23, %s10469_s22  ;;  %v13401_v40 = vld [vmem:[%s13385_s8 + $0x130] sm:$0xff]  ;;  %s9383_s29 = sld [smem:[%s14628_s0 + %s10503_s4]]  }
0x1293   :  { %6468 = vmatprep.subr.mxu1 %v6285_v10  ;;  %10430 = vrot.lane.b32.xlu1 %v14696_v22, %s10471_s24  ;;  %v13406_v10 = vld [vmem:[%s13385_s8 + $0x118] sm:$0xff] }
0x1294   :  { %6469 = vmatpush1.msra.mxu1 %v6284_v36  ;;  %v13316_v39 = vpop.permute.xlu0 %6120  ;;  %v6127_v3 = vpop.permute.xlu1 %6126  ;;  %v13411_v36 = vld [vmem:[%s13385_s8 + $0x100] sm:$0xff] }
0x1295   :  { %6470 = vmatprep.subr.mxu1 %v6283_v29  ;;  %v13426_v29 = vld [vmem:[%s13385_s8 + $0xb8] sm:$0xff] }
0x1296   :  { %6471 = vmatpush1.msra.mxu1 %v6282_v31  ;;  %7590 = vrot.lane.b32.xlu0 %v14707_v59, %s10465_s18  ;;  %v13436_v31 = vld [vmem:[%s13385_s8 + $0x88] sm:$0xff] }
0x1297   :  { %6472 = vmatprep.subr.mxu1 %v13137_v14 }
0x1298   :  { %6473 = vmatpush1.msra.mxu1 %v13123_v26  ;;  %v6201_v15 = vpop.permute.xlu0 %6200  ;;  %v6237_v62 = vpop.permute.xlu1 %6236  ;;  %v6240_v26 = vsel %vm465_vm4, %v10362_v27, %v13272_v4  ;;  %v13451_v27 = vld [vmem:[%s13385_s8 + $0x40] sm:$0xff] }
0x1299   :  { %6474 = vmatprep.subr.mxu1 %v13109_v34  ;;  %v6241_v51 = vsel %vm465_vm4, %v13272_v4, %v6237_v62  ;;  %v6239_v34 = vsel %vm465_vm4, %v13248_v41, %v13260_v63  ;;  %v6205_v19 = vsel %vm2246_vm13, %v13280_v60, %v6201_v15  ;;  %v6202_v63 = vsel %vm2246_vm13, %v10368_v53, %v13240_v54  ;;  %v13441_v15 = vld [vmem:[%s13385_s8 + $0x70] sm:$0xff]  ;;  %v13446_v62 = vld [vmem:[%s13385_s8 + $0x58] sm:$0xff]  ;;  %v6541_v53 = vld [vmem:[%s11544_s12] sm:$0x3]  ;;  %s10502_s12 = smov 26  }
0x129a   :  { %6475 = vmatpush1.msra.mxu1 %v13098_v20  ;;  %10425 = vrot.lane.b32.xlu0 %v14696_v22, %s10470_s23  ;;  %v6238_v20 = vsel %vm465_vm4, %v10363_v56, %v13248_v41  ;;  %v6203_v41 = vsel %vm2246_vm13, %v13240_v54, %v13262_v46  ;;  %v6167_v46 = vsel %vm2227_vm14, %v13296_v37, %v6159_v7  ;;  %v13388_v7 = vld [vmem:[%s13385_s8 + $0x178] sm:$0xff]  ;;  %vm14731_vm13 = vmmov %vm14722_vm2  ;;  %s13932_s2 = sld [smem:[%s14628_s0 + %s10502_s12]]  }
0x129b   :  { %6476 = vmatprep.subr.mxu1 %v6241_v51  ;;  %v6166_v54 = vsel %vm2227_vm14, %v10373_v47, %v13296_v37  ;;  %9891 = vmatprep.subr.mxu0 %v13388_v7 }
0x129c   :  { %6477 = vmatpush1.msra.mxu1 %v6240_v26  ;;  %v6385_v14 = vpop.permute.xlu0 %6384  ;;  %v10376_v9 = vpop.permute.xlu1 %10375  ;;  %9892 = vmatpush3.msra.mxu0 %v13388_v7 }
0x129d   :  { %6478 = vmatprep.subr.mxu1 %v6239_v34  ;;  %v10377_v11 = vunpack.i.l.bf16 %v10376_v9  ;;  %v10378_v44 = vunpack.i.h.bf16 %v10376_v9  ;;  %9893 = vmatprep.subr.mxu0 %v13392_v45 }
0x129e   :  { %6479 = vmatpush1.msra.mxu1 %v6238_v20  ;;  %7500 = vrot.lane.b32.xlu0 %v14709_v33, %s10468_s21 }
0x129f   :  { %6480 = vmatprep.subr.mxu1 %v6205_v19  ;;  %v6132_v28 = vsel %vm2208_vm15, %v10377_v11, %v6127_v3  ;;  %v6130_v13 = vsel %vm2208_vm15, %v10378_v44, %v13316_v39  ;;  %9894 = vmatpush3.msra.mxu0 %v13392_v45  ;;  %v13467_v44 = vld [vmem:[%s13385_s8 + $0x170] sm:$0xff] }
0x12a0   :  { %6481 = vmatpush1.msra.mxu1 %v6204_v50  ;;  %v6129_v2 = vpop.permute.xlu0 %6128  ;;  %v6165_v38 = vpop.permute.xlu1 %6164  ;;  %9895 = vmatprep.subr.mxu0 %v13396_v1 }
0x12a1   :  { %6482 = vmatprep.subr.mxu1 %v6203_v41  ;;  %v6169_v55 = vsel %vm2227_vm14, %v13278_v17, %v6165_v38  ;;  %v6133_v61 = vsel %vm2208_vm15, %v6127_v3, %v6129_v2  ;;  %9896 = vmatpush3.msra.mxu0 %v13396_v1  ;;  %v13431_v3 = vld [vmem:[%s13385_s8 + $0xa0] sm:$0xff]  ;;  %v6550_v41 = vrot.slane %v6541_v53, %v14704_v18  ;;  %vm14732_vm14 = vmmov %vm14723_vm5 }
0x12a2   :  { %6483 = vmatpush1.msra.mxu1 %v6202_v63  ;;  %7802 = vrot.lane.b32.xlu0 %v14711_v23, %s10471_s24  ;;  %v6546_v63 = vrot.slane %v6541_v53, %v14705_v52  ;;  %v13576_v53 = vld [vmem:[%s13385_s8 + $0x48] sm:$0xff] }
0x12a3   :  { %6484 = vmatprep.subr.mxu1 %v6169_v55  ;;  %9897 = vmatprep.subr.mxu0 %v13401_v40 }
0x12a4   :  { %6485 = vmatpush1.msra.mxu1 %v6168_v49  ;;  %v6123_v4 = vpop.permute.xlu1 %6122  ;;  %v6387_v60 = vpop.permute.xlu0 %6386  ;;  %9898 = vmatpush3.msra.mxu0 %v13401_v40 }
0x12a5   :  { %6486 = vmatprep.subr.mxu1 %v6167_v46  ;;  %v6131_v12 = vsel %vm2208_vm15, %v13316_v39, %v6123_v4  ;;  %v6392_v37 = vsel %vm2343_vm10, %v6385_v14, %v6387_v60  ;;  %9899 = vmatprep.subr.mxu0 %v13406_v10  ;;  %v13421_v39 = vld [vmem:[%s13385_s8 + $0xd0] sm:$0xff]  ;;  %v6565_v4 = vld [vmem:[%s13460_s1] sm:$0xff]  ;;  %vm14733_vm15 = vmmov %vm14722_vm2 }
0x12a6   :  { %6487 = vmatpush1.msra.mxu1 %v6166_v54  ;;  %9900 = vmatpush3.msra.mxu0 %v13406_v10  ;;  %v13470_v54 = vld [vmem:[%s13385_s8 + $0x168] sm:$0xff] }
0x12a7   :  { %6488 = vmatprep.subr.mxu1 %v6133_v61  ;;  %9901 = vmatprep.subr.mxu0 %v13411_v36  ;;  %v13478_v61 = vld [vmem:[%s13385_s8 + $0x150] sm:$0xff] }
0x12a8   :  { %6489 = vmatpush1.msra.mxu1 %v6132_v28  ;;  %v10381_v17 = vpop.permute.xlu1 %10380  ;;  %v6379_v5 = vpop.permute.xlu0 %6378  ;;  %9902 = vmatpush3.msra.mxu0 %v13411_v36  ;;  %v6566_v28 = vld [vmem:[%s13460_s1 + $0x8] sm:$0xff] }
0x12a9   :  { %v10382_v42 = vunpack.i.l.bf16 %v10381_v17  ;;  %6490 = vmatprep.subr.mxu1 %v6131_v12  ;;  %v10383_v16 = vunpack.i.h.bf16 %v10381_v17  ;;  %9903 = vmatprep.subr.mxu0 %v13416_v8  ;;  %v13484_v17 = vld [vmem:[%s13385_s8 + $0x140] sm:$0xff]  ;;  %v13488_v12 = vld [vmem:[%s13385_s8 + $0x138] sm:$0xff] }
0x12aa   :  { %6491 = vmatpush1.msra.mxu1 %v6130_v13  ;;  %9904 = vmatpush3.msra.mxu0 %v13416_v8  ;;  %v13497_v13 = vld [vmem:[%s13385_s8 + $0x120] sm:$0xff] }
0x12ab   :  { %v6393_v32 = vsel %vm2343_vm10, %v6387_v60, %v10382_v42  ;;  %9905 = vmatprep.subr.mxu0 %v13421_v39  ;;  %v13473_v60 = vld [vmem:[%s13385_s8 + $0x158] sm:$0xff]  ;;  %v13492_v42 = vld [vmem:[%s13385_s8 + $0x128] sm:$0xff] }
0x12ac   :  { %v6381_v0 = vpop.permute.xlu1 %6380  ;;  %6520 = vmatprep.subr.mxu1 %v6393_v32  ;;  %9906 = vmatpush3.msra.mxu0 %v13421_v39  ;;  %v13503_v32 = vld [vmem:[%s13385_s8 + $0x110] sm:$0xff] }
0x12ad   :  { %6521 = vmatpush2.msra.mxu1 %v6392_v37  ;;  %v6391_v57 = vsel %vm2343_vm10, %v6381_v0, %v10383_v16  ;;  %v6390_v43 = vsel %vm2343_vm10, %v6379_v5, %v6381_v0  ;;  %9907 = vmatprep.subr.mxu0 %v13426_v29  ;;  %v6567_v16 = vld [vmem:[%s13460_s1 + $0x10] sm:$0xff]  ;;  %v13507_v5 = vld [vmem:[%s13385_s8 + $0x108] sm:$0xff]  ;;  %v13511_v0 = vld [vmem:[%s13385_s8 + $0xf8] sm:$0xff] }
0x12ae   :  { %6522 = vmatprep.subr.mxu1 %v6391_v57  ;;  %9908 = vmatpush3.msra.mxu0 %v13426_v29  ;;  %v13516_v37 = vld [vmem:[%s13385_s8 + $0xf0] sm:$0xff]  ;;  %v6568_v57 = vld [vmem:[%s13460_s1 + $0x18] sm:$0xff]  ;;  %vm14727_vm10 = vmmov %vm14723_vm5 }
0x12af   :  { %6523 = vmatpush2.msra.mxu1 %v6390_v43  ;;  %9909 = vmatprep.subr.mxu0 %v13431_v3  ;;  %v13522_v43 = vld [vmem:[%s13385_s8 + $0xe0] sm:$0xff] }
0x12b0   :  { %6525 = vmatmul.mubr.f32.vlgmr.msra.gmra.mxu1 %v6402_v21  ;;  %9910 = vmatpush3.msra.mxu0 %v13431_v3  ;;  %v13526_v21 = vld [vmem:[%s13385_s8 + $0xd8] sm:$0xff] }
0x12b1   :  { %9424 = vmatprep.mubr.msk.f32.mxu1 %vm2837_vm9, %v6405_v30  ;;  %9911 = vmatprep.subr.mxu0 %v13436_v31  ;;  %v13530_v30 = vld [vmem:[%s13385_s8 + $0xc8] sm:$0xff] }
0x12b2   :  { %9912 = vmatpush3.msra.mxu0 %v13436_v31 }
0x12b3   :  { %9913 = vmatprep.subr.mxu0 %v13441_v15 }
0x12b4   :  { %6531 = vmatmul.mubr.f32.gmra.mxu1 %v6404_v35  ;;  %9914 = vmatpush3.msra.mxu0 %v13441_v15  ;;  %v13535_v35 = vld [vmem:[%s13385_s8 + $0xc0] sm:$0xff] }
0x12b5   :  { %6645 = vmatprep.mubr.f32.mxu1 %v14696_v22  ;;  %9915 = vmatprep.subr.mxu0 %v13446_v62  ;;  %v6447_v26 = vpop.permute.xlu0 %6446 }
0x12b6   :  { %9916 = vmatpush3.msra.mxu0 %v13446_v62 }
0x12b7   :  { %9917 = vmatprep.subr.mxu0 %v13451_v27 }
0x12b8   :  { %9918 = vmatpush3.msra.mxu0 %v13451_v27 }
0x12b9   :  { %v6452_v14 = vpop.permute.xlu1 %6451 }
0x12bd   :  { %v13633_v24 = vpop.permute.xlu1 %10390 }
0x1370   :  { %v6526_v51 = vpop.f32.mrf.mxu1 }
0x1371   :  { %v6527_v20 = vadd.f32 %v6526_v51, %v6447_v26  ;;  %v13539_v51 = vld [vmem:[%s13385_s8 + $0xb0] sm:$0xff] }
0x1372   :  { %v6528_v56 = vpop.f32.mrf.mxu1 }
0x1373   :  { %v6529_v9 = vadd.f32 %v6528_v56, %v6447_v26  ;;  %v6537_v47 = vmax.f32 %v6527_v20, 0.0  ;;  %v13544_v56 = vld [vmem:[%s13385_s8 + $0xa8] sm:$0xff]  ;;  %v13548_v26 = vld [vmem:[%s13385_s8 + $0x98] sm:$0xff]  ;;  %v13568_v20 = vld [vmem:[%s13385_s8 + $0x60] sm:$0xff] }
0x1374   :  { %v6532_v34 = vpop.f32.mrf.mxu1 }
0x1375   :  { %v6533_v6 = vadd.f32 %v6532_v34, %v6452_v14  ;;  %v6538_v2 = vmax.f32 %v6529_v9, 0.0  ;;  %v6553_v46 = vmul.f32 %v6546_v63, %v6537_v47  ;;  %v13556_v34 = vld [vmem:[%s13385_s8 + $0x80] sm:$0xff]  ;;  %v13560_v9 = vld [vmem:[%s13385_s8 + $0x78] sm:$0xff] }
0x1376   :  { %v6534_v19 = vpop.f32.mrf.mxu1  ;;  %v13600_v47 = vld [vmem:[%s13385_s8] sm:$0xff] }
0x1377   :  { %v6535_v48 = vadd.f32 %v6534_v19, %v6452_v14  ;;  %v6539_v50 = vmax.f32 %v6533_v6, 0.0  ;;  %v6554_v49 = vmul.f32 %v6550_v41, %v6538_v2  ;;  %v13552_v14 = vld [vmem:[%s13385_s8 + $0x90] sm:$0xff]  ;;  %v13564_v6 = vld [vmem:[%s13385_s8 + $0x68] sm:$0xff]  ;;  %v13588_v2 = vld [vmem:[%s13385_s8 + $0x20] sm:$0xff] }
0x1378   :  { %v13572_v19 = vld [vmem:[%s13385_s8 + $0x50] sm:$0xff] }
0x1379   :  { %v6540_v38 = vmax.f32 %v6535_v48, 0.0  ;;  %v6555_v11 = vmul.f32 %v6546_v63, %v6539_v50  ;;  %v13580_v48 = vld [vmem:[%s13385_s8 + $0x38] sm:$0xff]  ;;  %v13584_v50 = vld [vmem:[%s13385_s8 + $0x30] sm:$0xff]  ;;  %v13607_v63 = vld [vmem:[%s13385_s8 + $0x28] sm:$0xff] }
0x137a   :  { %9919 = vmatprep.subr.mxu0 %v13607_v63 }
0x137b   :  { %v6556_v55 = vmul.f32 %v6550_v41, %v6540_v38  ;;  %v13592_v41 = vld [vmem:[%s13385_s8 + $0x18] sm:$0xff]  ;;  %v13596_v38 = vld [vmem:[%s13385_s8 + $0x8] sm:$0xff]  ;;  %9920 = vmatpush3.msra.mxu0 %v13607_v63 }
0x137d   :  { %6609 = vmatprep.subr.mxu1 %v6556_v55  ;;  %v13612_v55 = vld [vmem:[%s13385_s8 + $0x10] sm:$0xff] }
0x137e   :  { %6610 = vmatpush1.msra.mxu1 %v6555_v11  ;;  %9921 = vmatprep.subr.mxu0 %v13612_v55  ;;  %v13617_v11 = vpop.permute.xlu0 %10385 }
0x137f   :  { %6611 = vmatprep.subr.mxu1 %v6554_v49  ;;  %9922 = vmatpush3.msra.mxu0 %v13612_v55 }
0x1380   :  { %6612 = vmatpush1.msra.mxu1 %v6553_v46  ;;  %9929 = vmatprep.subr.mxu0 %v13388_v7 }
0x1381   :  { %9425 = vmatmul.mubr.msk.f32.vlgmr.msra.gmra.mxu1 %vm2837_vm9, %v6565_v4  ;;  %6718 = vmatprep.subr.mxu1 %v13467_v44 }
0x1382   :  { %6651 = vmatprep.mubr.f32.mxu1 %v14696_v22  ;;  %6719 = vmatpush1.msra.mxu1 %v13470_v54  ;;  %v13619_v49 = vpop.permute.xlu0 %6986 }
0x1383   :  { %6720 = vmatprep.subr.mxu1 %v13473_v60 }
0x1384   :  { %6721 = vmatpush1.msra.mxu1 %v13478_v61 }
0x1385   :  { %9426 = vmatmul.mubr.msk.f32.gmra.mxu1 %vm2837_vm9, %v6566_v28  ;;  %6722 = vmatprep.subr.mxu1 %v13484_v17 }
0x1386   :  { %6657 = vmatprep.mubr.f32.mxu1 %v14696_v22  ;;  %6723 = vmatpush1.msra.mxu1 %v13488_v12  ;;  %v13621_v46 = vpop.permute.xlu0 %7330 }
0x1387   :  { %6724 = vmatprep.subr.mxu1 %v13492_v42 }
0x1388   :  { %6725 = vmatpush1.msra.mxu1 %v13497_v13 }
0x1389   :  { %9427 = vmatmul.mubr.msk.f32.gmra.mxu1 %vm2837_vm9, %v6567_v16  ;;  %6726 = vmatprep.subr.mxu1 %v13503_v32 }
0x138a   :  { %6663 = vmatprep.mubr.f32.mxu1 %v14696_v22  ;;  %6727 = vmatpush1.msra.mxu1 %v13507_v5  ;;  %v13623_v4 = vpop.permute.xlu0 %7978 }
0x138b   :  { %6728 = vmatprep.subr.mxu1 %v13511_v0 }
0x138c   :  { %6729 = vmatpush1.msra.mxu1 %v13516_v37 }
0x138d   :  { %9428 = vmatmul.mubr.msk.f32.gmra.mxu1 %vm2837_vm9, %v6568_v57  ;;  %6730 = vmatprep.subr.mxu1 %v13522_v43 }
0x138e   :  { %6731 = vmatpush1.msra.mxu1 %v13526_v21  ;;  %6782 = vmatprep.mubr.f32.mxu1 %v14696_v22 }
0x138f   :  { %6732 = vmatprep.subr.mxu1 %v13530_v30 }
0x1390   :  { %6733 = vmatpush1.msra.mxu1 %v13535_v35 }
0x1391   :  { %6734 = vmatprep.subr.mxu1 %v13539_v51 }
0x1392   :  { %6735 = vmatpush1.msra.mxu1 %v13544_v56 }
0x1393   :  { %6736 = vmatprep.subr.mxu1 %v13548_v26 }
0x1394   :  { %6737 = vmatpush1.msra.mxu1 %v13552_v14 }
0x1395   :  { %6738 = vmatprep.subr.mxu1 %v13556_v34 }
0x1396   :  { %6739 = vmatpush1.msra.mxu1 %v13560_v9 }
0x1397   :  { %6740 = vmatprep.subr.mxu1 %v13564_v6 }
0x1398   :  { %6741 = vmatpush1.msra.mxu1 %v13568_v20 }
0x1399   :  { %6742 = vmatprep.subr.mxu1 %v13572_v19 }
0x139a   :  { %6743 = vmatpush1.msra.mxu1 %v13576_v53 }
0x139b   :  { %6744 = vmatprep.subr.mxu1 %v13580_v48 }
0x139c   :  { %6745 = vmatpush1.msra.mxu1 %v13584_v50 }
0x139d   :  { %6746 = vmatprep.subr.mxu1 %v13588_v2 }
0x139e   :  { %6747 = vmatpush1.msra.mxu1 %v13592_v41 }
0x139f   :  { %6748 = vmatprep.subr.mxu1 %v13596_v38 }
0x13a0   :  { %6749 = vmatpush1.msra.mxu1 %v13600_v47 }
0x13a1   :  { %7062 = vmatprep.subr.mxu1 %v13467_v44  ;;  %v13625_v44 = vpop.permute.xlu0 %7976 }
0x13a5   :  { %v13627_v16 = vpop.permute.xlu0 %7886 }
0x1441   :  { %v6647_v28 = vpop.f32.mrf.mxu1 }
0x1442   :  { %6783 = vmatmul.mubr.f32.vlgmr.msra.gmra.mxu1 %v6647_v28  ;;  %9923 = vmatprep.mubr.f32.mxu0 %v6647_v28 }
0x1443   :  { %7063 = vmatpush1.msra.mxu1 %v13470_v54  ;;  %v13630_v57 = vpop.f32.mrf.mxu1  ;;  %6788 = vmatprep.mubr.f32.mxu1 %v14696_v22  ;;  %v13643_v54 = vpop.permute.xlu0 %7884 }
0x1444   :  { %7064 = vmatprep.subr.mxu1 %v13473_v60 }
0x1445   :  { %7065 = vmatpush1.msra.mxu1 %v13478_v61  ;;  %v6653_v25 = vpop.f32.mrf.mxu1  ;;  %v13647_v61 = vpop.permute.xlu1 %10395 }
0x1446   :  { %7066 = vmatprep.subr.mxu1 %v13484_v17  ;;  %6789 = vmatmul.mubr.f32.gmra.mxu1 %v6653_v25 }
0x1447   :  { %9924 = vmatmul.mubr.f32.vlgmr.msra.gmra.mxu0 %v6653_v25  ;;  %7067 = vmatpush1.msra.mxu1 %v13488_v12  ;;  %v13639_v28 = vpop.f32.mrf.mxu1 }
0x1448   :  { %9930 = vmatpush3.msra.mxu0 %v13388_v7  ;;  %7068 = vmatprep.subr.mxu1 %v13492_v42 }
0x1449   :  { %9931 = vmatprep.subr.mxu0 %v13392_v45  ;;  %7069 = vmatpush1.msra.mxu1 %v13497_v13  ;;  %v6659_v60 = vpop.f32.mrf.mxu1  ;;  %v13663_v17 = vpop.permute.xlu1 %7980 }
0x144a   :  { %9932 = vmatpush3.msra.mxu0 %v13392_v45  ;;  %6794 = vmatprep.mubr.f32.mxu1 %v14696_v22  ;;  %v13660_v45 = vpop.permute.xlu0 %7794 }
0x144b   :  { %7070 = vmatprep.subr.mxu1 %v13503_v32  ;;  %9933 = vmatprep.subr.mxu0 %v13396_v1  ;;  %v13653_v25 = vpop.f32.mrf.mxu1 }
0x144c   :  { %6795 = vmatmul.mubr.f32.gmra.mxu1 %v6659_v60  ;;  %9934 = vmatpush3.msra.mxu0 %v13396_v1 }
0x144d   :  { %7071 = vmatpush1.msra.mxu1 %v13507_v5  ;;  %9935 = vmatprep.subr.mxu0 %v13401_v40  ;;  %v6665_v7 = vpop.f32.mrf.mxu1 }
0x144e   :  { %7072 = vmatprep.subr.mxu1 %v13511_v0  ;;  %9936 = vmatpush3.msra.mxu0 %v13401_v40  ;;  %v13673_v1 = vpop.permute.xlu0 %7792  ;;  %v13677_v40 = vpop.permute.xlu1 %7888 }
0x144f   :  { %7073 = vmatpush1.msra.mxu1 %v13516_v37  ;;  %9926 = vmatprep.mubr.f32.mxu0 %v6659_v60  ;;  %v6667_v12 = vpop.f32.mrf.mxu1 }
0x1450   :  { %7074 = vmatprep.subr.mxu1 %v13522_v43  ;;  %9937 = vmatprep.subr.mxu0 %v13406_v10 }
0x1451   :  { %9927 = vmatmul.mubr.f32.gmra.mxu0 %v6665_v7  ;;  %7075 = vmatpush1.msra.mxu1 %v13526_v21 }
0x1452   :  { %9938 = vmatpush3.msra.mxu0 %v13406_v10  ;;  %6800 = vmatprep.mubr.f32.mxu1 %v14696_v22  ;;  %v13689_v10 = vpop.permute.xlu0 %7678 }
0x1453   :  { %7076 = vmatprep.subr.mxu1 %v13530_v30  ;;  %9939 = vmatprep.subr.mxu0 %v13411_v36 }
0x1454   :  { %9961 = vmatprep.mubr.f32.mxu0 %v13630_v57  ;;  %6801 = vmatmul.mubr.f32.gmra.mxu1 %v6665_v7 }
0x1455   :  { %7077 = vmatpush1.msra.mxu1 %v13535_v35  ;;  %9940 = vmatpush3.msra.mxu0 %v13411_v36  ;;  %v13693_v36 = vpop.permute.xlu1 %7796 }
0x1456   :  { %7078 = vmatprep.subr.mxu1 %v13539_v51  ;;  %9941 = vmatprep.subr.mxu0 %v13416_v8 }
0x1457   :  { %7079 = vmatpush1.msra.mxu1 %v13544_v56  ;;  %9942 = vmatpush3.msra.mxu0 %v13416_v8  ;;  %v13705_v8 = vpop.permute.xlu0 %10400 }
0x1458   :  { %7080 = vmatprep.subr.mxu1 %v13548_v26  ;;  %9943 = vmatprep.subr.mxu0 %v13421_v39 }
0x1459   :  { %7081 = vmatpush1.msra.mxu1 %v13552_v14  ;;  %9944 = vmatpush3.msra.mxu0 %v13421_v39  ;;  %v13709_v39 = vpop.permute.xlu1 %7680 }
0x145a   :  { %7082 = vmatprep.subr.mxu1 %v13556_v34  ;;  %9945 = vmatprep.subr.mxu0 %v13426_v29 }
0x145b   :  { %7083 = vmatpush1.msra.mxu1 %v13560_v9  ;;  %9946 = vmatpush3.msra.mxu0 %v13426_v29  ;;  %v7997_v29 = vsel %vm618_vm1, %v13623_v4, %v13663_v17 }
0x145c   :  { %7084 = vmatprep.subr.mxu1 %v13564_v6  ;;  %9947 = vmatprep.subr.mxu0 %v13431_v3 }
0x145d   :  { %7085 = vmatpush1.msra.mxu1 %v13568_v20  ;;  %9948 = vmatpush3.msra.mxu0 %v13431_v3  ;;  %v7996_v3 = vsel %vm618_vm1, %v13625_v44, %v13623_v4 }
0x145e   :  { %7086 = vmatprep.subr.mxu1 %v13572_v19  ;;  %9949 = vmatprep.subr.mxu0 %v13436_v31 }
0x145f   :  { %7087 = vmatpush1.msra.mxu1 %v13576_v53  ;;  %9950 = vmatpush3.msra.mxu0 %v13436_v31  ;;  %v13727_v31 = vpop.permute.xlu0 %7984 }
0x1460   :  { %7088 = vmatprep.subr.mxu1 %v13580_v48  ;;  %9951 = vmatprep.subr.mxu0 %v13441_v15 }
0x1461   :  { %7089 = vmatpush1.msra.mxu1 %v13584_v50  ;;  %9952 = vmatpush3.msra.mxu0 %v13441_v15  ;;  %v7983_v15 = vpop.permute.xlu1 %7982 }
0x1462   :  { %7090 = vmatprep.subr.mxu1 %v13588_v2  ;;  %9953 = vmatprep.subr.mxu0 %v13446_v62 }
0x1463   :  { %7091 = vmatpush1.msra.mxu1 %v13592_v41  ;;  %9954 = vmatpush3.msra.mxu0 %v13446_v62  ;;  %v7999_v62 = vsel %vm618_vm1, %v7983_v15, %v13727_v31  ;;  %v13771_v9 = vpop.permute.xlu0 %7588 }
0x1464   :  { %7092 = vmatprep.subr.mxu1 %v13596_v38  ;;  %9955 = vmatprep.subr.mxu0 %v13451_v27 }
0x1465   :  { %7093 = vmatpush1.msra.mxu1 %v13600_v47  ;;  %7126 = vmatprep.mubr.f32.mxu1 %v14696_v22  ;;  %v13767_v14 = vpop.permute.xlu1 %7586 }
0x1466   :  { %9956 = vmatpush3.msra.mxu0 %v13451_v27  ;;  %7127 = vmatmul.mubr.f32.vlgmr.msra.gmra.mxu1 %v13630_v57  ;;  %v7998_v27 = vsel %vm618_vm1, %v13663_v17, %v7983_v15 }
0x1467   :  { %9957 = vmatprep.subr.mxu0 %v13607_v63  ;;  %8237 = vmatprep.subr.mxu1 %v7997_v29  ;;  %v13779_v2 = vpop.permute.xlu0 %7890 }
0x1468   :  { %9958 = vmatpush3.msra.mxu0 %v13607_v63  ;;  %8238 = vmatpush1.msra.mxu1 %v7996_v3 }
0x1469   :  { %9959 = vmatprep.subr.mxu0 %v13612_v55  ;;  %7132 = vmatprep.mubr.f32.mxu1 %v14696_v22  ;;  %v13777_v48 = vpop.permute.xlu1 %10405 }
0x146a   :  { %9960 = vmatpush3.msra.mxu0 %v13612_v55  ;;  %7133 = vmatmul.mubr.f32.gmra.mxu1 %v13639_v28 }
0x146b   :  { %9962 = vmatmul.mubr.f32.vlgmr.msra.gmra.mxu0 %v13639_v28  ;;  %8308 = vmatprep.subr.mxu0 %v7999_v62  ;;  %v13787_v4 = vpop.permute.xlu0 %7494 }
0x146c   :  { %9964 = vmatprep.mubr.f32.mxu0 %v13653_v25  ;;  %8309 = vmatpush1.msra.mxu0 %v7998_v27 }
0x146d   :  { %7138 = vmatprep.mubr.f32.mxu1 %v14696_v22  ;;  %v13785_v55 = vpop.permute.xlu1 %7892 }
0x146e   :  { %7139 = vmatmul.mubr.f32.gmra.mxu1 %v13653_v25 }
0x146f   :  { %9965 = vmatmul.mubr.f32.gmra.mxu0 %v6667_v12  ;;  %7144 = vmatprep.mubr.f32.mxu1 %v14696_v22  ;;  %v13793_v28 = vpop.permute.xlu0 %10410 }
0x1471   :  { %v13791_v57 = vpop.permute.xlu1 %7496 }
0x1472   :  { %7145 = vmatmul.mubr.f32.gmra.mxu1 %v6667_v12 }
0x1473   :  { %v13800_v25 = vpop.permute.xlu0 %7800 }
0x1475   :  { %v13798_v60 = vpop.permute.xlu1 %7798 }
0x1476   :  { %14712 = vst [vmem:[#allocation24_spill] sm:$0xff] %v13798_v60 }
0x1477   :  { %v13804_v17 = vpop.permute.xlu0 %7404 }
0x1479   :  { %v13802_v7 = vpop.permute.xlu1 %7402 }
0x147b   :  { %v13808_v3 = vpop.permute.xlu0 %8070 }
0x147d   :  { %v13806_v29 = vpop.permute.xlu1 %10415 }
0x147f   :  { %v13812_v62 = vpop.permute.xlu0 %8068 }
0x1481   :  { %v13810_v15 = vpop.permute.xlu1 %8072 }
0x1483   :  { %v13816_v12 = vpop.permute.xlu0 %7684 }
0x1484   :  { %14714 = vst [vmem:[#allocation12_spill] sm:$0xff] %v13816_v12 }
0x1485   :  { %v13814_v27 = vpop.permute.xlu1 %7682 }
0x1486   :  { %14713 = vst [vmem:[#allocation23_spill] sm:$0xff] %v13814_v27 }
0x1502   :  { %v13744_v42 = vpop.f32.mrf.mxu1 }
0x1504   :  { %v13746_v13 = vpop.f32.mrf.mxu1 }
0x1506   :  { %v6790_v32 = vpop.f32.mrf.mxu1 }
0x1507   :  { %6917 = vrot.lane.b32.xlu1 %v6790_v32, %s10461_s6  ;;  %v9925_v0 = vpop.f32.mrf.mxu0  ;;  %v13818_v32 = vpop.permute.xlu1 %10420 }
0x1508   :  { %v6792_v5 = vpop.f32.mrf.mxu1 }
0x1509   :  { %6919 = vrot.lane.b32.xlu0 %v6792_v5, %s10461_s6  ;;  %v13755_v21 = vpop.f32.mrf.mxu0  ;;  %v13820_v5 = vpop.permute.xlu0 %7986 }
0x150b   :  { %6921 = vrot.lane.b32.xlu1 %v9925_v0, %s10461_s6  ;;  %v13822_v0 = vpop.permute.xlu1 %7592 }
0x150c   :  { %v6796_v37 = vpop.f32.mrf.mxu1  ;;  %14715 = vst [vmem:[#allocation11_spill] sm:$0xff] %v13822_v0 }
0x150e   :  { %v6798_v43 = vpop.f32.mrf.mxu1 }
0x150f   :  { %6944 = vrot.lane.b32.xlu0 %v6798_v43, %s10468_s21  ;;  %6942 = vrot.lane.b32.xlu1 %v6796_v37, %s10468_s21  ;;  %v13824_v37 = vpop.permute.xlu0 %7590  ;;  %v13826_v43 = vpop.permute.xlu1 %7894 }
0x1510   :  { %14716 = vst [vmem:[#allocation21_spill] sm:$0xff] %v13824_v37  ;;  %14717 = vst [vmem:[#allocation22_spill] sm:$0xff] %v13826_v43 }
0x1511   :  { %v9928_v35 = vpop.f32.mrf.mxu0 }
0x1513   :  { %7408 = vrot.lane.b32.xlu1 %v14709_v33, %s10466_s19  ;;  %v6883_v51 = vpop.f32.mrf.mxu0 }
0x1514   :  { %v6802_v30 = vpop.f32.mrf.mxu1 }
0x1515   :  { %6967 = vrot.lane.b32.xlu0 %v6802_v30, %s10466_s19  ;;  %v13828_v30 = vpop.permute.xlu0 %10425 }
0x1516   :  { %v6804_v56 = vpop.f32.mrf.mxu1 }
0x1517   :  { %8074 = vrot.lane.b32.xlu1 %v14709_v33, %s10467_s20 }
0x1519   :  { %6971 = vrot.lane.b32.xlu0 %v9928_v35, %s10466_s19  ;;  %v13830_v35 = vpop.permute.xlu1 %7498 }
0x151a   :  { %14718 = vst [vmem:[#allocation25_spill] sm:$0xff] %v13830_v35 }
0x151b   :  { %6946 = vrot.lane.b32.xlu1 %v6883_v51, %s10468_s21  ;;  %v13832_v51 = vpop.permute.xlu0 %7500 }
0x151c   :  { %14719 = vst [vmem:[#allocation26_spill] sm:$0xff] %v13832_v51 }
0x151d   :  { %7406 = vrot.lane.b32.xlu0 %v14707_v59, %s10466_s19 }
0x151f   :  { %6969 = vrot.lane.b32.xlu1 %v6804_v56, %s10466_s19  ;;  %v13834_v56 = vpop.permute.xlu1 %10430 }
0x1520   :  { %14720 = vst [vmem:[#allocation27_spill] sm:$0xff] %v13834_v56  ;;  %v6982_v56 = vld [vmem:[%s10528_s17] sm:$0x7] }
0x1521   :  { %v6996_v59 = vrot.slane %v6982_v56, %v14705_v52 }
0x1526   :  { %v13765_v26 = vpop.f32.mrf.mxu1 }
0x1528   :  { %v13769_v34 = vpop.f32.mrf.mxu1 }
0x152a   :  { %v7134_v6 = vpop.f32.mrf.mxu1 }
0x152b   :  { %v9963_v20 = vpop.f32.mrf.mxu0  ;;  %7261 = vrot.lane.b32.xlu0 %v7134_v6, %s10461_s6  ;;  %v13836_v6 = vpop.permute.xlu0 %7802 }
0x152c   :  { %7265 = vrot.lane.b32.xlu1 %v9963_v20, %s10461_s6  ;;  %v7136_v19 = vpop.f32.mrf.mxu1  ;;  %14721 = vst [vmem:[#allocation28_spill] sm:$0xff] %v13836_v6  ;;  %v10397_v6 = vunpack.i.l.bf16 %v13647_v61 }
0x152d   :  { %v13775_v53 = vpop.f32.mrf.mxu0 }
0x152e   :  { %v7140_v50 = vpop.f32.mrf.mxu1 }
0x152f   :  { %v9966_v41 = vpop.f32.mrf.mxu0  ;;  %7286 = vrot.lane.b32.xlu0 %v7140_v50, %s10468_s21 }
0x1530   :  { %7263 = vrot.lane.b32.xlu1 %v7136_v19, %s10461_s6  ;;  %v7142_v38 = vpop.f32.mrf.mxu1 }
0x1531   :  { %v7227_v47 = vpop.f32.mrf.mxu0 }
0x1532   :  { %v7146_v63 = vpop.f32.mrf.mxu1 }
0x1533   :  { %7290 = vrot.lane.b32.xlu0 %v7227_v47, %s10468_s21 }
0x1534   :  { %7315 = vrot.lane.b32.xlu1 %v9966_v41, %s10466_s19  ;;  %v7148_v44 = vpop.f32.mrf.mxu1  ;;  %v10387_v41 = vunpack.i.l.bf16 %v13617_v11 }
0x1537   :  { %7313 = vrot.lane.b32.xlu0 %v7148_v44, %s10466_s19 }
0x1538   :  { %7288 = vrot.lane.b32.xlu1 %v7142_v38, %s10468_s21  ;;  %v10392_v38 = vunpack.i.l.bf16 %v13633_v24 }
0x153b   :  { %8076 = vrot.lane.b32.xlu0 %v14710_v58, %s10467_s20 }
0x153c   :  { %7311 = vrot.lane.b32.xlu1 %v7146_v63, %s10466_s19 }
0x1579   :  { %v6918_v20 = vpop.permute.xlu1 %6917 }
0x157a   :  { %v6923_v47 = vsel %vm465_vm4, %v10387_v41, %v6918_v20 }
0x157b   :  { %v6920_v19 = vpop.permute.xlu0 %6919  ;;  %v6929_v51 = vadd.f32 %v6923_v47, %v13744_v42 }
0x157d   :  { %v6922_v50 = vpop.permute.xlu1 %6921 }
0x1581   :  { %v6945_v63 = vpop.permute.xlu0 %6944  ;;  %v6943_v44 = vpop.permute.xlu1 %6942 }
0x1582   :  { %v6948_v35 = vsel %vm14722_vm2, %v10392_v38, %v6943_v44  ;;  %v6924_v38 = vsel %vm465_vm4, %v6918_v20, %v6920_v19  ;;  %vm14735_vm2 = vcmask 908288  }
0x1583   :  { %v6954_v37 = vadd.f32 %v6948_v35, %v6929_v51  ;;  %v6949_v35 = vsel %vm14724_vm6, %v6943_v44, %v6945_v63  ;;  %v6930_v51 = vadd.f32 %v6924_v38, %v13746_v13  ;;  %v7000_v13 = vrot.slane %v6982_v56, %v14704_v18  ;;  %vm14737_vm6 = vmmov %vm14735_vm2 }
0x1585   :  { %v13843_v0 = vpop.permute.xlu1 %7408 }
0x1587   :  { %v6968_v27 = vpop.permute.xlu0 %6967 }
0x1588   :  { %v6973_v12 = vsel %vm14723_vm5, %v10397_v6, %v6968_v27  ;;  %vm14736_vm5 = vmmov %vm14735_vm2 }
0x1589   :  { %v6979_v33 = vadd.f32 %v6973_v12, %v6954_v37  ;;  %v13849_v43 = vpop.permute.xlu1 %8074  ;;  %v6925_v12 = vsel %vm465_vm4, %v6920_v19, %v6922_v50  ;;  %v6955_v37 = vadd.f32 %v6949_v35, %v6930_v51 }
0x158a   :  { %v6931_v20 = vadd.f32 %v6925_v12, %v13755_v21  ;;  %v14728_v21 = vld [vmem:[#allocation13_spill] sm:$0xff] }
0x158b   :  { %v6989_v41 = vadd.f32 %v13619_v49, %v6979_v33  ;;  %v6972_v47 = vpop.permute.xlu0 %6971 }
0x158d   :  { %v13853_v60 = vmul.f32 %v6996_v59, %v6989_v41  ;;  %v6947_v42 = vpop.permute.xlu1 %6946 }
0x158e   :  { %v6950_v33 = vsel %vm14725_vm7, %v6945_v63, %v6947_v42  ;;  %vm14738_vm7 = vmmov %vm14735_vm2 }
0x158f   :  { %7962 = vrot.lane.b32.xlu1 %v13853_v60, %s10469_s22  ;;  %7572 = vrot.lane.b32.xlu0 %v13853_v60, %s10465_s18  ;;  %v6956_v50 = vadd.f32 %v6950_v33, %v6931_v20  ;;  %v13884_v35 = vpop.permute.xlu0 %7406 }
0x1591   :  { %v6970_v6 = vpop.permute.xlu1 %6969 }
0x1592   :  { %v6974_v59 = vsel %vm14726_vm8, %v6968_v27, %v6970_v6  ;;  %v6975_v19 = vsel %vm14727_vm10, %v6970_v6, %v6972_v47  ;;  %v7004_v27 = vrot.slane %v6982_v56, %v14728_v21  ;;  %v10388_v6 = vunpack.i.h.bf16 %v13617_v11 }
0x1593   :  { %7870 = vrot.lane.b32.xlu1 %v13853_v60, %s10470_s23  ;;  %7388 = vrot.lane.b32.xlu0 %v13853_v60, %s10466_s19  ;;  %v6980_v44 = vadd.f32 %v6974_v59, %v6955_v37  ;;  %v6981_v63 = vadd.f32 %v6975_v19, %v6956_v50  ;;  %v10393_v59 = vunpack.i.h.bf16 %v13633_v24  ;;  %vm14741_vm8 = vcmask 138240  }
0x1594   :  { %vm14742_vm10 = vmmov %vm14741_vm8 }
0x1595   :  { %v6990_v41 = vadd.f32 %v13619_v49, %v6980_v44  ;;  %v6991_v42 = vadd.f32 %v13619_v49, %v6981_v63  ;;  %v10398_v44 = vunpack.i.h.bf16 %v13647_v61 }
0x1597   :  { %v13872_v38 = vmul.f32 %v7000_v13, %v6990_v41  ;;  %7778 = vrot.lane.b32.xlu1 %v13853_v60, %s10471_s24  ;;  %v13886_v12 = vmul.f32 %v7004_v27, %v6991_v42  ;;  %v7326_v27 = vld [vmem:[%s10528_s17 + $0x3] sm:$0x7] }
0x1599   :  { %7666 = vrot.lane.b32.xlu0 %v13872_v38, %s10461_s6 }
0x159b   :  { %7664 = vrot.lane.b32.xlu1 %v13853_v60, %s10461_s6 }
0x159d   :  { %7482 = vrot.lane.b32.xlu0 %v13872_v38, %s10468_s21  ;;  %v7262_v56 = vpop.permute.xlu0 %7261 }
0x159e   :  { %v7266_v51 = vpop.permute.xlu1 %7265  ;;  %v7267_v20 = vsel %vm465_vm4, %v10388_v6, %v7262_v56 }
0x159f   :  { %7480 = vrot.lane.b32.xlu1 %v13853_v60, %s10468_s21  ;;  %v7273_v11 = vadd.f32 %v7267_v20, %v13765_v26  ;;  %v7340_v26 = vrot.slane %v7326_v27, %v14705_v52 }
0x15a1   :  { %7966 = vrot.lane.b32.xlu0 %v13886_v12, %s10469_s22  ;;  %v7287_v33 = vpop.permute.xlu0 %7286 }
0x15a2   :  { %v7264_v37 = vpop.permute.xlu1 %7263  ;;  %v7292_v13 = vsel %vm14729_vm11, %v10393_v59, %v7287_v33  ;;  %vm14743_vm11 = vmmov %vm14741_vm8 }
0x15a3   :  { %8054 = vrot.lane.b32.xlu1 %v13853_v60, %s10467_s20  ;;  %v7298_v24 = vadd.f32 %v7292_v13, %v7273_v11  ;;  %v7268_v42 = vsel %vm465_vm4, %v7262_v56, %v7264_v37 }
0x15a4   :  { %v7274_v59 = vadd.f32 %v7268_v42, %v13769_v34 }
0x15a5   :  { %7874 = vrot.lane.b32.xlu0 %v13886_v12, %s10470_s23  ;;  %v7291_v63 = vpop.permute.xlu0 %7290 }
0x15a6   :  { %v7316_v49 = vpop.permute.xlu1 %7315 }
0x15a7   :  { %7964 = vrot.lane.b32.xlu1 %v13872_v38, %s10469_s22 }
0x15a9   :  { %7782 = vrot.lane.b32.xlu0 %v13886_v12, %s10471_s24  ;;  %v7314_v20 = vpop.permute.xlu0 %7313 }
0x15aa   :  { %v7289_v47 = vpop.permute.xlu1 %7288  ;;  %v7319_v42 = vsel %vm14734_vm0, %v7314_v20, %v7316_v49  ;;  %vm14747_vm0 = vmmov %vm14731_vm13 }
0x15ab   :  { %7872 = vrot.lane.b32.xlu1 %v13872_v38, %s10470_s23  ;;  %v7293_v6 = vsel %vm14731_vm13, %v7287_v33, %v7289_v47  ;;  %v13942_v33 = vld [vmem:[%s13932_s2 + $0x8] sm:$0xff] }
0x15ac   :  { %v7299_v11 = vadd.f32 %v7293_v6, %v7274_v59  ;;  %9429 = vmatprep.mubr.msk.f32.mxu1 %vm2837_vm9, %v13942_v33  ;;  %9430 = vmatprep.mubr.msk.f32.mxu0 %vm2837_vm9, %v13942_v33  ;;  %v8228_v59 = vld [vmem:[%s9383_s29] sm:$0xff] }
0x15ad   :  { %8058 = vrot.lane.b32.xlu0 %v13886_v12, %s10467_s20 }
0x15ae   :  { %v7312_v19 = vpop.permute.xlu1 %7311 }
0x15af   :  { %v7317_v50 = vsel %vm14730_vm12, %v10398_v44, %v7312_v19  ;;  %7780 = vrot.lane.b32.xlu1 %v13872_v38, %s10471_s24  ;;  %v7318_v56 = vsel %vm14732_vm14, %v7312_v19, %v7314_v20  ;;  %v7344_v44 = vrot.slane %v7326_v27, %v14704_v18  ;;  %vm14744_vm12 = vmmov %vm14741_vm8 }
0x15b0   :  { %v7323_v41 = vadd.f32 %v7317_v50, %v7298_v24  ;;  %v7324_v34 = vadd.f32 %v7318_v56, %v7299_v11  ;;  %v7269_v50 = vsel %vm465_vm4, %v7264_v37, %v7266_v51  ;;  %vm14745_vm14 = vmmov %vm14731_vm13 }
0x15b1   :  { %7668 = vrot.lane.b32.xlu0 %v13886_v12, %s10461_s6 }
0x15b2   :  { %v7333_v61 = vadd.f32 %v13621_v46, %v7323_v41  ;;  %v7334_v24 = vadd.f32 %v13621_v46, %v7324_v34  ;;  %v7294_v41 = vsel %vm14733_vm15, %v7289_v47, %v7291_v63  ;;  %vm14746_vm15 = vmmov %vm14731_vm13 }
0x15b3   :  { %7574 = vrot.lane.b32.xlu1 %v13872_v38, %s10465_s18 }
0x15b4   :  { %v13925_v13 = vmul.f32 %v7340_v26, %v7333_v61  ;;  %v13954_v19 = vmul.f32 %v7344_v44, %v7334_v24  ;;  %v7275_v26 = vadd.f32 %v7269_v50, %v13775_v53  ;;  %v7348_v53 = vrot.slane %v7326_v27, %v14728_v21 }
0x15b5   :  { %7484 = vrot.lane.b32.xlu0 %v13886_v12, %s10468_s21 }
0x15b6   :  { %v7300_v61 = vadd.f32 %v7294_v41, %v7275_v26 }
0x15b7   :  { %7390 = vrot.lane.b32.xlu1 %v13872_v38, %s10466_s19 }
0x15b8   :  { %v7325_v51 = vadd.f32 %v7319_v42, %v7300_v61 }
0x15b9   :  { %7876 = vrot.lane.b32.xlu0 %v13925_v13, %s10470_s23 }
0x15ba   :  { %v7335_v37 = vadd.f32 %v13621_v46, %v7325_v51  ;;  %v14022_v46 = vpop.permute.xlu0 %8076 }
0x15bb   :  { %8056 = vrot.lane.b32.xlu1 %v13872_v38, %s10467_s20 }
0x15bc   :  { %v13982_v47 = vmul.f32 %v7348_v53, %v7335_v37  ;;  %v7905_v53 = vsel %vm14735_vm2, %v13627_v16, %v13677_v40  ;;  %v7904_v37 = vsel %vm14736_vm5, %v13643_v54, %v13627_v16  ;;  %v7812_v16 = vsel %vm524_vm3, %v13673_v1, %v13660_v45  ;;  %v14740_v1 = vld [vmem:[#allocation19_spill] sm:$0xff] }
0x15bd   :  { %7578 = vrot.lane.b32.xlu0 %v13925_v13, %s10465_s18  ;;  %vm14748_vm2 = vcmask 154624  }
0x15be   :  { %vm14749_vm5 = vmmov %vm14748_vm2 }
0x15bf   :  { %7576 = vrot.lane.b32.xlu1 %v13886_v12, %s10465_s18 }
0x15c1   :  { %7394 = vrot.lane.b32.xlu0 %v13925_v13, %s10466_s19 }
0x15c3   :  { %7392 = vrot.lane.b32.xlu1 %v13886_v12, %s10466_s19 }
0x15c5   :  { %7970 = vrot.lane.b32.xlu0 %v13954_v19, %s10469_s22 }
0x15c7   :  { %7968 = vrot.lane.b32.xlu1 %v13925_v13, %s10469_s22 }
0x15c9   :  { %7688 = vrot.lane.b32.xlu0 %v14711_v23, %s10461_s6 }
0x15cb   :  { %7784 = vrot.lane.b32.xlu1 %v13925_v13, %s10471_s24 }
0x15cd   :  { %7596 = vrot.lane.b32.xlu0 %v14711_v23, %s10465_s18 }
0x15cf   :  { %7670 = vrot.lane.b32.xlu1 %v13925_v13, %s10461_s6 }
0x15d1   :  { %7786 = vrot.lane.b32.xlu0 %v13954_v19, %s10471_s24 }
0x15d3   :  { %7486 = vrot.lane.b32.xlu1 %v13925_v13, %s10468_s21 }
0x15d5   :  { %7504 = vrot.lane.b32.xlu0 %v14711_v23, %s10468_s21 }
0x15d7   :  { %7878 = vrot.lane.b32.xlu1 %v13954_v19, %s10470_s23 }
0x15d9   :  { %7972 = vrot.lane.b32.xlu0 %v13982_v47, %s10469_s22 }
0x15db   :  { %7686 = vrot.lane.b32.xlu1 %v14710_v58, %s10461_s6 }
0x15dd   :  { %7412 = vrot.lane.b32.xlu0 %v14711_v23, %s10466_s19 }
0x15df   :  { %8060 = vrot.lane.b32.xlu1 %v13925_v13, %s10467_s20 }
0x15e1   :  { %8080 = vrot.lane.b32.xlu0 %v14696_v22, %s10467_s20 }
0x15e3   :  { %7594 = vrot.lane.b32.xlu1 %v14710_v58, %s10465_s18 }
0x15e5   :  { %7788 = vrot.lane.b32.xlu0 %v13982_v47, %s10471_s24 }
0x15e7   :  { %7502 = vrot.lane.b32.xlu1 %v14710_v58, %s10468_s21 }
0x15e9   :  { %8062 = vrot.lane.b32.xlu0 %v13954_v19, %s10467_s20 }
0x15eb   :  { %7880 = vrot.lane.b32.xlu1 %v13982_v47, %s10470_s23 }
0x15ed   :  { %7674 = vrot.lane.b32.xlu0 %v13982_v47, %s10461_s6 }
0x15ef   :  { %7410 = vrot.lane.b32.xlu1 %v14710_v58, %s10466_s19 }
0x15f1   :  { %7582 = vrot.lane.b32.xlu0 %v13982_v47, %s10465_s18 }
0x15f3   :  { %8078 = vrot.lane.b32.xlu1 %v14711_v23, %s10467_s20 }
0x15f5   :  { %7490 = vrot.lane.b32.xlu0 %v13982_v47, %s10468_s21 }
0x15f7   :  { %7672 = vrot.lane.b32.xlu1 %v13954_v19, %s10461_s6 }
0x15f9   :  { %7398 = vrot.lane.b32.xlu0 %v13982_v47, %s10466_s19 }
0x15fb   :  { %7580 = vrot.lane.b32.xlu1 %v13954_v19, %s10465_s18 }
0x15fd   :  { %8066 = vrot.lane.b32.xlu0 %v14696_v22, %s10467_s20 }
0x15ff   :  { %7488 = vrot.lane.b32.xlu1 %v13954_v19, %s10468_s21 }
0x1601   :  { %v7963_v49 = vpop.permute.xlu1 %7962  ;;  %v14031_v63 = vpop.permute.xlu0 %7572  ;;  %8652 = vrot.lane.b32.xlu0 %v14696_v22, %s10461_s6 }
0x1603   :  { %7396 = vrot.lane.b32.xlu1 %v13954_v19, %s10466_s19 }
0x1605   :  { %v7871_v27 = vpop.permute.xlu1 %7870  ;;  %8560 = vrot.lane.b32.xlu0 %v14696_v22, %s10468_s21  ;;  %v14039_v6 = vpop.permute.xlu0 %7388 }
0x1607   :  { %8064 = vrot.lane.b32.xlu1 %v13982_v47, %s10467_s20 }
0x1609   :  { %v7779_v20 = vpop.permute.xlu1 %7778 }
0x160b   :  { %8231 = vperm.xlu1 %10017, %v8228_v59   ;;  %v14043_v56 = vpop.permute.xlu0 %7666 }
0x160d   :  { %v7665_v11 = vpop.permute.xlu1 %7664 }
0x160f   :  { %v14045_v34 = vpop.permute.xlu0 %7482  ;;  %8606 = vrot.lane.b32.xlu1 %v14696_v22, %s10465_s18 }
0x1611   :  { %v14049_v44 = vpop.permute.xlu1 %7480 }
0x1613   :  { %v14051_v24 = vpop.permute.xlu0 %7966  ;;  %8514 = vrot.lane.b32.xlu1 %v14696_v22, %s10466_s19 }
0x1615   :  { %v14055_v50 = vpop.permute.xlu1 %8054 }
0x1617   :  { %v14057_v41 = vpop.permute.xlu0 %7874  ;;  %8860 = vrot.lane.b32.xlu1 %v14696_v22, %s10467_s20 }
0x1619   :  { %v7965_v26 = vpop.permute.xlu1 %7964 }
0x161a   :  { %v7991_v61 = vsel %vm618_vm1, %v7965_v26, %v14051_v24  ;;  %v7990_v42 = vsel %vm618_vm1, %v7963_v49, %v7965_v26 }
0x161b   :  { %8239 = vmatprep.subr.mxu1 %v7991_v61  ;;  %v14064_v51 = vpop.permute.xlu0 %7782  ;;  %8814 = vrot.lane.b32.xlu1 %v14696_v22, %s10469_s22 }
0x161c   :  { %8240 = vmatpush1.msra.mxu1 %v7990_v42  ;;  %v7813_v42 = vsel %vm524_vm3, %v13660_v45, %v13693_v36  ;;  %v14739_v45 = vld [vmem:[#allocation17_spill] sm:$0xff] }
0x161d   :  { %v7873_v59 = vpop.permute.xlu1 %7872  ;;  %8241 = vmatprep.subr.mxu1 %v7905_v53 }
0x161e   :  { %8242 = vmatpush1.msra.mxu1 %v7904_v37  ;;  %v7899_v49 = vsel %vm14737_vm6, %v7873_v59, %v14057_v41  ;;  %v7898_v26 = vsel %vm14738_vm7, %v7871_v27, %v7873_v59  ;;  %v10402_v59 = vunpack.i.l.bf16 %v13705_v8  ;;  %vm14750_vm6 = vmmov %vm14748_vm2 }
0x161f   :  { %8243 = vmatprep.subr.mxu1 %v7899_v49  ;;  %v14077_v61 = vpop.permute.xlu0 %8058  ;;  %8768 = vrot.lane.b32.xlu1 %v14696_v22, %s10470_s23  ;;  %vm14751_vm7 = vmmov %vm14748_vm2 }
0x1620   :  { %8244 = vmatpush1.msra.mxu1 %v7898_v26 }
0x1621   :  { %v7781_v54 = vpop.permute.xlu1 %7780  ;;  %8245 = vmatprep.subr.mxu1 %v7813_v42  ;;  %v10407_v42 = vunpack.i.l.bf16 %v13777_v48 }
0x1622   :  { %8246 = vmatpush1.msra.mxu1 %v7812_v16  ;;  %v7807_v27 = vsel %vm524_vm3, %v7781_v54, %v14064_v51  ;;  %v7806_v53 = vsel %vm524_vm3, %v7779_v20, %v7781_v54  ;;  %v7697_v20 = vsel %vm465_vm4, %v13689_v10, %v13709_v39  ;;  %v10403_v16 = vunpack.i.h.bf16 %v13705_v8 }
0x1623   :  { %8247 = vmatprep.subr.mxu1 %v7807_v27  ;;  %v14090_v37 = vpop.permute.xlu0 %7668  ;;  %8722 = vrot.lane.b32.xlu1 %v14696_v22, %s10471_s24  ;;  %v7696_v27 = vsel %vm465_vm4, %v10402_v59, %v13689_v10  ;;  %v7605_v8 = vsel %vm14741_vm8, %v13767_v14, %v13771_v9  ;;  %v7604_v10 = vsel %vm14742_vm10, %v10407_v42, %v13767_v14  ;;  %v10413_v14 = vunpack.i.h.bf16 %v13793_v28 }
0x1624   :  { %8248 = vmatpush1.msra.mxu1 %v7806_v53  ;;  %vm14752_vm8 = vcmask 891904  }
0x1625   :  { %v14095_v49 = vpop.permute.xlu1 %7574  ;;  %8249 = vmatprep.subr.mxu1 %v14739_v45  ;;  %v10408_v45 = vunpack.i.h.bf16 %v13777_v48  ;;  %v7513_v48 = vsel %vm14731_vm13, %v13787_v4, %v13791_v57  ;;  %vm14753_vm10 = vmmov %vm14752_vm8  ;;  %vm14756_vm13 = vcmask 908288  }
0x1626   :  { %8250 = vmatpush1.msra.mxu1 %v14740_v1  ;;  %v10412_v1 = vunpack.i.l.bf16 %v13793_v28  ;;  %v7421_v28 = vsel %vm14748_vm2, %v13802_v7, %v13804_v17 }
0x1627   :  { %8251 = vmatprep.subr.mxu1 %v13872_v38  ;;  %v14100_v26 = vpop.permute.xlu0 %7484  ;;  %v7691_v38 = vsel %vm465_vm4, %v7665_v11, %v14043_v56  ;;  %v7598_v59 = vsel %vm14744_vm12, %v10408_v45, %v14031_v63  ;;  %v10418_v45 = vunpack.i.h.bf16 %v13806_v29  ;;  %vm14755_vm12 = vmmov %vm14752_vm8 }
0x1628   :  { %8252 = vmatpush1.msra.mxu1 %v13853_v60  ;;  %v7690_v60 = vsel %vm465_vm4, %v10403_v16, %v7665_v11  ;;  %v7599_v11 = vsel %vm14743_vm11, %v14031_v63, %v14095_v49  ;;  %v7507_v63 = vsel %vm14746_vm15, %v14049_v44, %v14045_v34  ;;  %vm14754_vm11 = vmmov %vm14752_vm8 }
0x1629   :  { %v14108_v54 = vpop.permute.xlu1 %7390  ;;  %8253 = vmatprep.subr.mxu1 %v7697_v20  ;;  %vm14758_vm15 = vmmov %vm14756_vm13 }
0x162a   :  { %8254 = vmatpush1.msra.mxu1 %v7696_v27  ;;  %v10417_v27 = vunpack.i.l.bf16 %v13806_v29  ;;  %v8089_v29 = vsel %vm14752_vm8, %v13808_v3, %v13810_v15 }
0x162b   :  { %8255 = vmatprep.subr.mxu1 %v7691_v38  ;;  %v14115_v53 = vpop.permute.xlu0 %7876  ;;  %v7512_v38 = vsel %vm14745_vm14, %v10412_v1, %v13787_v4  ;;  %v7414_v1 = vsel %vm14751_vm7, %v10418_v45, %v14039_v6  ;;  %vm14757_vm14 = vmmov %vm14756_vm13 }
0x162c   :  { %8256 = vmatpush1.msra.mxu1 %v7690_v60  ;;  %v7506_v60 = vsel %vm14747_vm0, %v10413_v14, %v14049_v44  ;;  %v7420_v4 = vsel %vm14749_vm5, %v10417_v27, %v13802_v7  ;;  %v7415_v44 = vsel %vm14750_vm6, %v14039_v6, %v14108_v54  ;;  %v8088_v7 = vsel %vm14753_vm10, %v13812_v62, %v13808_v3  ;;  %v14170_v14 = vld [vmem:[%s13932_s2] sm:$0xff]  ;;  %vm14759_vm0 = vmmov %vm14756_vm13 }
0x162d   :  { %v8057_v20 = vpop.permute.xlu1 %8056  ;;  %8257 = vmatprep.subr.mxu1 %v7605_v8  ;;  %vm14763_vm2 = vmmov %vm14759_vm0  ;;  %vm14770_vm5 = vcmask 138240   ;;  %vm14777_vm10 = vcmask 146432  }
0x162e   :  { %8258 = vmatpush1.msra.mxu1 %v7604_v10  ;;  %v8083_v27 = vsel %vm14754_vm11, %v8057_v20, %v14077_v61  ;;  %vm14771_vm6 = vmmov %vm14770_vm5 }
0x162f   :  { %8259 = vmatprep.subr.mxu1 %v7599_v11  ;;  %v14129_v16 = vpop.permute.xlu0 %7578  ;;  %vm14772_vm7 = vmmov %vm14770_vm5 }
0x1630   :  { %8260 = vmatpush1.msra.mxu1 %v7598_v59  ;;  %v10422_v59 = vunpack.i.l.bf16 %v13818_v32  ;;  %vm14773_vm8 = vmmov %vm14770_vm5 }
0x1631   :  { %v14136_v42 = vpop.permute.xlu1 %7576  ;;  %8261 = vmatprep.subr.mxu1 %v7513_v48  ;;  %vm14778_vm11 = vmmov %vm14777_vm10 }
0x1632   :  { %8262 = vmatpush1.msra.mxu1 %v7512_v38  ;;  %v8001_v3 = vsel %vm618_vm1, %v13820_v5, %v10422_v59  ;;  %v10427_v59 = vunpack.i.l.bf16 %v13828_v30 }
0x1633   :  { %8263 = vmatprep.subr.mxu1 %v7507_v63  ;;  %v14145_v8 = vpop.permute.xlu0 %7394  ;;  %v8082_v63 = vsel %vm14755_vm12, %v14055_v50, %v8057_v20  ;;  %v7907_v50 = vsel %vm14756_vm13, %v13779_v2, %v13785_v55  ;;  %v7906_v20 = vsel %vm14757_vm14, %v13677_v40, %v13779_v2  ;;  %v7900_v2 = vsel %vm14759_vm0, %v14057_v41, %v14115_v53  ;;  %vm14779_vm12 = vmmov %vm14759_vm0 }
0x1634   :  { %8264 = vmatpush1.msra.mxu1 %v7506_v60  ;;  %vm14780_vm13 = vmmov %vm14777_vm10 }
0x1635   :  { %v14151_v10 = vpop.permute.xlu1 %7392  ;;  %8265 = vmatprep.subr.mxu1 %v7421_v28  ;;  %vm14781_vm14 = vmmov %vm14759_vm0 }
0x1636   :  { %8266 = vmatpush1.msra.mxu1 %v7420_v4 }
0x1637   :  { %8267 = vmatprep.subr.mxu1 %v7415_v44  ;;  %v7971_v11 = vpop.permute.xlu0 %7970 }
0x1638   :  { %8268 = vmatpush1.msra.mxu1 %v7414_v1  ;;  %v10423_v1 = vunpack.i.h.bf16 %v13818_v32 }
0x1639   :  { %v7969_v48 = vpop.permute.xlu1 %7968  ;;  %8297 = vmatprep.subr.mxu1 %v8089_v29  ;;  %v14760_v29 = vld [vmem:[#allocation24_spill] sm:$0xff] }
0x163a   :  { %8298 = vmatpush2.msra.mxu1 %v8088_v7  ;;  %v7993_v6 = vsel %vm618_vm1, %v7969_v48, %v7971_v11  ;;  %v7992_v38 = vsel %vm618_vm1, %v14051_v24, %v7969_v48  ;;  %v8000_v24 = vsel %vm618_vm1, %v13727_v31, %v13820_v5  ;;  %v7815_v7 = vsel %vm524_vm3, %v14760_v29, %v13800_v25 }
0x163b   :  { %8299 = vmatprep.subr.mxu1 %v8083_v27  ;;  %8310 = vmatprep.subr.mxu0 %v7993_v6  ;;  %v14177_v60 = vpop.permute.xlu0 %7688  ;;  %v7814_v6 = vsel %vm524_vm3, %v13693_v36, %v14760_v29 }
0x163c   :  { %8300 = vmatpush2.msra.mxu1 %v8082_v63  ;;  %8311 = vmatpush1.msra.mxu0 %v7992_v38 }
0x163d   :  { %v7785_v62 = vpop.permute.xlu1 %7784  ;;  %8302 = vmatmul.mubr.f32.vlgmr.msra.gmra.mxu1 %v14170_v14  ;;  %8379 = vmatprep.subr.mxu1 %v8001_v3 }
0x163e   :  { %8380 = vmatpush1.msra.mxu1 %v8000_v24  ;;  %8312 = vmatprep.subr.mxu0 %v7907_v50  ;;  %v14764_v24 = vld [vmem:[#allocation20_spill] sm:$0xff]  ;;  %v14765_v50 = vld [vmem:[#allocation18_spill] sm:$0xff] }
0x163f   :  { %8313 = vmatpush1.msra.mxu0 %v7906_v20  ;;  %v14191_v28 = vpop.permute.xlu0 %7596  ;;  %9431 = vmatprep.mubr.msk.f32.mxu1 %vm2837_vm9, %v13942_v33  ;;  %vm14762_vm9 = vmmov %vm14759_vm0  ;;  %vm14783_vm0 = vcmask 154624  }
0x1641   :  { %v14195_v45 = vpop.permute.xlu1 %7670 }
0x1643   :  { %v14197_v4 = vpop.permute.xlu0 %7786 }
0x1644   :  { %v7809_v41 = vsel %vm524_vm3, %v7785_v62, %v14197_v4 }
0x1645   :  { %v14199_v31 = vpop.permute.xlu1 %7486 }
0x1647   :  { %v14201_v5 = vpop.permute.xlu0 %7504 }
0x1649   :  { %v7879_v44 = vpop.permute.xlu1 %7878 }
0x164a   :  { %v7901_v40 = vsel %vm14758_vm15, %v14115_v53, %v7879_v44  ;;  %v14761_v53 = vld [vmem:[#allocation22_spill] sm:$0xff]  ;;  %vm14782_vm15 = vmmov %vm14777_vm10 }
0x164b   :  { %8314 = vmatprep.subr.mxu0 %v7901_v40  ;;  %v7973_v33 = vpop.permute.xlu0 %7972  ;;  %v7909_v38 = vsel %vm14762_vm9, %v14761_v53, %v10427_v59  ;;  %v7908_v36 = vsel %vm14763_vm2, %v13785_v55, %v14761_v53  ;;  %v14775_v53 = vld [vmem:[#allocation26_spill] sm:$0xff]  ;;  %vm14785_vm9 = vmmov %vm14783_vm0 }
0x164c   :  { %8315 = vmatpush1.msra.mxu0 %v7900_v2  ;;  %v7994_v48 = vsel %vm618_vm1, %v7971_v11, %v7973_v33  ;;  %v7995_v32 = vsel %vm618_vm1, %v7973_v33, %v10423_v1  ;;  %v7808_v11 = vsel %vm524_vm3, %v14064_v51, %v7785_v62  ;;  %v14766_v51 = vld [vmem:[#allocation12_spill] sm:$0xff]  ;;  %v14767_v62 = vld [vmem:[#allocation23_spill] sm:$0xff]  ;;  %v14769_v33 = vld [vmem:[#allocation21_spill] sm:$0xff] }
0x164d   :  { %v14215_v27 = vpop.permute.xlu1 %7686  ;;  %8316 = vmatprep.subr.mxu0 %v7815_v7  ;;  %8381 = vmatprep.subr.mxu1 %v7995_v32  ;;  %v7699_v1 = vsel %vm465_vm4, %v14767_v62, %v14766_v51  ;;  %v7698_v55 = vsel %vm465_vm4, %v13709_v39, %v14767_v62  ;;  %v14768_v2 = vld [vmem:[#allocation11_spill] sm:$0xff]  ;;  %v7606_v39 = vsel %vm14771_vm6, %v13771_v9, %v14769_v33  ;;  %v10428_v32 = vunpack.i.h.bf16 %v13828_v30  ;;  %vm14786_vm2 = vmmov %vm14783_vm0 }
0x164e   :  { %8317 = vmatpush1.msra.mxu0 %v7814_v6  ;;  %8382 = vmatpush1.msra.mxu1 %v7994_v48  ;;  %v7607_v29 = vsel %vm14770_vm5, %v14769_v33, %v14768_v2  ;;  %v7601_v48 = vsel %vm14772_vm7, %v14136_v42, %v14129_v16  ;;  %v14774_v6 = vld [vmem:[#allocation27_spill] sm:$0xff]  ;;  %v7509_v30 = vsel %vm14780_vm13, %v14100_v26, %v14199_v31  ;;  %vm14787_vm5 = vmmov %vm14783_vm0  ;;  %vm14788_vm6 = vcmask 891904  }
0x164f   :  { %8318 = vmatprep.subr.mxu0 %v7809_v41  ;;  %8383 = vmatprep.subr.mxu1 %v7909_v38  ;;  %v14226_v63 = vpop.permute.xlu0 %7412  ;;  %v10432_v41 = vunpack.i.l.bf16 %v14774_v6  ;;  %v14776_v38 = vld [vmem:[#allocation25_spill] sm:$0xff]  ;;  %v7416_v33 = vsel %vm14787_vm5, %v14108_v54, %v14151_v10  ;;  %vm14789_vm7 = vmmov %vm14788_vm6 }
0x1650   :  { %8319 = vmatpush1.msra.mxu0 %v7808_v11  ;;  %8384 = vmatpush1.msra.mxu1 %v7908_v36  ;;  %v7515_v9 = vsel %vm14777_vm10, %v14776_v38, %v14775_v53  ;;  %v7514_v36 = vsel %vm14778_vm11, %v13791_v57, %v14776_v38  ;;  %v7423_v57 = vsel %vm14783_vm0, %v13884_v35, %v13843_v0  ;;  %vm14791_vm10 = vmmov %vm14788_vm6  ;;  %vm14792_vm11 = vcmask 138240  }
0x1651   :  { %v14231_v3 = vpop.permute.xlu1 %8060  ;;  %8320 = vmatprep.subr.mxu0 %v14764_v24  ;;  %v7508_v24 = vsel %vm14782_vm15, %v14045_v34, %v14100_v26  ;;  %v7422_v34 = vsel %vm14785_vm9, %v13804_v17, %v13884_v35  ;;  %vm14794_vm13 = vmmov %vm14792_vm11 }
0x1652   :  { %8321 = vmatpush1.msra.mxu0 %v14765_v50  ;;  %v10433_v50 = vunpack.i.h.bf16 %v14774_v6  ;;  %vm14796_vm0 = vmmov %vm14782_vm15 }
0x1653   :  { %8322 = vmatprep.subr.mxu0 %v13925_v13  ;;  %v14236_v20 = vpop.permute.xlu0 %8080  ;;  %v7693_v13 = vsel %vm465_vm4, %v14090_v37, %v14195_v45  ;;  %vm14797_vm9 = vmmov %vm14796_vm0 }
0x1654   :  { %8323 = vmatpush1.msra.mxu0 %v13886_v12  ;;  %v7692_v12 = vsel %vm465_vm4, %v14043_v56, %v14090_v37  ;;  %v7600_v56 = vsel %vm14773_vm8, %v14095_v49, %v14136_v42  ;;  %vm14790_vm8 = vmmov %vm14788_vm6 }
0x1655   :  { %v14242_v59 = vpop.permute.xlu1 %7594  ;;  %8324 = vmatprep.subr.mxu0 %v7699_v1 }
0x1656   :  { %8325 = vmatpush1.msra.mxu0 %v7698_v55 }
0x1657   :  { %8326 = vmatprep.subr.mxu0 %v7693_v13  ;;  %v7789_v40 = vpop.permute.xlu0 %7788  ;;  %v7417_v13 = vsel %vm14786_vm2, %v14151_v10, %v14145_v8  ;;  %v8084_v10 = vsel %vm14791_vm10, %v14077_v61, %v14231_v3  ;;  %vm14798_vm2 = vmmov %vm14796_vm0 }
0x1658   :  { %8327 = vmatpush1.msra.mxu0 %v7692_v12  ;;  %v7811_v12 = vsel %vm524_vm3, %v7789_v40, %v10433_v50  ;;  %v7810_v17 = vsel %vm524_vm3, %v14197_v4, %v7789_v40 }
0x1659   :  { %v14256_v7 = vpop.permute.xlu1 %7502  ;;  %8328 = vmatprep.subr.mxu0 %v7607_v29  ;;  %v8090_v29 = vsel %vm14789_vm7, %v13810_v15, %v13849_v43  ;;  %vm14800_vm7 = vmmov %vm14787_vm5 }
0x165a   :  { %8329 = vmatpush1.msra.mxu0 %v7606_v39 }
0x165b   :  { %8330 = vmatprep.subr.mxu0 %v7601_v48  ;;  %v14267_v37 = vpop.permute.xlu0 %8062 }
0x165c   :  { %8331 = vmatpush1.msra.mxu0 %v7600_v56  ;;  %v8085_v54 = vsel %vm14790_vm8, %v14231_v3, %v14267_v37  ;;  %vm14801_vm8 = vmmov %vm14787_vm5 }
0x165d   :  { %v7881_v11 = vpop.permute.xlu1 %7880  ;;  %8332 = vmatprep.subr.mxu0 %v7515_v9 }
0x165e   :  { %v7902_v49 = vsel %vm14779_vm12, %v7879_v44, %v7881_v11  ;;  %8333 = vmatpush1.msra.mxu0 %v7514_v36  ;;  %v7903_v42 = vsel %vm14781_vm14, %v7881_v11, %v10428_v32  ;;  %v14784_v44 = vld [vmem:[#allocation28_spill] sm:$0xff]  ;;  %vm14793_vm12 = vmmov %vm14792_vm11 }
0x165f   :  { %8334 = vmatprep.subr.mxu0 %v7509_v30  ;;  %8385 = vmatprep.subr.mxu1 %v7903_v42  ;;  %v7817_v62 = vsel %vm524_vm3, %v14784_v44, %v10432_v41  ;;  %v7816_v26 = vsel %vm524_vm3, %v13800_v25, %v14784_v44  ;;  %v7675_v55 = vpop.permute.xlu0 %7674  ;;  %v8091_v25 = vsel %vm14788_vm6, %v13849_v43, %v14022_v46  ;;  %vm14795_vm14 = vmmov %vm14792_vm11 }
0x1660   :  { %8335 = vmatpush1.msra.mxu0 %v7508_v24  ;;  %8386 = vmatpush1.msra.mxu1 %v7902_v49  ;;  %v7608_v61 = vsel %vm14793_vm12, %v14768_v2, %v14242_v59  ;;  %vm14799_vm6 = vmmov %vm14787_vm5 }
0x1661   :  { %v14291_v1 = vpop.permute.xlu1 %7410  ;;  %8336 = vmatprep.subr.mxu0 %v7423_v57  ;;  %8387 = vmatprep.subr.mxu1 %v7817_v62  ;;  %vm14803_vm12 = vmmov %vm14791_vm10 }
0x1662   :  { %8337 = vmatpush1.msra.mxu0 %v7422_v34  ;;  %8388 = vmatpush1.msra.mxu1 %v7816_v26  ;;  %v7425_v39 = vsel %vm14787_vm5, %v14291_v1, %v14226_v63 }
0x1663   :  { %8338 = vmatprep.subr.mxu0 %v7417_v13  ;;  %8389 = vmatprep.subr.mxu1 %v7811_v12  ;;  %v7583_v4 = vpop.permute.xlu0 %7582 }
0x1664   :  { %8339 = vmatpush1.msra.mxu0 %v7416_v33  ;;  %8390 = vmatpush1.msra.mxu1 %v7810_v17 }
0x1665   :  { %v8079_v35 = vpop.permute.xlu1 %8078  ;;  %8368 = vmatprep.subr.mxu0 %v8091_v25  ;;  %8391 = vmatprep.subr.mxu1 %v14711_v23  ;;  %v7701_v23 = vsel %vm465_vm4, %v14215_v27, %v14177_v60  ;;  %v14806_v25 = vld [vmem:[#allocation15_spill] sm:$0xff] }
0x1666   :  { %8369 = vmatpush2.msra.mxu0 %v8090_v29  ;;  %8392 = vmatpush1.msra.mxu1 %v14710_v58  ;;  %v7700_v58 = vsel %vm465_vm4, %v14766_v51, %v14215_v27  ;;  %v7517_v51 = vsel %vm14782_vm15, %v14256_v7, %v14201_v5  ;;  %v7424_v5 = vsel %vm14799_vm6, %v13843_v0, %v14291_v1  ;;  %vm14809_vm15 = vmmov %vm14791_vm10  ;;  %vm14814_vm6 = vcmask 146432  }
0x1667   :  { %8370 = vmatprep.subr.mxu0 %v8085_v54  ;;  %8393 = vmatprep.subr.mxu1 %v13982_v47  ;;  %v7491_v60 = vpop.permute.xlu0 %7490  ;;  %v8093_v32 = vsel %vm14791_vm10, %v8079_v35, %v14236_v20  ;;  %v14375_v20 = vld [vmem:[%s10528_s17] sm:$0x3f] }
0x1668   :  { %8371 = vmatpush2.msra.mxu0 %v8084_v10  ;;  %8394 = vmatpush1.msra.mxu1 %v13954_v19  ;;  %v7609_v19 = vsel %vm14792_vm11, %v14242_v59, %v14191_v28  ;;  %v7516_v28 = vsel %vm14796_vm0, %v14775_v53, %v14256_v7  ;;  %vm14802_vm11 = vmmov %vm14791_vm10  ;;  %v8461_v38 = vrot.slane %v14375_v20, %v14705_v52  ;;  %vm14810_vm0 = vcmask 908288  }
0x1669   :  { %v7673_v15 = vpop.permute.xlu1 %7672  ;;  %8373 = vmatmul.mubr.f32.vlgmr.msra.gmra.mxu0 %v14170_v14  ;;  %8395 = vmatprep.subr.mxu1 %v7701_v23  ;;  %v8092_v63 = vsel %vm14802_vm11, %v14022_v46, %v8079_v35  ;;  %v78_v46 = vstv %s9387_s5  ;;  %v8465_v30 = vrot.slane %v14375_v20, %v14704_v18  ;;  %v8469_v57 = vrot.slane %v14375_v20, %v14728_v21 }
0x166a   :  { %v7694_v43 = vsel %vm465_vm4, %v14195_v45, %v7673_v15  ;;  %8396 = vmatpush1.msra.mxu1 %v7700_v58  ;;  %v7695_v47 = vsel %vm465_vm4, %v7673_v15, %v7675_v55  ;;  %9008 = vmatprep.mubr.f32.mxu0 %v14696_v22  ;;  %79 = vst [vmem:[#allocation9] sm:$0x1] %v78_v46  ;;  %v14805_v55 = vld [vmem:[#allocation14_spill] sm:$0xff]  ;;  %v14807_v58 = vld [vmem:[#allocation16_spill] sm:$0xff]  ;;  %vm14817_vm11 = vcmask 588800  }
0x166b   :  { %8397 = vmatprep.subr.mxu1 %v7695_v47  ;;  %v7399_v2 = vpop.permute.xlu0 %7398  ;;  %v8473_v13 = vrot.slane %v14375_v20, %v14805_v55  ;;  %v8477_v35 = vrot.slane %v14375_v20, %v14806_v25  ;;  %v8481_v15 = vrot.slane %v14375_v20, %v14807_v58 }
0x166c   :  { %8398 = vmatpush1.msra.mxu1 %v7694_v43 }
0x166d   :  { %v7581_v27 = vpop.permute.xlu1 %7580  ;;  %8399 = vmatprep.subr.mxu1 %v7609_v19 }
0x166e   :  { %v7602_v45 = vsel %vm14794_vm13, %v14129_v16, %v7581_v27  ;;  %8400 = vmatpush1.msra.mxu1 %v7608_v61  ;;  %v7603_v3 = vsel %vm14795_vm14, %v7581_v27, %v7583_v4  ;;  %vm14804_vm13 = vmmov %vm14791_vm10  ;;  %v9201_v27 = vld [vmem:[%s9386_s7] sm:$0xff] }
0x166f   :  { %8401 = vmatprep.subr.mxu1 %v7603_v3  ;;  %v8067_v56 = vpop.permute.xlu0 %8066  ;;  %vm14808_vm14 = vmmov %vm14791_vm10 }
0x1670   :  { %8402 = vmatpush1.msra.mxu1 %v7602_v45  ;;  %vm14816_vm10 = vmmov %vm14801_vm8 }
0x1671   :  { %v7489_v59 = vpop.permute.xlu1 %7488  ;;  %8403 = vmatprep.subr.mxu1 %v7517_v51 }
0x1672   :  { %v7510_v40 = vsel %vm14797_vm9, %v14199_v31, %v7489_v59  ;;  %8404 = vmatpush1.msra.mxu1 %v7516_v28  ;;  %v7511_v16 = vsel %vm14798_vm2, %v7489_v59, %v7491_v60  ;;  %vm14811_vm9 = vmmov %vm14810_vm0  ;;  %vm14812_vm2 = vcmask 138240  }
0x1673   :  { %8405 = vmatprep.subr.mxu1 %v7511_v16  ;;  %v8653_v3 = vpop.permute.xlu0 %8652  ;;  %vm14813_vm5 = vmmov %vm14812_vm2 }
0x1674   :  { %8406 = vmatpush1.msra.mxu1 %v7510_v40 }
0x1675   :  { %v7397_v7 = vpop.permute.xlu1 %7396  ;;  %8407 = vmatprep.subr.mxu1 %v7425_v39 }
0x1676   :  { %v7418_v48 = vsel %vm14800_vm7, %v14145_v8, %v7397_v7  ;;  %8408 = vmatpush1.msra.mxu1 %v7424_v5  ;;  %v7419_v31 = vsel %vm14801_vm8, %v7397_v7, %v7399_v2  ;;  %v9249_v2 = vld [vmem:[#allocation9] sm:$0x1]  ;;  %vm14815_vm7 = vmmov %vm14814_vm6 }
0x1677   :  { %8409 = vmatprep.subr.mxu1 %v7419_v31  ;;  %v8561_v28 = vpop.permute.xlu0 %8560 }
0x1678   :  { %8410 = vmatpush1.msra.mxu1 %v7418_v48 }
0x1679   :  { %v8065_v6 = vpop.permute.xlu1 %8064  ;;  %8439 = vmatprep.subr.mxu1 %v8093_v32 }
0x167a   :  { %v8086_v0 = vsel %vm14803_vm12, %v14267_v37, %v8065_v6  ;;  %8440 = vmatpush2.msra.mxu1 %v8092_v63  ;;  %v8087_v8 = vsel %vm14804_vm13, %v8065_v6, %v8067_v56  ;;  %vm14818_vm13 = vmmov %vm14803_vm12 }
0x167b   :  { %8441 = vmatprep.subr.mxu1 %v8087_v8 }
0x167c   :  { %8442 = vmatpush2.msra.mxu1 %v8086_v0 }
0x167d   :  { %8444 = vmatmul.mubr.f32.vlgmr.msra.gmra.mxu1 %v14170_v14 }
0x167e   :  { %9150 = vmatprep.mubr.f32.mxu1 %v14696_v22 }
0x1686   :  { %v8232_v41 = vpop.permute.xlu1 %8231 }
0x168a   :  { %v14467_v43 = vpop.permute.xlu1 %8606 }
0x168e   :  { %v14479_v19 = vpop.permute.xlu1 %8514 }
0x1692   :  { %v14488_v61 = vpop.permute.xlu1 %8860 }
0x1696   :  { %v14498_v60 = vpop.permute.xlu1 %8814 }
0x169a   :  { %v14502_v45 = vpop.permute.xlu1 %8768 }
0x169e   :  { %v14511_v51 = vpop.permute.xlu1 %8722 }
0x16fd   :  { %v8303_v37 = vpop.f32.mrf.mxu1 }
0x16fe   :  { %v8304_v53 = vadd.f32 %v8303_v37, %v8232_v41 }
0x16ff   :  { %v8305_v14 = vpop.f32.mrf.mxu1 }
0x1700   :  { %v8450_v9 = vmax.f32 %v8304_v53, 0.0  ;;  %v8306_v36 = vadd.f32 %v8305_v14, %v8232_v41 }
0x1702   :  { %v14379_v11 = vmul.f32 %v8461_v38, %v8450_v9  ;;  %v8451_v49 = vmax.f32 %v8306_v36, 0.0 }
0x1704   :  { %8802 = vrot.lane.b32.xlu1 %v14379_v11, %s10469_s22  ;;  %8848 = vrot.lane.b32.xlu0 %v14379_v11, %s10467_s20  ;;  %v14399_v42 = vmul.f32 %v8465_v30, %v8451_v49 }
0x1708   :  { %8710 = vrot.lane.b32.xlu1 %v14379_v11, %s10471_s24  ;;  %8756 = vrot.lane.b32.xlu0 %v14379_v11, %s10470_s23 }
0x170c   :  { %8608 = vrot.lane.b32.xlu1 %v14379_v11, %s10465_s18  ;;  %8654 = vrot.lane.b32.xlu0 %v14379_v11, %s10461_s6 }
0x1710   :  { %8516 = vrot.lane.b32.xlu1 %v14379_v11, %s10466_s19  ;;  %8562 = vrot.lane.b32.xlu0 %v14379_v11, %s10468_s21 }
0x1714   :  { %8804 = vrot.lane.b32.xlu1 %v14399_v42, %s10469_s22  ;;  %8850 = vrot.lane.b32.xlu0 %v14399_v42, %s10467_s20 }
0x1718   :  { %8712 = vrot.lane.b32.xlu1 %v14399_v42, %s10471_s24  ;;  %8758 = vrot.lane.b32.xlu0 %v14399_v42, %s10470_s23 }
0x171c   :  { %8656 = vrot.lane.b32.xlu1 %v14399_v42, %s10461_s6  ;;  %8610 = vrot.lane.b32.xlu0 %v14399_v42, %s10465_s18 }
0x1720   :  { %8564 = vrot.lane.b32.xlu1 %v14399_v42, %s10468_s21  ;;  %8518 = vrot.lane.b32.xlu0 %v14399_v42, %s10466_s19 }
0x1729   :  { %v8374_v24 = vpop.f32.mrf.mxu0 }
0x172a   :  { %v8375_v50 = vadd.f32 %v8374_v24, %v8232_v41 }
0x172b   :  { %v8376_v44 = vpop.f32.mrf.mxu0 }
0x172c   :  { %v8452_v62 = vmax.f32 %v8375_v50, 0.0  ;;  %v8377_v34 = vadd.f32 %v8376_v44, %v8232_v41 }
0x172e   :  { %v14419_v1 = vmul.f32 %v8469_v57, %v8452_v62  ;;  %v8453_v26 = vmax.f32 %v8377_v34, 0.0 }
0x1730   :  { %8806 = vrot.lane.b32.xlu0 %v14419_v1, %s10469_s22  ;;  %8852 = vrot.lane.b32.xlu1 %v14419_v1, %s10467_s20  ;;  %v14431_v12 = vmul.f32 %v8473_v13, %v8453_v26 }
0x1734   :  { %8714 = vrot.lane.b32.xlu0 %v14419_v1, %s10471_s24  ;;  %8760 = vrot.lane.b32.xlu1 %v14419_v1, %s10470_s23 }
0x1738   :  { %8658 = vrot.lane.b32.xlu0 %v14419_v1, %s10461_s6  ;;  %8660 = vrot.lane.b32.xlu1 %v14431_v12, %s10461_s6 }
0x173c   :  { %8612 = vrot.lane.b32.xlu0 %v14419_v1, %s10465_s18  ;;  %8614 = vrot.lane.b32.xlu1 %v14431_v12, %s10465_s18 }
0x173d   :  { %v8445_v33 = vpop.f32.mrf.mxu1 }
0x173e   :  { %v8446_v17 = vadd.f32 %v8445_v33, %v8232_v41 }
0x173f   :  { %v8447_v10 = vpop.f32.mrf.mxu1 }
0x1740   :  { %v8454_v29 = vmax.f32 %v8446_v17, 0.0  ;;  %8566 = vrot.lane.b32.xlu0 %v14419_v1, %s10468_s21  ;;  %8568 = vrot.lane.b32.xlu1 %v14431_v12, %s10468_s21  ;;  %v8448_v4 = vadd.f32 %v8447_v10, %v8232_v41 }
0x1742   :  { %v14447_v54 = vmul.f32 %v8477_v35, %v8454_v29  ;;  %v8455_v23 = vmax.f32 %v8448_v4, 0.0 }
0x1744   :  { %8854 = vrot.lane.b32.xlu0 %v14431_v12, %s10467_s20  ;;  %8856 = vrot.lane.b32.xlu1 %v14447_v54, %s10467_s20  ;;  %v14473_v47 = vmul.f32 %v8481_v15, %v8455_v23 }
0x1748   :  { %8808 = vrot.lane.b32.xlu0 %v14431_v12, %s10469_s22  ;;  %8810 = vrot.lane.b32.xlu1 %v14447_v54, %s10469_s22 }
0x174c   :  { %8762 = vrot.lane.b32.xlu0 %v14431_v12, %s10470_s23  ;;  %8764 = vrot.lane.b32.xlu1 %v14447_v54, %s10470_s23 }
0x1750   :  { %8716 = vrot.lane.b32.xlu0 %v14431_v12, %s10471_s24  ;;  %8718 = vrot.lane.b32.xlu1 %v14447_v54, %s10471_s24 }
0x1754   :  { %8662 = vrot.lane.b32.xlu0 %v14447_v54, %s10461_s6  ;;  %8522 = vrot.lane.b32.xlu1 %v14431_v12, %s10466_s19 }
0x1758   :  { %8616 = vrot.lane.b32.xlu0 %v14447_v54, %s10465_s18  ;;  %8664 = vrot.lane.b32.xlu1 %v14473_v47, %s10461_s6  ;;  %s10506_s6 = smov 29  }
0x175c   :  { %8858 = vrot.lane.b32.xlu0 %v14473_v47, %s10467_s20  ;;  %8618 = vrot.lane.b32.xlu1 %v14473_v47, %s10465_s18 }
0x1760   :  { %8812 = vrot.lane.b32.xlu0 %v14473_v47, %s10469_s22  ;;  %8572 = vrot.lane.b32.xlu1 %v14473_v47, %s10468_s21  ;;  %s9385_s22 = sld [smem:[%s14628_s0 + %s10506_s6]]  }
0x1764   :  { %8766 = vrot.lane.b32.xlu0 %v14473_v47, %s10470_s23  ;;  %8526 = vrot.lane.b32.xlu1 %v14473_v47, %s10466_s19 }
0x1766   :  { %v8935_v59 = vld [vmem:[%s9385_s22] sm:$0xff] }
0x1768   :  { %8720 = vrot.lane.b32.xlu0 %v14473_v47, %s10471_s24  ;;  %9204 = vperm.xlu1 %10017, %v9201_v27  }
0x176c   :  { %8520 = vrot.lane.b32.xlu0 %v14419_v1, %s10466_s19 }
0x1770   :  { %8570 = vrot.lane.b32.xlu0 %v14447_v54, %s10468_s21 }
0x1774   :  { %8524 = vrot.lane.b32.xlu0 %v14447_v54, %s10466_s19  ;;  %s10507_s19 = smov 28  }
0x1775   :  { %s9384_s24 = sld [smem:[%s14628_s0 + %s10507_s19]]  }
0x1776   :  { %v8803_v40 = vpop.permute.xlu1 %8802  ;;  %v8849_v16 = vpop.permute.xlu0 %8848 }
0x1778   :  { %8938 = vperm.xlu0 %10018, %v8935_v59  }
0x177a   :  { %v8711_v39 = vpop.permute.xlu1 %8710  ;;  %v8757_v5 = vpop.permute.xlu0 %8756 }
0x177b   :  { %v14554_v15 = vld [vmem:[%s9384_s24] sm:$0xff] }
0x177c   :  { %9252 = vperm.xlu0 %10018, %v9249_v2  }
0x177e   :  { %v8609_v7 = vpop.permute.xlu1 %8608  ;;  %v8655_v48 = vpop.permute.xlu0 %8654 }
0x177f   :  { %v8666_v13 = vsel %vm465_vm4, %v8653_v3, %v8655_v48  ;;  %v8620_v29 = vsel %vm14813_vm5, %v14467_v43, %v8609_v7 }
0x1782   :  { %v8517_v31 = vpop.permute.xlu1 %8516  ;;  %v8563_v56 = vpop.permute.xlu0 %8562 }
0x1783   :  { %v8528_v43 = vsel %vm14816_vm10, %v14479_v19, %v8517_v31 }
0x1786   :  { %v8805_v32 = vpop.permute.xlu1 %8804  ;;  %v8851_v63 = vpop.permute.xlu0 %8850 }
0x1787   :  { %v8862_v9 = vsel %vm14809_vm15, %v8849_v16, %v8851_v63  ;;  %v8816_v36 = vsel %vm618_vm1, %v8803_v40, %v8805_v32  ;;  %vm14820_vm15 = vmmov %vm14810_vm0 }
0x178a   :  { %v8713_v6 = vpop.permute.xlu1 %8712  ;;  %v8759_v0 = vpop.permute.xlu0 %8758 }
0x178b   :  { %v8770_v50 = vsel %vm14811_vm9, %v8757_v5, %v8759_v0  ;;  %v8724_v44 = vsel %vm524_vm3, %v8711_v39, %v8713_v6 }
0x178e   :  { %v14515_v8 = vpop.permute.xlu1 %8656  ;;  %v14517_v46 = vpop.permute.xlu0 %8610 }
0x178f   :  { %v8667_v26 = vsel %vm465_vm4, %v8655_v48, %v14515_v8  ;;  %v8621_v35 = vsel %vm14812_vm2, %v8609_v7, %v14517_v46 }
0x1792   :  { %v14519_v20 = vpop.permute.xlu1 %8564  ;;  %v14521_v41 = vpop.permute.xlu0 %8518 }
0x1793   :  { %v8529_v23 = vsel %vm14801_vm8, %v8517_v31, %v14521_v41 }
0x17a2   :  { %v8853_v37 = vpop.permute.xlu1 %8852  ;;  %v8807_v53 = vpop.permute.xlu0 %8806 }
0x17a3   :  { %v8863_v38 = vsel %vm14808_vm14, %v8851_v63, %v8853_v37  ;;  %v8817_v14 = vsel %vm618_vm1, %v8805_v32, %v8807_v53  ;;  %vm14819_vm14 = vmmov %vm14810_vm0 }
0x17a4   :  { %8958 = vmatprep.subr.mxu0 %v8863_v38  ;;  %vm14827_vm8 = vmmov %vm14819_vm14 }
0x17a5   :  { %8959 = vmatpush1.msra.mxu0 %v8862_v9  ;;  %vm14828_vm10 = vmmov %vm14827_vm8 }
0x17a6   :  { %v8761_v49 = vpop.permute.xlu1 %8760  ;;  %8960 = vmatprep.subr.mxu0 %v8817_v14  ;;  %v8715_v30 = vpop.permute.xlu0 %8714 }
0x17a7   :  { %8961 = vmatpush1.msra.mxu0 %v8816_v36  ;;  %v8771_v24 = vsel %vm14810_vm0, %v8759_v0, %v8761_v49  ;;  %v8725_v57 = vsel %vm524_vm3, %v8713_v6, %v8715_v30  ;;  %vm14821_vm0 = vmmov %vm14812_vm2 }
0x17a8   :  { %8962 = vmatprep.subr.mxu0 %v8771_v24  ;;  %vm14822_vm9 = vmmov %vm14821_vm0 }
0x17a9   :  { %8963 = vmatpush1.msra.mxu0 %v8770_v50  ;;  %vm14823_vm2 = vmmov %vm14814_vm6 }
0x17aa   :  { %v14531_v62 = vpop.permute.xlu1 %8660  ;;  %8964 = vmatprep.subr.mxu0 %v8725_v57  ;;  %v8659_v34 = vpop.permute.xlu0 %8658  ;;  %vm14824_vm5 = vmmov %vm14823_vm2 }
0x17ab   :  { %8965 = vmatpush1.msra.mxu0 %v8724_v44  ;;  %v8669_v6 = vsel %vm465_vm4, %v8659_v34, %v14531_v62  ;;  %v8668_v0 = vsel %vm465_vm4, %v14515_v8, %v8659_v34 }
0x17ac   :  { %8966 = vmatprep.subr.mxu0 %v14399_v42  ;;  %v8574_v42 = vsel %vm14815_vm7, %v8561_v28, %v8563_v56 }
0x17ad   :  { %8967 = vmatpush1.msra.mxu0 %v14379_v11  ;;  %v8575_v11 = vsel %vm14814_vm6, %v8563_v56, %v14519_v20  ;;  %vm14825_vm6 = vmmov %vm14803_vm12 }
0x17ae   :  { %v14541_v33 = vpop.permute.xlu1 %8614  ;;  %8968 = vmatprep.subr.mxu0 %v8667_v26  ;;  %v8613_v17 = vpop.permute.xlu0 %8612  ;;  %vm14826_vm7 = vmmov %vm14825_vm6 }
0x17af   :  { %8969 = vmatpush1.msra.mxu0 %v8666_v13 }
0x17b0   :  { %8970 = vmatprep.subr.mxu0 %v8621_v35 }
0x17b1   :  { %8971 = vmatpush1.msra.mxu0 %v8620_v29 }
0x17b2   :  { %v14550_v10 = vpop.permute.xlu1 %8568  ;;  %8972 = vmatprep.subr.mxu0 %v8575_v11  ;;  %v8567_v4 = vpop.permute.xlu0 %8566 }
0x17b3   :  { %8973 = vmatpush1.msra.mxu0 %v8574_v42 }
0x17b4   :  { %8974 = vmatprep.subr.mxu0 %v8529_v23 }
0x17b5   :  { %8975 = vmatpush1.msra.mxu0 %v8528_v43 }
0x17b6   :  { %v8857_v27 = vpop.permute.xlu1 %8856  ;;  %9432 = vmatmul.mubr.msk.f32.vlgmr.msra.gmra.mxu0 %vm14817_vm11, %v14554_v15  ;;  %v8855_v3 = vpop.permute.xlu0 %8854 }
0x17b7   :  { %v8864_v28 = vsel %vm14803_vm12, %v8853_v37, %v8855_v3  ;;  %v8865_v59 = vsel %vm14818_vm13, %v8855_v3, %v8857_v27  ;;  %9079 = vmatprep.mubr.f32.mxu0 %v14696_v22  ;;  %v8623_v37 = vsel %vm14821_vm0, %v8613_v17, %v14541_v33  ;;  %vm14832_vm12 = vmmov %vm14821_vm0  ;;  %vm14833_vm13 = vcmask 588800   ;;  %v9163_v3 = vld [vmem:[%s10528_s17] sm:$0x3f]  ;;  %s10509_s17 = smov 36  }
0x17b8   :  { %9029 = vmatprep.subr.mxu0 %v8865_v59  ;;  %s9392_s10 = sld [smem:[%s14628_s0 + %s10509_s17]]  }
0x17b9   :  { %9030 = vmatpush1.msra.mxu0 %v8864_v28 }
0x17ba   :  { %v8811_v40 = vpop.permute.xlu1 %8810  ;;  %v8809_v16 = vpop.permute.xlu0 %8808 }
0x17bb   :  { %v8818_v2 = vsel %vm618_vm1, %v8807_v53, %v8809_v16  ;;  %v8819_v19 = vsel %vm618_vm1, %v8809_v16, %v8811_v40  ;;  %v8622_v53 = vsel %vm14822_vm9, %v14517_v46, %v8613_v17  ;;  %vm14838_vm9 = vmmov %vm14833_vm13 }
0x17bc   :  { %9031 = vmatprep.subr.mxu0 %v8819_v19 }
0x17bd   :  { %9032 = vmatpush1.msra.mxu0 %v8818_v2  ;;  %v9168_v2 = vrot.slane %v9163_v3, %v14705_v52 }
0x17be   :  { %v8765_v39 = vpop.permute.xlu1 %8764  ;;  %v8763_v5 = vpop.permute.xlu0 %8762 }
0x17bf   :  { %v8772_v7 = vsel %vm14819_vm14, %v8761_v49, %v8763_v5  ;;  %v8773_v48 = vsel %vm14820_vm15, %v8763_v5, %v8765_v39  ;;  %vm14834_vm14 = vmmov %vm14823_vm2 }
0x17c0   :  { %9033 = vmatprep.subr.mxu0 %v8773_v48 }
0x17c1   :  { %9034 = vmatpush1.msra.mxu0 %v8772_v7 }
0x17c2   :  { %v8719_v31 = vpop.permute.xlu1 %8718  ;;  %v8717_v22 = vpop.permute.xlu0 %8716 }
0x17c3   :  { %v8726_v56 = vsel %vm524_vm3, %v8715_v30, %v8717_v22  ;;  %v8727_v32 = vsel %vm524_vm3, %v8717_v22, %v8719_v31 }
0x17c4   :  { %9035 = vmatprep.subr.mxu0 %v8727_v32 }
0x17c5   :  { %9036 = vmatpush1.msra.mxu0 %v8726_v56 }
0x17c6   :  { %9037 = vmatprep.subr.mxu0 %v14431_v12  ;;  %v8663_v63 = vpop.permute.xlu0 %8662  ;;  %v8576_v12 = vsel %vm14824_vm5, %v14519_v20, %v8567_v4  ;;  %v8523_v8 = vpop.permute.xlu1 %8522 }
0x17c7   :  { %9038 = vmatpush1.msra.mxu0 %v14419_v1  ;;  %v8577_v1 = vsel %vm14823_vm2, %v8567_v4, %v14550_v10  ;;  %v8670_v35 = vsel %vm465_vm4, %v14531_v62, %v8663_v63 }
0x17c8   :  { %9039 = vmatprep.subr.mxu0 %v8669_v6 }
0x17c9   :  { %9040 = vmatpush1.msra.mxu0 %v8668_v0 }
0x17ca   :  { %9041 = vmatprep.subr.mxu0 %v8623_v37  ;;  %v8617_v38 = vpop.permute.xlu0 %8616  ;;  %v8665_v24 = vpop.permute.xlu1 %8664 }
0x17cb   :  { %9042 = vmatpush1.msra.mxu0 %v8622_v53  ;;  %v8671_v17 = vsel %vm465_vm4, %v8663_v63, %v8665_v24  ;;  %vm14835_vm4 = vmmov %vm14823_vm2  ;;  %v9176_v53 = vrot.slane %v9163_v3, %v14728_v21  ;;  %v9184_v21 = vrot.slane %v9163_v3, %v14806_v25 }
0x17cc   :  { %9043 = vmatprep.subr.mxu0 %v8577_v1 }
0x17cd   :  { %9044 = vmatpush1.msra.mxu0 %v8576_v12  ;;  %v9180_v12 = vrot.slane %v9163_v3, %v14805_v55 }
0x17ce   :  { %v8859_v9 = vpop.permute.xlu0 %8858 }
0x17cf   :  { %v8866_v14 = vsel %vm14825_vm6, %v8857_v27, %v8859_v9  ;;  %v8867_v36 = vsel %vm14826_vm7, %v8859_v9, %v14488_v61  ;;  %v8619_v61 = vpop.permute.xlu1 %8618 }
0x17d0   :  { %9100 = vmatprep.subr.mxu1 %v8867_v36 }
0x17d1   :  { %9101 = vmatpush1.msra.mxu1 %v8866_v14 }
0x17d2   :  { %v8813_v46 = vpop.permute.xlu0 %8812 }
0x17d3   :  { %v8820_v49 = vsel %vm618_vm1, %v8811_v40, %v8813_v46  ;;  %v8821_v30 = vsel %vm618_vm1, %v8813_v46, %v14498_v60  ;;  %vm14829_vm1 = vcmask 154624   ;;  %v8573_v29 = vpop.permute.xlu1 %8572  ;;  %v9172_v40 = vrot.slane %v9163_v3, %v14704_v18 }
0x17d4   :  { %9102 = vmatprep.subr.mxu1 %v8821_v30  ;;  %vm14830_vm11 = vmmov %vm14829_vm1 }
0x17d5   :  { %9103 = vmatpush1.msra.mxu1 %v8820_v49  ;;  %vm14836_vm15 = vmmov %vm14829_vm1 }
0x17d6   :  { %v8767_v20 = vpop.permute.xlu0 %8766 }
0x17d7   :  { %v8774_v50 = vsel %vm14827_vm8, %v8765_v39, %v8767_v20  ;;  %v8775_v57 = vsel %vm14828_vm10, %v8767_v20, %v14502_v45  ;;  %v8527_v11 = vpop.permute.xlu1 %8526 }
0x17d8   :  { %9104 = vmatprep.subr.mxu1 %v8775_v57 }
0x17d9   :  { %9105 = vmatpush1.msra.mxu1 %v8774_v50 }
0x17da   :  { %v8721_v44 = vpop.permute.xlu0 %8720 }
0x17db   :  { %v8728_v34 = vsel %vm524_vm3, %v8719_v31, %v8721_v44  ;;  %v8729_v26 = vsel %vm524_vm3, %v8721_v44, %v14511_v51  ;;  %vm14831_vm3 = vmmov %vm14821_vm0  ;;  %v8624_v51 = vsel %vm14832_vm12, %v14541_v33, %v8617_v38 }
0x17dc   :  { %9106 = vmatprep.subr.mxu1 %v8729_v26  ;;  %vm14837_vm0 = vmmov %vm14829_vm1 }
0x17dd   :  { %9107 = vmatpush1.msra.mxu1 %v8728_v34 }
0x17de   :  { %9108 = vmatprep.subr.mxu1 %v14473_v47  ;;  %v8521_v60 = vpop.permute.xlu0 %8520  ;;  %v8625_v47 = vsel %vm14831_vm3, %v8617_v38, %v8619_v61 }
0x17df   :  { %v8530_v13 = vsel %vm14829_vm1, %v14521_v41, %v8521_v60  ;;  %9109 = vmatpush1.msra.mxu1 %v14447_v54  ;;  %v8531_v45 = vsel %vm14830_vm11, %v8521_v60, %v8523_v8 }
0x17e0   :  { %9045 = vmatprep.subr.mxu0 %v8531_v45  ;;  %9110 = vmatprep.subr.mxu1 %v8671_v17 }
0x17e1   :  { %9046 = vmatpush1.msra.mxu0 %v8530_v13  ;;  %9111 = vmatpush1.msra.mxu1 %v8670_v35 }
0x17e2   :  { %9433 = vmatmul.mubr.msk.f32.vlgmr.msra.gmra.mxu0 %vm14833_vm13, %v14554_v15  ;;  %9112 = vmatprep.subr.mxu1 %v8625_v47  ;;  %v8571_v54 = vpop.permute.xlu0 %8570 }
0x17e3   :  { %v8578_v41 = vsel %vm14834_vm14, %v14550_v10, %v8571_v54  ;;  %9113 = vmatpush1.msra.mxu1 %v8624_v51  ;;  %v8579_v62 = vsel %vm14835_vm4, %v8571_v54, %v8573_v29  ;;  %v9205_v39 = vpop.permute.xlu1 %9204  ;;  %v9188_v29 = vrot.slane %v9163_v3, %v14807_v58 }
0x17e4   :  { %9114 = vmatprep.subr.mxu1 %v8579_v62 }
0x17e5   :  { %9115 = vmatpush1.msra.mxu1 %v8578_v41 }
0x17e6   :  { %v8525_v42 = vpop.permute.xlu0 %8524 }
0x17e7   :  { %v8532_v4 = vsel %vm14836_vm15, %v8523_v8, %v8525_v42  ;;  %v8533_v33 = vsel %vm14837_vm0, %v8525_v42, %v8527_v11 }
0x17e8   :  { %9116 = vmatprep.subr.mxu1 %v8533_v33 }
0x17e9   :  { %9117 = vmatpush1.msra.mxu1 %v8532_v4 }
0x17ea   :  { %9434 = vmatmul.mubr.msk.f32.vlgmr.msra.gmra.mxu1 %vm14838_vm9, %v14554_v15 }
0x17f3   :  { %v8939_v10 = vpop.permute.xlu0 %8938 }
0x17f7   :  { %v9253_v46 = vpop.permute.xlu0 %9252 }
0x17f8   :  { %v9258_v34 = vrot.slane %v9253_v46, %v14705_v52 }
0x1876   :  { %v9010_v23 = vpop.f32.mrf.mxu0 }
0x1877   :  { %v9011_v28 = vadd.f32 %v9010_v23, %v8939_v10 }
0x1878   :  { %v9012_v43 = vpop.f32.mrf.mxu0 }
0x1879   :  { %v9013_v27 = vadd.f32 %v9012_v43, %v8939_v10  ;;  %v9157_v16 = vmax.f32 %v9011_v28, 0.0 }
0x187b   :  { %v9158_v59 = vmax.f32 %v9013_v27, 0.0  ;;  %v9195_v5 = vmul.f32 %v9168_v2, %v9157_v16 }
0x187d   :  { %v9196_v19 = vmul.f32 %v9172_v40, %v9158_v59  ;;  %v9207_v48 = vmul.f32 %v9205_v39, %v9195_v5 }
0x187f   :  { %v9208_v7 = vmul.f32 %v9205_v39, %v9196_v19  ;;  %v9213_v22 = vrot.slane %v9207_v48, 4 }
0x1881   :  { %v9219_v31 = vrot.slane %v9208_v7, 4  ;;  %v9214_v56 = vadd.f32 %v9213_v22, %v9207_v48 }
0x1883   :  { %v9220_v15 = vadd.f32 %v9219_v31, %v9208_v7  ;;  %v9215_v63 = vrot.slane %v9214_v56, 2 }
0x1885   :  { %v9221_v32 = vrot.slane %v9220_v15, 2  ;;  %v9216_v8 = vadd.f32 %v9215_v63, %v9214_v56 }
0x1887   :  { %v9222_v6 = vadd.f32 %v9221_v32, %v9220_v15  ;;  %v9217_v24 = vrot.slane %v9216_v8, 1 }
0x1889   :  { %v9223_v9 = vrot.slane %v9222_v6, 1  ;;  %v9218_v17 = vadd.f32 %v9217_v24, %v9216_v8 }
0x188b   :  { %v9224_v20 = vadd.f32 %v9223_v9, %v9222_v6  ;;  %v9259_v4 = vadd.f32 %v9258_v34, %v9218_v17 }
0x188d   :  { %v9260_v35 = vadd.f32 %v9258_v34, %v9224_v20  ;;  %v9265_v40 = vsub.f32 0.0, %v9259_v4 }
0x188f   :  { %v9266_v25 = vsub.f32 0.0, %v9260_v35  ;;  %v9271_v22 = vmul.f32 1.442695, %v9265_v40 }
0x1891   :  { %v9273_v16 = vmul.f32 1.442695, %v9266_v25 }
0x1893   :  { %10436 = vpow2.f32 %v9273_v16 }
0x18a2   :  { %v9081_v0 = vpop.f32.mrf.mxu0 }
0x18a3   :  { %v9082_v37 = vadd.f32 %v9081_v0, %v8939_v10 }
0x18a4   :  { %v9083_v18 = vpop.f32.mrf.mxu0 }
0x18a5   :  { %v9159_v38 = vmax.f32 %v9082_v37, 0.0  ;;  %v9084_v1 = vadd.f32 %v9083_v18, %v8939_v10 }
0x18a7   :  { %v9197_v14 = vmul.f32 %v9176_v53, %v9159_v38  ;;  %v9160_v36 = vmax.f32 %v9084_v1, 0.0 }
0x18a9   :  { %v9209_v49 = vmul.f32 %v9205_v39, %v9197_v14  ;;  %v9198_v30 = vmul.f32 %v9180_v12, %v9160_v36  ;;  %v10437_v14 = vpop.eup %10436 }
0x18aa   :  { %v9152_v50 = vpop.f32.mrf.mxu1  ;;  %v9284_v46 = vadd.f32 1.0, %v10437_v14 }
0x18ab   :  { %v9225_v57 = vrot.slane %v9209_v49, 4  ;;  %v9210_v61 = vmul.f32 %v9205_v39, %v9198_v30  ;;  %v9153_v44 = vadd.f32 %v9152_v50, %v8939_v10 }
0x18ac   :  { %v9154_v26 = vpop.f32.mrf.mxu1 }
0x18ad   :  { %v9226_v60 = vadd.f32 %v9225_v57, %v9209_v49  ;;  %v9231_v55 = vrot.slane %v9210_v61, 4  ;;  %v9161_v13 = vmax.f32 %v9153_v44, 0.0  ;;  %v9155_v45 = vadd.f32 %v9154_v26, %v8939_v10 }
0x18af   :  { %v9227_v47 = vrot.slane %v9226_v60, 2  ;;  %v9232_v51 = vadd.f32 %v9231_v55, %v9210_v61  ;;  %v9199_v54 = vmul.f32 %v9184_v21, %v9161_v13  ;;  %v9162_v41 = vmax.f32 %v9155_v45, 0.0 }
0x18b1   :  { %v9228_v62 = vadd.f32 %v9227_v47, %v9226_v60  ;;  %v9233_v11 = vrot.slane %v9232_v51, 2  ;;  %v9211_v42 = vmul.f32 %v9205_v39, %v9199_v54  ;;  %v9200_v33 = vmul.f32 %v9188_v29, %v9162_v41  ;;  %v14839_v47 = vld [vmem:[#allocation10_spill] sm:$0xff] }
0x18b3   :  { %v9229_v52 = vrot.slane %v9228_v62, 1  ;;  %v9234_v23 = vadd.f32 %v9233_v11, %v9232_v51  ;;  %v9237_v43 = vrot.slane %v9211_v42, 4  ;;  %v9212_v27 = vmul.f32 %v9205_v39, %v9200_v33 }
0x18b5   :  { %v9230_v28 = vadd.f32 %v9229_v52, %v9228_v62  ;;  %v9235_v10 = vrot.slane %v9234_v23, 1  ;;  %v9238_v59 = vadd.f32 %v9237_v43, %v9211_v42  ;;  %v9243_v58 = vrot.slane %v9212_v27, 4 }
0x18b7   :  { %v9261_v3 = vadd.f32 %v9258_v34, %v9230_v28  ;;  %v9236_v2 = vadd.f32 %v9235_v10, %v9234_v23  ;;  %v9239_v19 = vrot.slane %v9238_v59, 2  ;;  %v9244_v5 = vadd.f32 %v9243_v58, %v9212_v27 }
0x18b8   :  { %v14840_v23 = vlaneseq }
0x18b9   :  { %v9267_v7 = vsub.f32 0.0, %v9261_v3  ;;  %v9262_v48 = vadd.f32 %v9258_v34, %v9236_v2  ;;  %v9240_v31 = vadd.f32 %v9239_v19, %v9238_v59  ;;  %v9245_v15 = vrot.slane %v9244_v5, 2 }
0x18ba   :  { %vm9350_vm2 = vcmp.lt.s32.totalorder %v14840_v23, 768 }
0x18bb   :  { %v9275_v56 = vmul.f32 1.442695, %v9267_v7  ;;  %v9268_v32 = vsub.f32 0.0, %v9262_v48  ;;  %v9241_v63 = vrot.slane %v9240_v31, 1  ;;  %v9246_v39 = vadd.f32 %v9245_v15, %v9244_v5 }
0x18bd   :  { %10438 = vpow2.f32 %v9275_v56  ;;  %v9277_v6 = vmul.f32 1.442695, %v9268_v32  ;;  %v9242_v0 = vadd.f32 %v9241_v63, %v9240_v31  ;;  %v9247_v37 = vrot.slane %v9246_v39, 1 }
0x18be   :  { %10440 = vpow2.f32 %v9271_v22 }
0x18bf   :  { %10442 = vpow2.f32 %v9277_v6  ;;  %v9263_v53 = vadd.f32 %v9258_v34, %v9242_v0  ;;  %v9248_v18 = vadd.f32 %v9247_v37, %v9246_v39 }
0x18c1   :  { %v9269_v38 = vsub.f32 0.0, %v9263_v53  ;;  %v9264_v1 = vadd.f32 %v9258_v34, %v9248_v18  ;;  %v10508_v34 = vmov 1966171168  }
0x18c2   :  { %v9311_v26 = vunpack.c.l.s4 %v10508_v34 }
0x18c3   :  { %v9279_v12 = vmul.f32 1.442695, %v9269_v38  ;;  %v9270_v8 = vsub.f32 0.0, %v9264_v1 }
0x18c4   :  { %v9312_v13 = vunpack.c.0.s8 %v9311_v26 }
0x18c5   :  { %10444 = vpow2.f32 %v9279_v12  ;;  %v9281_v9 = vmul.f32 1.442695, %v9270_v8 }
0x18c6   :  { %v9315_v51 = vsub.s32 %v9312_v13, %v14839_v47 }
0x18c7   :  { %10446 = vpow2.f32 %v9281_v9 }
0x18c8   :  { %10448 = vrcp.f32 %v9284_v46 }
0x18ca   :  { %v10439_v36 = vpop.eup %10438 }
0x18cb   :  { %v10441_v49 = vpop.eup %10440  ;;  %v9285_v24 = vadd.f32 1.0, %v10439_v36 }
0x18cc   :  { %v10443_v30 = vpop.eup %10442  ;;  %v9283_v50 = vadd.f32 1.0, %v10441_v49 }
0x18cd   :  { %v9286_v20 = vadd.f32 1.0, %v10443_v30 }
0x18cf   :  { %10450 = vrcp.f32 %v9286_v20 }
0x18d0   :  { %10452 = vrcp.f32 %v9285_v24 }
0x18d1   :  { %10454 = vrcp.f32 %v9283_v50 }
0x18d2   :  { %v10445_v57 = vpop.eup %10444 }
0x18d3   :  { %v9287_v61 = vadd.f32 1.0, %v10445_v57 }
0x18d4   :  { %v10447_v44 = vpop.eup %10446 }
0x18d5   :  { %v9288_v21 = vadd.f32 1.0, %v10447_v44  ;;  %10456 = vrcp.f32 %v9287_v61  ;;  %v10449_v60 = vpop.eup %10448 }
0x18d7   :  { %10458 = vrcp.f32 %v9288_v21 }
0x18dc   :  { %v10451_v55 = vpop.eup %10450 }
0x18dd   :  { %v10453_v45 = vpop.eup %10452 }
0x18de   :  { %v9308_v17 = vcombine.low %v10453_v45, %v10451_v55  ;;  %v10455_v35 = vpop.eup %10454 }
0x18df   :  { %v9307_v29 = vcombine.low %v10455_v35, %v10449_v60 }
0x18e0   :  { %v9323_v54 = vrot.slane %v9308_v17, %v9315_v51 }
0x18e1   :  { %v9316_v62 = vrot.slane %v9307_v29, %v9315_v51 }
0x18e2   :  { %v10457_v41 = vpop.eup %10456 }
0x18e3   :  { %v9331_v42 = vcombine.low %v9316_v62, %v9323_v54 }
0x18e4   :  { %v10459_v11 = vpop.eup %10458 }
0x18e5   :  { %v9309_v4 = vcombine.low %v10457_v41, %v10459_v11  ;;  %v9338_v33 = vrot.slane %v9331_v42, %v9315_v51 }
0x18e7   :  { %v9330_v25 = vrot.slane %v9309_v4, %v9315_v51 }
0x18e9   :  { %v9345_v52 = vrot.slane %v9330_v25, %v9315_v51 }
0x18eb   :  { %v9346_v43 = vcombine.low %v9338_v33, %v9345_v52 }
0x18ed   :  { %9352 = vst.msk [vmem:[%s9392_s10] sm:$0x3f] %vm9350_vm2, %v9346_v43 }

</bundles_post_ra>
